<compile_context>
chip_gen: v7x
topology: tpu7x:2x2x1
jax: 0.10.0
libtpu: 0.0.40
codegen_flags: <defaults>
</compile_context>

<pallas_src>
import functools

import jax
import jax.numpy as jnp
from jax.experimental import pallas as pl
from jax.experimental.pallas import tpu as pltpu


# ---------------------------------------------------------------------------
# Fused kernel, per batch tile:
#   h = tanh(x @ W1^T + b1); z = h @ W2^T + b2
#   loss += sum(BCEWithLogits(z, y)) / (B * numLabel)
# ---------------------------------------------------------------------------
def _mlp_bce_kernel(x_ref, y_ref, w1_ref, b1_ref, w2_ref, b2_ref, loss_ref,
                    *, inv_total):
    i = pl.program_id(0)

    @pl.when(i == 0)
    def _():
        loss_ref[...] = jnp.zeros_like(loss_ref)

    x = x_ref[...]                                                # (TM, 1024)
    h = jnp.tanh(
        jnp.dot(x, w1_ref[...], preferred_element_type=jnp.float32)
        + b1_ref[...]
    )                                                             # (TM, 1000)
    z = (jnp.dot(h, w2_ref[...], preferred_element_type=jnp.float32)
         + b2_ref[...])                                           # (TM, 1000)
    y = y_ref[...]

    # Numerically stable BCE-with-logits (identical to PyTorch's formulation):
    #   max(z, 0) - z*y + log1p(exp(-|z|))
    bce = jnp.maximum(z, 0.0) - z * y + jnp.log1p(jnp.exp(-jnp.abs(z)))

    # Partial sum, pre-scaled so the accumulated total equals the mean.
    loss_ref[...] += jnp.sum(bce, keepdims=True) * inv_total


def _pick_batch_tile(b):
    # Largest tile that divides the batch; per-step overhead amortization.
    for tm in (512, 256, 128, 64, 32, 16, 8):
        if b % tm == 0:
            return tm
    return b  # full-extent block (always a legal BlockSpec) handles any B


def multi_label_classify1_forward(params, weighted_features, target_labels,
                                  block_rows=None):
    """Returns the scalar BCEWithLogits loss (reduction='mean')."""
    x = weighted_features.astype(jnp.float32)
    y = target_labels.astype(jnp.float32)
    B, Din = x.shape
    H1, _ = params["out_1"]["weight"].shape        # 1000, 1024
    H2, _ = params["out_2"]["weight"].shape        # 1000, 1000
    assert y.shape == (B, H2)

    # PyTorch Linear stores (out, in); transpose once at the JAX level so the
    # kernel runs lane-dense (M, K) x (K, N) MXU matmuls.
    w1_t = jnp.transpose(params["out_1"]["weight"]).astype(jnp.float32)  # (Din, H1)
    w2_t = jnp.transpose(params["out_2"]["weight"]).astype(jnp.float32)  # (H1, H2)
    b1 = params["out_1"]["bias"].reshape(1, H1).astype(jnp.float32)
    b2 = params["out_2"]["bias"].reshape(1, H2).astype(jnp.float32)

    tm = block_rows if block_rows is not None else _pick_batch_tile(B)
    assert B % tm == 0, "batch must divide the batch tile"
    nb = B // tm
    inv_total = 1.0 / float(B * H2)

    grid_spec = pltpu.PrefetchScalarGridSpec(
        num_scalar_prefetch=0,
        grid=(nb,),
        in_specs=[
            pl.BlockSpec((tm, Din), lambda i: (i, 0)),   # activations (streamed)
            pl.BlockSpec((tm, H2), lambda i: (i, 0)),    # labels      (streamed)
            pl.BlockSpec((Din, H1), lambda i: (0, 0)),   # W1^T        (pinned)
            pl.BlockSpec((1, H1), lambda i: (0, 0)),     # b1          (pinned)
            pl.BlockSpec((H1, H2), lambda i: (0, 0)),    # W2^T        (pinned)
            pl.BlockSpec((1, H2), lambda i: (0, 0)),     # b2          (pinned)
        ],
        out_specs=pl.BlockSpec((1, 1), lambda i: (0, 0)),  # resident accumulator
    )

    loss = pl.pallas_call(
        functools.partial(_mlp_bce_kernel, inv_total=inv_total),
        out_shape=jax.ShapeDtypeStruct((1, 1), jnp.float32),
        grid_spec=grid_spec,
        compiler_params=pltpu.CompilerParams(
            dimension_semantics=("arbitrary",),      # loss accumulates over tiles
            vmem_limit_bytes=48 * 1024 * 1024,       # within v7x 64 MiB/TC budget
        ),
    )(x, y, w1_t, b1, w2_t, b2)
    return loss[0, 0]


# ---------------------------------------------------------------------------
# Parameter init: Linear weights ~ U(-r, r), r = sqrt(6)/sqrt(in+out); bias 0.
# (Matches MultiLabelClassify1.init_weights.)
# ---------------------------------------------------------------------------
def init_multi_label_classify1_params(key, in_dim=1024, hidden=1000,
                                      out_dim=1000):
    def linear(k, fan_in, fan_out):
        r = jnp.sqrt(6.0) / jnp.sqrt(jnp.float32(fan_in + fan_out))
        w = jax.random.uniform(k, (fan_out, fan_in), jnp.float32, -r, r)
        b = jnp.zeros((fan_out,), jnp.float32)
        return {"weight": w, "bias": b}

    k1, k2 = jax.random.split(key)
    return {"out_1": linear(k1, in_dim, hidden),
            "out_2": linear(k2, hidden, out_dim)}


# ---------------------------------------------------------------------------
if __name__ == "__main__":
    key = jax.random.PRNGKey(0)
    B, IN_DIM, HIDDEN, NUM_LABEL = 32, 1024, 1000, 1000  # dims fixed by module

    k_x, k_y, k_p = jax.random.split(key, 3)
    weighted_features = jax.random.normal(k_x, (B, IN_DIM), dtype=jnp.float32)
    target_labels = jax.random.bernoulli(
        k_y, 0.3, (B, NUM_LABEL)).astype(jnp.float32)

    params = init_multi_label_classify1_params(k_p, IN_DIM, HIDDEN, NUM_LABEL)

    # block_rows=16 -> grid of 2 batch tiles, exercising the accumulator path.
    loss = multi_label_classify1_forward(params, weighted_features,
                                         target_labels, block_rows=16)
    jax.block_until_ready(loss)

    # Pure-JAX reference for correctness.
    h_ref = jnp.tanh(weighted_features @ params["out_1"]["weight"].T
                     + params["out_1"]["bias"])
    z_ref = h_ref @ params["out_2"]["weight"].T + params["out_2"]["bias"]
    bce_ref = (jnp.maximum(z_ref, 0.0) - z_ref * target_labels
               + jnp.log1p(jnp.exp(-jnp.abs(z_ref))))
    loss_ref = jnp.mean(bce_ref)

    assert loss.shape == ()
    assert bool(jnp.isfinite(loss))
    assert jnp.allclose(loss, loss_ref, rtol=1e-4, atol=1e-5), (loss, loss_ref)
    print("KERNEL_OK")
</pallas_src>

<mosaic_0001>
module attributes {stable_mosaic.version = 11 : i64} {
  func.func @_mlp_bce_kernel(%arg0: i32, %arg1: memref<16x1024xf32, #tpu.memory_space<vmem>>, %arg2: memref<16x1000xf32, #tpu.memory_space<vmem>>, %arg3: memref<1024x1000xf32, #tpu.memory_space<vmem>>, %arg4: memref<1x1000xf32, #tpu.memory_space<vmem>>, %arg5: memref<1000x1000xf32, #tpu.memory_space<vmem>>, %arg6: memref<1x1000xf32, #tpu.memory_space<vmem>>, %arg7: memref<1x1xf32, #tpu.memory_space<vmem>>) attributes {dimension_semantics = [#tpu.dimension_semantics<arbitrary>], iteration_bounds = array<i64: 2>, scalar_prefetch = 0 : i64, scratch_operands = 0 : i64, tpu.core_type = #tpu.core_type<tc>, window_params = [{transform_indices = @transform_0, window_bounds = array<i64: 16, 1024>}, {transform_indices = @transform_1, window_bounds = array<i64: 16, 1000>}, {pipeline_mode = #tpu.pipeline_mode<synchronous>, transform_indices = @transform_2, window_bounds = array<i64: 1024, 1000>}, {pipeline_mode = #tpu.pipeline_mode<synchronous>, transform_indices = @transform_3, window_bounds = array<i64: 1, 1000>}, {pipeline_mode = #tpu.pipeline_mode<synchronous>, transform_indices = @transform_4, window_bounds = array<i64: 1000, 1000>}, {pipeline_mode = #tpu.pipeline_mode<synchronous>, transform_indices = @transform_5, window_bounds = array<i64: 1, 1000>}, {pipeline_mode = #tpu.pipeline_mode<synchronous>, transform_indices = @transform_6, window_bounds = array<i64: 1, 1>}]} {
    %c0_i32 = arith.constant 0 : i32
    %0 = arith.cmpi eq, %arg0, %c0_i32 : i32
    %1 = arith.extui %0 : i1 to i32
    %c0_i32_0 = arith.constant 0 : i32
    %2 = arith.cmpi ne, %1, %c0_i32_0 : i32
    scf.if %2 {
      %cst_21 = arith.constant 0.000000e+00 : f32
      %36 = vector.broadcast %cst_21 : f32 to vector<1x1xf32>
      %c0_22 = arith.constant 0 : index
      %c0_23 = arith.constant 0 : index
      %37 = vector.load %arg7[%c0_22, %c0_23] : memref<1x1xf32, #tpu.memory_space<vmem>>, vector<1x1xf32>
      tpu.vector_store %arg7[%c0_22, %c0_23], %36 {strides = array<i32>} : memref<1x1xf32, #tpu.memory_space<vmem>>, vector<1x1xf32>,
    } else {
    }
    %c0 = arith.constant 0 : index
    %c0_1 = arith.constant 0 : index
    %3 = vector.load %arg1[%c0, %c0_1] : memref<16x1024xf32, #tpu.memory_space<vmem>>, vector<16x1024xf32>
    %c0_2 = arith.constant 0 : index
    %c0_3 = arith.constant 0 : index
    %4 = vector.load %arg3[%c0_2, %c0_3] : memref<1024x1000xf32, #tpu.memory_space<vmem>>, vector<1024x1000xf32>
    %cst = arith.constant dense<0.000000e+00> : vector<16x1000xf32>
    %5 = tpu.matmul %3, %4, %cst {dimension_numbers = #tpu.dot_dimension_numbers<[1], [0], [0], [1], [0, 0, 1, 1], [], []>} : vector<16x1024xf32>, vector<1024x1000xf32>, vector<16x1000xf32> -> vector<16x1000xf32>
    %c0_4 = arith.constant 0 : index
    %c0_5 = arith.constant 0 : index
    %6 = vector.load %arg4[%c0_4, %c0_5] : memref<1x1000xf32, #tpu.memory_space<vmem>>, vector<1x1000xf32>
    %7 = vector.broadcast %6 : vector<1x1000xf32> to vector<16x1000xf32>
    %8 = arith.addf %5, %7 : vector<16x1000xf32>
    %9 = math.tanh %8 : vector<16x1000xf32>
    %c0_6 = arith.constant 0 : index
    %c0_7 = arith.constant 0 : index
    %10 = vector.load %arg5[%c0_6, %c0_7] : memref<1000x1000xf32, #tpu.memory_space<vmem>>, vector<1000x1000xf32>
    %cst_8 = arith.constant dense<0.000000e+00> : vector<16x1000xf32>
    %11 = tpu.matmul %9, %10, %cst_8 {dimension_numbers = #tpu.dot_dimension_numbers<[1], [0], [0], [1], [0, 0, 1, 1], [], []>} : vector<16x1000xf32>, vector<1000x1000xf32>, vector<16x1000xf32> -> vector<16x1000xf32>
    %c0_9 = arith.constant 0 : index
    %c0_10 = arith.constant 0 : index
    %12 = vector.load %arg6[%c0_9, %c0_10] : memref<1x1000xf32, #tpu.memory_space<vmem>>, vector<1x1000xf32>
    %13 = vector.broadcast %12 : vector<1x1000xf32> to vector<16x1000xf32>
    %14 = arith.addf %11, %13 : vector<16x1000xf32>
    %c0_11 = arith.constant 0 : index
    %c0_12 = arith.constant 0 : index
    %15 = vector.load %arg2[%c0_11, %c0_12] : memref<16x1000xf32, #tpu.memory_space<vmem>>, vector<16x1000xf32>
    %cst_13 = arith.constant 0.000000e+00 : f32
    %16 = vector.broadcast %cst_13 : f32 to vector<16x1000xf32>
    %17 = arith.maximumf %14, %16 : vector<16x1000xf32>
    %18 = arith.mulf %14, %15 : vector<16x1000xf32>
    %19 = arith.subf %17, %18 : vector<16x1000xf32>
    %20 = math.absf %14 : vector<16x1000xf32>
    %cst_14 = arith.constant 0.000000e+00 : f32
    %21 = vector.broadcast %cst_14 : f32 to vector<16x1000xf32>
    %22 = arith.subf %21, %20 : vector<16x1000xf32>
    %23 = math.exp %22 : vector<16x1000xf32>
    %24 = math.log1p %23 : vector<16x1000xf32>
    %25 = arith.addf %19, %24 : vector<16x1000xf32>
    %c0_15 = arith.constant 0 : index
    %c0_16 = arith.constant 0 : index
    %26 = vector.load %arg7[%c0_15, %c0_16] : memref<1x1xf32, #tpu.memory_space<vmem>>, vector<1x1xf32>
    %27 = vector.shape_cast %25 : vector<16x1000xf32> to vector<1x16x1000xf32>
    %cst_17 = arith.constant dense<0.000000e+00> : vector<1xf32>
    %28 = vector.multi_reduction <add>, %27, %cst_17 [1, 2] : vector<1x16x1000xf32> to vector<1xf32>
    %29 = vector.shape_cast %28 : vector<1xf32> to vector<1x1x1xf32>
    %30 = vector.extract %29[0, 0, 0] : f32 from vector<1x1x1xf32>
    %31 = vector.broadcast %30 : f32 to vector<1x1xf32>
    %cst_18 = arith.constant 3.125000e-05 : f32
    %32 = vector.broadcast %cst_18 : f32 to vector<1x1xf32>
    %33 = arith.mulf %31, %32 : vector<1x1xf32>
    %34 = arith.addf %26, %33 : vector<1x1xf32>
    %c0_19 = arith.constant 0 : index
    %c0_20 = arith.constant 0 : index
    %35 = vector.load %arg7[%c0_19, %c0_20] : memref<1x1xf32, #tpu.memory_space<vmem>>, vector<1x1xf32>
    tpu.vector_store %arg7[%c0_19, %c0_20], %34 {strides = array<i32>} : memref<1x1xf32, #tpu.memory_space<vmem>>, vector<1x1xf32>,
    return
  }
  func.func @transform_0(%arg0: i32) -> (i32, i32) {
    %c0_i32 = arith.constant 0 : i32
    %c0_i32_0 = arith.constant 0 : i32
    return %arg0, %c0_i32 : i32, i32
  }
  func.func @transform_1(%arg0: i32) -> (i32, i32) {
    %c0_i32 = arith.constant 0 : i32
    %c0_i32_0 = arith.constant 0 : i32
    return %arg0, %c0_i32 : i32, i32
  }
  func.func @transform_2(%arg0: i32) -> (i32, i32) {
    %c0_i32 = arith.constant 0 : i32
    %c0_i32_0 = arith.constant 0 : i32
    %c0_i32_1 = arith.constant 0 : i32
    return %c0_i32, %c0_i32_0 : i32, i32
  }
  func.func @transform_3(%arg0: i32) -> (i32, i32) {
    %c0_i32 = arith.constant 0 : i32
    %c0_i32_0 = arith.constant 0 : i32
    %c0_i32_1 = arith.constant 0 : i32
    return %c0_i32, %c0_i32_0 : i32, i32
  }
  func.func @transform_4(%arg0: i32) -> (i32, i32) {
    %c0_i32 = arith.constant 0 : i32
    %c0_i32_0 = arith.constant 0 : i32
    %c0_i32_1 = arith.constant 0 : i32
    return %c0_i32, %c0_i32_0 : i32, i32
  }
  func.func @transform_5(%arg0: i32) -> (i32, i32) {
    %c0_i32 = arith.constant 0 : i32
    %c0_i32_0 = arith.constant 0 : i32
    %c0_i32_1 = arith.constant 0 : i32
    return %c0_i32, %c0_i32_0 : i32, i32
  }
  func.func @transform_6(%arg0: i32) -> (i32, i32) {
    %c0_i32 = arith.constant 0 : i32
    %c0_i32_0 = arith.constant 0 : i32
    %c0_i32_1 = arith.constant 0 : i32
    return %c0_i32, %c0_i32_0 : i32, i32
  }
}

</mosaic_0001>

<bundles_post_ra>
// kernel: tpu_custom_call.1
= control target key start
LH: loop header
LB: loop body
LE: loop exit
PB: predicated region body
PF: predicated region fallthrough
CT: control target
= control target key end

     0   :  { %11 = vsyncpa [#allocation3], 0  ;;  %s7639_s21 = smov 0   ;;  %s14338_s0 = inlined_call_operand.vmem [shape: f32[32,1024], index: 0, kind: input, shape index: {}]   ;;  %s14339_s1 = inlined_call_operand.vmem [shape: f32[32,1000], index: 1, kind: input, shape index: {}]   ;;  %s14340_s2 = inlined_call_operand.vmem [shape: f32[1024,1000], index: 2, kind: input, shape index: {}]   ;;  %s14341_s3 = inlined_call_operand.vmem [shape: f32[1,1000], index: 3, kind: input, shape index: {}]   ;;  %s14342_s4 = inlined_call_operand.vmem [shape: f32[1000,1000], index: 4, kind: input, shape index: {}]   ;;  %s14343_s5 = inlined_call_operand.vmem [shape: f32[1,1000], index: 5, kind: input, shape index: {}]   ;;  %s14344_s6 = inlined_call_operand.hbm [shape: f32[1,1], index: 6, kind: output, shape index: {}]  }
   0x1 LB: > { %s7645_s22 = sadd.s32 4294967295, %s7600_s21   ;;  %p5266_p0 = scmp.ge.s32.totalorder %s7600_s21, 1  ;;  %s7600_s21 = sphi %s7639_s21, %s17_s21  }
   0x2   : > { %p222_p1 = scmp.lt.s32.totalorder %s7600_s21, 3 }
   0x4   : > { %p223_p2 = pnand %p5266_p0, %p222_p1 }
   0x5   : > { %s5267_s23 = sshll.u32 (!%p223_p2), %s7645_s22, 1  ;;  %p5273_p4 = scmp.ne.s32.totalorder (!%p223_p2), %s7645_s22, 0 }
   0x6   : > { %226 = sbr.rel (%p223_p2) target bundleno = 1572 (0x624), region = 44  ;;  %p255_p3 = scmp.lt.s32.totalorder (!%p223_p2), %s5267_s23, 3 }
   0xd   : > { %s14360_s23 = smov (!%p255_p3, %s5267_s23), 3  ;;  %271 = sbr.rel (%p5273_p4) target bundleno = 20 (0x14), region = 48 }
   0xe   : > { %s5286_s24 = sshll.u32 %s14360_s23, 6  ;;  %vm272_vm0 = vcmask (!%p5273_p4), 0   ;;  %v7602_v0 = vmov (!%p5273_p4), 0.0  }
   0xf   : > { %s7653_s27 = scalar_lea.vmem %s14338_s0, %s5286_s24  ;;  %s7658_s30 = scalar_lea.vmem %s14339_s1, %s5286_s24  ;;  %273 = vst.msk [vmem:[#allocation2] sm:$0x1] (!%p5273_p4), %vm272_vm0, %v7602_v0 }
  0x14 PF: > { %v291_v1 = vld [vmem:[%s14340_s2 + $0x8] sm:$0xff]  ;;  %v293_v3 = vld [vmem:[%s14340_s2 + $0x18] sm:$0xff]  ;;  %v290_v6 = vld [vmem:[%s14340_s2] sm:$0xff]  ;;  %vm3646_vm1 = vcmask 850944   ;;  %s7603_s10 = smov [#allocation2]   ;;  %p7438_p5 = scmp.eq.s32.totalorder %s7645_s22, 1 }
  0x15   : > { %v299_v2 = vld [vmem:[%s14340_s2 + $0x48] sm:$0xff]  ;;  %v301_v5 = vld [vmem:[%s14340_s2 + $0x58] sm:$0xff]  ;;  %v298_v7 = vld [vmem:[%s14340_s2 + $0x40] sm:$0xff]  ;;  %s5212_s11 = sshll.u32 %s7603_s10, 4  ;;  %s5213_s11 = int_to_ptr.vmem [resolvable:$true] %s5212_s11 }
  0x16   : > { %v5288_v4 = vpack.c.bf16 %v299_v2, %v291_v1  ;;  %v5544_v8 = vpack.c.bf16 %v301_v5, %v293_v3  ;;  %v5290_v9 = vpack.c.bf16 %v298_v7, %v290_v6  ;;  %v292_v10 = vld [vmem:[%s14340_s2 + $0x10] sm:$0xff]  ;;  %v307_v12 = vld [vmem:[%s14340_s2 + $0x88] sm:$0xff]  ;;  %v309_v15 = vld [vmem:[%s14340_s2 + $0x98] sm:$0xff]  ;;  %s7564_s12 = scalar_lea.vmem %s5213_s11, 16  ;;  %p7571_p9 = scmp.lt.s32.totalorder %s5213_s11, %s5213_s11 }
  0x17   : > { %v300_v11 = vld [vmem:[%s14340_s2 + $0x50] sm:$0xff]  ;;  %v315_v14 = vld [vmem:[%s14340_s2 + $0xc8] sm:$0xff]  ;;  %v317_v16 = vld [vmem:[%s14340_s2 + $0xd8] sm:$0xff]  ;;  %p7565_p6 = scmp.ne.s32.totalorder %s5213_s11, %s7564_s12 }
  0x18   : > { %5289 = vmatprep.subr.bf16.mxu0 %v5288_v4  ;;  %v5546_v13 = vpack.c.bf16 %v300_v11, %v292_v10  ;;  %5545 = vmatprep.subr.bf16.mxu1 %v5544_v8  ;;  %v5292_v17 = vpack.c.bf16 %v315_v14, %v307_v12  ;;  %v5548_v18 = vpack.c.bf16 %v317_v16, %v309_v15  ;;  %v306_v19 = vld [vmem:[%s14340_s2 + $0x80] sm:$0xff]  ;;  %v308_v21 = vld [vmem:[%s14340_s2 + $0x90] sm:$0xff]  ;;  %v323_v24 = vld [vmem:[%s14340_s2 + $0x108] sm:$0xff] }
  0x19   : > { %5291 = vmatpush1.bf16.msra.mxu0 %v5290_v9  ;;  %v314_v20 = vld [vmem:[%s14340_s2 + $0xc0] sm:$0xff]  ;;  %v316_v23 = vld [vmem:[%s14340_s2 + $0xd0] sm:$0xff]  ;;  %v331_v25 = vld [vmem:[%s14340_s2 + $0x148] sm:$0xff]  ;;  %p7566_p7 = pnand %p7565_p6, %p7438_p5 }
  0x1a   : > { %5547 = vmatpush1.bf16.msra.mxu1 %v5546_v13  ;;  %v5294_v22 = vpack.c.bf16 %v314_v20, %v306_v19  ;;  %5293 = vmatprep.subr.bf16.mxu0 %v5292_v17  ;;  %v5550_v26 = vpack.c.bf16 %v316_v23, %v308_v21  ;;  %v5296_v27 = vpack.c.bf16 %v331_v25, %v323_v24  ;;  %v325_v28 = vld [vmem:[%s14340_s2 + $0x118] sm:$0xff]  ;;  %v322_v30 = vld [vmem:[%s14340_s2 + $0x100] sm:$0xff]  ;;  %v324_v33 = vld [vmem:[%s14340_s2 + $0x110] sm:$0xff] }
  0x1b   : > { %5549 = vmatprep.subr.bf16.mxu1 %v5548_v18  ;;  %v333_v29 = vld [vmem:[%s14340_s2 + $0x158] sm:$0xff]  ;;  %v330_v32 = vld [vmem:[%s14340_s2 + $0x140] sm:$0xff]  ;;  %v332_v34 = vld [vmem:[%s14340_s2 + $0x150] sm:$0xff]  ;;  %p7567_p8 = pneg %p7566_p7 }
  0x1c   : > { %v5552_v31 = vpack.c.bf16 %v333_v29, %v325_v28  ;;  %v5298_v35 = vpack.c.bf16 %v330_v32, %v322_v30  ;;  %v339_v36 = vld [vmem:[%s14340_s2 + $0x188] sm:$0xff]  ;;  %v341_v38 = vld [vmem:[%s14340_s2 + $0x198] sm:$0xff]  ;;  %v5554_v39 = vpack.c.bf16 %v332_v34, %v324_v33  ;;  %v338_v42 = vld [vmem:[%s14340_s2 + $0x180] sm:$0xff] }
  0x1d   : > { %5295 = vmatpush1.bf16.msra.mxu0 %v5294_v22  ;;  %v347_v37 = vld [vmem:[%s14340_s2 + $0x1c8] sm:$0xff]  ;;  %v349_v41 = vld [vmem:[%s14340_s2 + $0x1d8] sm:$0xff]  ;;  %v346_v43 = vld [vmem:[%s14340_s2 + $0x1c0] sm:$0xff] }
  0x1e   : > { %5551 = vmatpush1.bf16.msra.mxu1 %v5550_v26  ;;  %5297 = vmatprep.subr.bf16.mxu0 %v5296_v27  ;;  %v5300_v40 = vpack.c.bf16 %v347_v37, %v339_v36  ;;  %v5556_v44 = vpack.c.bf16 %v349_v41, %v341_v38  ;;  %v340_v45 = vld [vmem:[%s14340_s2 + $0x190] sm:$0xff]  ;;  %v355_v47 = vld [vmem:[%s14340_s2 + $0x208] sm:$0xff]  ;;  %v357_v49 = vld [vmem:[%s14340_s2 + $0x218] sm:$0xff]  ;;  %v5302_v51 = vpack.c.bf16 %v346_v43, %v338_v42 }
  0x1f   : > { %5553 = vmatprep.subr.bf16.mxu1 %v5552_v31  ;;  %v348_v46 = vld [vmem:[%s14340_s2 + $0x1d0] sm:$0xff]  ;;  %v363_v48 = vld [vmem:[%s14340_s2 + $0x248] sm:$0xff]  ;;  %v365_v50 = vld [vmem:[%s14340_s2 + $0x258] sm:$0xff] }
  0x20   : > { %v5558_v52 = vpack.c.bf16 %v348_v46, %v340_v45  ;;  %v5304_v53 = vpack.c.bf16 %v363_v48, %v355_v47  ;;  %v354_v54 = vld [vmem:[%s14340_s2 + $0x200] sm:$0xff]  ;;  %v356_v56 = vld [vmem:[%s14340_s2 + $0x210] sm:$0xff]  ;;  %v5560_v57 = vpack.c.bf16 %v365_v50, %v357_v49  ;;  %v371_v59 = vld [vmem:[%s14340_s2 + $0x288] sm:$0xff] }
  0x21   : > { %5299 = vmatpush1.bf16.msra.mxu0 %v5298_v35  ;;  %v362_v55 = vld [vmem:[%s14340_s2 + $0x240] sm:$0xff]  ;;  %v364_v58 = vld [vmem:[%s14340_s2 + $0x250] sm:$0xff]  ;;  %v379_v60 = vld [vmem:[%s14340_s2 + $0x2c8] sm:$0xff] }
  0x22   : > { %5555 = vmatpush1.bf16.msra.mxu1 %v5554_v39  ;;  %5301 = vmatprep.subr.bf16.mxu0 %v5300_v40  ;;  %v373_v61 = vld [vmem:[%s14340_s2 + $0x298] sm:$0xff]  ;;  %v5306_v63 = vpack.c.bf16 %v362_v55, %v354_v54  ;;  %v5562_v0 = vpack.c.bf16 %v364_v58, %v356_v56  ;;  %v5308_v1 = vpack.c.bf16 %v379_v60, %v371_v59  ;;  %v370_v2 = vld [vmem:[%s14340_s2 + $0x280] sm:$0xff]  ;;  %v372_v4 = vld [vmem:[%s14340_s2 + $0x290] sm:$0xff] }
  0x23   : > { %5557 = vmatprep.subr.bf16.mxu1 %v5556_v44  ;;  %v381_v62 = vld [vmem:[%s14340_s2 + $0x2d8] sm:$0xff]  ;;  %v378_v3 = vld [vmem:[%s14340_s2 + $0x2c0] sm:$0xff]  ;;  %v380_v6 = vld [vmem:[%s14340_s2 + $0x2d0] sm:$0xff] }
  0x24   : > { %v5564_v5 = vpack.c.bf16 %v381_v62, %v373_v61  ;;  %v387_v7 = vld [vmem:[%s14340_s2 + $0x308] sm:$0xff]  ;;  %v389_v9 = vld [vmem:[%s14340_s2 + $0x318] sm:$0xff]  ;;  %v5310_v11 = vpack.c.bf16 %v378_v3, %v370_v2  ;;  %v5566_v12 = vpack.c.bf16 %v380_v6, %v372_v4  ;;  %v386_v14 = vld [vmem:[%s14340_s2 + $0x300] sm:$0xff] }
  0x25   : > { %5303 = vmatpush1.bf16.msra.mxu0 %v5302_v51  ;;  %v395_v8 = vld [vmem:[%s14340_s2 + $0x348] sm:$0xff]  ;;  %v397_v10 = vld [vmem:[%s14340_s2 + $0x358] sm:$0xff]  ;;  %v394_v15 = vld [vmem:[%s14340_s2 + $0x340] sm:$0xff] }
  0x26   : > { %5559 = vmatpush1.bf16.msra.mxu1 %v5558_v52  ;;  %5305 = vmatprep.subr.bf16.mxu0 %v5304_v53  ;;  %v5312_v13 = vpack.c.bf16 %v395_v8, %v387_v7  ;;  %v388_v16 = vld [vmem:[%s14340_s2 + $0x310] sm:$0xff]  ;;  %v5568_v17 = vpack.c.bf16 %v397_v10, %v389_v9  ;;  %v403_v19 = vld [vmem:[%s14340_s2 + $0x388] sm:$0xff]  ;;  %v405_v21 = vld [vmem:[%s14340_s2 + $0x398] sm:$0xff]  ;;  %v5314_v23 = vpack.c.bf16 %v394_v15, %v386_v14 }
  0x27   : > { %5561 = vmatprep.subr.bf16.mxu1 %v5560_v57  ;;  %v396_v18 = vld [vmem:[%s14340_s2 + $0x350] sm:$0xff]  ;;  %v411_v20 = vld [vmem:[%s14340_s2 + $0x3c8] sm:$0xff]  ;;  %v413_v22 = vld [vmem:[%s14340_s2 + $0x3d8] sm:$0xff] }
  0x28   : > { %v5570_v24 = vpack.c.bf16 %v396_v18, %v388_v16  ;;  %v5316_v25 = vpack.c.bf16 %v411_v20, %v403_v19  ;;  %v402_v26 = vld [vmem:[%s14340_s2 + $0x380] sm:$0xff]  ;;  %v404_v28 = vld [vmem:[%s14340_s2 + $0x390] sm:$0xff]  ;;  %v5572_v29 = vpack.c.bf16 %v413_v22, %v405_v21  ;;  %v419_v31 = vld [vmem:[%s14340_s2 + $0x408] sm:$0xff] }
  0x29   : > { %5307 = vmatpush1.bf16.msra.mxu0 %v5306_v63  ;;  %v410_v27 = vld [vmem:[%s14340_s2 + $0x3c0] sm:$0xff]  ;;  %v412_v30 = vld [vmem:[%s14340_s2 + $0x3d0] sm:$0xff]  ;;  %v427_v32 = vld [vmem:[%s14340_s2 + $0x448] sm:$0xff] }
  0x2a   : > { %5563 = vmatpush1.bf16.msra.mxu1 %v5562_v0  ;;  %5309 = vmatprep.subr.bf16.mxu0 %v5308_v1  ;;  %v421_v33 = vld [vmem:[%s14340_s2 + $0x418] sm:$0xff]  ;;  %v5318_v35 = vpack.c.bf16 %v410_v27, %v402_v26  ;;  %v5574_v36 = vpack.c.bf16 %v412_v30, %v404_v28  ;;  %v5320_v37 = vpack.c.bf16 %v427_v32, %v419_v31  ;;  %v418_v38 = vld [vmem:[%s14340_s2 + $0x400] sm:$0xff]  ;;  %v420_v40 = vld [vmem:[%s14340_s2 + $0x410] sm:$0xff] }
  0x2b   : > { %5565 = vmatprep.subr.bf16.mxu1 %v5564_v5  ;;  %v429_v34 = vld [vmem:[%s14340_s2 + $0x458] sm:$0xff]  ;;  %v426_v39 = vld [vmem:[%s14340_s2 + $0x440] sm:$0xff]  ;;  %v428_v42 = vld [vmem:[%s14340_s2 + $0x450] sm:$0xff] }
  0x2c   : > { %v5576_v41 = vpack.c.bf16 %v429_v34, %v421_v33  ;;  %v435_v43 = vld [vmem:[%s14340_s2 + $0x488] sm:$0xff]  ;;  %v437_v45 = vld [vmem:[%s14340_s2 + $0x498] sm:$0xff]  ;;  %v5322_v47 = vpack.c.bf16 %v426_v39, %v418_v38  ;;  %v5578_v48 = vpack.c.bf16 %v428_v42, %v420_v40  ;;  %v434_v50 = vld [vmem:[%s14340_s2 + $0x480] sm:$0xff] }
  0x2d   : > { %5311 = vmatpush1.bf16.msra.mxu0 %v5310_v11  ;;  %v443_v44 = vld [vmem:[%s14340_s2 + $0x4c8] sm:$0xff]  ;;  %v445_v46 = vld [vmem:[%s14340_s2 + $0x4d8] sm:$0xff]  ;;  %v442_v51 = vld [vmem:[%s14340_s2 + $0x4c0] sm:$0xff] }
  0x2e   : > { %5567 = vmatpush1.bf16.msra.mxu1 %v5566_v12  ;;  %5313 = vmatprep.subr.bf16.mxu0 %v5312_v13  ;;  %v5324_v49 = vpack.c.bf16 %v443_v44, %v435_v43  ;;  %v436_v52 = vld [vmem:[%s14340_s2 + $0x490] sm:$0xff]  ;;  %v5580_v53 = vpack.c.bf16 %v445_v46, %v437_v45  ;;  %v451_v55 = vld [vmem:[%s14340_s2 + $0x508] sm:$0xff]  ;;  %v453_v57 = vld [vmem:[%s14340_s2 + $0x518] sm:$0xff]  ;;  %v5326_v59 = vpack.c.bf16 %v442_v51, %v434_v50 }
  0x2f   : > { %5569 = vmatprep.subr.bf16.mxu1 %v5568_v17  ;;  %v444_v54 = vld [vmem:[%s14340_s2 + $0x4d0] sm:$0xff]  ;;  %v459_v56 = vld [vmem:[%s14340_s2 + $0x548] sm:$0xff]  ;;  %v461_v58 = vld [vmem:[%s14340_s2 + $0x558] sm:$0xff] }
  0x30   : > { %v5582_v60 = vpack.c.bf16 %v444_v54, %v436_v52  ;;  %v5328_v61 = vpack.c.bf16 %v459_v56, %v451_v55  ;;  %v450_v62 = vld [vmem:[%s14340_s2 + $0x500] sm:$0xff]  ;;  %v452_v0 = vld [vmem:[%s14340_s2 + $0x510] sm:$0xff]  ;;  %v5584_v1 = vpack.c.bf16 %v461_v58, %v453_v57  ;;  %v467_v3 = vld [vmem:[%s14340_s2 + $0x588] sm:$0xff] }
  0x31   : > { %5315 = vmatpush1.bf16.msra.mxu0 %v5314_v23  ;;  %v458_v63 = vld [vmem:[%s14340_s2 + $0x540] sm:$0xff]  ;;  %v460_v2 = vld [vmem:[%s14340_s2 + $0x550] sm:$0xff]  ;;  %v475_v4 = vld [vmem:[%s14340_s2 + $0x5c8] sm:$0xff] }
  0x32   : > { %5571 = vmatpush1.bf16.msra.mxu1 %v5570_v24  ;;  %5317 = vmatprep.subr.bf16.mxu0 %v5316_v25  ;;  %v469_v5 = vld [vmem:[%s14340_s2 + $0x598] sm:$0xff]  ;;  %v5330_v7 = vpack.c.bf16 %v458_v63, %v450_v62  ;;  %v466_v8 = vld [vmem:[%s14340_s2 + $0x580] sm:$0xff]  ;;  %v5586_v9 = vpack.c.bf16 %v460_v2, %v452_v0  ;;  %v5332_v10 = vpack.c.bf16 %v475_v4, %v467_v3  ;;  %v468_v12 = vld [vmem:[%s14340_s2 + $0x590] sm:$0xff] }
  0x33   : > { %5573 = vmatprep.subr.bf16.mxu1 %v5572_v29  ;;  %v477_v6 = vld [vmem:[%s14340_s2 + $0x5d8] sm:$0xff]  ;;  %v474_v11 = vld [vmem:[%s14340_s2 + $0x5c0] sm:$0xff]  ;;  %v476_v13 = vld [vmem:[%s14340_s2 + $0x5d0] sm:$0xff] }
  0x34   : > { %v5588_v14 = vpack.c.bf16 %v477_v6, %v469_v5  ;;  %v483_v15 = vld [vmem:[%s14340_s2 + $0x608] sm:$0xff]  ;;  %v485_v18 = vld [vmem:[%s14340_s2 + $0x618] sm:$0xff]  ;;  %v5334_v20 = vpack.c.bf16 %v474_v11, %v466_v8  ;;  %v5590_v21 = vpack.c.bf16 %v476_v13, %v468_v12  ;;  %v482_v23 = vld [vmem:[%s14340_s2 + $0x600] sm:$0xff] }
  0x35   : > { %5319 = vmatpush1.bf16.msra.mxu0 %v5318_v35  ;;  %v491_v16 = vld [vmem:[%s14340_s2 + $0x648] sm:$0xff]  ;;  %v493_v19 = vld [vmem:[%s14340_s2 + $0x658] sm:$0xff]  ;;  %v490_v24 = vld [vmem:[%s14340_s2 + $0x640] sm:$0xff] }
  0x36   : > { %5575 = vmatpush1.bf16.msra.mxu1 %v5574_v36  ;;  %5321 = vmatprep.subr.bf16.mxu0 %v5320_v37  ;;  %v275_v17 = vld [vmem:[%s7653_s27 + $0x8] sm:$0xff]  ;;  %v5336_v22 = vpack.c.bf16 %v491_v16, %v483_v15  ;;  %v484_v25 = vld [vmem:[%s14340_s2 + $0x610] sm:$0xff]  ;;  %v5592_v26 = vpack.c.bf16 %v493_v19, %v485_v18  ;;  %v501_v30 = vld [vmem:[%s14340_s2 + $0x698] sm:$0xff]  ;;  %v5338_v32 = vpack.c.bf16 %v490_v24, %v482_v23 }
  0x37   : > { %5577 = vmatprep.subr.bf16.mxu1 %v5576_v41  ;;  %1420 = vmatprep.mubr.f32.mxu0 %v275_v17  ;;  %v492_v27 = vld [vmem:[%s14340_s2 + $0x650] sm:$0xff]  ;;  %v499_v28 = vld [vmem:[%s14340_s2 + $0x688] sm:$0xff]  ;;  %v509_v31 = vld [vmem:[%s14340_s2 + $0x6d8] sm:$0xff] }
  0x38   : > { %1728 = vmatprep.mubr.f32.mxu1 %v275_v17  ;;  %v507_v29 = vld [vmem:[%s14340_s2 + $0x6c8] sm:$0xff]  ;;  %v5594_v33 = vpack.c.bf16 %v492_v27, %v484_v25  ;;  %v498_v35 = vld [vmem:[%s14340_s2 + $0x680] sm:$0xff]  ;;  %v500_v37 = vld [vmem:[%s14340_s2 + $0x690] sm:$0xff]  ;;  %v5596_v38 = vpack.c.bf16 %v509_v31, %v501_v30 }
  0x39   : > { %5323 = vmatpush1.bf16.msra.mxu0 %v5322_v47  ;;  %v5340_v34 = vpack.c.bf16 %v507_v29, %v499_v28  ;;  %v506_v36 = vld [vmem:[%s14340_s2 + $0x6c0] sm:$0xff]  ;;  %v508_v39 = vld [vmem:[%s14340_s2 + $0x6d0] sm:$0xff]  ;;  %v515_v40 = vld [vmem:[%s14340_s2 + $0x708] sm:$0xff] }
  0x3a   : > { %5579 = vmatpush1.bf16.msra.mxu1 %v5578_v48  ;;  %5325 = vmatprep.subr.bf16.mxu0 %v5324_v49  ;;  %v523_v41 = vld [vmem:[%s14340_s2 + $0x748] sm:$0xff]  ;;  %v517_v42 = vld [vmem:[%s14340_s2 + $0x718] sm:$0xff]  ;;  %v5342_v44 = vpack.c.bf16 %v506_v36, %v498_v35  ;;  %v5598_v45 = vpack.c.bf16 %v508_v39, %v500_v37  ;;  %v514_v47 = vld [vmem:[%s14340_s2 + $0x700] sm:$0xff] }
  0x3b   : > { %5581 = vmatprep.subr.bf16.mxu1 %v5580_v53  ;;  %v525_v43 = vld [vmem:[%s14340_s2 + $0x758] sm:$0xff]  ;;  %v5344_v46 = vpack.c.bf16 %v523_v41, %v515_v40  ;;  %v522_v48 = vld [vmem:[%s14340_s2 + $0x740] sm:$0xff]  ;;  %v516_v49 = vld [vmem:[%s14340_s2 + $0x710] sm:$0xff] }
  0x3c   : > { %v5600_v50 = vpack.c.bf16 %v525_v43, %v517_v42  ;;  %v524_v51 = vld [vmem:[%s14340_s2 + $0x750] sm:$0xff]  ;;  %v531_v52 = vld [vmem:[%s14340_s2 + $0x788] sm:$0xff]  ;;  %v533_v54 = vld [vmem:[%s14340_s2 + $0x798] sm:$0xff]  ;;  %v5346_v56 = vpack.c.bf16 %v522_v48, %v514_v47 }
  0x3d   : > { %5327 = vmatpush1.bf16.msra.mxu0 %v5326_v59  ;;  %v539_v53 = vld [vmem:[%s14340_s2 + $0x7c8] sm:$0xff]  ;;  %v541_v55 = vld [vmem:[%s14340_s2 + $0x7d8] sm:$0xff]  ;;  %v5602_v57 = vpack.c.bf16 %v524_v51, %v516_v49  ;;  %v530_v59 = vld [vmem:[%s14340_s2 + $0x780] sm:$0xff] }
  0x3e   : > { %5583 = vmatpush1.bf16.msra.mxu1 %v5582_v60  ;;  %5329 = vmatprep.subr.bf16.mxu0 %v5328_v61  ;;  %v5348_v58 = vpack.c.bf16 %v539_v53, %v531_v52  ;;  %v538_v60 = vld [vmem:[%s14340_s2 + $0x7c0] sm:$0xff]  ;;  %v532_v61 = vld [vmem:[%s14340_s2 + $0x790] sm:$0xff]  ;;  %v5604_v62 = vpack.c.bf16 %v541_v55, %v533_v54  ;;  %v547_v0 = vld [vmem:[%s14340_s2 + $0x808] sm:$0xff] }
  0x3f   : > { %5585 = vmatprep.subr.bf16.mxu1 %v5584_v1  ;;  %v540_v63 = vld [vmem:[%s14340_s2 + $0x7d0] sm:$0xff]  ;;  %v555_v1 = vld [vmem:[%s14340_s2 + $0x848] sm:$0xff]  ;;  %v549_v2 = vld [vmem:[%s14340_s2 + $0x818] sm:$0xff]  ;;  %v5350_v4 = vpack.c.bf16 %v538_v60, %v530_v59 }
  0x40   : > { %v557_v3 = vld [vmem:[%s14340_s2 + $0x858] sm:$0xff]  ;;  %v5606_v5 = vpack.c.bf16 %v540_v63, %v532_v61  ;;  %v5352_v6 = vpack.c.bf16 %v555_v1, %v547_v0  ;;  %v554_v8 = vld [vmem:[%s14340_s2 + $0x840] sm:$0xff]  ;;  %v556_v11 = vld [vmem:[%s14340_s2 + $0x850] sm:$0xff] }
  0x41   : > { %5331 = vmatpush1.bf16.msra.mxu0 %v5330_v7  ;;  %v546_v7 = vld [vmem:[%s14340_s2 + $0x800] sm:$0xff]  ;;  %v563_v12 = vld [vmem:[%s14340_s2 + $0x888] sm:$0xff]  ;;  %v573_v15 = vld [vmem:[%s14340_s2 + $0x8d8] sm:$0xff] }
  0x42   : > { %5587 = vmatpush1.bf16.msra.mxu1 %v5586_v9  ;;  %5333 = vmatprep.subr.bf16.mxu0 %v5332_v10  ;;  %v548_v9 = vld [vmem:[%s14340_s2 + $0x810] sm:$0xff]  ;;  %v5608_v10 = vpack.c.bf16 %v557_v3, %v549_v2  ;;  %v571_v13 = vld [vmem:[%s14340_s2 + $0x8c8] sm:$0xff]  ;;  %v274_v16 = vld [vmem:[%s7653_s27] sm:$0xff]  ;;  %v5354_v17 = vpack.c.bf16 %v554_v8, %v546_v7 }
  0x43   : > { %5589 = vmatprep.subr.bf16.mxu1 %v5588_v14  ;;  %v565_v14 = vld [vmem:[%s14340_s2 + $0x898] sm:$0xff]  ;;  %v5610_v18 = vpack.c.bf16 %v556_v11, %v548_v9  ;;  %v5356_v19 = vpack.c.bf16 %v571_v13, %v563_v12  ;;  %v572_v24 = vld [vmem:[%s14340_s2 + $0x8d0] sm:$0xff]  ;;  %v579_v25 = vld [vmem:[%s14340_s2 + $0x908] sm:$0xff] }
  0x44   : > { %v5612_v23 = vpack.c.bf16 %v573_v15, %v565_v14  ;;  %v581_v27 = vld [vmem:[%s14340_s2 + $0x918] sm:$0xff]  ;;  %v588_v36 = vld [vmem:[%s14340_s2 + $0x950] sm:$0xff]  ;;  %v595_v37 = vld [vmem:[%s14340_s2 + $0x988] sm:$0xff] }
  0x45   : > { %5335 = vmatpush1.bf16.msra.mxu0 %v5334_v20  ;;  %v562_v20 = vld [vmem:[%s14340_s2 + $0x880] sm:$0xff]  ;;  %v589_v28 = vld [vmem:[%s14340_s2 + $0x958] sm:$0xff]  ;;  %v604_v48 = vld [vmem:[%s14340_s2 + $0x9d0] sm:$0xff] }
  0x46   : > { %5591 = vmatpush1.bf16.msra.mxu1 %v5590_v21  ;;  %5337 = vmatprep.subr.bf16.mxu0 %v5336_v22  ;;  %v570_v21 = vld [vmem:[%s14340_s2 + $0x8c0] sm:$0xff]  ;;  %v564_v22 = vld [vmem:[%s14340_s2 + $0x890] sm:$0xff]  ;;  %v5616_v35 = vpack.c.bf16 %v589_v28, %v581_v27  ;;  %v597_v39 = vld [vmem:[%s14340_s2 + $0x998] sm:$0xff] }
  0x47   : > { %5593 = vmatprep.subr.bf16.mxu1 %v5592_v26  ;;  %v587_v26 = vld [vmem:[%s14340_s2 + $0x948] sm:$0xff]  ;;  %v5358_v29 = vpack.c.bf16 %v570_v21, %v562_v20  ;;  %v5614_v30 = vpack.c.bf16 %v572_v24, %v564_v22  ;;  %v605_v40 = vld [vmem:[%s14340_s2 + $0x9d8] sm:$0xff]  ;;  %v620_v60 = vld [vmem:[%s14340_s2 + $0xa50] sm:$0xff] }
  0x48   : > { %v5360_v31 = vpack.c.bf16 %v587_v26, %v579_v25  ;;  %v5620_v47 = vpack.c.bf16 %v605_v40, %v597_v39  ;;  %v611_v49 = vld [vmem:[%s14340_s2 + $0xa08] sm:$0xff]  ;;  %v613_v51 = vld [vmem:[%s14340_s2 + $0xa18] sm:$0xff]  ;;  %v636_v8 = vld [vmem:[%s14340_s2 + $0xad0] sm:$0xff] }
  0x49   : > { %5339 = vmatpush1.bf16.msra.mxu0 %v5338_v32  ;;  %v578_v32 = vld [vmem:[%s14340_s2 + $0x900] sm:$0xff]  ;;  %v621_v52 = vld [vmem:[%s14340_s2 + $0xa58] sm:$0xff]  ;;  %v627_v61 = vld [vmem:[%s14340_s2 + $0xa88] sm:$0xff] }
  0x4a   : > { %5595 = vmatpush1.bf16.msra.mxu1 %v5594_v33  ;;  %5341 = vmatprep.subr.bf16.mxu0 %v5340_v34  ;;  %v586_v33 = vld [vmem:[%s14340_s2 + $0x940] sm:$0xff]  ;;  %v580_v34 = vld [vmem:[%s14340_s2 + $0x910] sm:$0xff]  ;;  %v5624_v59 = vpack.c.bf16 %v621_v52, %v613_v51  ;;  %v629_v63 = vld [vmem:[%s14340_s2 + $0xa98] sm:$0xff] }
  0x4b   : > { %5597 = vmatprep.subr.bf16.mxu1 %v5596_v38  ;;  %v603_v38 = vld [vmem:[%s14340_s2 + $0x9c8] sm:$0xff]  ;;  %v5362_v41 = vpack.c.bf16 %v586_v33, %v578_v32  ;;  %v5618_v42 = vpack.c.bf16 %v588_v36, %v580_v34  ;;  %v637_v0 = vld [vmem:[%s14340_s2 + $0xad8] sm:$0xff]  ;;  %v642_v15 = vld [vmem:[%s14340_s2 + $0xb00] sm:$0xff] }
  0x4c   : > { %v5364_v43 = vpack.c.bf16 %v603_v38, %v595_v37  ;;  %v5628_v7 = vpack.c.bf16 %v637_v0, %v629_v63  ;;  %v643_v9 = vld [vmem:[%s14340_s2 + $0xb08] sm:$0xff]  ;;  %v645_v11 = vld [vmem:[%s14340_s2 + $0xb18] sm:$0xff]  ;;  %v652_v20 = vld [vmem:[%s14340_s2 + $0xb50] sm:$0xff] }
  0x4d   : > { %5343 = vmatpush1.bf16.msra.mxu0 %v5342_v44  ;;  %v594_v44 = vld [vmem:[%s14340_s2 + $0x980] sm:$0xff]  ;;  %v653_v12 = vld [vmem:[%s14340_s2 + $0xb58] sm:$0xff]  ;;  %v283_v13 = vld [vmem:[%s7653_s27 + $0x48] sm:$0xff] }
  0x4e   : > { %5599 = vmatpush1.bf16.msra.mxu1 %v5598_v45  ;;  %5345 = vmatprep.subr.bf16.mxu0 %v5344_v46  ;;  %v602_v45 = vld [vmem:[%s14340_s2 + $0x9c0] sm:$0xff]  ;;  %v596_v46 = vld [vmem:[%s14340_s2 + $0x990] sm:$0xff]  ;;  %v5632_v22 = vpack.c.bf16 %v653_v12, %v645_v11  ;;  %v667_v24 = vld [vmem:[%s14340_s2 + $0xbc8] sm:$0xff] }
  0x4f   : > { %5601 = vmatprep.subr.bf16.mxu1 %v5600_v50  ;;  %v619_v50 = vld [vmem:[%s14340_s2 + $0xa48] sm:$0xff]  ;;  %v5366_v53 = vpack.c.bf16 %v602_v45, %v594_v44  ;;  %v5622_v54 = vpack.c.bf16 %v604_v48, %v596_v46  ;;  %v282_v21 = vld [vmem:[%s7653_s27 + $0x40] sm:$0xff]  ;;  %v277_v25 = vld [vmem:[%s7653_s27 + $0x18] sm:$0xff] }
  0x50   : > { %v5368_v55 = vpack.c.bf16 %v619_v50, %v611_v49  ;;  %v661_v26 = vld [vmem:[%s14340_s2 + $0xb98] sm:$0xff]  ;;  %v666_v32 = vld [vmem:[%s14340_s2 + $0xbc0] sm:$0xff]  ;;  %v660_v33 = vld [vmem:[%s14340_s2 + $0xb90] sm:$0xff] }
  0x51   : > { %5347 = vmatpush1.bf16.msra.mxu0 %v5346_v56  ;;  %v610_v56 = vld [vmem:[%s14340_s2 + $0xa00] sm:$0xff]  ;;  %v669_v27 = vld [vmem:[%s14340_s2 + $0xbd8] sm:$0xff]  ;;  %v675_v36 = vld [vmem:[%s14340_s2 + $0xc08] sm:$0xff] }
  0x52   : > { %5603 = vmatpush1.bf16.msra.mxu1 %v5602_v57  ;;  %5349 = vmatprep.subr.bf16.mxu0 %v5348_v58  ;;  %v618_v57 = vld [vmem:[%s14340_s2 + $0xa40] sm:$0xff]  ;;  %v612_v58 = vld [vmem:[%s14340_s2 + $0xa10] sm:$0xff]  ;;  %v5636_v34 = vpack.c.bf16 %v669_v27, %v661_v26  ;;  %v683_v37 = vld [vmem:[%s14340_s2 + $0xc48] sm:$0xff] }
  0x53   : > { %5605 = vmatprep.subr.bf16.mxu1 %v5604_v62  ;;  %v635_v62 = vld [vmem:[%s14340_s2 + $0xac8] sm:$0xff]  ;;  %v5370_v1 = vpack.c.bf16 %v618_v57, %v610_v56  ;;  %v5626_v2 = vpack.c.bf16 %v620_v60, %v612_v58  ;;  %v677_v38 = vld [vmem:[%s14340_s2 + $0xc18] sm:$0xff]  ;;  %v682_v44 = vld [vmem:[%s14340_s2 + $0xc40] sm:$0xff] }
  0x54   : > { %v5372_v3 = vpack.c.bf16 %v635_v62, %v627_v61  ;;  %v685_v39 = vld [vmem:[%s14340_s2 + $0xc58] sm:$0xff]  ;;  %v676_v45 = vld [vmem:[%s14340_s2 + $0xc10] sm:$0xff]  ;;  %v691_v48 = vld [vmem:[%s14340_s2 + $0xc88] sm:$0xff] }
  0x55   : > { %5351 = vmatpush1.bf16.msra.mxu0 %v5350_v4  ;;  %v626_v4 = vld [vmem:[%s14340_s2 + $0xa80] sm:$0xff]  ;;  %v5640_v46 = vpack.c.bf16 %v685_v39, %v677_v38  ;;  %v699_v49 = vld [vmem:[%s14340_s2 + $0xcc8] sm:$0xff]  ;;  %v693_v50 = vld [vmem:[%s14340_s2 + $0xc98] sm:$0xff] }
  0x56   : > { %5607 = vmatpush1.bf16.msra.mxu1 %v5606_v5  ;;  %5353 = vmatprep.subr.bf16.mxu0 %v5352_v6  ;;  %v634_v5 = vld [vmem:[%s14340_s2 + $0xac0] sm:$0xff]  ;;  %v628_v6 = vld [vmem:[%s14340_s2 + $0xa90] sm:$0xff]  ;;  %v701_v51 = vld [vmem:[%s14340_s2 + $0xcd8] sm:$0xff] }
  0x57   : > { %5609 = vmatprep.subr.bf16.mxu1 %v5608_v10  ;;  %v651_v10 = vld [vmem:[%s14340_s2 + $0xb48] sm:$0xff]  ;;  %v5374_v14 = vpack.c.bf16 %v634_v5, %v626_v4  ;;  %v698_v56 = vld [vmem:[%s14340_s2 + $0xcc0] sm:$0xff]  ;;  %v692_v57 = vld [vmem:[%s14340_s2 + $0xc90] sm:$0xff]  ;;  %v5644_v58 = vpack.c.bf16 %v701_v51, %v693_v50 }
  0x58   : > { %1421 = vmatmul.mubr.f32.vlgmr.msra.gmra.mrb[0].mxu0 %v274_v16  ;;  %v707_v60 = vld [vmem:[%s14340_s2 + $0xd08] sm:$0xff]  ;;  %v709_v62 = vld [vmem:[%s14340_s2 + $0xd18] sm:$0xff]  ;;  %v714_v4 = vld [vmem:[%s14340_s2 + $0xd40] sm:$0xff] }
  0x59   : > { %5355 = vmatpush1.bf16.msra.mxu0 %v5354_v17  ;;  %1729 = vmatmul.mubr.f32.vlgmr.msra.gmra.mrb[0].mxu1 %v274_v16  ;;  %v650_v16 = vld [vmem:[%s14340_s2 + $0xb40] sm:$0xff]  ;;  %v5630_v17 = vpack.c.bf16 %v636_v8, %v628_v6  ;;  %v715_v61 = vld [vmem:[%s14340_s2 + $0xd48] sm:$0xff]  ;;  %v717_v63 = vld [vmem:[%s14340_s2 + $0xd58] sm:$0xff] }
  0x5a   : > { %5611 = vmatpush1.bf16.msra.mxu1 %v5610_v18  ;;  %5357 = vmatprep.subr.bf16.mxu0 %v5356_v19  ;;  %v5376_v18 = vpack.c.bf16 %v651_v10, %v643_v9  ;;  %v644_v19 = vld [vmem:[%s14340_s2 + $0xb10] sm:$0xff]  ;;  %v5378_v28 = vpack.c.bf16 %v650_v16, %v642_v15  ;;  %v5648_v6 = vpack.c.bf16 %v717_v63, %v709_v62  ;;  %v723_v8 = vld [vmem:[%s14340_s2 + $0xd88] sm:$0xff]  ;;  %v725_v10 = vld [vmem:[%s14340_s2 + $0xd98] sm:$0xff] }
  0x5b   : > { %5613 = vmatprep.subr.bf16.mxu1 %v5612_v23  ;;  %1426 = vmatprep.mubr.f32.mxu0 %v283_v13  ;;  %v659_v23 = vld [vmem:[%s14340_s2 + $0xb88] sm:$0xff]  ;;  %v708_v5 = vld [vmem:[%s14340_s2 + $0xd10] sm:$0xff]  ;;  %v733_v11 = vld [vmem:[%s14340_s2 + $0xdd8] sm:$0xff] }
  0x5c   : > { %1734 = vmatprep.mubr.f32.mxu1 %v283_v13  ;;  %1427 = vmatmul.mubr.f32.gmra.mrb[2].mxu0 %v282_v21  ;;  %v731_v9 = vld [vmem:[%s14340_s2 + $0xdc8] sm:$0xff]  ;;  %v722_v15 = vld [vmem:[%s14340_s2 + $0xd80] sm:$0xff] }
  0x5d   : > { %5359 = vmatpush1.bf16.msra.mxu0 %v5358_v29  ;;  %1735 = vmatmul.mubr.f32.gmra.mrb[2].mxu1 %v282_v21  ;;  %v5634_v29 = vpack.c.bf16 %v652_v20, %v644_v19  ;;  %v730_v16 = vld [vmem:[%s14340_s2 + $0xdc0] sm:$0xff]  ;;  %v732_v19 = vld [vmem:[%s14340_s2 + $0xdd0] sm:$0xff]  ;;  %v739_v20 = vld [vmem:[%s14340_s2 + $0xe08] sm:$0xff] }
  0x5e   : > { %5615 = vmatpush1.bf16.msra.mxu1 %v5614_v30  ;;  %5361 = vmatprep.subr.bf16.mxu0 %v5360_v31  ;;  %v5380_v30 = vpack.c.bf16 %v667_v24, %v659_v23  ;;  %v658_v31 = vld [vmem:[%s14340_s2 + $0xb80] sm:$0xff]  ;;  %v747_v21 = vld [vmem:[%s14340_s2 + $0xe48] sm:$0xff]  ;;  %v749_v23 = vld [vmem:[%s14340_s2 + $0xe58] sm:$0xff]  ;;  %v5398_v24 = vpack.c.bf16 %v730_v16, %v722_v15 }
  0x5f   : > { %5617 = vmatprep.subr.bf16.mxu1 %v5616_v35  ;;  %1497 = vmatprep.mubr.f32.mxu0 %v277_v25  ;;  %v668_v35 = vld [vmem:[%s14340_s2 + $0xbd0] sm:$0xff]  ;;  %v5382_v40 = vpack.c.bf16 %v666_v32, %v658_v31  ;;  %v5400_v26 = vpack.c.bf16 %v747_v21, %v739_v20  ;;  %v738_v27 = vld [vmem:[%s14340_s2 + $0xe00] sm:$0xff]  ;;  %v755_v32 = vld [vmem:[%s14340_s2 + $0xe88] sm:$0xff] }
  0x60   : > { %1805 = vmatprep.mubr.f32.mxu1 %v277_v25  ;;  %v748_v31 = vld [vmem:[%s14340_s2 + $0xe50] sm:$0xff]  ;;  %v754_v39 = vld [vmem:[%s14340_s2 + $0xe80] sm:$0xff]  ;;  %v819_v16 = vld [vmem:[%s14340_s2 + $0x1088] sm:$0xff] }
  0x61   : > { %5363 = vmatpush1.bf16.msra.mxu0 %v5362_v41  ;;  %v5638_v41 = vpack.c.bf16 %v668_v35, %v660_v33  ;;  %v763_v33 = vld [vmem:[%s14340_s2 + $0xec8] sm:$0xff]  ;;  %v765_v35 = vld [vmem:[%s14340_s2 + $0xed8] sm:$0xff]  ;;  %v770_v51 = vld [vmem:[%s14340_s2 + $0xf00] sm:$0xff] }
  0x62   : > { %5619 = vmatpush1.bf16.msra.mxu1 %v5618_v42  ;;  %5365 = vmatprep.subr.bf16.mxu0 %v5364_v43  ;;  %v5384_v42 = vpack.c.bf16 %v683_v37, %v675_v36  ;;  %v674_v43 = vld [vmem:[%s14340_s2 + $0xc00] sm:$0xff]  ;;  %v5404_v38 = vpack.c.bf16 %v763_v33, %v755_v32  ;;  %v812_v15 = vld [vmem:[%s14340_s2 + $0x1050] sm:$0xff]  ;;  %v845_v32 = vld [vmem:[%s14340_s2 + $0x1158] sm:$0xff] }
  0x63   : > { %5621 = vmatprep.subr.bf16.mxu1 %v5620_v47  ;;  %v684_v47 = vld [vmem:[%s14340_s2 + $0xc50] sm:$0xff]  ;;  %v5386_v52 = vpack.c.bf16 %v682_v44, %v674_v43  ;;  %v771_v44 = vld [vmem:[%s14340_s2 + $0xf08] sm:$0xff]  ;;  %v786_v63 = vld [vmem:[%s14340_s2 + $0xf80] sm:$0xff] }
  0x64   : > { %v764_v43 = vld [vmem:[%s14340_s2 + $0xed0] sm:$0xff]  ;;  %v285_v33 = vld [vmem:[%s7653_s27 + $0x58] sm:$0xff] }
  0x65   : > { %5367 = vmatpush1.bf16.msra.mxu0 %v5366_v53  ;;  %v5642_v53 = vpack.c.bf16 %v684_v47, %v676_v45  ;;  %v779_v45 = vld [vmem:[%s14340_s2 + $0xf48] sm:$0xff]  ;;  %v781_v47 = vld [vmem:[%s14340_s2 + $0xf58] sm:$0xff]  ;;  %v276_v20 = vld [vmem:[%s7653_s27 + $0x10] sm:$0xff] }
  0x66   : > { %5623 = vmatpush1.bf16.msra.mxu1 %v5622_v54  ;;  %5369 = vmatprep.subr.bf16.mxu0 %v5368_v55  ;;  %v5388_v54 = vpack.c.bf16 %v699_v49, %v691_v48  ;;  %v690_v55 = vld [vmem:[%s14340_s2 + $0xc80] sm:$0xff]  ;;  %v5408_v50 = vpack.c.bf16 %v779_v45, %v771_v44  ;;  %v859_v44 = vld [vmem:[%s14340_s2 + $0x11c8] sm:$0xff]  ;;  %v853_v45 = vld [vmem:[%s14340_s2 + $0x1198] sm:$0xff] }
  0x67   : > { %5625 = vmatprep.subr.bf16.mxu1 %v5624_v59  ;;  %v700_v59 = vld [vmem:[%s14340_s2 + $0xcd0] sm:$0xff]  ;;  %v5390_v0 = vpack.c.bf16 %v698_v56, %v690_v55  ;;  %v787_v56 = vld [vmem:[%s14340_s2 + $0xf88] sm:$0xff] }
  0x68   : > { %v780_v55 = vld [vmem:[%s14340_s2 + $0xf50] sm:$0xff] }
  0x69   : > { %5371 = vmatpush1.bf16.msra.mxu0 %v5370_v1  ;;  %v5646_v1 = vpack.c.bf16 %v700_v59, %v692_v57  ;;  %v795_v57 = vld [vmem:[%s14340_s2 + $0xfc8] sm:$0xff]  ;;  %v797_v59 = vld [vmem:[%s14340_s2 + $0xfd8] sm:$0xff] }
  0x6a   : > { %5627 = vmatpush1.bf16.msra.mxu1 %v5626_v2  ;;  %5373 = vmatprep.subr.bf16.mxu0 %v5372_v3  ;;  %v5392_v2 = vpack.c.bf16 %v715_v61, %v707_v60  ;;  %v706_v3 = vld [vmem:[%s14340_s2 + $0xd00] sm:$0xff]  ;;  %v5412_v62 = vpack.c.bf16 %v795_v57, %v787_v56  ;;  %v867_v56 = vld [vmem:[%s14340_s2 + $0x1208] sm:$0xff] }
  0x6b   : > { %5629 = vmatprep.subr.bf16.mxu1 %v5628_v7  ;;  %v716_v7 = vld [vmem:[%s14340_s2 + $0xd50] sm:$0xff]  ;;  %v5394_v12 = vpack.c.bf16 %v714_v4, %v706_v3  ;;  %v803_v4 = vld [vmem:[%s14340_s2 + $0x1008] sm:$0xff] }
  0x6c   : > { %v5650_v13 = vpack.c.bf16 %v716_v7, %v708_v5  ;;  %v796_v3 = vld [vmem:[%s14340_s2 + $0xfd0] sm:$0xff]  ;;  %v811_v5 = vld [vmem:[%s14340_s2 + $0x1048] sm:$0xff]  ;;  %v813_v7 = vld [vmem:[%s14340_s2 + $0x1058] sm:$0xff] }
  0x6d   : > { %5375 = vmatpush1.bf16.msra.mxu0 %v5374_v14  ;;  %v5396_v14 = vpack.c.bf16 %v731_v9, %v723_v8  ;;  %v875_v57 = vld [vmem:[%s14340_s2 + $0x1248] sm:$0xff] }
  0x6e   : > { %5631 = vmatpush1.bf16.msra.mxu1 %v5630_v17  ;;  %5377 = vmatprep.subr.bf16.mxu0 %v5376_v18  ;;  %v724_v17 = vld [vmem:[%s14340_s2 + $0xd90] sm:$0xff]  ;;  %v5652_v18 = vpack.c.bf16 %v733_v11, %v725_v10  ;;  %v5416_v10 = vpack.c.bf16 %v811_v5, %v803_v4  ;;  %v802_v11 = vld [vmem:[%s14340_s2 + $0x1000] sm:$0xff]  ;;  %v883_v4 = vld [vmem:[%s14340_s2 + $0x1288] sm:$0xff] }
  0x6f   : > { %5633 = vmatprep.subr.bf16.mxu1 %v5632_v22  ;;  %v741_v22 = vld [vmem:[%s14340_s2 + $0xe18] sm:$0xff]  ;;  %v5654_v25 = vpack.c.bf16 %v732_v19, %v724_v17  ;;  %v827_v17 = vld [vmem:[%s14340_s2 + $0x10c8] sm:$0xff] }
  0x70   : > { %v829_v19 = vld [vmem:[%s14340_s2 + $0x10d8] sm:$0xff]  ;;  %v891_v5 = vld [vmem:[%s14340_s2 + $0x12c8] sm:$0xff] }
  0x71   : > { %5379 = vmatpush1.bf16.msra.mxu0 %v5378_v28  ;;  %v746_v28 = vld [vmem:[%s14340_s2 + $0xe40] sm:$0xff] }
  0x72   : > { %5635 = vmatpush1.bf16.msra.mxu1 %v5634_v29  ;;  %5381 = vmatprep.subr.bf16.mxu0 %v5380_v30  ;;  %v740_v29 = vld [vmem:[%s14340_s2 + $0xe10] sm:$0xff]  ;;  %v5656_v30 = vpack.c.bf16 %v749_v23, %v741_v22  ;;  %v5402_v36 = vpack.c.bf16 %v746_v28, %v738_v27  ;;  %v5420_v23 = vpack.c.bf16 %v827_v17, %v819_v16  ;;  %v899_v16 = vld [vmem:[%s14340_s2 + $0x1308] sm:$0xff] }
  0x73   : > { %5637 = vmatprep.subr.bf16.mxu1 %v5636_v34  ;;  %v757_v34 = vld [vmem:[%s14340_s2 + $0xe98] sm:$0xff]  ;;  %v5658_v37 = vpack.c.bf16 %v748_v31, %v740_v29  ;;  %v828_v28 = vld [vmem:[%s14340_s2 + $0x10d0] sm:$0xff]  ;;  %v835_v29 = vld [vmem:[%s14340_s2 + $0x1108] sm:$0xff] }
  0x74   : > { %v837_v31 = vld [vmem:[%s14340_s2 + $0x1118] sm:$0xff]  ;;  %v907_v17 = vld [vmem:[%s14340_s2 + $0x1348] sm:$0xff] }
  0x75   : > { %5383 = vmatpush1.bf16.msra.mxu0 %v5382_v40  ;;  %v762_v40 = vld [vmem:[%s14340_s2 + $0xec0] sm:$0xff] }
  0x76   : > { %5639 = vmatpush1.bf16.msra.mxu1 %v5638_v41  ;;  %5385 = vmatprep.subr.bf16.mxu0 %v5384_v42  ;;  %v756_v41 = vld [vmem:[%s14340_s2 + $0xe90] sm:$0xff]  ;;  %v5660_v42 = vpack.c.bf16 %v765_v35, %v757_v34  ;;  %v5406_v48 = vpack.c.bf16 %v762_v40, %v754_v39  ;;  %v842_v39 = vld [vmem:[%s14340_s2 + $0x1140] sm:$0xff] }
  0x77   : > { %5641 = vmatprep.subr.bf16.mxu1 %v5640_v46  ;;  %v773_v46 = vld [vmem:[%s14340_s2 + $0xf18] sm:$0xff]  ;;  %v5662_v49 = vpack.c.bf16 %v764_v43, %v756_v41  ;;  %v284_v35 = vld [vmem:[%s7653_s27 + $0x50] sm:$0xff]  ;;  %v5680_v41 = vpack.c.bf16 %v845_v32, %v837_v31  ;;  %v851_v43 = vld [vmem:[%s14340_s2 + $0x1188] sm:$0xff] }
  0x78   : > { %v836_v40 = vld [vmem:[%s14340_s2 + $0x1110] sm:$0xff]  ;;  %v925_v31 = vld [vmem:[%s14340_s2 + $0x13d8] sm:$0xff] }
  0x79   : > { %5387 = vmatpush1.bf16.msra.mxu0 %v5386_v52  ;;  %v778_v52 = vld [vmem:[%s14340_s2 + $0xf40] sm:$0xff] }
  0x7a   : > { %5643 = vmatpush1.bf16.msra.mxu1 %v5642_v53  ;;  %5389 = vmatprep.subr.bf16.mxu0 %v5388_v54  ;;  %v772_v53 = vld [vmem:[%s14340_s2 + $0xf10] sm:$0xff]  ;;  %v5664_v54 = vpack.c.bf16 %v781_v47, %v773_v46  ;;  %v5410_v60 = vpack.c.bf16 %v778_v52, %v770_v51  ;;  %v861_v46 = vld [vmem:[%s14340_s2 + $0x11d8] sm:$0xff]  ;;  %v279_v47 = vld [vmem:[%s7653_s27 + $0x28] sm:$0xff] }
  0x7b   : > { %5645 = vmatprep.subr.bf16.mxu1 %v5644_v58  ;;  %v789_v58 = vld [vmem:[%s14340_s2 + $0xf98] sm:$0xff]  ;;  %v5666_v61 = vpack.c.bf16 %v780_v55, %v772_v53  ;;  %v850_v51 = vld [vmem:[%s14340_s2 + $0x1180] sm:$0xff]  ;;  %v852_v53 = vld [vmem:[%s14340_s2 + $0x1190] sm:$0xff] }
  0x7c   : > { %v858_v52 = vld [vmem:[%s14340_s2 + $0x11c0] sm:$0xff]  ;;  %v860_v55 = vld [vmem:[%s14340_s2 + $0x11d0] sm:$0xff] }
  0x7d   : > { %5391 = vmatpush1.bf16.msra.mxu0 %v5390_v0  ;;  %v794_v0 = vld [vmem:[%s14340_s2 + $0xfc0] sm:$0xff] }
  0x7e   : > { %5647 = vmatpush1.bf16.msra.mxu1 %v5646_v1  ;;  %5393 = vmatprep.subr.bf16.mxu0 %v5392_v2  ;;  %v788_v1 = vld [vmem:[%s14340_s2 + $0xf90] sm:$0xff]  ;;  %v5668_v2 = vpack.c.bf16 %v797_v59, %v789_v58  ;;  %v5414_v8 = vpack.c.bf16 %v794_v0, %v786_v63  ;;  %v869_v58 = vld [vmem:[%s14340_s2 + $0x1218] sm:$0xff]  ;;  %v866_v63 = vld [vmem:[%s14340_s2 + $0x1200] sm:$0xff] }
  0x7f   : > { %5649 = vmatprep.subr.bf16.mxu1 %v5648_v6  ;;  %v805_v6 = vld [vmem:[%s14340_s2 + $0x1018] sm:$0xff]  ;;  %v5670_v9 = vpack.c.bf16 %v796_v3, %v788_v1  ;;  %v874_v0 = vld [vmem:[%s14340_s2 + $0x1240] sm:$0xff]  ;;  %v868_v1 = vld [vmem:[%s14340_s2 + $0x1210] sm:$0xff] }
  0x80   : > { %v877_v59 = vld [vmem:[%s14340_s2 + $0x1258] sm:$0xff]  ;;  %v876_v3 = vld [vmem:[%s14340_s2 + $0x1250] sm:$0xff] }
  0x81   : > { %5395 = vmatpush1.bf16.msra.mxu0 %v5394_v12  ;;  %v810_v12 = vld [vmem:[%s14340_s2 + $0x1040] sm:$0xff] }
  0x82   : > { %5651 = vmatpush1.bf16.msra.mxu1 %v5650_v13  ;;  %5397 = vmatprep.subr.bf16.mxu0 %v5396_v14  ;;  %v804_v13 = vld [vmem:[%s14340_s2 + $0x1010] sm:$0xff]  ;;  %v5672_v14 = vpack.c.bf16 %v813_v7, %v805_v6  ;;  %v5418_v21 = vpack.c.bf16 %v810_v12, %v802_v11  ;;  %v885_v6 = vld [vmem:[%s14340_s2 + $0x1298] sm:$0xff]  ;;  %v882_v11 = vld [vmem:[%s14340_s2 + $0x1280] sm:$0xff] }
  0x83   : > { %5653 = vmatprep.subr.bf16.mxu1 %v5652_v18  ;;  %v821_v18 = vld [vmem:[%s14340_s2 + $0x1098] sm:$0xff]  ;;  %v5674_v22 = vpack.c.bf16 %v812_v15, %v804_v13  ;;  %v890_v12 = vld [vmem:[%s14340_s2 + $0x12c0] sm:$0xff]  ;;  %v884_v13 = vld [vmem:[%s14340_s2 + $0x1290] sm:$0xff] }
  0x84   : > { %v5676_v27 = vpack.c.bf16 %v829_v19, %v821_v18  ;;  %v893_v7 = vld [vmem:[%s14340_s2 + $0x12d8] sm:$0xff]  ;;  %v892_v15 = vld [vmem:[%s14340_s2 + $0x12d0] sm:$0xff] }
  0x85   : > { %5399 = vmatpush1.bf16.msra.mxu0 %v5398_v24  ;;  %v818_v24 = vld [vmem:[%s14340_s2 + $0x1080] sm:$0xff]  ;;  %v901_v18 = vld [vmem:[%s14340_s2 + $0x1318] sm:$0xff] }
  0x86   : > { %5655 = vmatpush1.bf16.msra.mxu1 %v5654_v25  ;;  %5401 = vmatprep.subr.bf16.mxu0 %v5400_v26  ;;  %v826_v25 = vld [vmem:[%s14340_s2 + $0x10c0] sm:$0xff]  ;;  %v820_v26 = vld [vmem:[%s14340_s2 + $0x1090] sm:$0xff]  ;;  %v909_v19 = vld [vmem:[%s14340_s2 + $0x1358] sm:$0xff] }
  0x87   : > { %5657 = vmatprep.subr.bf16.mxu1 %v5656_v30  ;;  %v843_v30 = vld [vmem:[%s14340_s2 + $0x1148] sm:$0xff]  ;;  %v5422_v34 = vpack.c.bf16 %v826_v25, %v818_v24  ;;  %v906_v24 = vld [vmem:[%s14340_s2 + $0x1340] sm:$0xff]  ;;  %v900_v25 = vld [vmem:[%s14340_s2 + $0x1310] sm:$0xff] }
  0x89   : > { %5403 = vmatpush1.bf16.msra.mxu0 %v5402_v36  ;;  %v5678_v36 = vpack.c.bf16 %v828_v28, %v820_v26  ;;  %v5696_v26 = vpack.c.bf16 %v909_v19, %v901_v18  ;;  %v915_v28 = vld [vmem:[%s14340_s2 + $0x1388] sm:$0xff]  ;;  %v978_v19 = vld [vmem:[%s14340_s2 + $0x1580] sm:$0xff] }
  0x8a   : > { %5659 = vmatpush1.bf16.msra.mxu1 %v5658_v37  ;;  %5405 = vmatprep.subr.bf16.mxu0 %v5404_v38  ;;  %v5424_v37 = vpack.c.bf16 %v843_v30, %v835_v29  ;;  %v834_v38 = vld [vmem:[%s14340_s2 + $0x1100] sm:$0xff]  ;;  %v923_v29 = vld [vmem:[%s14340_s2 + $0x13c8] sm:$0xff]  ;;  %v917_v30 = vld [vmem:[%s14340_s2 + $0x1398] sm:$0xff] }
  0x8b   : > { %5661 = vmatprep.subr.bf16.mxu1 %v5660_v42  ;;  %v844_v42 = vld [vmem:[%s14340_s2 + $0x1150] sm:$0xff] }
  0x8d   : > { %5407 = vmatpush1.bf16.msra.mxu0 %v5406_v48  ;;  %v5426_v48 = vpack.c.bf16 %v842_v39, %v834_v38  ;;  %v5700_v38 = vpack.c.bf16 %v925_v31, %v917_v30  ;;  %v924_v39 = vld [vmem:[%s14340_s2 + $0x13d0] sm:$0xff]  ;;  %v994_v31 = vld [vmem:[%s14340_s2 + $0x1600] sm:$0xff] }
  0x8e   : > { %5663 = vmatpush1.bf16.msra.mxu1 %v5662_v49  ;;  %5409 = vmatprep.subr.bf16.mxu0 %v5408_v50  ;;  %v5682_v49 = vpack.c.bf16 %v844_v42, %v836_v40  ;;  %v5428_v50 = vpack.c.bf16 %v859_v44, %v851_v43  ;;  %v931_v40 = vld [vmem:[%s14340_s2 + $0x1408] sm:$0xff]  ;;  %v933_v42 = vld [vmem:[%s14340_s2 + $0x1418] sm:$0xff] }
  0x8f   : > { %5665 = vmatprep.subr.bf16.mxu1 %v5664_v54  ;;  %v5684_v54 = vpack.c.bf16 %v861_v46, %v853_v45  ;;  %v941_v43 = vld [vmem:[%s14340_s2 + $0x1458] sm:$0xff] }
  0x91   : > { %5411 = vmatpush1.bf16.msra.mxu0 %v5410_v60  ;;  %v5430_v60 = vpack.c.bf16 %v858_v52, %v850_v51  ;;  %v940_v51 = vld [vmem:[%s14340_s2 + $0x1450] sm:$0xff]  ;;  %v947_v52 = vld [vmem:[%s14340_s2 + $0x1488] sm:$0xff] }
  0x92   : > { %5667 = vmatpush1.bf16.msra.mxu1 %v5666_v61  ;;  %5413 = vmatprep.subr.bf16.mxu0 %v5412_v62  ;;  %v5686_v61 = vpack.c.bf16 %v860_v55, %v852_v53  ;;  %v5432_v62 = vpack.c.bf16 %v875_v57, %v867_v56  ;;  %v955_v53 = vld [vmem:[%s14340_s2 + $0x14c8] sm:$0xff]  ;;  %v957_v55 = vld [vmem:[%s14340_s2 + $0x14d8] sm:$0xff] }
  0x93   : > { %5669 = vmatprep.subr.bf16.mxu1 %v5668_v2  ;;  %v5688_v2 = vpack.c.bf16 %v877_v59, %v869_v58  ;;  %v5452_v58 = vpack.c.bf16 %v955_v53, %v947_v52  ;;  %v946_v59 = vld [vmem:[%s14340_s2 + $0x1480] sm:$0xff] }
  0x95   : > { %5415 = vmatpush1.bf16.msra.mxu0 %v5414_v8  ;;  %v5434_v8 = vpack.c.bf16 %v874_v0, %v866_v63  ;;  %v956_v63 = vld [vmem:[%s14340_s2 + $0x14d0] sm:$0xff]  ;;  %v963_v0 = vld [vmem:[%s14340_s2 + $0x1508] sm:$0xff] }
  0x96   : > { %5671 = vmatpush1.bf16.msra.mxu1 %v5670_v9  ;;  %5417 = vmatprep.subr.bf16.mxu0 %v5416_v10  ;;  %v5690_v9 = vpack.c.bf16 %v876_v3, %v868_v1  ;;  %v5436_v10 = vpack.c.bf16 %v891_v5, %v883_v4  ;;  %v971_v1 = vld [vmem:[%s14340_s2 + $0x1548] sm:$0xff]  ;;  %v973_v3 = vld [vmem:[%s14340_s2 + $0x1558] sm:$0xff] }
  0x97   : > { %5673 = vmatprep.subr.bf16.mxu1 %v5672_v14  ;;  %v5692_v14 = vpack.c.bf16 %v893_v7, %v885_v6  ;;  %v5456_v6 = vpack.c.bf16 %v971_v1, %v963_v0  ;;  %v962_v7 = vld [vmem:[%s14340_s2 + $0x1500] sm:$0xff] }
  0x98   : > { %1498 = vmatmul.mubr.f32.vlgmr.msra.gmra.mrb[0].mxu0 %v276_v20 }
  0x99   : > { %5419 = vmatpush1.bf16.msra.mxu0 %v5418_v21  ;;  %1806 = vmatmul.mubr.f32.vlgmr.msra.gmra.mrb[0].mxu1 %v276_v20  ;;  %v5438_v20 = vpack.c.bf16 %v890_v12, %v882_v11  ;;  %v5694_v21 = vpack.c.bf16 %v892_v15, %v884_v13  ;;  %v972_v11 = vld [vmem:[%s14340_s2 + $0x1550] sm:$0xff]  ;;  %v979_v12 = vld [vmem:[%s14340_s2 + $0x1588] sm:$0xff]  ;;  %v989_v15 = vld [vmem:[%s14340_s2 + $0x15d8] sm:$0xff] }
  0x9a   : > { %5675 = vmatpush1.bf16.msra.mxu1 %v5674_v22  ;;  %5421 = vmatprep.subr.bf16.mxu0 %v5420_v23  ;;  %v5440_v22 = vpack.c.bf16 %v907_v17, %v899_v16  ;;  %v898_v23 = vld [vmem:[%s14340_s2 + $0x1300] sm:$0xff]  ;;  %v987_v13 = vld [vmem:[%s14340_s2 + $0x15c8] sm:$0xff] }
  0x9b   : > { %5677 = vmatprep.subr.bf16.mxu1 %v5676_v27  ;;  %1503 = vmatprep.mubr.f32.mxu0 %v285_v33  ;;  %v908_v27 = vld [vmem:[%s14340_s2 + $0x1350] sm:$0xff]  ;;  %v5442_v32 = vpack.c.bf16 %v906_v24, %v898_v23  ;;  %v5460_v18 = vpack.c.bf16 %v987_v13, %v979_v12  ;;  %v995_v24 = vld [vmem:[%s14340_s2 + $0x1608] sm:$0xff] }
  0x9c   : > { %1811 = vmatprep.mubr.f32.mxu1 %v285_v33  ;;  %1504 = vmatmul.mubr.f32.gmra.mrb[2].mxu0 %v284_v35  ;;  %v5698_v33 = vpack.c.bf16 %v908_v27, %v900_v25  ;;  %v988_v23 = vld [vmem:[%s14340_s2 + $0x15d0] sm:$0xff]  ;;  %v1003_v25 = vld [vmem:[%s14340_s2 + $0x1648] sm:$0xff]  ;;  %v1005_v27 = vld [vmem:[%s14340_s2 + $0x1658] sm:$0xff] }
  0x9d   : > { %5423 = vmatpush1.bf16.msra.mxu0 %v5422_v34  ;;  %1812 = vmatmul.mubr.f32.gmra.mrb[2].mxu1 %v284_v35  ;;  %v5444_v34 = vpack.c.bf16 %v923_v29, %v915_v28  ;;  %v914_v35 = vld [vmem:[%s14340_s2 + $0x1380] sm:$0xff]  ;;  %v5464_v30 = vpack.c.bf16 %v1003_v25, %v995_v24 }
  0x9e   : > { %5679 = vmatpush1.bf16.msra.mxu1 %v5678_v36  ;;  %5425 = vmatprep.subr.bf16.mxu0 %v5424_v37  ;;  %v922_v36 = vld [vmem:[%s14340_s2 + $0x13c0] sm:$0xff]  ;;  %v916_v37 = vld [vmem:[%s14340_s2 + $0x1390] sm:$0xff] }
  0x9f   : > { %5681 = vmatprep.subr.bf16.mxu1 %v5680_v41  ;;  %1574 = vmatprep.mubr.f32.mxu0 %v279_v47  ;;  %v939_v41 = vld [vmem:[%s14340_s2 + $0x1448] sm:$0xff]  ;;  %v5446_v44 = vpack.c.bf16 %v922_v36, %v914_v35  ;;  %v5702_v45 = vpack.c.bf16 %v924_v39, %v916_v37  ;;  %v1004_v35 = vld [vmem:[%s14340_s2 + $0x1650] sm:$0xff]  ;;  %v1021_v39 = vld [vmem:[%s14340_s2 + $0x16d8] sm:$0xff] }
  0xa0   : > { %1882 = vmatprep.mubr.f32.mxu1 %v279_v47  ;;  %v5448_v46 = vpack.c.bf16 %v939_v41, %v931_v40  ;;  %v930_v47 = vld [vmem:[%s14340_s2 + $0x1400] sm:$0xff]  ;;  %v1011_v36 = vld [vmem:[%s14340_s2 + $0x1688] sm:$0xff] }
  0xa1   : > { %5427 = vmatpush1.bf16.msra.mxu0 %v5426_v48  ;;  %v938_v48 = vld [vmem:[%s14340_s2 + $0x1440] sm:$0xff]  ;;  %v1019_v37 = vld [vmem:[%s14340_s2 + $0x16c8] sm:$0xff] }
  0xa2   : > { %5683 = vmatpush1.bf16.msra.mxu1 %v5682_v49  ;;  %5429 = vmatprep.subr.bf16.mxu0 %v5428_v50  ;;  %v932_v49 = vld [vmem:[%s14340_s2 + $0x1410] sm:$0xff]  ;;  %v5704_v50 = vpack.c.bf16 %v941_v43, %v933_v42  ;;  %v5450_v56 = vpack.c.bf16 %v938_v48, %v930_v47  ;;  %v5468_v42 = vpack.c.bf16 %v1019_v37, %v1011_v36  ;;  %v1010_v43 = vld [vmem:[%s14340_s2 + $0x1680] sm:$0xff]  ;;  %v1027_v48 = vld [vmem:[%s14340_s2 + $0x1708] sm:$0xff] }
  0xa3   : > { %5685 = vmatprep.subr.bf16.mxu1 %v5684_v54  ;;  %v949_v54 = vld [vmem:[%s14340_s2 + $0x1498] sm:$0xff]  ;;  %v5706_v57 = vpack.c.bf16 %v940_v51, %v932_v49  ;;  %v1020_v47 = vld [vmem:[%s14340_s2 + $0x16d0] sm:$0xff]  ;;  %v1035_v49 = vld [vmem:[%s14340_s2 + $0x1748] sm:$0xff] }
  0xa4   : > { %v1037_v51 = vld [vmem:[%s14340_s2 + $0x1758] sm:$0xff]  ;;  %v278_v24 = vld [vmem:[%s7653_s27 + $0x20] sm:$0xff]  ;;  %v287_v37 = vld [vmem:[%s7653_s27 + $0x68] sm:$0xff] }
  0xa5   : > { %5431 = vmatpush1.bf16.msra.mxu0 %v5430_v60  ;;  %v954_v60 = vld [vmem:[%s14340_s2 + $0x14c0] sm:$0xff]  ;;  %v1101_v36 = vld [vmem:[%s14340_s2 + $0x1958] sm:$0xff] }
  0xa6   : > { %5687 = vmatpush1.bf16.msra.mxu1 %v5686_v61  ;;  %5433 = vmatprep.subr.bf16.mxu0 %v5432_v62  ;;  %v948_v61 = vld [vmem:[%s14340_s2 + $0x1490] sm:$0xff]  ;;  %v5708_v62 = vpack.c.bf16 %v957_v55, %v949_v54  ;;  %v5454_v4 = vpack.c.bf16 %v954_v60, %v946_v59  ;;  %v5472_v54 = vpack.c.bf16 %v1035_v49, %v1027_v48  ;;  %v1026_v55 = vld [vmem:[%s14340_s2 + $0x1700] sm:$0xff]  ;;  %v1043_v60 = vld [vmem:[%s14340_s2 + $0x1788] sm:$0xff] }
  0xa7   : > { %5689 = vmatprep.subr.bf16.mxu1 %v5688_v2  ;;  %v965_v2 = vld [vmem:[%s14340_s2 + $0x1518] sm:$0xff]  ;;  %v5710_v5 = vpack.c.bf16 %v956_v63, %v948_v61  ;;  %v1036_v59 = vld [vmem:[%s14340_s2 + $0x1750] sm:$0xff]  ;;  %v1051_v61 = vld [vmem:[%s14340_s2 + $0x17c8] sm:$0xff] }
  0xa8   : > { %v1053_v63 = vld [vmem:[%s14340_s2 + $0x17d8] sm:$0xff]  ;;  %v1115_v48 = vld [vmem:[%s14340_s2 + $0x19c8] sm:$0xff] }
  0xa9   : > { %5435 = vmatpush1.bf16.msra.mxu0 %v5434_v8  ;;  %v970_v8 = vld [vmem:[%s14340_s2 + $0x1540] sm:$0xff]  ;;  %v1109_v49 = vld [vmem:[%s14340_s2 + $0x1998] sm:$0xff] }
  0xaa   : > { %5691 = vmatpush1.bf16.msra.mxu1 %v5690_v9  ;;  %5437 = vmatprep.subr.bf16.mxu0 %v5436_v10  ;;  %v964_v9 = vld [vmem:[%s14340_s2 + $0x1510] sm:$0xff]  ;;  %v5712_v10 = vpack.c.bf16 %v973_v3, %v965_v2  ;;  %v5458_v16 = vpack.c.bf16 %v970_v8, %v962_v7  ;;  %v5476_v2 = vpack.c.bf16 %v1051_v61, %v1043_v60  ;;  %v1042_v3 = vld [vmem:[%s14340_s2 + $0x1780] sm:$0xff]  ;;  %v1059_v8 = vld [vmem:[%s14340_s2 + $0x1808] sm:$0xff] }
  0xab   : > { %5693 = vmatprep.subr.bf16.mxu1 %v5692_v14  ;;  %v981_v14 = vld [vmem:[%s14340_s2 + $0x1598] sm:$0xff]  ;;  %v5714_v17 = vpack.c.bf16 %v972_v11, %v964_v9  ;;  %v1052_v7 = vld [vmem:[%s14340_s2 + $0x17d0] sm:$0xff]  ;;  %v1067_v9 = vld [vmem:[%s14340_s2 + $0x1848] sm:$0xff] }
  0xac   : > { %v1069_v11 = vld [vmem:[%s14340_s2 + $0x1858] sm:$0xff]  ;;  %v1123_v60 = vld [vmem:[%s14340_s2 + $0x1a08] sm:$0xff] }
  0xad   : > { %5439 = vmatpush1.bf16.msra.mxu0 %v5438_v20  ;;  %v986_v20 = vld [vmem:[%s14340_s2 + $0x15c0] sm:$0xff]  ;;  %v1131_v61 = vld [vmem:[%s14340_s2 + $0x1a48] sm:$0xff] }
  0xae   : > { %5695 = vmatpush1.bf16.msra.mxu1 %v5694_v21  ;;  %5441 = vmatprep.subr.bf16.mxu0 %v5440_v22  ;;  %v980_v21 = vld [vmem:[%s14340_s2 + $0x1590] sm:$0xff]  ;;  %v5716_v22 = vpack.c.bf16 %v989_v15, %v981_v14  ;;  %v5462_v28 = vpack.c.bf16 %v986_v20, %v978_v19  ;;  %v5480_v14 = vpack.c.bf16 %v1067_v9, %v1059_v8  ;;  %v1058_v15 = vld [vmem:[%s14340_s2 + $0x1800] sm:$0xff]  ;;  %v1075_v20 = vld [vmem:[%s14340_s2 + $0x1888] sm:$0xff] }
  0xaf   : > { %5697 = vmatprep.subr.bf16.mxu1 %v5696_v26  ;;  %v997_v26 = vld [vmem:[%s14340_s2 + $0x1618] sm:$0xff]  ;;  %v5718_v29 = vpack.c.bf16 %v988_v23, %v980_v21  ;;  %v1068_v19 = vld [vmem:[%s14340_s2 + $0x1850] sm:$0xff]  ;;  %v1083_v21 = vld [vmem:[%s14340_s2 + $0x18c8] sm:$0xff] }
  0xb0   : > { %v1085_v23 = vld [vmem:[%s14340_s2 + $0x18d8] sm:$0xff]  ;;  %v1139_v8 = vld [vmem:[%s14340_s2 + $0x1a88] sm:$0xff] }
  0xb1   : > { %5443 = vmatpush1.bf16.msra.mxu0 %v5442_v32  ;;  %v1002_v32 = vld [vmem:[%s14340_s2 + $0x1640] sm:$0xff]  ;;  %v1147_v9 = vld [vmem:[%s14340_s2 + $0x1ac8] sm:$0xff] }
  0xb2   : > { %5699 = vmatpush1.bf16.msra.mxu1 %v5698_v33  ;;  %5445 = vmatprep.subr.bf16.mxu0 %v5444_v34  ;;  %v996_v33 = vld [vmem:[%s14340_s2 + $0x1610] sm:$0xff]  ;;  %v5720_v34 = vpack.c.bf16 %v1005_v27, %v997_v26  ;;  %v5466_v40 = vpack.c.bf16 %v1002_v32, %v994_v31  ;;  %v5484_v27 = vpack.c.bf16 %v1083_v21, %v1075_v20  ;;  %v1155_v20 = vld [vmem:[%s14340_s2 + $0x1b08] sm:$0xff] }
  0xb3   : > { %5701 = vmatprep.subr.bf16.mxu1 %v5700_v38  ;;  %v1013_v38 = vld [vmem:[%s14340_s2 + $0x1698] sm:$0xff]  ;;  %v5722_v41 = vpack.c.bf16 %v1004_v35, %v996_v33  ;;  %v1084_v32 = vld [vmem:[%s14340_s2 + $0x18d0] sm:$0xff]  ;;  %v1091_v33 = vld [vmem:[%s14340_s2 + $0x1908] sm:$0xff] }
  0xb4   : > { %v1093_v35 = vld [vmem:[%s14340_s2 + $0x1918] sm:$0xff]  ;;  %v1163_v21 = vld [vmem:[%s14340_s2 + $0x1b48] sm:$0xff] }
  0xb5   : > { %5447 = vmatpush1.bf16.msra.mxu0 %v5446_v44  ;;  %v1018_v44 = vld [vmem:[%s14340_s2 + $0x16c0] sm:$0xff] }
  0xb6   : > { %5703 = vmatpush1.bf16.msra.mxu1 %v5702_v45  ;;  %5449 = vmatprep.subr.bf16.mxu0 %v5448_v46  ;;  %v1012_v45 = vld [vmem:[%s14340_s2 + $0x1690] sm:$0xff]  ;;  %v5724_v46 = vpack.c.bf16 %v1021_v39, %v1013_v38  ;;  %v5470_v52 = vpack.c.bf16 %v1018_v44, %v1010_v43  ;;  %v286_v39 = vld [vmem:[%s7653_s27 + $0x60] sm:$0xff] }
  0xb7   : > { %5705 = vmatprep.subr.bf16.mxu1 %v5704_v50  ;;  %v1029_v50 = vld [vmem:[%s14340_s2 + $0x1718] sm:$0xff]  ;;  %v5726_v53 = vpack.c.bf16 %v1020_v47, %v1012_v45  ;;  %v1098_v43 = vld [vmem:[%s14340_s2 + $0x1940] sm:$0xff]  ;;  %v1092_v44 = vld [vmem:[%s14340_s2 + $0x1910] sm:$0xff]  ;;  %v5744_v45 = vpack.c.bf16 %v1101_v36, %v1093_v35 }
  0xb8   : > { %v1107_v47 = vld [vmem:[%s14340_s2 + $0x1988] sm:$0xff]  ;;  %v1181_v35 = vld [vmem:[%s14340_s2 + $0x1bd8] sm:$0xff] }
  0xb9   : > { %5451 = vmatpush1.bf16.msra.mxu0 %v5450_v56  ;;  %v1034_v56 = vld [vmem:[%s14340_s2 + $0x1740] sm:$0xff] }
  0xba   : > { %5707 = vmatpush1.bf16.msra.mxu1 %v5706_v57  ;;  %5453 = vmatprep.subr.bf16.mxu0 %v5452_v58  ;;  %v1028_v57 = vld [vmem:[%s14340_s2 + $0x1710] sm:$0xff]  ;;  %v5728_v58 = vpack.c.bf16 %v1037_v51, %v1029_v50  ;;  %v5474_v0 = vpack.c.bf16 %v1034_v56, %v1026_v55  ;;  %v1117_v50 = vld [vmem:[%s14340_s2 + $0x19d8] sm:$0xff]  ;;  %v1106_v55 = vld [vmem:[%s14340_s2 + $0x1980] sm:$0xff] }
  0xbb   : > { %5709 = vmatprep.subr.bf16.mxu1 %v5708_v62  ;;  %v1045_v62 = vld [vmem:[%s14340_s2 + $0x1798] sm:$0xff]  ;;  %v5730_v1 = vpack.c.bf16 %v1036_v59, %v1028_v57  ;;  %v1114_v56 = vld [vmem:[%s14340_s2 + $0x19c0] sm:$0xff]  ;;  %v1108_v57 = vld [vmem:[%s14340_s2 + $0x1990] sm:$0xff] }
  0xbc   : > { %v281_v51 = vld [vmem:[%s7653_s27 + $0x38] sm:$0xff]  ;;  %v1116_v59 = vld [vmem:[%s14340_s2 + $0x19d0] sm:$0xff] }
  0xbd   : > { %5455 = vmatpush1.bf16.msra.mxu0 %v5454_v4  ;;  %v1050_v4 = vld [vmem:[%s14340_s2 + $0x17c0] sm:$0xff] }
  0xbe   : > { %5711 = vmatpush1.bf16.msra.mxu1 %v5710_v5  ;;  %5457 = vmatprep.subr.bf16.mxu0 %v5456_v6  ;;  %v1044_v5 = vld [vmem:[%s14340_s2 + $0x1790] sm:$0xff]  ;;  %v5732_v6 = vpack.c.bf16 %v1053_v63, %v1045_v62  ;;  %v5478_v12 = vpack.c.bf16 %v1050_v4, %v1042_v3  ;;  %v1125_v62 = vld [vmem:[%s14340_s2 + $0x1a18] sm:$0xff]  ;;  %v1122_v3 = vld [vmem:[%s14340_s2 + $0x1a00] sm:$0xff] }
  0xbf   : > { %5713 = vmatprep.subr.bf16.mxu1 %v5712_v10  ;;  %v1061_v10 = vld [vmem:[%s14340_s2 + $0x1818] sm:$0xff]  ;;  %v5734_v13 = vpack.c.bf16 %v1052_v7, %v1044_v5  ;;  %v1130_v4 = vld [vmem:[%s14340_s2 + $0x1a40] sm:$0xff]  ;;  %v1124_v5 = vld [vmem:[%s14340_s2 + $0x1a10] sm:$0xff] }
  0xc0   : > { %v1133_v63 = vld [vmem:[%s14340_s2 + $0x1a58] sm:$0xff]  ;;  %v1132_v7 = vld [vmem:[%s14340_s2 + $0x1a50] sm:$0xff] }
  0xc1   : > { %5459 = vmatpush1.bf16.msra.mxu0 %v5458_v16  ;;  %v1066_v16 = vld [vmem:[%s14340_s2 + $0x1840] sm:$0xff] }
  0xc2   : > { %5715 = vmatpush1.bf16.msra.mxu1 %v5714_v17  ;;  %5461 = vmatprep.subr.bf16.mxu0 %v5460_v18  ;;  %v1060_v17 = vld [vmem:[%s14340_s2 + $0x1810] sm:$0xff]  ;;  %v5736_v18 = vpack.c.bf16 %v1069_v11, %v1061_v10  ;;  %v5482_v25 = vpack.c.bf16 %v1066_v16, %v1058_v15  ;;  %v1141_v10 = vld [vmem:[%s14340_s2 + $0x1a98] sm:$0xff]  ;;  %v1138_v15 = vld [vmem:[%s14340_s2 + $0x1a80] sm:$0xff] }
  0xc3   : > { %5717 = vmatprep.subr.bf16.mxu1 %v5716_v22  ;;  %v1077_v22 = vld [vmem:[%s14340_s2 + $0x1898] sm:$0xff]  ;;  %v5738_v26 = vpack.c.bf16 %v1068_v19, %v1060_v17  ;;  %v1146_v16 = vld [vmem:[%s14340_s2 + $0x1ac0] sm:$0xff]  ;;  %v1140_v17 = vld [vmem:[%s14340_s2 + $0x1a90] sm:$0xff] }
  0xc4   : > { %v5740_v31 = vpack.c.bf16 %v1085_v23, %v1077_v22  ;;  %v1149_v11 = vld [vmem:[%s14340_s2 + $0x1ad8] sm:$0xff]  ;;  %v1148_v19 = vld [vmem:[%s14340_s2 + $0x1ad0] sm:$0xff] }
  0xc5   : > { %5463 = vmatpush1.bf16.msra.mxu0 %v5462_v28  ;;  %v1074_v28 = vld [vmem:[%s14340_s2 + $0x1880] sm:$0xff]  ;;  %v1157_v22 = vld [vmem:[%s14340_s2 + $0x1b18] sm:$0xff] }
  0xc6   : > { %5719 = vmatpush1.bf16.msra.mxu1 %v5718_v29  ;;  %5465 = vmatprep.subr.bf16.mxu0 %v5464_v30  ;;  %v1082_v29 = vld [vmem:[%s14340_s2 + $0x18c0] sm:$0xff]  ;;  %v1076_v30 = vld [vmem:[%s14340_s2 + $0x1890] sm:$0xff]  ;;  %v1165_v23 = vld [vmem:[%s14340_s2 + $0x1b58] sm:$0xff] }
  0xc7   : > { %5721 = vmatprep.subr.bf16.mxu1 %v5720_v34  ;;  %v1099_v34 = vld [vmem:[%s14340_s2 + $0x1948] sm:$0xff]  ;;  %v5486_v38 = vpack.c.bf16 %v1082_v29, %v1074_v28  ;;  %v1162_v28 = vld [vmem:[%s14340_s2 + $0x1b40] sm:$0xff]  ;;  %v1156_v29 = vld [vmem:[%s14340_s2 + $0x1b10] sm:$0xff] }
  0xc9   : > { %5467 = vmatpush1.bf16.msra.mxu0 %v5466_v40  ;;  %v5742_v40 = vpack.c.bf16 %v1084_v32, %v1076_v30  ;;  %v5760_v30 = vpack.c.bf16 %v1165_v23, %v1157_v22  ;;  %v1171_v32 = vld [vmem:[%s14340_s2 + $0x1b88] sm:$0xff]  ;;  %v1234_v23 = vld [vmem:[%s14340_s2 + $0x1d80] sm:$0xff] }
  0xca   : > { %5723 = vmatpush1.bf16.msra.mxu1 %v5722_v41  ;;  %5469 = vmatprep.subr.bf16.mxu0 %v5468_v42  ;;  %v5488_v41 = vpack.c.bf16 %v1099_v34, %v1091_v33  ;;  %v1090_v42 = vld [vmem:[%s14340_s2 + $0x1900] sm:$0xff]  ;;  %v1179_v33 = vld [vmem:[%s14340_s2 + $0x1bc8] sm:$0xff]  ;;  %v1173_v34 = vld [vmem:[%s14340_s2 + $0x1b98] sm:$0xff] }
  0xcb   : > { %5725 = vmatprep.subr.bf16.mxu1 %v5724_v46  ;;  %v1100_v46 = vld [vmem:[%s14340_s2 + $0x1950] sm:$0xff] }
  0xcd   : > { %5471 = vmatpush1.bf16.msra.mxu0 %v5470_v52  ;;  %v5490_v52 = vpack.c.bf16 %v1098_v43, %v1090_v42  ;;  %v5764_v42 = vpack.c.bf16 %v1181_v35, %v1173_v34  ;;  %v1180_v43 = vld [vmem:[%s14340_s2 + $0x1bd0] sm:$0xff]  ;;  %v1250_v35 = vld [vmem:[%s14340_s2 + $0x1e00] sm:$0xff] }
  0xce   : > { %5727 = vmatpush1.bf16.msra.mxu1 %v5726_v53  ;;  %5473 = vmatprep.subr.bf16.mxu0 %v5472_v54  ;;  %v5746_v53 = vpack.c.bf16 %v1100_v46, %v1092_v44  ;;  %v5492_v54 = vpack.c.bf16 %v1115_v48, %v1107_v47  ;;  %v1187_v44 = vld [vmem:[%s14340_s2 + $0x1c08] sm:$0xff]  ;;  %v1189_v46 = vld [vmem:[%s14340_s2 + $0x1c18] sm:$0xff] }
  0xcf   : > { %5729 = vmatprep.subr.bf16.mxu1 %v5728_v58  ;;  %v5748_v58 = vpack.c.bf16 %v1117_v50, %v1109_v49  ;;  %v1197_v47 = vld [vmem:[%s14340_s2 + $0x1c58] sm:$0xff] }
  0xd1   : > { %5475 = vmatpush1.bf16.msra.mxu0 %v5474_v0  ;;  %v5494_v0 = vpack.c.bf16 %v1114_v56, %v1106_v55  ;;  %v1196_v55 = vld [vmem:[%s14340_s2 + $0x1c50] sm:$0xff]  ;;  %v1203_v56 = vld [vmem:[%s14340_s2 + $0x1c88] sm:$0xff] }
  0xd2   : > { %5731 = vmatpush1.bf16.msra.mxu1 %v5730_v1  ;;  %5477 = vmatprep.subr.bf16.mxu0 %v5476_v2  ;;  %v5750_v1 = vpack.c.bf16 %v1116_v59, %v1108_v57  ;;  %v5496_v2 = vpack.c.bf16 %v1131_v61, %v1123_v60  ;;  %v1211_v57 = vld [vmem:[%s14340_s2 + $0x1cc8] sm:$0xff]  ;;  %v1213_v59 = vld [vmem:[%s14340_s2 + $0x1cd8] sm:$0xff] }
  0xd3   : > { %5733 = vmatprep.subr.bf16.mxu1 %v5732_v6  ;;  %v5752_v6 = vpack.c.bf16 %v1133_v63, %v1125_v62  ;;  %v5516_v62 = vpack.c.bf16 %v1211_v57, %v1203_v56  ;;  %v1202_v63 = vld [vmem:[%s14340_s2 + $0x1c80] sm:$0xff] }
  0xd5   : > { %5479 = vmatpush1.bf16.msra.mxu0 %v5478_v12  ;;  %v5498_v12 = vpack.c.bf16 %v1130_v4, %v1122_v3  ;;  %v1212_v3 = vld [vmem:[%s14340_s2 + $0x1cd0] sm:$0xff]  ;;  %v1219_v4 = vld [vmem:[%s14340_s2 + $0x1d08] sm:$0xff] }
  0xd6   : > { %5735 = vmatpush1.bf16.msra.mxu1 %v5734_v13  ;;  %5481 = vmatprep.subr.bf16.mxu0 %v5480_v14  ;;  %v5754_v13 = vpack.c.bf16 %v1132_v7, %v1124_v5  ;;  %v5500_v14 = vpack.c.bf16 %v1147_v9, %v1139_v8  ;;  %v1227_v5 = vld [vmem:[%s14340_s2 + $0x1d48] sm:$0xff]  ;;  %v1229_v7 = vld [vmem:[%s14340_s2 + $0x1d58] sm:$0xff] }
  0xd7   : > { %5737 = vmatprep.subr.bf16.mxu1 %v5736_v18  ;;  %v5756_v18 = vpack.c.bf16 %v1149_v11, %v1141_v10  ;;  %v5520_v10 = vpack.c.bf16 %v1227_v5, %v1219_v4  ;;  %v1218_v11 = vld [vmem:[%s14340_s2 + $0x1d00] sm:$0xff] }
  0xd8   : > { %1575 = vmatmul.mubr.f32.vlgmr.msra.gmra.mrb[0].mxu0 %v278_v24 }
  0xd9   : > { %5483 = vmatpush1.bf16.msra.mxu0 %v5482_v25  ;;  %1883 = vmatmul.mubr.f32.vlgmr.msra.gmra.mrb[0].mxu1 %v278_v24  ;;  %v5502_v24 = vpack.c.bf16 %v1146_v16, %v1138_v15  ;;  %v5758_v25 = vpack.c.bf16 %v1148_v19, %v1140_v17  ;;  %v1228_v15 = vld [vmem:[%s14340_s2 + $0x1d50] sm:$0xff]  ;;  %v1235_v16 = vld [vmem:[%s14340_s2 + $0x1d88] sm:$0xff]  ;;  %v1245_v19 = vld [vmem:[%s14340_s2 + $0x1dd8] sm:$0xff] }
  0xda   : > { %5739 = vmatpush1.bf16.msra.mxu1 %v5738_v26  ;;  %5485 = vmatprep.subr.bf16.mxu0 %v5484_v27  ;;  %v5504_v26 = vpack.c.bf16 %v1163_v21, %v1155_v20  ;;  %v1154_v27 = vld [vmem:[%s14340_s2 + $0x1b00] sm:$0xff]  ;;  %v1243_v17 = vld [vmem:[%s14340_s2 + $0x1dc8] sm:$0xff] }
  0xdb   : > { %5741 = vmatprep.subr.bf16.mxu1 %v5740_v31  ;;  %1580 = vmatprep.mubr.f32.mxu0 %v287_v37  ;;  %v1164_v31 = vld [vmem:[%s14340_s2 + $0x1b50] sm:$0xff]  ;;  %v5506_v36 = vpack.c.bf16 %v1162_v28, %v1154_v27  ;;  %v5524_v22 = vpack.c.bf16 %v1243_v17, %v1235_v16  ;;  %v1251_v28 = vld [vmem:[%s14340_s2 + $0x1e08] sm:$0xff] }
  0xdc   : > { %1888 = vmatprep.mubr.f32.mxu1 %v287_v37  ;;  %1581 = vmatmul.mubr.f32.gmra.mrb[2].mxu0 %v286_v39  ;;  %v5762_v37 = vpack.c.bf16 %v1164_v31, %v1156_v29  ;;  %v1244_v27 = vld [vmem:[%s14340_s2 + $0x1dd0] sm:$0xff]  ;;  %v1259_v29 = vld [vmem:[%s14340_s2 + $0x1e48] sm:$0xff]  ;;  %v1261_v31 = vld [vmem:[%s14340_s2 + $0x1e58] sm:$0xff] }
  0xdd   : > { %5487 = vmatpush1.bf16.msra.mxu0 %v5486_v38  ;;  %1889 = vmatmul.mubr.f32.gmra.mrb[2].mxu1 %v286_v39  ;;  %v5508_v38 = vpack.c.bf16 %v1179_v33, %v1171_v32  ;;  %v1170_v39 = vld [vmem:[%s14340_s2 + $0x1b80] sm:$0xff]  ;;  %v5528_v34 = vpack.c.bf16 %v1259_v29, %v1251_v28  ;;  %v289_v28 = vld [vmem:[%s7653_s27 + $0x78] sm:$0xff] }
  0xde   : > { %5743 = vmatpush1.bf16.msra.mxu1 %v5742_v40  ;;  %5489 = vmatprep.subr.bf16.mxu0 %v5488_v41  ;;  %v1178_v40 = vld [vmem:[%s14340_s2 + $0x1bc0] sm:$0xff]  ;;  %v1172_v41 = vld [vmem:[%s14340_s2 + $0x1b90] sm:$0xff]  ;;  %v313_v29 = vld [vmem:[%s14340_s2 + $0xb8] sm:$0xff] }
  0xdf   : > { %5745 = vmatprep.subr.bf16.mxu1 %v5744_v45  ;;  %1651 = vmatprep.mubr.f32.mxu0 %v281_v51  ;;  %v1195_v45 = vld [vmem:[%s14340_s2 + $0x1c48] sm:$0xff]  ;;  %v5510_v48 = vpack.c.bf16 %v1178_v40, %v1170_v39  ;;  %v5766_v49 = vpack.c.bf16 %v1180_v43, %v1172_v41  ;;  %v1260_v39 = vld [vmem:[%s14340_s2 + $0x1e50] sm:$0xff]  ;;  %v1277_v43 = vld [vmem:[%s14340_s2 + $0x1ed8] sm:$0xff] }
  0xe0   : > { %1959 = vmatprep.mubr.f32.mxu1 %v281_v51  ;;  %v5512_v50 = vpack.c.bf16 %v1195_v45, %v1187_v44  ;;  %v1186_v51 = vld [vmem:[%s14340_s2 + $0x1c00] sm:$0xff]  ;;  %v1267_v40 = vld [vmem:[%s14340_s2 + $0x1e88] sm:$0xff] }
  0xe1   : > { %5491 = vmatpush1.bf16.msra.mxu0 %v5490_v52  ;;  %v1194_v52 = vld [vmem:[%s14340_s2 + $0x1c40] sm:$0xff]  ;;  %v1275_v41 = vld [vmem:[%s14340_s2 + $0x1ec8] sm:$0xff] }
  0xe2   : > { %5747 = vmatpush1.bf16.msra.mxu1 %v5746_v53  ;;  %5493 = vmatprep.subr.bf16.mxu0 %v5492_v54  ;;  %v1188_v53 = vld [vmem:[%s14340_s2 + $0x1c10] sm:$0xff]  ;;  %v5768_v54 = vpack.c.bf16 %v1197_v47, %v1189_v46  ;;  %v5514_v60 = vpack.c.bf16 %v1194_v52, %v1186_v51  ;;  %v5532_v46 = vpack.c.bf16 %v1275_v41, %v1267_v40  ;;  %v1266_v47 = vld [vmem:[%s14340_s2 + $0x1e80] sm:$0xff]  ;;  %v1283_v52 = vld [vmem:[%s14340_s2 + $0x1f08] sm:$0xff] }
  0xe3   : > { %5749 = vmatprep.subr.bf16.mxu1 %v5748_v58  ;;  %v1205_v58 = vld [vmem:[%s14340_s2 + $0x1c98] sm:$0xff]  ;;  %v5770_v61 = vpack.c.bf16 %v1196_v55, %v1188_v53  ;;  %v1276_v51 = vld [vmem:[%s14340_s2 + $0x1ed0] sm:$0xff]  ;;  %v1291_v53 = vld [vmem:[%s14340_s2 + $0x1f48] sm:$0xff] }
  0xe4   : > { %v1293_v55 = vld [vmem:[%s14340_s2 + $0x1f58] sm:$0xff] }
  0xe5   : > { %5495 = vmatpush1.bf16.msra.mxu0 %v5494_v0  ;;  %v1210_v0 = vld [vmem:[%s14340_s2 + $0x1cc0] sm:$0xff]  ;;  %v329_v40 = vld [vmem:[%s14340_s2 + $0x138] sm:$0xff] }
  0xe6   : > { %5751 = vmatpush1.bf16.msra.mxu1 %v5750_v1  ;;  %5497 = vmatprep.subr.bf16.mxu0 %v5496_v2  ;;  %v1204_v1 = vld [vmem:[%s14340_s2 + $0x1c90] sm:$0xff]  ;;  %v5772_v2 = vpack.c.bf16 %v1213_v59, %v1205_v58  ;;  %v5518_v8 = vpack.c.bf16 %v1210_v0, %v1202_v63  ;;  %v5536_v58 = vpack.c.bf16 %v1291_v53, %v1283_v52  ;;  %v1282_v59 = vld [vmem:[%s14340_s2 + $0x1f00] sm:$0xff]  ;;  %v1299_v0 = vld [vmem:[%s14340_s2 + $0x1f88] sm:$0xff] }
  0xe7   : > { %5753 = vmatprep.subr.bf16.mxu1 %v5752_v6  ;;  %v1221_v6 = vld [vmem:[%s14340_s2 + $0x1d18] sm:$0xff]  ;;  %v5774_v9 = vpack.c.bf16 %v1212_v3, %v1204_v1  ;;  %v1292_v63 = vld [vmem:[%s14340_s2 + $0x1f50] sm:$0xff]  ;;  %v1307_v1 = vld [vmem:[%s14340_s2 + $0x1fc8] sm:$0xff] }
  0xe8   : > { %v1309_v3 = vld [vmem:[%s14340_s2 + $0x1fd8] sm:$0xff]  ;;  %v351_v52 = vld [vmem:[%s14340_s2 + $0x1e8] sm:$0xff] }
  0xe9   : > { %5499 = vmatpush1.bf16.msra.mxu0 %v5498_v12  ;;  %v1226_v12 = vld [vmem:[%s14340_s2 + $0x1d40] sm:$0xff]  ;;  %v337_v41 = vld [vmem:[%s14340_s2 + $0x178] sm:$0xff] }
  0xea   : > { %5755 = vmatpush1.bf16.msra.mxu1 %v5754_v13  ;;  %5501 = vmatprep.subr.bf16.mxu0 %v5500_v14  ;;  %v1220_v13 = vld [vmem:[%s14340_s2 + $0x1d10] sm:$0xff]  ;;  %v5776_v14 = vpack.c.bf16 %v1229_v7, %v1221_v6  ;;  %v5522_v20 = vpack.c.bf16 %v1226_v12, %v1218_v11  ;;  %v5540_v6 = vpack.c.bf16 %v1307_v1, %v1299_v0  ;;  %v1298_v7 = vld [vmem:[%s14340_s2 + $0x1f80] sm:$0xff]  ;;  %v295_v12 = vld [vmem:[%s14340_s2 + $0x28] sm:$0xff] }
  0xeb   : > { %5757 = vmatprep.subr.bf16.mxu1 %v5756_v18  ;;  %v1237_v18 = vld [vmem:[%s14340_s2 + $0x1d98] sm:$0xff]  ;;  %v5778_v21 = vpack.c.bf16 %v1228_v15, %v1220_v13  ;;  %v1308_v11 = vld [vmem:[%s14340_s2 + $0x1fd0] sm:$0xff]  ;;  %v303_v13 = vld [vmem:[%s14340_s2 + $0x68] sm:$0xff] }
  0xec   : > { %v305_v15 = vld [vmem:[%s14340_s2 + $0x78] sm:$0xff]  ;;  %v367_v0 = vld [vmem:[%s14340_s2 + $0x268] sm:$0xff] }
  0xed   : > { %5503 = vmatpush1.bf16.msra.mxu0 %v5502_v24  ;;  %v1242_v24 = vld [vmem:[%s14340_s2 + $0x1dc0] sm:$0xff]  ;;  %v345_v53 = vld [vmem:[%s14340_s2 + $0x1b8] sm:$0xff]  ;;  %v7546_v1 = vld [vmem:[%s7653_s27 + $0x8] sm:$0xff] }
  0xee   : > { %5759 = vmatpush1.bf16.msra.mxu1 %v5758_v25  ;;  %5505 = vmatprep.subr.bf16.mxu0 %v5504_v26  ;;  %v1236_v25 = vld [vmem:[%s14340_s2 + $0x1d90] sm:$0xff]  ;;  %v5780_v26 = vpack.c.bf16 %v1245_v19, %v1237_v18  ;;  %v5526_v32 = vpack.c.bf16 %v1242_v24, %v1234_v23  ;;  %v5800_v18 = vpack.c.bf16 %v303_v13, %v295_v12  ;;  %v294_v19 = vld [vmem:[%s14340_s2 + $0x20] sm:$0xff]  ;;  %v375_v12 = vld [vmem:[%s14340_s2 + $0x2a8] sm:$0xff] }
  0xef   : > { %5761 = vmatprep.subr.bf16.mxu1 %v5760_v30  ;;  %v1253_v30 = vld [vmem:[%s14340_s2 + $0x1e18] sm:$0xff]  ;;  %v5782_v33 = vpack.c.bf16 %v1244_v27, %v1236_v25  ;;  %v304_v23 = vld [vmem:[%s14340_s2 + $0x70] sm:$0xff]  ;;  %v311_v25 = vld [vmem:[%s14340_s2 + $0xa8] sm:$0xff] }
  0xf0   : > { %v280_v24 = vld [vmem:[%s7653_s27 + $0x30] sm:$0xff]  ;;  %v383_v13 = vld [vmem:[%s14340_s2 + $0x2e8] sm:$0xff] }
  0xf1   : > { %5507 = vmatpush1.bf16.msra.mxu0 %v5506_v36  ;;  %v1258_v36 = vld [vmem:[%s14340_s2 + $0x1e40] sm:$0xff] }
  0xf2   : > { %5763 = vmatpush1.bf16.msra.mxu1 %v5762_v37  ;;  %5509 = vmatprep.subr.bf16.mxu0 %v5508_v38  ;;  %v1252_v37 = vld [vmem:[%s14340_s2 + $0x1e10] sm:$0xff]  ;;  %v5784_v38 = vpack.c.bf16 %v1261_v31, %v1253_v30  ;;  %v5530_v44 = vpack.c.bf16 %v1258_v36, %v1250_v35  ;;  %v321_v30 = vld [vmem:[%s14340_s2 + $0xf8] sm:$0xff] }
  0xf3   : > { %5765 = vmatprep.subr.bf16.mxu1 %v5764_v42  ;;  %v1269_v42 = vld [vmem:[%s14340_s2 + $0x1e98] sm:$0xff]  ;;  %v5786_v45 = vpack.c.bf16 %v1260_v39, %v1252_v37  ;;  %v320_v36 = vld [vmem:[%s14340_s2 + $0xf0] sm:$0xff]  ;;  %v327_v37 = vld [vmem:[%s14340_s2 + $0x128] sm:$0xff]  ;;  %v6060_v39 = vpack.c.bf16 %v321_v30, %v313_v29 }
  0xf5   : > { %5511 = vmatpush1.bf16.msra.mxu0 %v5510_v48  ;;  %v1274_v48 = vld [vmem:[%s14340_s2 + $0x1ec0] sm:$0xff] }
  0xf6   : > { %5767 = vmatpush1.bf16.msra.mxu1 %v5766_v49  ;;  %5513 = vmatprep.subr.bf16.mxu0 %v5512_v50  ;;  %v1268_v49 = vld [vmem:[%s14340_s2 + $0x1e90] sm:$0xff]  ;;  %v5788_v50 = vpack.c.bf16 %v1277_v43, %v1269_v42  ;;  %v5534_v56 = vpack.c.bf16 %v1274_v48, %v1266_v47  ;;  %v334_v47 = vld [vmem:[%s14340_s2 + $0x160] sm:$0xff] }
  0xf7   : > { %5769 = vmatprep.subr.bf16.mxu1 %v5768_v54  ;;  %v1285_v54 = vld [vmem:[%s14340_s2 + $0x1f18] sm:$0xff]  ;;  %v5790_v57 = vpack.c.bf16 %v1276_v51, %v1268_v49  ;;  %v288_v42 = vld [vmem:[%s7653_s27 + $0x70] sm:$0xff]  ;;  %v6064_v49 = vpack.c.bf16 %v337_v41, %v329_v40  ;;  %v343_v51 = vld [vmem:[%s14340_s2 + $0x1a8] sm:$0xff] }
  0xf8   : > { %v328_v48 = vld [vmem:[%s14340_s2 + $0x130] sm:$0xff] }
  0xf9   : > { %5515 = vmatpush1.bf16.msra.mxu0 %v5514_v60  ;;  %v1290_v60 = vld [vmem:[%s14340_s2 + $0x1f40] sm:$0xff] }
  0xfa   : > { %5771 = vmatpush1.bf16.msra.mxu1 %v5770_v61  ;;  %5517 = vmatprep.subr.bf16.mxu0 %v5516_v62  ;;  %v1284_v61 = vld [vmem:[%s14340_s2 + $0x1f10] sm:$0xff]  ;;  %v5792_v62 = vpack.c.bf16 %v1293_v55, %v1285_v54  ;;  %v5538_v4 = vpack.c.bf16 %v1290_v60, %v1282_v59  ;;  %v353_v54 = vld [vmem:[%s14340_s2 + $0x1f8] sm:$0xff]  ;;  %v350_v59 = vld [vmem:[%s14340_s2 + $0x1e0] sm:$0xff] }
  0xfb   : > { %5773 = vmatprep.subr.bf16.mxu1 %v5772_v2  ;;  %v1301_v2 = vld [vmem:[%s14340_s2 + $0x1f98] sm:$0xff]  ;;  %v5794_v5 = vpack.c.bf16 %v1292_v63, %v1284_v61  ;;  %v344_v60 = vld [vmem:[%s14340_s2 + $0x1b0] sm:$0xff]  ;;  %v6068_v61 = vpack.c.bf16 %v353_v54, %v345_v53  ;;  %v359_v63 = vld [vmem:[%s14340_s2 + $0x228] sm:$0xff] }
  0xfd   : > { %5519 = vmatpush1.bf16.msra.mxu0 %v5518_v8  ;;  %v1306_v8 = vld [vmem:[%s14340_s2 + $0x1fc0] sm:$0xff] }
  0xfe   : > { %5775 = vmatpush1.bf16.msra.mxu1 %v5774_v9  ;;  %5521 = vmatprep.subr.bf16.mxu0 %v5520_v10  ;;  %v1300_v9 = vld [vmem:[%s14340_s2 + $0x1f90] sm:$0xff]  ;;  %v5796_v10 = vpack.c.bf16 %v1309_v3, %v1301_v2  ;;  %v5542_v16 = vpack.c.bf16 %v1306_v8, %v1298_v7  ;;  %v361_v2 = vld [vmem:[%s14340_s2 + $0x238] sm:$0xff]  ;;  %v358_v7 = vld [vmem:[%s14340_s2 + $0x220] sm:$0xff] }
  0xff   : > { %5777 = vmatprep.subr.bf16.mxu1 %v5776_v14  ;;  %v297_v14 = vld [vmem:[%s14340_s2 + $0x38] sm:$0xff]  ;;  %v5798_v17 = vpack.c.bf16 %v1308_v11, %v1300_v9  ;;  %v366_v8 = vld [vmem:[%s14340_s2 + $0x260] sm:$0xff]  ;;  %v360_v9 = vld [vmem:[%s14340_s2 + $0x230] sm:$0xff] }
 0x100   : > { %v369_v3 = vld [vmem:[%s14340_s2 + $0x278] sm:$0xff]  ;;  %v368_v11 = vld [vmem:[%s14340_s2 + $0x270] sm:$0xff] }
 0x101   : > { %5523 = vmatpush1.bf16.msra.mxu0 %v5522_v20  ;;  %v302_v20 = vld [vmem:[%s14340_s2 + $0x60] sm:$0xff] }
 0x102   : > { %5779 = vmatpush1.bf16.msra.mxu1 %v5778_v21  ;;  %5525 = vmatprep.subr.bf16.mxu0 %v5524_v22  ;;  %v6056_v21 = vpack.c.bf16 %v305_v15, %v297_v14  ;;  %v296_v22 = vld [vmem:[%s14340_s2 + $0x30] sm:$0xff]  ;;  %v5802_v27 = vpack.c.bf16 %v302_v20, %v294_v19  ;;  %v377_v14 = vld [vmem:[%s14340_s2 + $0x2b8] sm:$0xff]  ;;  %v374_v19 = vld [vmem:[%s14340_s2 + $0x2a0] sm:$0xff] }
 0x103   : > { %5781 = vmatprep.subr.bf16.mxu1 %v5780_v26  ;;  %v319_v26 = vld [vmem:[%s14340_s2 + $0xe8] sm:$0xff]  ;;  %v6058_v31 = vpack.c.bf16 %v304_v23, %v296_v22  ;;  %v385_v15 = vld [vmem:[%s14340_s2 + $0x2f8] sm:$0xff]  ;;  %v382_v20 = vld [vmem:[%s14340_s2 + $0x2e0] sm:$0xff] }
 0x104   : > { %v5804_v35 = vpack.c.bf16 %v319_v26, %v311_v25  ;;  %v6076_v22 = vpack.c.bf16 %v385_v15, %v377_v14  ;;  %v384_v23 = vld [vmem:[%s14340_s2 + $0x2f0] sm:$0xff]  ;;  %v399_v25 = vld [vmem:[%s14340_s2 + $0x368] sm:$0xff]  ;;  %v393_v26 = vld [vmem:[%s14340_s2 + $0x338] sm:$0xff] }
 0x105   : > { %5527 = vmatpush1.bf16.msra.mxu0 %v5526_v32  ;;  %v310_v32 = vld [vmem:[%s14340_s2 + $0xa0] sm:$0xff] }
 0x106   : > { %5783 = vmatpush1.bf16.msra.mxu1 %v5782_v33  ;;  %5529 = vmatprep.subr.bf16.mxu0 %v5528_v34  ;;  %v318_v33 = vld [vmem:[%s14340_s2 + $0xe0] sm:$0xff]  ;;  %v312_v34 = vld [vmem:[%s14340_s2 + $0xb0] sm:$0xff] }
 0x107   : > { %5785 = vmatprep.subr.bf16.mxu1 %v5784_v38  ;;  %v335_v38 = vld [vmem:[%s14340_s2 + $0x168] sm:$0xff]  ;;  %v5806_v43 = vpack.c.bf16 %v318_v33, %v310_v32  ;;  %v398_v32 = vld [vmem:[%s14340_s2 + $0x360] sm:$0xff]  ;;  %v392_v33 = vld [vmem:[%s14340_s2 + $0x330] sm:$0xff] }
 0x108   : > { %v454_v15 = vld [vmem:[%s14340_s2 + $0x520] sm:$0xff] }
 0x109   : > { %5531 = vmatpush1.bf16.msra.mxu0 %v5530_v44  ;;  %v6062_v44 = vpack.c.bf16 %v320_v36, %v312_v34  ;;  %v407_v36 = vld [vmem:[%s14340_s2 + $0x3a8] sm:$0xff] }
 0x10a   : > { %5787 = vmatpush1.bf16.msra.mxu1 %v5786_v45  ;;  %5533 = vmatprep.subr.bf16.mxu0 %v5532_v46  ;;  %v5808_v45 = vpack.c.bf16 %v335_v38, %v327_v37  ;;  %v326_v46 = vld [vmem:[%s14340_s2 + $0x120] sm:$0xff]  ;;  %v415_v37 = vld [vmem:[%s14340_s2 + $0x3e8] sm:$0xff]  ;;  %v409_v38 = vld [vmem:[%s14340_s2 + $0x3b8] sm:$0xff] }
 0x10b   : > { %5789 = vmatprep.subr.bf16.mxu1 %v5788_v50  ;;  %v336_v50 = vld [vmem:[%s14340_s2 + $0x170] sm:$0xff]  ;;  %v5810_v55 = vpack.c.bf16 %v334_v47, %v326_v46 }
 0x10c   : > { %v416_v47 = vld [vmem:[%s14340_s2 + $0x3f0] sm:$0xff] }
 0x10d   : > { %5535 = vmatpush1.bf16.msra.mxu0 %v5534_v56  ;;  %v6066_v56 = vpack.c.bf16 %v336_v50, %v328_v48  ;;  %v423_v48 = vld [vmem:[%s14340_s2 + $0x428] sm:$0xff]  ;;  %v425_v50 = vld [vmem:[%s14340_s2 + $0x438] sm:$0xff] }
 0x10e   : > { %5791 = vmatpush1.bf16.msra.mxu1 %v5790_v57  ;;  %5537 = vmatprep.subr.bf16.mxu0 %v5536_v58  ;;  %v5812_v57 = vpack.c.bf16 %v351_v52, %v343_v51  ;;  %v342_v58 = vld [vmem:[%s14340_s2 + $0x1a0] sm:$0xff]  ;;  %v433_v51 = vld [vmem:[%s14340_s2 + $0x478] sm:$0xff] }
 0x10f   : > { %5793 = vmatprep.subr.bf16.mxu1 %v5792_v62  ;;  %v352_v62 = vld [vmem:[%s14340_s2 + $0x1f0] sm:$0xff] }
 0x111   : > { %5539 = vmatpush1.bf16.msra.mxu0 %v5538_v4  ;;  %v5814_v4 = vpack.c.bf16 %v350_v59, %v342_v58  ;;  %v6088_v58 = vpack.c.bf16 %v433_v51, %v425_v50  ;;  %v432_v59 = vld [vmem:[%s14340_s2 + $0x470] sm:$0xff]  ;;  %v502_v51 = vld [vmem:[%s14340_s2 + $0x6a0] sm:$0xff] }
 0x112   : > { %5795 = vmatpush1.bf16.msra.mxu1 %v5794_v5  ;;  %5541 = vmatprep.subr.bf16.mxu0 %v5540_v6  ;;  %v6070_v5 = vpack.c.bf16 %v352_v62, %v344_v60  ;;  %v5816_v6 = vpack.c.bf16 %v367_v0, %v359_v63  ;;  %v439_v60 = vld [vmem:[%s14340_s2 + $0x4a8] sm:$0xff]  ;;  %v441_v62 = vld [vmem:[%s14340_s2 + $0x4b8] sm:$0xff] }
 0x113   : > { %5797 = vmatprep.subr.bf16.mxu1 %v5796_v10  ;;  %v6072_v10 = vpack.c.bf16 %v369_v3, %v361_v2  ;;  %v449_v63 = vld [vmem:[%s14340_s2 + $0x4f8] sm:$0xff]  ;;  %v438_v3 = vld [vmem:[%s14340_s2 + $0x4a0] sm:$0xff] }
 0x115   : > { %5543 = vmatpush1.bf16.msra.mxu0 %v5542_v16  ;;  %v5818_v16 = vpack.c.bf16 %v366_v8, %v358_v7  ;;  %v448_v7 = vld [vmem:[%s14340_s2 + $0x4f0] sm:$0xff]  ;;  %v455_v8 = vld [vmem:[%s14340_s2 + $0x528] sm:$0xff] }
 0x116   : > { %5799 = vmatpush1.bf16.msra.mxu1 %v5798_v17  ;;  %5801 = vmatprep.subr.bf16.mxu0 %v5800_v18  ;;  %v6074_v17 = vpack.c.bf16 %v368_v11, %v360_v9  ;;  %v5820_v18 = vpack.c.bf16 %v383_v13, %v375_v12  ;;  %v463_v9 = vld [vmem:[%s14340_s2 + $0x568] sm:$0xff]  ;;  %v465_v11 = vld [vmem:[%s14340_s2 + $0x578] sm:$0xff] }
 0x117   : > { %6057 = vmatprep.subr.bf16.mxu1 %v6056_v21  ;;  %v376_v21 = vld [vmem:[%s14340_s2 + $0x2b0] sm:$0xff]  ;;  %v5840_v14 = vpack.c.bf16 %v463_v9, %v455_v8 }
 0x118   : > { %1652 = vmatmul.mubr.f32.vlgmr.msra.gmra.mrb[0].mxu0 %v280_v24  ;;  %v6078_v29 = vpack.c.bf16 %v384_v23, %v376_v21  ;;  %v479_v21 = vld [vmem:[%s14340_s2 + $0x5e8] sm:$0xff]  ;;  %v481_v23 = vld [vmem:[%s14340_s2 + $0x5f8] sm:$0xff] }
 0x119   : > { %1960 = vmatmul.mubr.f32.vlgmr.msra.gmra.mrb[0].mxu1 %v280_v24  ;;  %5803 = vmatpush1.bf16.msra.mxu0 %v5802_v27  ;;  %v391_v24 = vld [vmem:[%s14340_s2 + $0x328] sm:$0xff]  ;;  %v401_v27 = vld [vmem:[%s14340_s2 + $0x378] sm:$0xff] }
 0x11a   : > { %6059 = vmatpush1.bf16.msra.mxu1 %v6058_v31  ;;  %1657 = vmatprep.mubr.f32.mxu0 %v289_v28  ;;  %v5824_v30 = vpack.c.bf16 %v399_v25, %v391_v24  ;;  %v390_v31 = vld [vmem:[%s14340_s2 + $0x320] sm:$0xff]  ;;  %v6080_v34 = vpack.c.bf16 %v401_v27, %v393_v26 }
 0x11b   : > { %1965 = vmatprep.mubr.f32.mxu1 %v289_v28  ;;  %5805 = vmatprep.subr.bf16.mxu0 %v5804_v35  ;;  %v5822_v28 = vpack.c.bf16 %v382_v20, %v374_v19  ;;  %v400_v35 = vld [vmem:[%s14340_s2 + $0x370] sm:$0xff]  ;;  %v5826_v40 = vpack.c.bf16 %v398_v32, %v390_v31  ;;  %v471_v20 = vld [vmem:[%s14340_s2 + $0x5a8] sm:$0xff]  ;;  %v470_v27 = vld [vmem:[%s14340_s2 + $0x5a0] sm:$0xff] }
 0x11c   : > { %1658 = vmatmul.mubr.f32.gmra.mrb[2].mxu0 %v288_v42  ;;  %6061 = vmatprep.subr.bf16.mxu1 %v6060_v39  ;;  %v417_v39 = vld [vmem:[%s14340_s2 + $0x3f8] sm:$0xff]  ;;  %v6082_v41 = vpack.c.bf16 %v400_v35, %v392_v33  ;;  %v464_v19 = vld [vmem:[%s14340_s2 + $0x570] sm:$0xff]  ;;  %v5844_v26 = vpack.c.bf16 %v479_v21, %v471_v20  ;;  %v487_v32 = vld [vmem:[%s14340_s2 + $0x628] sm:$0xff] }
 0x11d   : > { %1966 = vmatmul.mubr.f32.gmra.mrb[2].mxu1 %v288_v42  ;;  %5807 = vmatpush1.bf16.msra.mxu0 %v5806_v43  ;;  %v5828_v42 = vpack.c.bf16 %v415_v37, %v407_v36  ;;  %v406_v43 = vld [vmem:[%s14340_s2 + $0x3a0] sm:$0xff]  ;;  %v6084_v46 = vpack.c.bf16 %v417_v39, %v409_v38  ;;  %v480_v31 = vld [vmem:[%s14340_s2 + $0x5f0] sm:$0xff]  ;;  %v495_v33 = vld [vmem:[%s14340_s2 + $0x668] sm:$0xff] }
 0x11e   : > { %6063 = vmatpush1.bf16.msra.mxu1 %v6062_v44  ;;  %5809 = vmatprep.subr.bf16.mxu0 %v5808_v45  ;;  %v414_v44 = vld [vmem:[%s14340_s2 + $0x3e0] sm:$0xff]  ;;  %v408_v45 = vld [vmem:[%s14340_s2 + $0x3b0] sm:$0xff]  ;;  %v497_v35 = vld [vmem:[%s14340_s2 + $0x678] sm:$0xff]  ;;  %v5848_v38 = vpack.c.bf16 %v495_v33, %v487_v32 }
 0x11f   : > { %6065 = vmatprep.subr.bf16.mxu1 %v6064_v49  ;;  %2036 = vmatprep.mubr.f32.mxu0 %v7546_v1  ;;  %v431_v49 = vld [vmem:[%s14340_s2 + $0x468] sm:$0xff]  ;;  %v5830_v52 = vpack.c.bf16 %v414_v44, %v406_v43  ;;  %v6086_v53 = vpack.c.bf16 %v416_v47, %v408_v45  ;;  %v486_v39 = vld [vmem:[%s14340_s2 + $0x620] sm:$0xff]  ;;  %v496_v43 = vld [vmem:[%s14340_s2 + $0x670] sm:$0xff] }
 0x120   : > { %2344 = vmatprep.mubr.f32.mxu1 %v7546_v1  ;;  %v5832_v54 = vpack.c.bf16 %v431_v49, %v423_v48  ;;  %v503_v44 = vld [vmem:[%s14340_s2 + $0x6a8] sm:$0xff]  ;;  %v513_v47 = vld [vmem:[%s14340_s2 + $0x6f8] sm:$0xff] }
 0x121   : > { %5811 = vmatpush1.bf16.msra.mxu0 %v5810_v55  ;;  %v422_v55 = vld [vmem:[%s14340_s2 + $0x420] sm:$0xff]  ;;  %v511_v45 = vld [vmem:[%s14340_s2 + $0x6e8] sm:$0xff] }
 0x122   : > { %6067 = vmatpush1.bf16.msra.mxu1 %v6066_v56  ;;  %5813 = vmatprep.subr.bf16.mxu0 %v5812_v57  ;;  %v430_v56 = vld [vmem:[%s14340_s2 + $0x460] sm:$0xff]  ;;  %v424_v57 = vld [vmem:[%s14340_s2 + $0x430] sm:$0xff]  ;;  %v5852_v50 = vpack.c.bf16 %v511_v45, %v503_v44  ;;  %v593_v44 = vld [vmem:[%s14340_s2 + $0x978] sm:$0xff] }
 0x123   : > { %6069 = vmatprep.subr.bf16.mxu1 %v6068_v61  ;;  %v447_v61 = vld [vmem:[%s14340_s2 + $0x4e8] sm:$0xff]  ;;  %v5834_v0 = vpack.c.bf16 %v430_v56, %v422_v55  ;;  %v6090_v1 = vpack.c.bf16 %v432_v59, %v424_v57  ;;  %v512_v55 = vld [vmem:[%s14340_s2 + $0x6f0] sm:$0xff]  ;;  %v529_v59 = vld [vmem:[%s14340_s2 + $0x778] sm:$0xff] }
 0x124   : > { %v5836_v2 = vpack.c.bf16 %v447_v61, %v439_v60  ;;  %v519_v56 = vld [vmem:[%s14340_s2 + $0x728] sm:$0xff] }
 0x125   : > { %5815 = vmatpush1.bf16.msra.mxu0 %v5814_v4  ;;  %v446_v4 = vld [vmem:[%s14340_s2 + $0x4e0] sm:$0xff]  ;;  %v527_v57 = vld [vmem:[%s14340_s2 + $0x768] sm:$0xff] }
 0x126   : > { %6071 = vmatpush1.bf16.msra.mxu1 %v6070_v5  ;;  %5817 = vmatprep.subr.bf16.mxu0 %v5816_v6  ;;  %v440_v5 = vld [vmem:[%s14340_s2 + $0x4b0] sm:$0xff]  ;;  %v6092_v6 = vpack.c.bf16 %v449_v63, %v441_v62  ;;  %v5838_v12 = vpack.c.bf16 %v446_v4, %v438_v3  ;;  %v5856_v62 = vpack.c.bf16 %v527_v57, %v519_v56  ;;  %v518_v63 = vld [vmem:[%s14340_s2 + $0x720] sm:$0xff]  ;;  %v535_v4 = vld [vmem:[%s14340_s2 + $0x7a8] sm:$0xff] }
 0x127   : > { %6073 = vmatprep.subr.bf16.mxu1 %v6072_v10  ;;  %v457_v10 = vld [vmem:[%s14340_s2 + $0x538] sm:$0xff]  ;;  %v6094_v13 = vpack.c.bf16 %v448_v7, %v440_v5  ;;  %v528_v3 = vld [vmem:[%s14340_s2 + $0x770] sm:$0xff]  ;;  %v543_v5 = vld [vmem:[%s14340_s2 + $0x7e8] sm:$0xff] }
 0x128   : > { %v545_v7 = vld [vmem:[%s14340_s2 + $0x7f8] sm:$0xff] }
 0x129   : > { %5819 = vmatpush1.bf16.msra.mxu0 %v5818_v16  ;;  %v462_v16 = vld [vmem:[%s14340_s2 + $0x560] sm:$0xff]  ;;  %v601_v56 = vld [vmem:[%s14340_s2 + $0x9b8] sm:$0xff] }
 0x12a   : > { %6075 = vmatpush1.bf16.msra.mxu1 %v6074_v17  ;;  %5821 = vmatprep.subr.bf16.mxu0 %v5820_v18  ;;  %v456_v17 = vld [vmem:[%s14340_s2 + $0x530] sm:$0xff]  ;;  %v6096_v18 = vpack.c.bf16 %v465_v11, %v457_v10  ;;  %v5842_v24 = vpack.c.bf16 %v462_v16, %v454_v15  ;;  %v5860_v10 = vpack.c.bf16 %v543_v5, %v535_v4  ;;  %v534_v11 = vld [vmem:[%s14340_s2 + $0x7a0] sm:$0xff]  ;;  %v551_v16 = vld [vmem:[%s14340_s2 + $0x828] sm:$0xff] }
 0x12b   : > { %6077 = vmatprep.subr.bf16.mxu1 %v6076_v22  ;;  %v473_v22 = vld [vmem:[%s14340_s2 + $0x5b8] sm:$0xff]  ;;  %v6098_v25 = vpack.c.bf16 %v464_v19, %v456_v17  ;;  %v544_v15 = vld [vmem:[%s14340_s2 + $0x7f0] sm:$0xff]  ;;  %v559_v17 = vld [vmem:[%s14340_s2 + $0x868] sm:$0xff] }
 0x12c   : > { %v561_v19 = vld [vmem:[%s14340_s2 + $0x878] sm:$0xff]  ;;  %v623_v4 = vld [vmem:[%s14340_s2 + $0xa68] sm:$0xff] }
 0x12d   : > { %5823 = vmatpush1.bf16.msra.mxu0 %v5822_v28  ;;  %v478_v28 = vld [vmem:[%s14340_s2 + $0x5e0] sm:$0xff]  ;;  %v609_v57 = vld [vmem:[%s14340_s2 + $0x9f8] sm:$0xff] }
 0x12e   : > { %6079 = vmatpush1.bf16.msra.mxu1 %v6078_v29  ;;  %5825 = vmatprep.subr.bf16.mxu0 %v5824_v30  ;;  %v472_v29 = vld [vmem:[%s14340_s2 + $0x5b0] sm:$0xff]  ;;  %v6100_v30 = vpack.c.bf16 %v481_v23, %v473_v22  ;;  %v5846_v36 = vpack.c.bf16 %v478_v28, %v470_v27  ;;  %v5864_v22 = vpack.c.bf16 %v559_v17, %v551_v16  ;;  %v550_v23 = vld [vmem:[%s14340_s2 + $0x820] sm:$0xff]  ;;  %v567_v28 = vld [vmem:[%s14340_s2 + $0x8a8] sm:$0xff] }
 0x12f   : > { %6081 = vmatprep.subr.bf16.mxu1 %v6080_v34  ;;  %v489_v34 = vld [vmem:[%s14340_s2 + $0x638] sm:$0xff]  ;;  %v6102_v37 = vpack.c.bf16 %v480_v31, %v472_v29  ;;  %v560_v27 = vld [vmem:[%s14340_s2 + $0x870] sm:$0xff]  ;;  %v575_v29 = vld [vmem:[%s14340_s2 + $0x8e8] sm:$0xff] }
 0x130   : > { %v577_v31 = vld [vmem:[%s14340_s2 + $0x8f8] sm:$0xff]  ;;  %v631_v16 = vld [vmem:[%s14340_s2 + $0xaa8] sm:$0xff] }
 0x131   : > { %5827 = vmatpush1.bf16.msra.mxu0 %v5826_v40  ;;  %v494_v40 = vld [vmem:[%s14340_s2 + $0x660] sm:$0xff]  ;;  %v7550_v5 = vld [vmem:[%s7653_s27 + $0x18] sm:$0xff]  ;;  %v639_v17 = vld [vmem:[%s14340_s2 + $0xae8] sm:$0xff] }
 0x132   : > { %6083 = vmatpush1.bf16.msra.mxu1 %v6082_v41  ;;  %5829 = vmatprep.subr.bf16.mxu0 %v5828_v42  ;;  %v488_v41 = vld [vmem:[%s14340_s2 + $0x630] sm:$0xff]  ;;  %v6104_v42 = vpack.c.bf16 %v497_v35, %v489_v34  ;;  %v5850_v48 = vpack.c.bf16 %v494_v40, %v486_v39  ;;  %v5868_v34 = vpack.c.bf16 %v575_v29, %v567_v28  ;;  %v566_v35 = vld [vmem:[%s14340_s2 + $0x8a0] sm:$0xff]  ;;  %v583_v40 = vld [vmem:[%s14340_s2 + $0x928] sm:$0xff] }
 0x133   : > { %6085 = vmatprep.subr.bf16.mxu1 %v6084_v46  ;;  %v505_v46 = vld [vmem:[%s14340_s2 + $0x6b8] sm:$0xff]  ;;  %v6106_v49 = vpack.c.bf16 %v496_v43, %v488_v41  ;;  %v576_v39 = vld [vmem:[%s14340_s2 + $0x8f0] sm:$0xff]  ;;  %v591_v41 = vld [vmem:[%s14340_s2 + $0x968] sm:$0xff] }
 0x134   : > { %v585_v43 = vld [vmem:[%s14340_s2 + $0x938] sm:$0xff]  ;;  %v647_v28 = vld [vmem:[%s14340_s2 + $0xb28] sm:$0xff] }
 0x135   : > { %5831 = vmatpush1.bf16.msra.mxu0 %v5830_v52  ;;  %v510_v52 = vld [vmem:[%s14340_s2 + $0x6e0] sm:$0xff]  ;;  %v655_v29 = vld [vmem:[%s14340_s2 + $0xb68] sm:$0xff] }
 0x136   : > { %6087 = vmatpush1.bf16.msra.mxu1 %v6086_v53  ;;  %5833 = vmatprep.subr.bf16.mxu0 %v5832_v54  ;;  %v504_v53 = vld [vmem:[%s14340_s2 + $0x6b0] sm:$0xff]  ;;  %v6108_v54 = vpack.c.bf16 %v513_v47, %v505_v46  ;;  %v5854_v60 = vpack.c.bf16 %v510_v52, %v502_v51  ;;  %v5872_v47 = vpack.c.bf16 %v591_v41, %v583_v40  ;;  %v663_v40 = vld [vmem:[%s14340_s2 + $0xba8] sm:$0xff] }
 0x137   : > { %6089 = vmatprep.subr.bf16.mxu1 %v6088_v58  ;;  %v521_v58 = vld [vmem:[%s14340_s2 + $0x738] sm:$0xff]  ;;  %v6110_v61 = vpack.c.bf16 %v512_v55, %v504_v53  ;;  %v6128_v51 = vpack.c.bf16 %v593_v44, %v585_v43  ;;  %v592_v52 = vld [vmem:[%s14340_s2 + $0x970] sm:$0xff]  ;;  %v599_v53 = vld [vmem:[%s14340_s2 + $0x9a8] sm:$0xff] }
 0x138   : > { %v7548_v55 = vld [vmem:[%s7653_s27 + $0x48] sm:$0xff]  ;;  %v673_v43 = vld [vmem:[%s14340_s2 + $0xbf8] sm:$0xff] }
 0x139   : > { %5835 = vmatpush1.bf16.msra.mxu0 %v5834_v0  ;;  %v526_v0 = vld [vmem:[%s14340_s2 + $0x760] sm:$0xff]  ;;  %v671_v41 = vld [vmem:[%s14340_s2 + $0xbe8] sm:$0xff] }
 0x13a   : > { %6091 = vmatpush1.bf16.msra.mxu1 %v6090_v1  ;;  %5837 = vmatprep.subr.bf16.mxu0 %v5836_v2  ;;  %v520_v1 = vld [vmem:[%s14340_s2 + $0x730] sm:$0xff]  ;;  %v6112_v2 = vpack.c.bf16 %v529_v59, %v521_v58  ;;  %v5858_v8 = vpack.c.bf16 %v526_v0, %v518_v63  ;;  %v7549_v58 = vld [vmem:[%s7653_s27 + $0x40] sm:$0xff] }
 0x13b   : > { %6093 = vmatprep.subr.bf16.mxu1 %v6092_v6  ;;  %v537_v6 = vld [vmem:[%s14340_s2 + $0x7b8] sm:$0xff]  ;;  %v6114_v9 = vpack.c.bf16 %v528_v3, %v520_v1  ;;  %v606_v63 = vld [vmem:[%s14340_s2 + $0x9e0] sm:$0xff]  ;;  %v600_v0 = vld [vmem:[%s14340_s2 + $0x9b0] sm:$0xff]  ;;  %v6132_v1 = vpack.c.bf16 %v609_v57, %v601_v56 }
 0x13c   : > { %v615_v3 = vld [vmem:[%s14340_s2 + $0xa28] sm:$0xff] }
 0x13d   : > { %5839 = vmatpush1.bf16.msra.mxu0 %v5838_v12  ;;  %v542_v12 = vld [vmem:[%s14340_s2 + $0x7e0] sm:$0xff] }
 0x13e   : > { %6095 = vmatpush1.bf16.msra.mxu1 %v6094_v13  ;;  %5841 = vmatprep.subr.bf16.mxu0 %v5840_v14  ;;  %v536_v13 = vld [vmem:[%s14340_s2 + $0x7b0] sm:$0xff]  ;;  %v6116_v14 = vpack.c.bf16 %v545_v7, %v537_v6  ;;  %v5862_v20 = vpack.c.bf16 %v542_v12, %v534_v11  ;;  %v617_v6 = vld [vmem:[%s14340_s2 + $0xa38] sm:$0xff]  ;;  %v614_v11 = vld [vmem:[%s14340_s2 + $0xa20] sm:$0xff] }
 0x13f   : > { %6097 = vmatprep.subr.bf16.mxu1 %v6096_v18  ;;  %v553_v18 = vld [vmem:[%s14340_s2 + $0x838] sm:$0xff]  ;;  %v6118_v21 = vpack.c.bf16 %v544_v15, %v536_v13  ;;  %v622_v12 = vld [vmem:[%s14340_s2 + $0xa60] sm:$0xff]  ;;  %v616_v13 = vld [vmem:[%s14340_s2 + $0xa30] sm:$0xff] }
 0x140   : > { %v625_v7 = vld [vmem:[%s14340_s2 + $0xa78] sm:$0xff]  ;;  %v624_v15 = vld [vmem:[%s14340_s2 + $0xa70] sm:$0xff] }
 0x141   : > { %5843 = vmatpush1.bf16.msra.mxu0 %v5842_v24  ;;  %v558_v24 = vld [vmem:[%s14340_s2 + $0x860] sm:$0xff] }
 0x142   : > { %6099 = vmatpush1.bf16.msra.mxu1 %v6098_v25  ;;  %5845 = vmatprep.subr.bf16.mxu0 %v5844_v26  ;;  %v552_v25 = vld [vmem:[%s14340_s2 + $0x830] sm:$0xff]  ;;  %v6120_v26 = vpack.c.bf16 %v561_v19, %v553_v18  ;;  %v5866_v32 = vpack.c.bf16 %v558_v24, %v550_v23  ;;  %v633_v18 = vld [vmem:[%s14340_s2 + $0xab8] sm:$0xff]  ;;  %v630_v23 = vld [vmem:[%s14340_s2 + $0xaa0] sm:$0xff] }
 0x143   : > { %6101 = vmatprep.subr.bf16.mxu1 %v6100_v30  ;;  %v569_v30 = vld [vmem:[%s14340_s2 + $0x8b8] sm:$0xff]  ;;  %v6122_v33 = vpack.c.bf16 %v560_v27, %v552_v25  ;;  %v638_v24 = vld [vmem:[%s14340_s2 + $0xae0] sm:$0xff]  ;;  %v632_v25 = vld [vmem:[%s14340_s2 + $0xab0] sm:$0xff] }
 0x144   : > { %v641_v19 = vld [vmem:[%s14340_s2 + $0xaf8] sm:$0xff]  ;;  %v640_v27 = vld [vmem:[%s14340_s2 + $0xaf0] sm:$0xff] }
 0x145   : > { %5847 = vmatpush1.bf16.msra.mxu0 %v5846_v36  ;;  %v574_v36 = vld [vmem:[%s14340_s2 + $0x8e0] sm:$0xff] }
 0x146   : > { %6103 = vmatpush1.bf16.msra.mxu1 %v6102_v37  ;;  %5849 = vmatprep.subr.bf16.mxu0 %v5848_v38  ;;  %v568_v37 = vld [vmem:[%s14340_s2 + $0x8b0] sm:$0xff]  ;;  %v6124_v38 = vpack.c.bf16 %v577_v31, %v569_v30  ;;  %v5870_v45 = vpack.c.bf16 %v574_v36, %v566_v35  ;;  %v649_v30 = vld [vmem:[%s14340_s2 + $0xb38] sm:$0xff]  ;;  %v646_v35 = vld [vmem:[%s14340_s2 + $0xb20] sm:$0xff] }
 0x147   : > { %6105 = vmatprep.subr.bf16.mxu1 %v6104_v42  ;;  %v7547_v42 = vld [vmem:[%s7653_s27] sm:$0xff]  ;;  %v6126_v46 = vpack.c.bf16 %v576_v39, %v568_v37  ;;  %v657_v31 = vld [vmem:[%s14340_s2 + $0xb78] sm:$0xff]  ;;  %v648_v37 = vld [vmem:[%s14340_s2 + $0xb30] sm:$0xff] }
 0x148   : > { %v654_v36 = vld [vmem:[%s14340_s2 + $0xb60] sm:$0xff]  ;;  %v656_v39 = vld [vmem:[%s14340_s2 + $0xb70] sm:$0xff] }
 0x149   : > { %5851 = vmatpush1.bf16.msra.mxu0 %v5850_v48  ;;  %v582_v48 = vld [vmem:[%s14340_s2 + $0x920] sm:$0xff]  ;;  %v5890_v44 = vpack.c.bf16 %v654_v36, %v646_v35  ;;  %v736_v35 = vld [vmem:[%s14340_s2 + $0xdf0] sm:$0xff]  ;;  %v743_v36 = vld [vmem:[%s14340_s2 + $0xe28] sm:$0xff] }
 0x14a   : > { %6107 = vmatpush1.bf16.msra.mxu1 %v6106_v49  ;;  %5853 = vmatprep.subr.bf16.mxu0 %v5852_v50  ;;  %v590_v49 = vld [vmem:[%s14340_s2 + $0x960] sm:$0xff]  ;;  %v584_v50 = vld [vmem:[%s14340_s2 + $0x930] sm:$0xff] }
 0x14b   : > { %6109 = vmatprep.subr.bf16.mxu1 %v6108_v54  ;;  %v607_v54 = vld [vmem:[%s14340_s2 + $0x9e8] sm:$0xff]  ;;  %v5874_v59 = vpack.c.bf16 %v590_v49, %v582_v48  ;;  %v670_v48 = vld [vmem:[%s14340_s2 + $0xbe0] sm:$0xff]  ;;  %v664_v49 = vld [vmem:[%s14340_s2 + $0xbb0] sm:$0xff] }
 0x14d   : > { %5855 = vmatpush1.bf16.msra.mxu0 %v5854_v60  ;;  %v6130_v60 = vpack.c.bf16 %v592_v52, %v584_v50  ;;  %v679_v52 = vld [vmem:[%s14340_s2 + $0xc28] sm:$0xff] }
 0x14e   : > { %6111 = vmatpush1.bf16.msra.mxu1 %v6110_v61  ;;  %5857 = vmatprep.subr.bf16.mxu0 %v5856_v62  ;;  %v5876_v61 = vpack.c.bf16 %v607_v54, %v599_v53  ;;  %v598_v62 = vld [vmem:[%s14340_s2 + $0x9a0] sm:$0xff]  ;;  %v687_v53 = vld [vmem:[%s14340_s2 + $0xc68] sm:$0xff]  ;;  %v681_v54 = vld [vmem:[%s14340_s2 + $0xc38] sm:$0xff] }
 0x14f   : > { %6113 = vmatprep.subr.bf16.mxu1 %v6112_v2  ;;  %v608_v2 = vld [vmem:[%s14340_s2 + $0x9f0] sm:$0xff] }
 0x151   : > { %5859 = vmatpush1.bf16.msra.mxu0 %v5858_v8  ;;  %v5878_v8 = vpack.c.bf16 %v606_v63, %v598_v62  ;;  %v688_v63 = vld [vmem:[%s14340_s2 + $0xc70] sm:$0xff] }
 0x152   : > { %6115 = vmatpush1.bf16.msra.mxu1 %v6114_v9  ;;  %5861 = vmatprep.subr.bf16.mxu0 %v5860_v10  ;;  %v6134_v9 = vpack.c.bf16 %v608_v2, %v600_v0  ;;  %v5880_v10 = vpack.c.bf16 %v623_v4, %v615_v3  ;;  %v695_v0 = vld [vmem:[%s14340_s2 + $0xca8] sm:$0xff]  ;;  %v697_v2 = vld [vmem:[%s14340_s2 + $0xcb8] sm:$0xff] }
 0x153   : > { %6117 = vmatprep.subr.bf16.mxu1 %v6116_v14  ;;  %v6136_v14 = vpack.c.bf16 %v625_v7, %v617_v6  ;;  %v705_v3 = vld [vmem:[%s14340_s2 + $0xcf8] sm:$0xff]  ;;  %v694_v7 = vld [vmem:[%s14340_s2 + $0xca0] sm:$0xff] }
 0x155   : > { %5863 = vmatpush1.bf16.msra.mxu0 %v5862_v20  ;;  %v5882_v20 = vpack.c.bf16 %v622_v12, %v614_v11  ;;  %v704_v11 = vld [vmem:[%s14340_s2 + $0xcf0] sm:$0xff]  ;;  %v711_v12 = vld [vmem:[%s14340_s2 + $0xd28] sm:$0xff] }
 0x156   : > { %6119 = vmatpush1.bf16.msra.mxu1 %v6118_v21  ;;  %5865 = vmatprep.subr.bf16.mxu0 %v5864_v22  ;;  %v6138_v21 = vpack.c.bf16 %v624_v15, %v616_v13  ;;  %v5884_v22 = vpack.c.bf16 %v639_v17, %v631_v16  ;;  %v719_v13 = vld [vmem:[%s14340_s2 + $0xd68] sm:$0xff]  ;;  %v721_v15 = vld [vmem:[%s14340_s2 + $0xd78] sm:$0xff] }
 0x157   : > { %6121 = vmatprep.subr.bf16.mxu1 %v6120_v26  ;;  %v6140_v26 = vpack.c.bf16 %v641_v19, %v633_v18  ;;  %v5904_v18 = vpack.c.bf16 %v719_v13, %v711_v12  ;;  %v710_v19 = vld [vmem:[%s14340_s2 + $0xd20] sm:$0xff] }
 0x158   : > { %2037 = vmatmul.mubr.f32.vlgmr.msra.gmra.mrb[4].mxu0 %v7547_v42 }
 0x159   : > { %5867 = vmatpush1.bf16.msra.mxu0 %v5866_v32  ;;  %2345 = vmatmul.mubr.f32.vlgmr.msra.gmra.mrb[4].mxu1 %v7547_v42  ;;  %v5886_v32 = vpack.c.bf16 %v638_v24, %v630_v23  ;;  %v665_v42 = vld [vmem:[%s14340_s2 + $0xbb8] sm:$0xff]  ;;  %v720_v23 = vld [vmem:[%s14340_s2 + $0xd70] sm:$0xff]  ;;  %v727_v24 = vld [vmem:[%s14340_s2 + $0xda8] sm:$0xff] }
 0x15a   : > { %6123 = vmatpush1.bf16.msra.mxu1 %v6122_v33  ;;  %5869 = vmatprep.subr.bf16.mxu0 %v5868_v34  ;;  %v6142_v33 = vpack.c.bf16 %v640_v27, %v632_v25  ;;  %v5888_v34 = vpack.c.bf16 %v655_v29, %v647_v28  ;;  %v6148_v50 = vpack.c.bf16 %v673_v43, %v665_v42  ;;  %v735_v25 = vld [vmem:[%s14340_s2 + $0xde8] sm:$0xff]  ;;  %v737_v27 = vld [vmem:[%s14340_s2 + $0xdf8] sm:$0xff]  ;;  %v742_v43 = vld [vmem:[%s14340_s2 + $0xe20] sm:$0xff] }
 0x15b   : > { %6125 = vmatprep.subr.bf16.mxu1 %v6124_v38  ;;  %2042 = vmatprep.mubr.f32.mxu0 %v7548_v55  ;;  %v6144_v38 = vpack.c.bf16 %v657_v31, %v649_v30  ;;  %v5908_v30 = vpack.c.bf16 %v735_v25, %v727_v24  ;;  %v726_v31 = vld [vmem:[%s14340_s2 + $0xda0] sm:$0xff] }
 0x15c   : > { %2350 = vmatprep.mubr.f32.mxu1 %v7548_v55  ;;  %2043 = vmatmul.mubr.f32.gmra.mrb[6].mxu0 %v7549_v58  ;;  %v689_v55 = vld [vmem:[%s14340_s2 + $0xc78] sm:$0xff] }
 0x15d   : > { %5871 = vmatpush1.bf16.msra.mxu0 %v5870_v45  ;;  %2351 = vmatmul.mubr.f32.gmra.mrb[6].mxu1 %v7549_v58  ;;  %v6146_v45 = vpack.c.bf16 %v656_v39, %v648_v37  ;;  %v5896_v58 = vpack.c.bf16 %v687_v53, %v679_v52  ;;  %v6152_v62 = vpack.c.bf16 %v689_v55, %v681_v54  ;;  %v751_v37 = vld [vmem:[%s14340_s2 + $0xe68] sm:$0xff]  ;;  %v753_v39 = vld [vmem:[%s14340_s2 + $0xe78] sm:$0xff]  ;;  %v758_v55 = vld [vmem:[%s14340_s2 + $0xea0] sm:$0xff] }
 0x15e   : > { %6127 = vmatpush1.bf16.msra.mxu1 %v6126_v46  ;;  %5873 = vmatprep.subr.bf16.mxu0 %v5872_v47  ;;  %v5892_v46 = vpack.c.bf16 %v671_v41, %v663_v40  ;;  %v662_v47 = vld [vmem:[%s14340_s2 + $0xba0] sm:$0xff]  ;;  %v5912_v42 = vpack.c.bf16 %v751_v37, %v743_v36 }
 0x15f   : > { %6129 = vmatprep.subr.bf16.mxu1 %v6128_v51  ;;  %2113 = vmatprep.mubr.f32.mxu0 %v7550_v5  ;;  %v672_v51 = vld [vmem:[%s14340_s2 + $0xbf0] sm:$0xff]  ;;  %v5894_v56 = vpack.c.bf16 %v670_v48, %v662_v47  ;;  %v759_v48 = vld [vmem:[%s14340_s2 + $0xea8] sm:$0xff] }
 0x160   : > { %2421 = vmatprep.mubr.f32.mxu1 %v7550_v5  ;;  %v6150_v57 = vpack.c.bf16 %v672_v51, %v664_v49  ;;  %v752_v47 = vld [vmem:[%s14340_s2 + $0xe70] sm:$0xff]  ;;  %v767_v49 = vld [vmem:[%s14340_s2 + $0xee8] sm:$0xff]  ;;  %v769_v51 = vld [vmem:[%s14340_s2 + $0xef8] sm:$0xff] }
 0x161   : > { %5875 = vmatpush1.bf16.msra.mxu0 %v5874_v59  ;;  %v678_v59 = vld [vmem:[%s14340_s2 + $0xc20] sm:$0xff]  ;;  %v5916_v54 = vpack.c.bf16 %v767_v49, %v759_v48  ;;  %v849_v48 = vld [vmem:[%s14340_s2 + $0x1178] sm:$0xff] }
 0x162   : > { %6131 = vmatpush1.bf16.msra.mxu1 %v6130_v60  ;;  %5877 = vmatprep.subr.bf16.mxu0 %v5876_v61  ;;  %v686_v60 = vld [vmem:[%s14340_s2 + $0xc60] sm:$0xff]  ;;  %v680_v61 = vld [vmem:[%s14340_s2 + $0xc30] sm:$0xff] }
 0x163   : > { %6133 = vmatprep.subr.bf16.mxu1 %v6132_v1  ;;  %v703_v1 = vld [vmem:[%s14340_s2 + $0xce8] sm:$0xff]  ;;  %v5898_v4 = vpack.c.bf16 %v686_v60, %v678_v59  ;;  %v6154_v5 = vpack.c.bf16 %v688_v63, %v680_v61  ;;  %v768_v59 = vld [vmem:[%s14340_s2 + $0xef0] sm:$0xff]  ;;  %v785_v63 = vld [vmem:[%s14340_s2 + $0xf78] sm:$0xff] }
 0x164   : > { %v5900_v6 = vpack.c.bf16 %v703_v1, %v695_v0  ;;  %v775_v60 = vld [vmem:[%s14340_s2 + $0xf28] sm:$0xff] }
 0x165   : > { %5879 = vmatpush1.bf16.msra.mxu0 %v5878_v8  ;;  %v702_v8 = vld [vmem:[%s14340_s2 + $0xce0] sm:$0xff]  ;;  %v783_v61 = vld [vmem:[%s14340_s2 + $0xf68] sm:$0xff] }
 0x166   : > { %6135 = vmatpush1.bf16.msra.mxu1 %v6134_v9  ;;  %5881 = vmatprep.subr.bf16.mxu0 %v5880_v10  ;;  %v696_v9 = vld [vmem:[%s14340_s2 + $0xcb0] sm:$0xff]  ;;  %v6156_v10 = vpack.c.bf16 %v705_v3, %v697_v2  ;;  %v5902_v16 = vpack.c.bf16 %v702_v8, %v694_v7  ;;  %v5920_v2 = vpack.c.bf16 %v783_v61, %v775_v60  ;;  %v774_v3 = vld [vmem:[%s14340_s2 + $0xf20] sm:$0xff]  ;;  %v791_v8 = vld [vmem:[%s14340_s2 + $0xfa8] sm:$0xff] }
 0x167   : > { %6137 = vmatprep.subr.bf16.mxu1 %v6136_v14  ;;  %v713_v14 = vld [vmem:[%s14340_s2 + $0xd38] sm:$0xff]  ;;  %v6158_v17 = vpack.c.bf16 %v704_v11, %v696_v9  ;;  %v784_v7 = vld [vmem:[%s14340_s2 + $0xf70] sm:$0xff]  ;;  %v799_v9 = vld [vmem:[%s14340_s2 + $0xfe8] sm:$0xff] }
 0x168   : > { %v801_v11 = vld [vmem:[%s14340_s2 + $0xff8] sm:$0xff] }
 0x169   : > { %5883 = vmatpush1.bf16.msra.mxu0 %v5882_v20  ;;  %v718_v20 = vld [vmem:[%s14340_s2 + $0xd60] sm:$0xff]  ;;  %v857_v60 = vld [vmem:[%s14340_s2 + $0x11b8] sm:$0xff] }
 0x16a   : > { %6139 = vmatpush1.bf16.msra.mxu1 %v6138_v21  ;;  %5885 = vmatprep.subr.bf16.mxu0 %v5884_v22  ;;  %v712_v21 = vld [vmem:[%s14340_s2 + $0xd30] sm:$0xff]  ;;  %v6160_v22 = vpack.c.bf16 %v721_v15, %v713_v14  ;;  %v5906_v28 = vpack.c.bf16 %v718_v20, %v710_v19  ;;  %v5924_v14 = vpack.c.bf16 %v799_v9, %v791_v8  ;;  %v790_v15 = vld [vmem:[%s14340_s2 + $0xfa0] sm:$0xff]  ;;  %v807_v20 = vld [vmem:[%s14340_s2 + $0x1028] sm:$0xff] }
 0x16b   : > { %6141 = vmatprep.subr.bf16.mxu1 %v6140_v26  ;;  %v729_v26 = vld [vmem:[%s14340_s2 + $0xdb8] sm:$0xff]  ;;  %v6162_v29 = vpack.c.bf16 %v720_v23, %v712_v21  ;;  %v800_v19 = vld [vmem:[%s14340_s2 + $0xff0] sm:$0xff]  ;;  %v815_v21 = vld [vmem:[%s14340_s2 + $0x1068] sm:$0xff] }
 0x16c   : > { %v817_v23 = vld [vmem:[%s14340_s2 + $0x1078] sm:$0xff]  ;;  %v879_v8 = vld [vmem:[%s14340_s2 + $0x1268] sm:$0xff] }
 0x16d   : > { %5887 = vmatpush1.bf16.msra.mxu0 %v5886_v32  ;;  %v734_v32 = vld [vmem:[%s14340_s2 + $0xde0] sm:$0xff]  ;;  %v865_v61 = vld [vmem:[%s14340_s2 + $0x11f8] sm:$0xff]  ;;  %v7554_v9 = vld [vmem:[%s7653_s27 + $0x28] sm:$0xff] }
 0x16e   : > { %6143 = vmatpush1.bf16.msra.mxu1 %v6142_v33  ;;  %5889 = vmatprep.subr.bf16.mxu0 %v5888_v34  ;;  %v728_v33 = vld [vmem:[%s14340_s2 + $0xdb0] sm:$0xff]  ;;  %v6164_v34 = vpack.c.bf16 %v737_v27, %v729_v26  ;;  %v5910_v40 = vpack.c.bf16 %v734_v32, %v726_v31  ;;  %v5928_v26 = vpack.c.bf16 %v815_v21, %v807_v20  ;;  %v806_v27 = vld [vmem:[%s14340_s2 + $0x1020] sm:$0xff]  ;;  %v823_v32 = vld [vmem:[%s14340_s2 + $0x10a8] sm:$0xff] }
 0x16f   : > { %6145 = vmatprep.subr.bf16.mxu1 %v6144_v38  ;;  %v745_v38 = vld [vmem:[%s14340_s2 + $0xe38] sm:$0xff]  ;;  %v6166_v41 = vpack.c.bf16 %v736_v35, %v728_v33  ;;  %v816_v31 = vld [vmem:[%s14340_s2 + $0x1070] sm:$0xff]  ;;  %v831_v33 = vld [vmem:[%s14340_s2 + $0x10e8] sm:$0xff] }
 0x170   : > { %v833_v35 = vld [vmem:[%s14340_s2 + $0x10f8] sm:$0xff]  ;;  %v887_v20 = vld [vmem:[%s14340_s2 + $0x12a8] sm:$0xff] }
 0x171   : > { %5891 = vmatpush1.bf16.msra.mxu0 %v5890_v44  ;;  %v750_v44 = vld [vmem:[%s14340_s2 + $0xe60] sm:$0xff]  ;;  %v895_v21 = vld [vmem:[%s14340_s2 + $0x12e8] sm:$0xff] }
 0x172   : > { %6147 = vmatpush1.bf16.msra.mxu1 %v6146_v45  ;;  %5893 = vmatprep.subr.bf16.mxu0 %v5892_v46  ;;  %v744_v45 = vld [vmem:[%s14340_s2 + $0xe30] sm:$0xff]  ;;  %v6168_v46 = vpack.c.bf16 %v753_v39, %v745_v38  ;;  %v5914_v52 = vpack.c.bf16 %v750_v44, %v742_v43  ;;  %v5932_v38 = vpack.c.bf16 %v831_v33, %v823_v32  ;;  %v822_v39 = vld [vmem:[%s14340_s2 + $0x10a0] sm:$0xff]  ;;  %v839_v44 = vld [vmem:[%s14340_s2 + $0x1128] sm:$0xff] }
 0x173   : > { %6149 = vmatprep.subr.bf16.mxu1 %v6148_v50  ;;  %v761_v50 = vld [vmem:[%s14340_s2 + $0xeb8] sm:$0xff]  ;;  %v6170_v53 = vpack.c.bf16 %v752_v47, %v744_v45  ;;  %v832_v43 = vld [vmem:[%s14340_s2 + $0x10f0] sm:$0xff]  ;;  %v847_v45 = vld [vmem:[%s14340_s2 + $0x1168] sm:$0xff] }
 0x174   : > { %v841_v47 = vld [vmem:[%s14340_s2 + $0x1138] sm:$0xff]  ;;  %v903_v32 = vld [vmem:[%s14340_s2 + $0x1328] sm:$0xff] }
 0x175   : > { %5895 = vmatpush1.bf16.msra.mxu0 %v5894_v56  ;;  %v766_v56 = vld [vmem:[%s14340_s2 + $0xee0] sm:$0xff]  ;;  %v911_v33 = vld [vmem:[%s14340_s2 + $0x1368] sm:$0xff] }
 0x176   : > { %6151 = vmatpush1.bf16.msra.mxu1 %v6150_v57  ;;  %5897 = vmatprep.subr.bf16.mxu0 %v5896_v58  ;;  %v760_v57 = vld [vmem:[%s14340_s2 + $0xeb0] sm:$0xff]  ;;  %v6172_v58 = vpack.c.bf16 %v769_v51, %v761_v50  ;;  %v5918_v0 = vpack.c.bf16 %v766_v56, %v758_v55  ;;  %v5936_v51 = vpack.c.bf16 %v847_v45, %v839_v44  ;;  %v919_v44 = vld [vmem:[%s14340_s2 + $0x13a8] sm:$0xff] }
 0x177   : > { %6153 = vmatprep.subr.bf16.mxu1 %v6152_v62  ;;  %v777_v62 = vld [vmem:[%s14340_s2 + $0xf38] sm:$0xff]  ;;  %v6174_v1 = vpack.c.bf16 %v768_v59, %v760_v57  ;;  %v6192_v55 = vpack.c.bf16 %v849_v48, %v841_v47  ;;  %v848_v56 = vld [vmem:[%s14340_s2 + $0x1170] sm:$0xff]  ;;  %v855_v57 = vld [vmem:[%s14340_s2 + $0x11a8] sm:$0xff] }
 0x178   : > { %v7552_v59 = vld [vmem:[%s7653_s27 + $0x58] sm:$0xff]  ;;  %v927_v45 = vld [vmem:[%s14340_s2 + $0x13e8] sm:$0xff] }
 0x179   : > { %5899 = vmatpush1.bf16.msra.mxu0 %v5898_v4  ;;  %v782_v4 = vld [vmem:[%s14340_s2 + $0xf60] sm:$0xff]  ;;  %v929_v47 = vld [vmem:[%s14340_s2 + $0x13f8] sm:$0xff] }
 0x17a   : > { %6155 = vmatpush1.bf16.msra.mxu1 %v6154_v5  ;;  %5901 = vmatprep.subr.bf16.mxu0 %v5900_v6  ;;  %v776_v5 = vld [vmem:[%s14340_s2 + $0xf30] sm:$0xff]  ;;  %v6176_v6 = vpack.c.bf16 %v785_v63, %v777_v62  ;;  %v5922_v12 = vpack.c.bf16 %v782_v4, %v774_v3  ;;  %v862_v3 = vld [vmem:[%s14340_s2 + $0x11e0] sm:$0xff] }
 0x17b   : > { %6157 = vmatprep.subr.bf16.mxu1 %v6156_v10  ;;  %v793_v10 = vld [vmem:[%s14340_s2 + $0xfb8] sm:$0xff]  ;;  %v6178_v13 = vpack.c.bf16 %v784_v7, %v776_v5  ;;  %v7553_v62 = vld [vmem:[%s7653_s27 + $0x50] sm:$0xff]  ;;  %v6196_v5 = vpack.c.bf16 %v865_v61, %v857_v60  ;;  %v871_v7 = vld [vmem:[%s14340_s2 + $0x1228] sm:$0xff] }
 0x17c   : > { %v856_v4 = vld [vmem:[%s14340_s2 + $0x11b0] sm:$0xff] }
 0x17d   : > { %5903 = vmatpush1.bf16.msra.mxu0 %v5902_v16  ;;  %v798_v16 = vld [vmem:[%s14340_s2 + $0xfe0] sm:$0xff] }
 0x17e   : > { %6159 = vmatpush1.bf16.msra.mxu1 %v6158_v17  ;;  %5905 = vmatprep.subr.bf16.mxu0 %v5904_v18  ;;  %v792_v17 = vld [vmem:[%s14340_s2 + $0xfb0] sm:$0xff]  ;;  %v6180_v18 = vpack.c.bf16 %v801_v11, %v793_v10  ;;  %v5926_v24 = vpack.c.bf16 %v798_v16, %v790_v15  ;;  %v873_v10 = vld [vmem:[%s14340_s2 + $0x1238] sm:$0xff]  ;;  %v870_v15 = vld [vmem:[%s14340_s2 + $0x1220] sm:$0xff] }
 0x17f   : > { %6161 = vmatprep.subr.bf16.mxu1 %v6160_v22  ;;  %v809_v22 = vld [vmem:[%s14340_s2 + $0x1038] sm:$0xff]  ;;  %v6182_v25 = vpack.c.bf16 %v800_v19, %v792_v17  ;;  %v878_v16 = vld [vmem:[%s14340_s2 + $0x1260] sm:$0xff]  ;;  %v872_v17 = vld [vmem:[%s14340_s2 + $0x1230] sm:$0xff] }
 0x180   : > { %v881_v11 = vld [vmem:[%s14340_s2 + $0x1278] sm:$0xff]  ;;  %v880_v19 = vld [vmem:[%s14340_s2 + $0x1270] sm:$0xff] }
 0x181   : > { %5907 = vmatpush1.bf16.msra.mxu0 %v5906_v28  ;;  %v814_v28 = vld [vmem:[%s14340_s2 + $0x1060] sm:$0xff] }
 0x182   : > { %6163 = vmatpush1.bf16.msra.mxu1 %v6162_v29  ;;  %5909 = vmatprep.subr.bf16.mxu0 %v5908_v30  ;;  %v808_v29 = vld [vmem:[%s14340_s2 + $0x1030] sm:$0xff]  ;;  %v6184_v30 = vpack.c.bf16 %v817_v23, %v809_v22  ;;  %v5930_v36 = vpack.c.bf16 %v814_v28, %v806_v27  ;;  %v889_v22 = vld [vmem:[%s14340_s2 + $0x12b8] sm:$0xff]  ;;  %v886_v27 = vld [vmem:[%s14340_s2 + $0x12a0] sm:$0xff] }
 0x183   : > { %6165 = vmatprep.subr.bf16.mxu1 %v6164_v34  ;;  %v825_v34 = vld [vmem:[%s14340_s2 + $0x10b8] sm:$0xff]  ;;  %v6186_v37 = vpack.c.bf16 %v816_v31, %v808_v29  ;;  %v894_v28 = vld [vmem:[%s14340_s2 + $0x12e0] sm:$0xff]  ;;  %v888_v29 = vld [vmem:[%s14340_s2 + $0x12b0] sm:$0xff] }
 0x184   : > { %v897_v23 = vld [vmem:[%s14340_s2 + $0x12f8] sm:$0xff]  ;;  %v896_v31 = vld [vmem:[%s14340_s2 + $0x12f0] sm:$0xff] }
 0x185   : > { %5911 = vmatpush1.bf16.msra.mxu0 %v5910_v40  ;;  %v830_v40 = vld [vmem:[%s14340_s2 + $0x10e0] sm:$0xff] }
 0x186   : > { %6167 = vmatpush1.bf16.msra.mxu1 %v6166_v41  ;;  %5913 = vmatprep.subr.bf16.mxu0 %v5912_v42  ;;  %v824_v41 = vld [vmem:[%s14340_s2 + $0x10b0] sm:$0xff]  ;;  %v6188_v42 = vpack.c.bf16 %v833_v35, %v825_v34  ;;  %v5934_v49 = vpack.c.bf16 %v830_v40, %v822_v39  ;;  %v905_v34 = vld [vmem:[%s14340_s2 + $0x1338] sm:$0xff]  ;;  %v902_v39 = vld [vmem:[%s14340_s2 + $0x1320] sm:$0xff] }
 0x187   : > { %6169 = vmatprep.subr.bf16.mxu1 %v6168_v46  ;;  %v7551_v46 = vld [vmem:[%s7653_s27 + $0x10] sm:$0xff]  ;;  %v6190_v50 = vpack.c.bf16 %v832_v43, %v824_v41  ;;  %v913_v35 = vld [vmem:[%s14340_s2 + $0x1378] sm:$0xff]  ;;  %v910_v40 = vld [vmem:[%s14340_s2 + $0x1360] sm:$0xff] }
 0x188   : > { %v904_v41 = vld [vmem:[%s14340_s2 + $0x1330] sm:$0xff]  ;;  %v5954_v48 = vpack.c.bf16 %v910_v40, %v902_v39  ;;  %v999_v40 = vld [vmem:[%s14340_s2 + $0x1628] sm:$0xff] }
 0x189   : > { %5915 = vmatpush1.bf16.msra.mxu0 %v5914_v52  ;;  %v838_v52 = vld [vmem:[%s14340_s2 + $0x1120] sm:$0xff]  ;;  %v912_v43 = vld [vmem:[%s14340_s2 + $0x1370] sm:$0xff] }
 0x18a   : > { %6171 = vmatpush1.bf16.msra.mxu1 %v6170_v53  ;;  %5917 = vmatprep.subr.bf16.mxu0 %v5916_v54  ;;  %v846_v53 = vld [vmem:[%s14340_s2 + $0x1160] sm:$0xff]  ;;  %v840_v54 = vld [vmem:[%s14340_s2 + $0x1130] sm:$0xff] }
 0x18b   : > { %6173 = vmatprep.subr.bf16.mxu1 %v6172_v58  ;;  %v863_v58 = vld [vmem:[%s14340_s2 + $0x11e8] sm:$0xff]  ;;  %v5938_v63 = vpack.c.bf16 %v846_v53, %v838_v52  ;;  %v926_v52 = vld [vmem:[%s14340_s2 + $0x13e0] sm:$0xff]  ;;  %v920_v53 = vld [vmem:[%s14340_s2 + $0x13b0] sm:$0xff] }
 0x18c   : > { %v992_v39 = vld [vmem:[%s14340_s2 + $0x15f0] sm:$0xff] }
 0x18d   : > { %5919 = vmatpush1.bf16.msra.mxu0 %v5918_v0  ;;  %v6194_v0 = vpack.c.bf16 %v848_v56, %v840_v54  ;;  %v935_v56 = vld [vmem:[%s14340_s2 + $0x1428] sm:$0xff] }
 0x18e   : > { %6175 = vmatpush1.bf16.msra.mxu1 %v6174_v1  ;;  %5921 = vmatprep.subr.bf16.mxu0 %v5920_v2  ;;  %v5940_v1 = vpack.c.bf16 %v863_v58, %v855_v57  ;;  %v854_v2 = vld [vmem:[%s14340_s2 + $0x11a0] sm:$0xff]  ;;  %v943_v57 = vld [vmem:[%s14340_s2 + $0x1468] sm:$0xff]  ;;  %v937_v58 = vld [vmem:[%s14340_s2 + $0x1438] sm:$0xff] }
 0x18f   : > { %6177 = vmatprep.subr.bf16.mxu1 %v6176_v6  ;;  %v864_v6 = vld [vmem:[%s14340_s2 + $0x11f0] sm:$0xff] }
 0x191   : > { %5923 = vmatpush1.bf16.msra.mxu0 %v5922_v12  ;;  %v5942_v12 = vpack.c.bf16 %v862_v3, %v854_v2  ;;  %v944_v3 = vld [vmem:[%s14340_s2 + $0x1470] sm:$0xff] }
 0x192   : > { %6179 = vmatpush1.bf16.msra.mxu1 %v6178_v13  ;;  %5925 = vmatprep.subr.bf16.mxu0 %v5924_v14  ;;  %v6198_v13 = vpack.c.bf16 %v864_v6, %v856_v4  ;;  %v5944_v14 = vpack.c.bf16 %v879_v8, %v871_v7  ;;  %v951_v4 = vld [vmem:[%s14340_s2 + $0x14a8] sm:$0xff]  ;;  %v953_v6 = vld [vmem:[%s14340_s2 + $0x14b8] sm:$0xff] }
 0x193   : > { %6181 = vmatprep.subr.bf16.mxu1 %v6180_v18  ;;  %v6200_v18 = vpack.c.bf16 %v881_v11, %v873_v10  ;;  %v961_v7 = vld [vmem:[%s14340_s2 + $0x14f8] sm:$0xff]  ;;  %v950_v11 = vld [vmem:[%s14340_s2 + $0x14a0] sm:$0xff] }
 0x195   : > { %5927 = vmatpush1.bf16.msra.mxu0 %v5926_v24  ;;  %v5946_v24 = vpack.c.bf16 %v878_v16, %v870_v15  ;;  %v960_v15 = vld [vmem:[%s14340_s2 + $0x14f0] sm:$0xff]  ;;  %v967_v16 = vld [vmem:[%s14340_s2 + $0x1528] sm:$0xff] }
 0x196   : > { %6183 = vmatpush1.bf16.msra.mxu1 %v6182_v25  ;;  %5929 = vmatprep.subr.bf16.mxu0 %v5928_v26  ;;  %v6202_v25 = vpack.c.bf16 %v880_v19, %v872_v17  ;;  %v5948_v26 = vpack.c.bf16 %v895_v21, %v887_v20  ;;  %v975_v17 = vld [vmem:[%s14340_s2 + $0x1568] sm:$0xff]  ;;  %v977_v19 = vld [vmem:[%s14340_s2 + $0x1578] sm:$0xff] }
 0x197   : > { %6185 = vmatprep.subr.bf16.mxu1 %v6184_v30  ;;  %v6204_v30 = vpack.c.bf16 %v897_v23, %v889_v22  ;;  %v5968_v22 = vpack.c.bf16 %v975_v17, %v967_v16  ;;  %v966_v23 = vld [vmem:[%s14340_s2 + $0x1520] sm:$0xff] }
 0x198   : > { %2114 = vmatmul.mubr.f32.vlgmr.msra.gmra.mrb[4].mxu0 %v7551_v46 }
 0x199   : > { %5931 = vmatpush1.bf16.msra.mxu0 %v5930_v36  ;;  %2422 = vmatmul.mubr.f32.vlgmr.msra.gmra.mrb[4].mxu1 %v7551_v46  ;;  %v5950_v36 = vpack.c.bf16 %v894_v28, %v886_v27  ;;  %v921_v46 = vld [vmem:[%s14340_s2 + $0x13b8] sm:$0xff]  ;;  %v976_v27 = vld [vmem:[%s14340_s2 + $0x1570] sm:$0xff]  ;;  %v983_v28 = vld [vmem:[%s14340_s2 + $0x15a8] sm:$0xff] }
 0x19a   : > { %6187 = vmatpush1.bf16.msra.mxu1 %v6186_v37  ;;  %5933 = vmatprep.subr.bf16.mxu0 %v5932_v38  ;;  %v6206_v37 = vpack.c.bf16 %v896_v31, %v888_v29  ;;  %v5952_v38 = vpack.c.bf16 %v911_v33, %v903_v32  ;;  %v6212_v54 = vpack.c.bf16 %v929_v47, %v921_v46  ;;  %v991_v29 = vld [vmem:[%s14340_s2 + $0x15e8] sm:$0xff]  ;;  %v993_v31 = vld [vmem:[%s14340_s2 + $0x15f8] sm:$0xff]  ;;  %v998_v47 = vld [vmem:[%s14340_s2 + $0x1620] sm:$0xff] }
 0x19b   : > { %6189 = vmatprep.subr.bf16.mxu1 %v6188_v42  ;;  %2119 = vmatprep.mubr.f32.mxu0 %v7552_v59  ;;  %v6208_v42 = vpack.c.bf16 %v913_v35, %v905_v34  ;;  %v5972_v34 = vpack.c.bf16 %v991_v29, %v983_v28  ;;  %v982_v35 = vld [vmem:[%s14340_s2 + $0x15a0] sm:$0xff] }
 0x19c   : > { %2427 = vmatprep.mubr.f32.mxu1 %v7552_v59  ;;  %2120 = vmatmul.mubr.f32.gmra.mrb[6].mxu0 %v7553_v62  ;;  %v945_v59 = vld [vmem:[%s14340_s2 + $0x1478] sm:$0xff] }
 0x19d   : > { %5935 = vmatpush1.bf16.msra.mxu0 %v5934_v49  ;;  %2428 = vmatmul.mubr.f32.gmra.mrb[6].mxu1 %v7553_v62  ;;  %v6210_v49 = vpack.c.bf16 %v912_v43, %v904_v41  ;;  %v5960_v62 = vpack.c.bf16 %v943_v57, %v935_v56  ;;  %v6216_v2 = vpack.c.bf16 %v945_v59, %v937_v58  ;;  %v1007_v41 = vld [vmem:[%s14340_s2 + $0x1668] sm:$0xff]  ;;  %v1009_v43 = vld [vmem:[%s14340_s2 + $0x1678] sm:$0xff]  ;;  %v1014_v59 = vld [vmem:[%s14340_s2 + $0x16a0] sm:$0xff] }
 0x19e   : > { %6191 = vmatpush1.bf16.msra.mxu1 %v6190_v50  ;;  %5937 = vmatprep.subr.bf16.mxu0 %v5936_v51  ;;  %v5956_v50 = vpack.c.bf16 %v927_v45, %v919_v44  ;;  %v918_v51 = vld [vmem:[%s14340_s2 + $0x13a0] sm:$0xff]  ;;  %v5976_v46 = vpack.c.bf16 %v1007_v41, %v999_v40 }
 0x19f   : > { %6193 = vmatprep.subr.bf16.mxu1 %v6192_v55  ;;  %2190 = vmatprep.mubr.f32.mxu0 %v7554_v9  ;;  %v928_v55 = vld [vmem:[%s14340_s2 + $0x13f0] sm:$0xff]  ;;  %v5958_v60 = vpack.c.bf16 %v926_v52, %v918_v51  ;;  %v1015_v52 = vld [vmem:[%s14340_s2 + $0x16a8] sm:$0xff] }
 0x1a0   : > { %2498 = vmatprep.mubr.f32.mxu1 %v7554_v9  ;;  %v6214_v61 = vpack.c.bf16 %v928_v55, %v920_v53  ;;  %v1008_v51 = vld [vmem:[%s14340_s2 + $0x1670] sm:$0xff]  ;;  %v1023_v53 = vld [vmem:[%s14340_s2 + $0x16e8] sm:$0xff]  ;;  %v1025_v55 = vld [vmem:[%s14340_s2 + $0x16f8] sm:$0xff] }
 0x1a1   : > { %5939 = vmatpush1.bf16.msra.mxu0 %v5938_v63  ;;  %v934_v63 = vld [vmem:[%s14340_s2 + $0x1420] sm:$0xff]  ;;  %v5980_v58 = vpack.c.bf16 %v1023_v53, %v1015_v52  ;;  %v1105_v52 = vld [vmem:[%s14340_s2 + $0x1978] sm:$0xff] }
 0x1a2   : > { %6195 = vmatpush1.bf16.msra.mxu1 %v6194_v0  ;;  %5941 = vmatprep.subr.bf16.mxu0 %v5940_v1  ;;  %v942_v0 = vld [vmem:[%s14340_s2 + $0x1460] sm:$0xff]  ;;  %v936_v1 = vld [vmem:[%s14340_s2 + $0x1430] sm:$0xff] }
 0x1a3   : > { %6197 = vmatprep.subr.bf16.mxu1 %v6196_v5  ;;  %v959_v5 = vld [vmem:[%s14340_s2 + $0x14e8] sm:$0xff]  ;;  %v5962_v8 = vpack.c.bf16 %v942_v0, %v934_v63  ;;  %v6218_v9 = vpack.c.bf16 %v944_v3, %v936_v1  ;;  %v1024_v63 = vld [vmem:[%s14340_s2 + $0x16f0] sm:$0xff]  ;;  %v1041_v3 = vld [vmem:[%s14340_s2 + $0x1778] sm:$0xff] }
 0x1a4   : > { %v5964_v10 = vpack.c.bf16 %v959_v5, %v951_v4  ;;  %v1031_v0 = vld [vmem:[%s14340_s2 + $0x1728] sm:$0xff] }
 0x1a5   : > { %5943 = vmatpush1.bf16.msra.mxu0 %v5942_v12  ;;  %v958_v12 = vld [vmem:[%s14340_s2 + $0x14e0] sm:$0xff]  ;;  %v1039_v1 = vld [vmem:[%s14340_s2 + $0x1768] sm:$0xff] }
 0x1a6   : > { %6199 = vmatpush1.bf16.msra.mxu1 %v6198_v13  ;;  %5945 = vmatprep.subr.bf16.mxu0 %v5944_v14  ;;  %v952_v13 = vld [vmem:[%s14340_s2 + $0x14b0] sm:$0xff]  ;;  %v6220_v14 = vpack.c.bf16 %v961_v7, %v953_v6  ;;  %v5966_v20 = vpack.c.bf16 %v958_v12, %v950_v11  ;;  %v5984_v6 = vpack.c.bf16 %v1039_v1, %v1031_v0  ;;  %v1030_v7 = vld [vmem:[%s14340_s2 + $0x1720] sm:$0xff]  ;;  %v1047_v12 = vld [vmem:[%s14340_s2 + $0x17a8] sm:$0xff] }
 0x1a7   : > { %6201 = vmatprep.subr.bf16.mxu1 %v6200_v18  ;;  %v969_v18 = vld [vmem:[%s14340_s2 + $0x1538] sm:$0xff]  ;;  %v6222_v21 = vpack.c.bf16 %v960_v15, %v952_v13  ;;  %v1040_v11 = vld [vmem:[%s14340_s2 + $0x1770] sm:$0xff]  ;;  %v1055_v13 = vld [vmem:[%s14340_s2 + $0x17e8] sm:$0xff] }
 0x1a8   : > { %v1057_v15 = vld [vmem:[%s14340_s2 + $0x17f8] sm:$0xff] }
 0x1a9   : > { %5947 = vmatpush1.bf16.msra.mxu0 %v5946_v24  ;;  %v974_v24 = vld [vmem:[%s14340_s2 + $0x1560] sm:$0xff]  ;;  %v1113_v0 = vld [vmem:[%s14340_s2 + $0x19b8] sm:$0xff] }
 0x1aa   : > { %6203 = vmatpush1.bf16.msra.mxu1 %v6202_v25  ;;  %5949 = vmatprep.subr.bf16.mxu0 %v5948_v26  ;;  %v968_v25 = vld [vmem:[%s14340_s2 + $0x1530] sm:$0xff]  ;;  %v6224_v26 = vpack.c.bf16 %v977_v19, %v969_v18  ;;  %v5970_v32 = vpack.c.bf16 %v974_v24, %v966_v23  ;;  %v5988_v18 = vpack.c.bf16 %v1055_v13, %v1047_v12  ;;  %v1046_v19 = vld [vmem:[%s14340_s2 + $0x17a0] sm:$0xff]  ;;  %v1063_v24 = vld [vmem:[%s14340_s2 + $0x1828] sm:$0xff] }
 0x1ab   : > { %6205 = vmatprep.subr.bf16.mxu1 %v6204_v30  ;;  %v985_v30 = vld [vmem:[%s14340_s2 + $0x15b8] sm:$0xff]  ;;  %v6226_v33 = vpack.c.bf16 %v976_v27, %v968_v25  ;;  %v1056_v23 = vld [vmem:[%s14340_s2 + $0x17f0] sm:$0xff]  ;;  %v1071_v25 = vld [vmem:[%s14340_s2 + $0x1868] sm:$0xff] }
 0x1ac   : > { %v1073_v27 = vld [vmem:[%s14340_s2 + $0x1878] sm:$0xff]  ;;  %v1135_v12 = vld [vmem:[%s14340_s2 + $0x1a68] sm:$0xff] }
 0x1ad   : > { %5951 = vmatpush1.bf16.msra.mxu0 %v5950_v36  ;;  %v990_v36 = vld [vmem:[%s14340_s2 + $0x15e0] sm:$0xff]  ;;  %v1121_v1 = vld [vmem:[%s14340_s2 + $0x19f8] sm:$0xff] }
 0x1ae   : > { %6207 = vmatpush1.bf16.msra.mxu1 %v6206_v37  ;;  %5953 = vmatprep.subr.bf16.mxu0 %v5952_v38  ;;  %v984_v37 = vld [vmem:[%s14340_s2 + $0x15b0] sm:$0xff]  ;;  %v6228_v38 = vpack.c.bf16 %v993_v31, %v985_v30  ;;  %v5974_v44 = vpack.c.bf16 %v990_v36, %v982_v35  ;;  %v5992_v30 = vpack.c.bf16 %v1071_v25, %v1063_v24  ;;  %v1062_v31 = vld [vmem:[%s14340_s2 + $0x1820] sm:$0xff]  ;;  %v1079_v36 = vld [vmem:[%s14340_s2 + $0x18a8] sm:$0xff] }
 0x1af   : > { %6209 = vmatprep.subr.bf16.mxu1 %v6208_v42  ;;  %v1001_v42 = vld [vmem:[%s14340_s2 + $0x1638] sm:$0xff]  ;;  %v6230_v45 = vpack.c.bf16 %v992_v39, %v984_v37  ;;  %v1072_v35 = vld [vmem:[%s14340_s2 + $0x1870] sm:$0xff]  ;;  %v1087_v37 = vld [vmem:[%s14340_s2 + $0x18e8] sm:$0xff] }
 0x1b0   : > { %v1089_v39 = vld [vmem:[%s14340_s2 + $0x18f8] sm:$0xff]  ;;  %v1143_v24 = vld [vmem:[%s14340_s2 + $0x1aa8] sm:$0xff] }
 0x1b1   : > { %5955 = vmatpush1.bf16.msra.mxu0 %v5954_v48  ;;  %v1006_v48 = vld [vmem:[%s14340_s2 + $0x1660] sm:$0xff]  ;;  %v7558_v13 = vld [vmem:[%s7653_s27 + $0x38] sm:$0xff]  ;;  %v1151_v25 = vld [vmem:[%s14340_s2 + $0x1ae8] sm:$0xff] }
 0x1b2   : > { %6211 = vmatpush1.bf16.msra.mxu1 %v6210_v49  ;;  %5957 = vmatprep.subr.bf16.mxu0 %v5956_v50  ;;  %v1000_v49 = vld [vmem:[%s14340_s2 + $0x1630] sm:$0xff]  ;;  %v6232_v50 = vpack.c.bf16 %v1009_v43, %v1001_v42  ;;  %v5978_v56 = vpack.c.bf16 %v1006_v48, %v998_v47  ;;  %v5996_v42 = vpack.c.bf16 %v1087_v37, %v1079_v36  ;;  %v1078_v43 = vld [vmem:[%s14340_s2 + $0x18a0] sm:$0xff]  ;;  %v1095_v48 = vld [vmem:[%s14340_s2 + $0x1928] sm:$0xff] }
 0x1b3   : > { %6213 = vmatprep.subr.bf16.mxu1 %v6212_v54  ;;  %v1017_v54 = vld [vmem:[%s14340_s2 + $0x16b8] sm:$0xff]  ;;  %v6234_v57 = vpack.c.bf16 %v1008_v51, %v1000_v49  ;;  %v1088_v47 = vld [vmem:[%s14340_s2 + $0x18f0] sm:$0xff]  ;;  %v1103_v49 = vld [vmem:[%s14340_s2 + $0x1968] sm:$0xff] }
 0x1b4   : > { %v1097_v51 = vld [vmem:[%s14340_s2 + $0x1938] sm:$0xff]  ;;  %v1159_v36 = vld [vmem:[%s14340_s2 + $0x1b28] sm:$0xff] }
 0x1b5   : > { %5959 = vmatpush1.bf16.msra.mxu0 %v5958_v60  ;;  %v1022_v60 = vld [vmem:[%s14340_s2 + $0x16e0] sm:$0xff]  ;;  %v1167_v37 = vld [vmem:[%s14340_s2 + $0x1b68] sm:$0xff] }
 0x1b6   : > { %6215 = vmatpush1.bf16.msra.mxu1 %v6214_v61  ;;  %5961 = vmatprep.subr.bf16.mxu0 %v5960_v62  ;;  %v1016_v61 = vld [vmem:[%s14340_s2 + $0x16b0] sm:$0xff]  ;;  %v6236_v62 = vpack.c.bf16 %v1025_v55, %v1017_v54  ;;  %v5982_v4 = vpack.c.bf16 %v1022_v60, %v1014_v59  ;;  %v6000_v55 = vpack.c.bf16 %v1103_v49, %v1095_v48  ;;  %v1175_v49 = vld [vmem:[%s14340_s2 + $0x1ba8] sm:$0xff] }
 0x1b7   : > { %6217 = vmatprep.subr.bf16.mxu1 %v6216_v2  ;;  %v1033_v2 = vld [vmem:[%s14340_s2 + $0x1738] sm:$0xff]  ;;  %v6238_v5 = vpack.c.bf16 %v1024_v63, %v1016_v61  ;;  %v6256_v59 = vpack.c.bf16 %v1105_v52, %v1097_v51  ;;  %v1104_v60 = vld [vmem:[%s14340_s2 + $0x1970] sm:$0xff]  ;;  %v1111_v61 = vld [vmem:[%s14340_s2 + $0x19a8] sm:$0xff] }
 0x1b8   : > { %v7556_v63 = vld [vmem:[%s7653_s27 + $0x68] sm:$0xff]  ;;  %v1168_v48 = vld [vmem:[%s14340_s2 + $0x1b70] sm:$0xff] }
 0x1b9   : > { %5963 = vmatpush1.bf16.msra.mxu0 %v5962_v8  ;;  %v1038_v8 = vld [vmem:[%s14340_s2 + $0x1760] sm:$0xff] }
 0x1ba   : > { %6219 = vmatpush1.bf16.msra.mxu1 %v6218_v9  ;;  %5965 = vmatprep.subr.bf16.mxu0 %v5964_v10  ;;  %v1032_v9 = vld [vmem:[%s14340_s2 + $0x1730] sm:$0xff]  ;;  %v6240_v10 = vpack.c.bf16 %v1041_v3, %v1033_v2  ;;  %v5986_v16 = vpack.c.bf16 %v1038_v8, %v1030_v7  ;;  %v7557_v2 = vld [vmem:[%s7653_s27 + $0x60] sm:$0xff] }
 0x1bb   : > { %6221 = vmatprep.subr.bf16.mxu1 %v6220_v14  ;;  %v1049_v14 = vld [vmem:[%s14340_s2 + $0x17b8] sm:$0xff]  ;;  %v6242_v17 = vpack.c.bf16 %v1040_v11, %v1032_v9  ;;  %v1118_v7 = vld [vmem:[%s14340_s2 + $0x19e0] sm:$0xff]  ;;  %v1112_v8 = vld [vmem:[%s14340_s2 + $0x19b0] sm:$0xff]  ;;  %v6260_v9 = vpack.c.bf16 %v1121_v1, %v1113_v0 }
 0x1bc   : > { %v1127_v11 = vld [vmem:[%s14340_s2 + $0x1a28] sm:$0xff]  ;;  %v1184_v0 = vld [vmem:[%s14340_s2 + $0x1bf0] sm:$0xff] }
 0x1bd   : > { %5967 = vmatpush1.bf16.msra.mxu0 %v5966_v20  ;;  %v1054_v20 = vld [vmem:[%s14340_s2 + $0x17e0] sm:$0xff]  ;;  %v1191_v1 = vld [vmem:[%s14340_s2 + $0x1c28] sm:$0xff] }
 0x1be   : > { %6223 = vmatpush1.bf16.msra.mxu1 %v6222_v21  ;;  %5969 = vmatprep.subr.bf16.mxu0 %v5968_v22  ;;  %v1048_v21 = vld [vmem:[%s14340_s2 + $0x17b0] sm:$0xff]  ;;  %v6244_v22 = vpack.c.bf16 %v1057_v15, %v1049_v14  ;;  %v5990_v28 = vpack.c.bf16 %v1054_v20, %v1046_v19  ;;  %v1129_v14 = vld [vmem:[%s14340_s2 + $0x1a38] sm:$0xff]  ;;  %v1126_v19 = vld [vmem:[%s14340_s2 + $0x1a20] sm:$0xff] }
 0x1bf   : > { %6225 = vmatprep.subr.bf16.mxu1 %v6224_v26  ;;  %v1065_v26 = vld [vmem:[%s14340_s2 + $0x1838] sm:$0xff]  ;;  %v6246_v29 = vpack.c.bf16 %v1056_v23, %v1048_v21  ;;  %v1134_v20 = vld [vmem:[%s14340_s2 + $0x1a60] sm:$0xff]  ;;  %v1128_v21 = vld [vmem:[%s14340_s2 + $0x1a30] sm:$0xff] }
 0x1c0   : > { %v1137_v15 = vld [vmem:[%s14340_s2 + $0x1a78] sm:$0xff]  ;;  %v1136_v23 = vld [vmem:[%s14340_s2 + $0x1a70] sm:$0xff] }
 0x1c1   : > { %5971 = vmatpush1.bf16.msra.mxu0 %v5970_v32  ;;  %v1070_v32 = vld [vmem:[%s14340_s2 + $0x1860] sm:$0xff] }
 0x1c2   : > { %6227 = vmatpush1.bf16.msra.mxu1 %v6226_v33  ;;  %5973 = vmatprep.subr.bf16.mxu0 %v5972_v34  ;;  %v1064_v33 = vld [vmem:[%s14340_s2 + $0x1830] sm:$0xff]  ;;  %v6248_v34 = vpack.c.bf16 %v1073_v27, %v1065_v26  ;;  %v5994_v40 = vpack.c.bf16 %v1070_v32, %v1062_v31  ;;  %v1145_v26 = vld [vmem:[%s14340_s2 + $0x1ab8] sm:$0xff]  ;;  %v1142_v31 = vld [vmem:[%s14340_s2 + $0x1aa0] sm:$0xff] }
 0x1c3   : > { %6229 = vmatprep.subr.bf16.mxu1 %v6228_v38  ;;  %v1081_v38 = vld [vmem:[%s14340_s2 + $0x18b8] sm:$0xff]  ;;  %v6250_v41 = vpack.c.bf16 %v1072_v35, %v1064_v33  ;;  %v1150_v32 = vld [vmem:[%s14340_s2 + $0x1ae0] sm:$0xff]  ;;  %v1144_v33 = vld [vmem:[%s14340_s2 + $0x1ab0] sm:$0xff] }
 0x1c4   : > { %v1153_v27 = vld [vmem:[%s14340_s2 + $0x1af8] sm:$0xff]  ;;  %v1152_v35 = vld [vmem:[%s14340_s2 + $0x1af0] sm:$0xff] }
 0x1c5   : > { %5975 = vmatpush1.bf16.msra.mxu0 %v5974_v44  ;;  %v1086_v44 = vld [vmem:[%s14340_s2 + $0x18e0] sm:$0xff] }
 0x1c6   : > { %6231 = vmatpush1.bf16.msra.mxu1 %v6230_v45  ;;  %5977 = vmatprep.subr.bf16.mxu0 %v5976_v46  ;;  %v1080_v45 = vld [vmem:[%s14340_s2 + $0x18b0] sm:$0xff]  ;;  %v6252_v46 = vpack.c.bf16 %v1089_v39, %v1081_v38  ;;  %v5998_v53 = vpack.c.bf16 %v1086_v44, %v1078_v43  ;;  %v1161_v38 = vld [vmem:[%s14340_s2 + $0x1b38] sm:$0xff]  ;;  %v1158_v43 = vld [vmem:[%s14340_s2 + $0x1b20] sm:$0xff] }
 0x1c7   : > { %6233 = vmatprep.subr.bf16.mxu1 %v6232_v50  ;;  %v7555_v50 = vld [vmem:[%s7653_s27 + $0x20] sm:$0xff]  ;;  %v6254_v54 = vpack.c.bf16 %v1088_v47, %v1080_v45  ;;  %v1169_v39 = vld [vmem:[%s14340_s2 + $0x1b78] sm:$0xff]  ;;  %v1160_v45 = vld [vmem:[%s14340_s2 + $0x1b30] sm:$0xff] }
 0x1c8   : > { %v1166_v44 = vld [vmem:[%s14340_s2 + $0x1b60] sm:$0xff]  ;;  %v6272_v47 = vpack.c.bf16 %v1169_v39, %v1161_v38  ;;  %v1232_v39 = vld [vmem:[%s14340_s2 + $0x1d70] sm:$0xff] }
 0x1c9   : > { %5979 = vmatpush1.bf16.msra.mxu0 %v5978_v56  ;;  %v1094_v56 = vld [vmem:[%s14340_s2 + $0x1920] sm:$0xff] }
 0x1ca   : > { %6235 = vmatpush1.bf16.msra.mxu1 %v6234_v57  ;;  %5981 = vmatprep.subr.bf16.mxu0 %v5980_v58  ;;  %v1102_v57 = vld [vmem:[%s14340_s2 + $0x1960] sm:$0xff]  ;;  %v1096_v58 = vld [vmem:[%s14340_s2 + $0x1930] sm:$0xff] }
 0x1cb   : > { %6237 = vmatprep.subr.bf16.mxu1 %v6236_v62  ;;  %v1119_v62 = vld [vmem:[%s14340_s2 + $0x19e8] sm:$0xff]  ;;  %v6002_v3 = vpack.c.bf16 %v1102_v57, %v1094_v56  ;;  %v6018_v56 = vpack.c.bf16 %v1166_v44, %v1158_v43  ;;  %v6274_v57 = vpack.c.bf16 %v1168_v48, %v1160_v45  ;;  %v1249_v43 = vld [vmem:[%s14340_s2 + $0x1df8] sm:$0xff]  ;;  %v1238_v48 = vld [vmem:[%s14340_s2 + $0x1da0] sm:$0xff] }
 0x1cd   : > { %5983 = vmatpush1.bf16.msra.mxu0 %v5982_v4  ;;  %v6258_v4 = vpack.c.bf16 %v1104_v60, %v1096_v58  ;;  %v1182_v60 = vld [vmem:[%s14340_s2 + $0x1be0] sm:$0xff] }
 0x1ce   : > { %6239 = vmatpush1.bf16.msra.mxu1 %v6238_v5  ;;  %5985 = vmatprep.subr.bf16.mxu0 %v5984_v6  ;;  %v6004_v5 = vpack.c.bf16 %v1119_v62, %v1111_v61  ;;  %v1110_v6 = vld [vmem:[%s14340_s2 + $0x19a0] sm:$0xff]  ;;  %v1176_v61 = vld [vmem:[%s14340_s2 + $0x1bb0] sm:$0xff] }
 0x1cf   : > { %6241 = vmatprep.subr.bf16.mxu1 %v6240_v10  ;;  %v1120_v10 = vld [vmem:[%s14340_s2 + $0x19f0] sm:$0xff] }
 0x1d1   : > { %5987 = vmatpush1.bf16.msra.mxu0 %v5986_v16  ;;  %v6006_v16 = vpack.c.bf16 %v1118_v7, %v1110_v6  ;;  %v1201_v6 = vld [vmem:[%s14340_s2 + $0x1c78] sm:$0xff] }
 0x1d2   : > { %6243 = vmatpush1.bf16.msra.mxu1 %v6242_v17  ;;  %5989 = vmatprep.subr.bf16.mxu0 %v5988_v18  ;;  %v6262_v17 = vpack.c.bf16 %v1120_v10, %v1112_v8  ;;  %v6008_v18 = vpack.c.bf16 %v1135_v12, %v1127_v11  ;;  %v1190_v11 = vld [vmem:[%s14340_s2 + $0x1c20] sm:$0xff] }
 0x1d3   : > { %6245 = vmatprep.subr.bf16.mxu1 %v6244_v22  ;;  %v6264_v22 = vpack.c.bf16 %v1137_v15, %v1129_v14  ;;  %v1198_v12 = vld [vmem:[%s14340_s2 + $0x1c60] sm:$0xff]  ;;  %v1200_v15 = vld [vmem:[%s14340_s2 + $0x1c70] sm:$0xff] }
 0x1d5   : > { %5991 = vmatpush1.bf16.msra.mxu0 %v5990_v28  ;;  %v6010_v28 = vpack.c.bf16 %v1134_v20, %v1126_v19  ;;  %v1217_v19 = vld [vmem:[%s14340_s2 + $0x1cf8] sm:$0xff]  ;;  %v6026_v20 = vpack.c.bf16 %v1198_v12, %v1190_v11  ;;  %v1279_v11 = vld [vmem:[%s14340_s2 + $0x1ee8] sm:$0xff] }
 0x1d6   : > { %6247 = vmatpush1.bf16.msra.mxu1 %v6246_v29  ;;  %5993 = vmatprep.subr.bf16.mxu0 %v5992_v30  ;;  %v6266_v29 = vpack.c.bf16 %v1136_v23, %v1128_v21  ;;  %v6012_v30 = vpack.c.bf16 %v1151_v25, %v1143_v24  ;;  %v1206_v23 = vld [vmem:[%s14340_s2 + $0x1ca0] sm:$0xff]  ;;  %v1208_v25 = vld [vmem:[%s14340_s2 + $0x1cb0] sm:$0xff]  ;;  %v1273_v12 = vld [vmem:[%s14340_s2 + $0x1eb8] sm:$0xff] }
 0x1d7   : > { %6249 = vmatprep.subr.bf16.mxu1 %v6248_v34  ;;  %v6268_v34 = vpack.c.bf16 %v1153_v27, %v1145_v26  ;;  %v1214_v24 = vld [vmem:[%s14340_s2 + $0x1ce0] sm:$0xff]  ;;  %v1216_v27 = vld [vmem:[%s14340_s2 + $0x1cf0] sm:$0xff] }
 0x1d8   : > { %2191 = vmatmul.mubr.f32.vlgmr.msra.gmra.mrb[4].mxu0 %v7555_v50 }
 0x1d9   : > { %5995 = vmatpush1.bf16.msra.mxu0 %v5994_v40  ;;  %2499 = vmatmul.mubr.f32.vlgmr.msra.gmra.mrb[4].mxu1 %v7555_v50  ;;  %v6014_v40 = vpack.c.bf16 %v1150_v32, %v1142_v31  ;;  %v1183_v50 = vld [vmem:[%s14340_s2 + $0x1be8] sm:$0xff]  ;;  %v1233_v31 = vld [vmem:[%s14340_s2 + $0x1d78] sm:$0xff]  ;;  %v6030_v32 = vpack.c.bf16 %v1214_v24, %v1206_v23 }
 0x1da   : > { %6251 = vmatpush1.bf16.msra.mxu1 %v6250_v41  ;;  %5997 = vmatprep.subr.bf16.mxu0 %v5996_v42  ;;  %v6270_v41 = vpack.c.bf16 %v1152_v35, %v1144_v33  ;;  %v6016_v42 = vpack.c.bf16 %v1167_v37, %v1159_v36  ;;  %v6020_v58 = vpack.c.bf16 %v1183_v50, %v1175_v49  ;;  %v1222_v35 = vld [vmem:[%s14340_s2 + $0x1d20] sm:$0xff]  ;;  %v1224_v37 = vld [vmem:[%s14340_s2 + $0x1d30] sm:$0xff]  ;;  %v1287_v23 = vld [vmem:[%s14340_s2 + $0x1f28] sm:$0xff] }
 0x1db   : > { %6253 = vmatprep.subr.bf16.mxu1 %v6252_v46  ;;  %2196 = vmatprep.mubr.f32.mxu0 %v7556_v63  ;;  %v6286_v33 = vpack.c.bf16 %v1216_v27, %v1208_v25  ;;  %v1230_v36 = vld [vmem:[%s14340_s2 + $0x1d60] sm:$0xff]  ;;  %v6290_v45 = vpack.c.bf16 %v1232_v39, %v1224_v37  ;;  %v1240_v50 = vld [vmem:[%s14340_s2 + $0x1db0] sm:$0xff]  ;;  %v1295_v24 = vld [vmem:[%s14340_s2 + $0x1f68] sm:$0xff] }
 0x1dc   : > { %2504 = vmatprep.mubr.f32.mxu1 %v7556_v63  ;;  %2197 = vmatmul.mubr.f32.gmra.mrb[6].mxu0 %v7557_v2  ;;  %v6034_v44 = vpack.c.bf16 %v1230_v36, %v1222_v35  ;;  %v1246_v49 = vld [vmem:[%s14340_s2 + $0x1de0] sm:$0xff]  ;;  %v1297_v27 = vld [vmem:[%s14340_s2 + $0x1f78] sm:$0xff]  ;;  %v1296_v36 = vld [vmem:[%s14340_s2 + $0x1f70] sm:$0xff] }
 0x1dd   : > { %5999 = vmatpush1.bf16.msra.mxu0 %v5998_v53  ;;  %2505 = vmatmul.mubr.f32.gmra.mrb[6].mxu1 %v7557_v2  ;;  %v1177_v53 = vld [vmem:[%s14340_s2 + $0x1bb8] sm:$0xff]  ;;  %v1199_v2 = vld [vmem:[%s14340_s2 + $0x1c68] sm:$0xff]  ;;  %v10742_v25 = vld [vmem:[%s14341_s3] sm:$0xff] }
 0x1de   : > { %6255 = vmatpush1.bf16.msra.mxu1 %v6254_v54  ;;  %6001 = vmatprep.subr.bf16.mxu0 %v6000_v55  ;;  %v1185_v54 = vld [vmem:[%s14340_s2 + $0x1bf8] sm:$0xff]  ;;  %v6024_v10 = vpack.c.bf16 %v1199_v2, %v1191_v1  ;;  %v1254_v1 = vld [vmem:[%s14340_s2 + $0x1e20] sm:$0xff]  ;;  %v1303_v37 = vld [vmem:[%s14340_s2 + $0x1fa8] sm:$0xff] }
 0x1df   : > { %6257 = vmatprep.subr.bf16.mxu1 %v6256_v59  ;;  %2267 = vmatprep.mubr.f32.mxu0 %v7558_v13  ;;  %v1174_v59 = vld [vmem:[%s14340_s2 + $0x1ba0] sm:$0xff]  ;;  %v6276_v63 = vpack.c.bf16 %v1185_v54, %v1177_v53  ;;  %v1316_v53 = vlaneseq  ;;  %v1305_v39 = vld [vmem:[%s14340_s2 + $0x1fb8] sm:$0xff] }
 0x1e0   : > { %2575 = vmatprep.mubr.f32.mxu1 %v7558_v13  ;;  %v6022_v8 = vpack.c.bf16 %v1182_v60, %v1174_v59  ;;  %v1192_v13 = vld [vmem:[%s14340_s2 + $0x1c30] sm:$0xff]  ;;  %v1257_v59 = vld [vmem:[%s14340_s2 + $0x1e38] sm:$0xff]  ;;  %v1262_v2 = vld [vmem:[%s14340_s2 + $0x1e60] sm:$0xff] }
 0x1e1   : > { %6003 = vmatpush1.bf16.msra.mxu0 %v6002_v3  ;;  %v6282_v21 = vpack.c.bf16 %v1200_v15, %v1192_v13  ;;  %v1265_v60 = vld [vmem:[%s14340_s2 + $0x1e78] sm:$0xff] }
 0x1e2   : > { %6259 = vmatpush1.bf16.msra.mxu1 %v6258_v4  ;;  %6005 = vmatprep.subr.bf16.mxu0 %v6004_v5  ;;  %v1193_v5 = vld [vmem:[%s14340_s2 + $0x1c38] sm:$0xff] }
 0x1e3   : > { %6261 = vmatprep.subr.bf16.mxu1 %v6260_v9  ;;  %v6278_v9 = vpack.c.bf16 %v1184_v0, %v1176_v61  ;;  %v6280_v14 = vpack.c.bf16 %v1201_v6, %v1193_v5  ;;  %v6038_v61 = vpack.c.bf16 %v1246_v49, %v1238_v48  ;;  %v1256_v5 = vld [vmem:[%s14340_s2 + $0x1e30] sm:$0xff]  ;;  %v10703_v6 = vshrl.u32 %v1316_v53, 7  ;;  %v1281_v13 = vld [vmem:[%s14340_s2 + $0x1ef8] sm:$0xff]  ;;  %v2605_v53 = vld [vmem:[%s14342_s4 + $0x8] sm:$0xff] }
 0x1e5   : > { %6007 = vmatpush1.bf16.msra.mxu0 %v6006_v16  ;;  %v1207_v16 = vld [vmem:[%s14340_s2 + $0x1ca8] sm:$0xff] }
 0x1e6   : > { %6263 = vmatpush1.bf16.msra.mxu1 %v6262_v17  ;;  %6009 = vmatprep.subr.bf16.mxu0 %v6008_v18  ;;  %v1215_v17 = vld [vmem:[%s14340_s2 + $0x1ce8] sm:$0xff]  ;;  %v1209_v18 = vld [vmem:[%s14340_s2 + $0x1cb8] sm:$0xff] }
 0x1e7   : > { %6265 = vmatprep.subr.bf16.mxu1 %v6264_v22  ;;  %v6028_v22 = vpack.c.bf16 %v1215_v17, %v1207_v16  ;;  %v6284_v26 = vpack.c.bf16 %v1217_v19, %v1209_v18  ;;  %v1270_v17 = vld [vmem:[%s14340_s2 + $0x1ea0] sm:$0xff]  ;;  %v1272_v19 = vld [vmem:[%s14340_s2 + $0x1eb0] sm:$0xff] }
 0x1e8   : > { %v1278_v18 = vld [vmem:[%s14340_s2 + $0x1ee0] sm:$0xff] }
 0x1e9   : > { %6011 = vmatpush1.bf16.msra.mxu0 %v6010_v28  ;;  %v1223_v28 = vld [vmem:[%s14340_s2 + $0x1d28] sm:$0xff] }
 0x1ea   : > { %6267 = vmatpush1.bf16.msra.mxu1 %v6266_v29  ;;  %6013 = vmatprep.subr.bf16.mxu0 %v6012_v30  ;;  %v1231_v29 = vld [vmem:[%s14340_s2 + $0x1d68] sm:$0xff]  ;;  %v1225_v30 = vld [vmem:[%s14340_s2 + $0x1d38] sm:$0xff] }
 0x1eb   : > { %v10543_v46 = vpop.f32.mrb[0].mxu0  ;;  %6269 = vmatprep.subr.bf16.mxu1 %v6268_v34  ;;  %v6032_v34 = vpack.c.bf16 %v1231_v29, %v1223_v28  ;;  %v6288_v38 = vpack.c.bf16 %v1233_v31, %v1225_v30  ;;  %v6046_v28 = vpack.c.bf16 %v1278_v18, %v1270_v17  ;;  %v6048_v30 = vpack.c.bf16 %v1295_v24, %v1287_v23  ;;  %v1286_v31 = vld [vmem:[%s14340_s2 + $0x1f20] sm:$0xff]  ;;  %v7559_v17 = vld [vmem:[%s7653_s27 + $0x30] sm:$0xff]  ;;  %v2639_v23 = vld [vmem:[%s14342_s4 + $0x118] sm:$0xff] }
 0x1ec   : > { %v10554_v51 = vpop.f32.mrb[0].mxu1  ;;  %v10556_v52 = vpop.f32.mrb[1].mxu0  ;;  %v2647_v24 = vld [vmem:[%s14342_s4 + $0x158] sm:$0xff] }
 0x1ed   : > { %v10564_v55 = vpop.f32.mrb[1].mxu1  ;;  %6015 = vmatpush1.bf16.msra.mxu0 %v6014_v40  ;;  %v1239_v40 = vld [vmem:[%s14340_s2 + $0x1da8] sm:$0xff] }
 0x1ee   : > { %6271 = vmatpush1.bf16.msra.mxu1 %v6270_v41  ;;  %6017 = vmatprep.subr.bf16.mxu0 %v6016_v42  ;;  %v1247_v41 = vld [vmem:[%s14340_s2 + $0x1de8] sm:$0xff]  ;;  %v1241_v42 = vld [vmem:[%s14340_s2 + $0x1db8] sm:$0xff] }
 0x1ef   : > { %v10575_v62 = vpop.f32.mrb[2].mxu0  ;;  %6273 = vmatprep.subr.bf16.mxu1 %v6272_v47  ;;  %v6036_v47 = vpack.c.bf16 %v1247_v41, %v1239_v40  ;;  %v6292_v54 = vpack.c.bf16 %v1249_v43, %v1241_v42  ;;  %v1313_v40 = vld [vmem:[%s14340_s2 + $0x1ff8] sm:$0xff] }
 0x1f0   : > { %v10586_v3 = vpop.f32.mrb[2].mxu1  ;;  %v10588_v4 = vpop.f32.mrb[3].mxu0  ;;  %v6308_v49 = vpack.c.bf16 %v1313_v40, %v1305_v39  ;;  %v2663_v39 = vld [vmem:[%s14342_s4 + $0x1d8] sm:$0xff] }
 0x1f1   : > { %v10596_v7 = vpop.f32.mrb[3].mxu1  ;;  %6019 = vmatpush1.bf16.msra.mxu0 %v6018_v56  ;;  %v1248_v56 = vld [vmem:[%s14340_s2 + $0x1df0] sm:$0xff] }
 0x1f2   : > { %6275 = vmatpush1.bf16.msra.mxu1 %v6274_v57  ;;  %6021 = vmatprep.subr.bf16.mxu0 %v6020_v58  ;;  %v1255_v57 = vld [vmem:[%s14340_s2 + $0x1e28] sm:$0xff] }
 0x1f3   : > { %6277 = vmatprep.subr.bf16.mxu1 %v6276_v63  ;;  %v1263_v58 = vld [vmem:[%s14340_s2 + $0x1e68] sm:$0xff]  ;;  %v6294_v63 = vpack.c.bf16 %v1248_v56, %v1240_v50  ;;  %v1312_v50 = vld [vmem:[%s14340_s2 + $0x1ff0] sm:$0xff]  ;;  %v2607_v56 = vld [vmem:[%s14342_s4 + $0x18] sm:$0xff] }
 0x1f4   : > { %v6040_v0 = vpack.c.bf16 %v1263_v58, %v1255_v57 }
 0x1f5   : > { %6023 = vmatpush1.bf16.msra.mxu0 %v6022_v8  ;;  %v6296_v8 = vpack.c.bf16 %v1265_v60, %v1257_v59  ;;  %v2604_v60 = vld [vmem:[%s14342_s4] sm:$0xff] }
 0x1f6   : > { %6279 = vmatpush1.bf16.msra.mxu1 %v6278_v9  ;;  %6025 = vmatprep.subr.bf16.mxu0 %v6024_v10  ;;  %v1264_v9 = vld [vmem:[%s14340_s2 + $0x1e70] sm:$0xff]  ;;  %v1271_v10 = vld [vmem:[%s14340_s2 + $0x1ea8] sm:$0xff] }
 0x1f7   : > { %6281 = vmatprep.subr.bf16.mxu1 %v6280_v14  ;;  %v6042_v14 = vpack.c.bf16 %v1262_v2, %v1254_v1  ;;  %v6298_v15 = vpack.c.bf16 %v1264_v9, %v1256_v5  ;;  %v6044_v16 = vpack.c.bf16 %v1279_v11, %v1271_v10  ;;  %v2614_v1 = vld [vmem:[%s14342_s4 + $0x50] sm:$0xff]  ;;  %v2621_v2 = vld [vmem:[%s14342_s4 + $0x88] sm:$0xff]  ;;  %v2623_v9 = vld [vmem:[%s14342_s4 + $0x98] sm:$0xff] }
 0x1f8   : > { %v2629_v5 = vld [vmem:[%s14342_s4 + $0xc8] sm:$0xff]  ;;  %v2631_v10 = vld [vmem:[%s14342_s4 + $0xd8] sm:$0xff] }
 0x1f9   : > { %6027 = vmatpush1.bf16.msra.mxu0 %v6026_v20  ;;  %v1322_v20 = vsub.s32 1, %v10703_v6  ;;  %v6564_v18 = vpack.c.bf16 %v2631_v10, %v2623_v9 }
 0x1fa   : > { %6283 = vmatpush1.bf16.msra.mxu1 %v6282_v21  ;;  %6029 = vmatprep.subr.bf16.mxu0 %v6028_v22  ;;  %v6300_v21 = vpack.c.bf16 %v1281_v13, %v1273_v12  ;;  %v1280_v22 = vld [vmem:[%s14340_s2 + $0x1ef0] sm:$0xff]  ;;  %v2620_v12 = vld [vmem:[%s14342_s4 + $0x80] sm:$0xff] }
 0x1fb   : > { %6285 = vmatprep.subr.bf16.mxu1 %v6284_v26  ;;  %v1289_v26 = vld [vmem:[%s14340_s2 + $0x1f38] sm:$0xff]  ;;  %v6302_v29 = vpack.c.bf16 %v1280_v22, %v1272_v19  ;;  %v2628_v13 = vld [vmem:[%s14342_s4 + $0xc0] sm:$0xff]  ;;  %v2637_v19 = vld [vmem:[%s14342_s4 + $0x108] sm:$0xff] }
 0x1fc   : > { %v6304_v35 = vpack.c.bf16 %v1297_v27, %v1289_v26  ;;  %v6318_v22 = vpack.c.bf16 %v2628_v13, %v2620_v12  ;;  %v7560_v26 = vld [vmem:[%s7653_s27 + $0x78] sm:$0xff]  ;;  %v2684_v12 = vld [vmem:[%s14342_s4 + $0x280] sm:$0xff] }
 0x1fd   : > { %6031 = vmatpush1.bf16.msra.mxu0 %v6030_v32  ;;  %v1294_v32 = vld [vmem:[%s14340_s2 + $0x1f60] sm:$0xff] }
 0x1fe   : > { %6287 = vmatpush1.bf16.msra.mxu1 %v6286_v33  ;;  %6033 = vmatprep.subr.bf16.mxu0 %v6032_v34  ;;  %v1288_v33 = vld [vmem:[%s14340_s2 + $0x1f30] sm:$0xff]  ;;  %v10762_v34 = vrot.slane %v10742_v25, %v1322_v20  ;;  %v6050_v41 = vpack.c.bf16 %v1294_v32, %v1286_v31  ;;  %v2692_v13 = vld [vmem:[%s14342_s4 + $0x2c0] sm:$0xff] }
 0x1ff   : > { %6289 = vmatprep.subr.bf16.mxu1 %v6288_v38  ;;  %v1311_v38 = vld [vmem:[%s14340_s2 + $0x1fe8] sm:$0xff]  ;;  %v6306_v42 = vpack.c.bf16 %v1296_v36, %v1288_v33  ;;  %v2646_v32 = vld [vmem:[%s14342_s4 + $0x150] sm:$0xff] }
 0x200   : > { %v6052_v43 = vpack.c.bf16 %v1311_v38, %v1303_v37  ;;  %v7305_v48 = vadd.f32 %v10556_v52, %v10762_v34  ;;  %v2615_v52 = vld [vmem:[%s14342_s4 + $0x58] sm:$0xff]  ;;  %v2653_v33 = vld [vmem:[%s14342_s4 + $0x188] sm:$0xff]  ;;  %v7561_v36 = vld [vmem:[%s7653_s27 + $0x70] sm:$0xff]  ;;  %v6568_v37 = vpack.c.bf16 %v2647_v24, %v2639_v23  ;;  %s7570_s27 = scalar_lea.vmem %s5213_s11, 32 }
 0x201   : > { %6035 = vmatpush1.bf16.msra.mxu0 %v6034_v44  ;;  %v1302_v44 = vld [vmem:[%s14340_s2 + $0x1fa0] sm:$0xff]  ;;  %v2655_v38 = vld [vmem:[%s14342_s4 + $0x198] sm:$0xff]  ;;  %p7572_p10 = scmp.lt.s32.totalorder %s7570_s27, %s7564_s12 }
 0x202   : > { %6291 = vmatpush1.bf16.msra.mxu1 %v6290_v45  ;;  %6037 = vmatprep.subr.bf16.mxu0 %v6036_v47  ;;  %v1310_v45 = vld [vmem:[%s14340_s2 + $0x1fe0] sm:$0xff]  ;;  %v1304_v47 = vld [vmem:[%s14340_s2 + $0x1fb0] sm:$0xff]  ;;  %7450 = vtanh.f32 %v7305_v48  ;;  %v6572_v48 = vpack.c.bf16 %v2663_v39, %v2655_v38 }
 0x203   : > { %6293 = vmatprep.subr.bf16.mxu1 %v6292_v54  ;;  %v2613_v54 = vld [vmem:[%s14342_s4 + $0x48] sm:$0xff]  ;;  %v6054_v57 = vpack.c.bf16 %v1310_v45, %v1302_v44  ;;  %v6310_v58 = vpack.c.bf16 %v1312_v50, %v1304_v47  ;;  %v2652_v44 = vld [vmem:[%s14342_s4 + $0x180] sm:$0xff]  ;;  %v2654_v47 = vld [vmem:[%s14342_s4 + $0x190] sm:$0xff]  ;;  %p7573_p11 = por %p7572_p10, %p7571_p9 }
 0x204   : > { %v6312_v59 = vpack.c.bf16 %v2613_v54, %v2605_v53  ;;  %v2660_v45 = vld [vmem:[%s14342_s4 + $0x1c0] sm:$0xff]  ;;  %v2669_v50 = vld [vmem:[%s14342_s4 + $0x208] sm:$0xff]  ;;  %v2671_v54 = vld [vmem:[%s14342_s4 + $0x218] sm:$0xff] }
 0x205   : > { %6039 = vmatpush1.bf16.msra.mxu0 %v6038_v61  ;;  %v2612_v61 = vld [vmem:[%s14342_s4 + $0x40] sm:$0xff]  ;;  %v2677_v53 = vld [vmem:[%s14342_s4 + $0x248] sm:$0xff]  ;;  %p7574_p12 = pnand %p7573_p11, %p7567_p8 }
 0x206   : > { %6295 = vmatpush1.bf16.msra.mxu1 %v6294_v63  ;;  %6041 = vmatprep.subr.bf16.mxu0 %v6040_v0  ;;  %v6560_v63 = vpack.c.bf16 %v2615_v52, %v2607_v56  ;;  %v2606_v0 = vld [vmem:[%s14342_s4 + $0x10] sm:$0xff]  ;;  %v2679_v56 = vld [vmem:[%s14342_s4 + $0x258] sm:$0xff]  ;;  %v6326_v52 = vpack.c.bf16 %v2660_v45, %v2652_v44  ;;  %v2716_v39 = vld [vmem:[%s14342_s4 + $0x380] sm:$0xff] }
 0x207   : > { %6297 = vmatprep.subr.bf16.mxu1 %v6296_v8  ;;  %v6314_v8 = vpack.c.bf16 %v2612_v61, %v2604_v60  ;;  %v6562_v11 = vpack.c.bf16 %v2614_v1, %v2606_v0  ;;  %v2676_v60 = vld [vmem:[%s14342_s4 + $0x240] sm:$0xff]  ;;  %v2670_v61 = vld [vmem:[%s14342_s4 + $0x210] sm:$0xff]  ;;  %v2685_v1 = vld [vmem:[%s14342_s4 + $0x288] sm:$0xff] }
 0x208   : > { %v2678_v0 = vld [vmem:[%s14342_s4 + $0x250] sm:$0xff]  ;;  %v2733_v45 = vld [vmem:[%s14342_s4 + $0x408] sm:$0xff] }
 0x209   : > { %6043 = vmatpush1.bf16.msra.mxu0 %v6042_v14  ;;  %v6316_v14 = vpack.c.bf16 %v2629_v5, %v2621_v2  ;;  %v2693_v2 = vld [vmem:[%s14342_s4 + $0x2c8] sm:$0xff]  ;;  %v2687_v5 = vld [vmem:[%s14342_s4 + $0x298] sm:$0xff]  ;;  %v6578_v10 = vpack.c.bf16 %v2678_v0, %v2670_v61  ;;  %v2726_v44 = vld [vmem:[%s14342_s4 + $0x3d0] sm:$0xff] }
 0x20a   : > { %6299 = vmatpush1.bf16.msra.mxu1 %v6298_v15  ;;  %6045 = vmatprep.subr.bf16.mxu0 %v6044_v16  ;;  %v2622_v15 = vld [vmem:[%s14342_s4 + $0x90] sm:$0xff]  ;;  %v2757_v61 = vld [vmem:[%s14342_s4 + $0x4c8] sm:$0xff]  ;;  %v2759_v0 = vld [vmem:[%s14342_s4 + $0x4d8] sm:$0xff] }
 0x20b   : > { %6301 = vmatprep.subr.bf16.mxu1 %v6300_v21  ;;  %v2630_v16 = vld [vmem:[%s14342_s4 + $0xd0] sm:$0xff]  ;;  %v2645_v21 = vld [vmem:[%s14342_s4 + $0x148] sm:$0xff] }
 0x20c   : > { %v6566_v27 = vpack.c.bf16 %v2630_v16, %v2622_v15  ;;  %v6320_v31 = vpack.c.bf16 %v2645_v21, %v2637_v19  ;;  %v10880_v40 = vpop.eup %7450  ;;  %v2694_v16 = vld [vmem:[%s14342_s4 + $0x2d0] sm:$0xff]  ;;  %v2703_v19 = vld [vmem:[%s14342_s4 + $0x318] sm:$0xff] }
 0x20d   : > { %6047 = vmatpush1.bf16.msra.mxu0 %v6046_v28  ;;  %v2636_v28 = vld [vmem:[%s14342_s4 + $0x100] sm:$0xff]  ;;  %v2711_v21 = vld [vmem:[%s14342_s4 + $0x358] sm:$0xff] }
 0x20e   : > { %6303 = vmatpush1.bf16.msra.mxu1 %v6302_v29  ;;  %6049 = vmatprep.subr.bf16.mxu0 %v6048_v30  ;;  %v2644_v29 = vld [vmem:[%s14342_s4 + $0x140] sm:$0xff]  ;;  %v2638_v30 = vld [vmem:[%s14342_s4 + $0x110] sm:$0xff] }
 0x20f   : > { %6305 = vmatprep.subr.bf16.mxu1 %v6304_v35  ;;  %v2661_v35 = vld [vmem:[%s14342_s4 + $0x1c8] sm:$0xff] }
 0x211   : > { %6051 = vmatpush1.bf16.msra.mxu0 %v6050_v41  ;;  %v6322_v41 = vpack.c.bf16 %v2644_v29, %v2636_v28  ;;  %v2702_v28 = vld [vmem:[%s14342_s4 + $0x310] sm:$0xff]  ;;  %v6584_v29 = vpack.c.bf16 %v2711_v21, %v2703_v19  ;;  %v2764_v21 = vld [vmem:[%s14342_s4 + $0x500] sm:$0xff] }
 0x212   : > { %6307 = vmatpush1.bf16.msra.mxu1 %v6306_v42  ;;  %6053 = vmatprep.subr.bf16.mxu0 %v6052_v43  ;;  %v6570_v42 = vpack.c.bf16 %v2646_v32, %v2638_v30  ;;  %v6324_v43 = vpack.c.bf16 %v2661_v35, %v2653_v33  ;;  %v2710_v30 = vld [vmem:[%s14342_s4 + $0x350] sm:$0xff]  ;;  %v2725_v32 = vld [vmem:[%s14342_s4 + $0x3c8] sm:$0xff]  ;;  %v2719_v33 = vld [vmem:[%s14342_s4 + $0x398] sm:$0xff] }
 0x213   : > { %6309 = vmatprep.subr.bf16.mxu1 %v6308_v49  ;;  %v2662_v49 = vld [vmem:[%s14342_s4 + $0x1d0] sm:$0xff]  ;;  %v2727_v35 = vld [vmem:[%s14342_s4 + $0x3d8] sm:$0xff] }
 0x215   : > { %6055 = vmatpush1.bf16.msra.mxu0 %v6054_v57  ;;  %v6574_v57 = vpack.c.bf16 %v2662_v49, %v2654_v47  ;;  %v2741_v47 = vld [vmem:[%s14342_s4 + $0x448] sm:$0xff]  ;;  %v2743_v49 = vld [vmem:[%s14342_s4 + $0x458] sm:$0xff] }
 0x216   : > { %6311 = vmatpush1.bf16.msra.mxu1 %v6310_v58  ;;  %6313 = vmatprep.subr.bf16.mxu0 %v6312_v59  ;;  %v6328_v58 = vpack.c.bf16 %v2677_v53, %v2669_v50  ;;  %v2668_v59 = vld [vmem:[%s14342_s4 + $0x200] sm:$0xff] }
 0x217   : > { %6561 = vmatprep.subr.bf16.mxu1 %v6560_v63  ;;  %v6576_v63 = vpack.c.bf16 %v2679_v56, %v2671_v54  ;;  %v6330_v9 = vpack.c.bf16 %v2676_v60, %v2668_v59  ;;  %v6344_v54 = vpack.c.bf16 %v2741_v47, %v2733_v45  ;;  %v2732_v56 = vld [vmem:[%s14342_s4 + $0x400] sm:$0xff]  ;;  %v2742_v59 = vld [vmem:[%s14342_s4 + $0x450] sm:$0xff]  ;;  %v2749_v60 = vld [vmem:[%s14342_s4 + $0x488] sm:$0xff]  ;;  %v1318_v45 = vsub.s32 0, %v10703_v6 }
 0x218   : > { %2268 = vmatmul.mubr.f32.vlgmr.msra.gmra.mrb[4].mxu0 %v7559_v17 }
 0x219   : > { %2576 = vmatmul.mubr.f32.vlgmr.msra.gmra.mrb[4].mxu1 %v7559_v17  ;;  %6315 = vmatpush1.bf16.msra.mxu0 %v6314_v8  ;;  %v2695_v8 = vld [vmem:[%s14342_s4 + $0x2d8] sm:$0xff]  ;;  %v2701_v17 = vld [vmem:[%s14342_s4 + $0x308] sm:$0xff] }
 0x21a   : > { %6563 = vmatpush1.bf16.msra.mxu1 %v6562_v11  ;;  %2273 = vmatprep.mubr.f32.mxu0 %v7560_v26  ;;  %v6332_v11 = vpack.c.bf16 %v2693_v2, %v2685_v1  ;;  %v6580_v15 = vpack.c.bf16 %v2695_v8, %v2687_v5  ;;  %v6348_v5 = vpack.c.bf16 %v2757_v61, %v2749_v60  ;;  %v2748_v8 = vld [vmem:[%s14342_s4 + $0x480] sm:$0xff]  ;;  %v2823_v60 = vld [vmem:[%s14342_s4 + $0x6d8] sm:$0xff] }
 0x21b   : > { %2581 = vmatprep.mubr.f32.mxu1 %v7560_v26  ;;  %6317 = vmatprep.subr.bf16.mxu0 %v6316_v14  ;;  %v2686_v14 = vld [vmem:[%s14342_s4 + $0x290] sm:$0xff]  ;;  %v2700_v26 = vld [vmem:[%s14342_s4 + $0x300] sm:$0xff]  ;;  %v1319_v61 = vrot.slane %v10742_v25, %v1318_v45 }
 0x21c   : > { %2274 = vmatmul.mubr.f32.gmra.mrb[6].mxu0 %v7561_v36  ;;  %6565 = vmatprep.subr.bf16.mxu1 %v6564_v18  ;;  %v2709_v18 = vld [vmem:[%s14342_s4 + $0x348] sm:$0xff]  ;;  %v6582_v23 = vpack.c.bf16 %v2694_v16, %v2686_v14  ;;  %v2775_v16 = vld [vmem:[%s14342_s4 + $0x558] sm:$0xff] }
 0x21d   : > { %2582 = vmatmul.mubr.f32.gmra.mrb[6].mxu1 %v7561_v36  ;;  %6319 = vmatpush1.bf16.msra.mxu0 %v6318_v22  ;;  %v6334_v22 = vpack.c.bf16 %v2692_v13, %v2684_v12  ;;  %v6336_v24 = vpack.c.bf16 %v2709_v18, %v2701_v17  ;;  %v2758_v12 = vld [vmem:[%s14342_s4 + $0x4d0] sm:$0xff]  ;;  %v2765_v13 = vld [vmem:[%s14342_s4 + $0x508] sm:$0xff] }
 0x21e   : > { %3717 = vmatprep.mubr.f32.mxu0 %v10880_v40  ;;  %6567 = vmatpush1.bf16.msra.mxu1 %v6566_v27  ;;  %v2708_v27 = vld [vmem:[%s14342_s4 + $0x340] sm:$0xff]  ;;  %v2773_v14 = vld [vmem:[%s14342_s4 + $0x548] sm:$0xff] }
 0x21f   : > { %4025 = vmatprep.mubr.f32.mxu1 %v10880_v40  ;;  %6321 = vmatprep.subr.bf16.mxu0 %v6320_v31  ;;  %v2717_v31 = vld [vmem:[%s14342_s4 + $0x388] sm:$0xff]  ;;  %v6338_v36 = vpack.c.bf16 %v2708_v27, %v2700_v26  ;;  %v6352_v19 = vpack.c.bf16 %v2773_v14, %v2765_v13  ;;  %v2774_v26 = vld [vmem:[%s14342_s4 + $0x550] sm:$0xff]  ;;  %v2831_v14 = vld [vmem:[%s14342_s4 + $0x718] sm:$0xff] }
 0x220   : > { %6569 = vmatprep.subr.bf16.mxu1 %v6568_v37  ;;  %v6586_v37 = vpack.c.bf16 %v2710_v30, %v2702_v28  ;;  %v6340_v38 = vpack.c.bf16 %v2725_v32, %v2717_v31  ;;  %v2781_v27 = vld [vmem:[%s14342_s4 + $0x588] sm:$0xff]  ;;  %v2791_v30 = vld [vmem:[%s14342_s4 + $0x5d8] sm:$0xff] }
 0x221   : > { %6323 = vmatpush1.bf16.msra.mxu0 %v6322_v41  ;;  %v2724_v41 = vld [vmem:[%s14342_s4 + $0x3c0] sm:$0xff]  ;;  %v2789_v28 = vld [vmem:[%s14342_s4 + $0x5c8] sm:$0xff] }
 0x222   : > { %6571 = vmatpush1.bf16.msra.mxu1 %v6570_v42  ;;  %6325 = vmatprep.subr.bf16.mxu0 %v6324_v43  ;;  %v2718_v42 = vld [vmem:[%s14342_s4 + $0x390] sm:$0xff]  ;;  %v6588_v43 = vpack.c.bf16 %v2727_v35, %v2719_v33  ;;  %v6342_v50 = vpack.c.bf16 %v2724_v41, %v2716_v39  ;;  %v6356_v33 = vpack.c.bf16 %v2789_v28, %v2781_v27  ;;  %v2780_v35 = vld [vmem:[%s14342_s4 + $0x580] sm:$0xff]  ;;  %v2797_v41 = vld [vmem:[%s14342_s4 + $0x608] sm:$0xff] }
 0x223   : > { %6573 = vmatprep.subr.bf16.mxu1 %v6572_v48  ;;  %v2735_v48 = vld [vmem:[%s14342_s4 + $0x418] sm:$0xff]  ;;  %v6590_v53 = vpack.c.bf16 %v2726_v44, %v2718_v42  ;;  %v2790_v39 = vld [vmem:[%s14342_s4 + $0x5d0] sm:$0xff]  ;;  %v2805_v42 = vld [vmem:[%s14342_s4 + $0x648] sm:$0xff] }
 0x224   : > { %v2807_v44 = vld [vmem:[%s14342_s4 + $0x658] sm:$0xff]  ;;  %v2837_v13 = vld [vmem:[%s14342_s4 + $0x748] sm:$0xff] }
 0x225   : > { %6327 = vmatpush1.bf16.msra.mxu0 %v6326_v52  ;;  %v2740_v52 = vld [vmem:[%s14342_s4 + $0x440] sm:$0xff]  ;;  %v2847_v27 = vld [vmem:[%s14342_s4 + $0x798] sm:$0xff] }
 0x226   : > { %6575 = vmatpush1.bf16.msra.mxu1 %v6574_v57  ;;  %6329 = vmatprep.subr.bf16.mxu0 %v6328_v58  ;;  %v2734_v57 = vld [vmem:[%s14342_s4 + $0x410] sm:$0xff]  ;;  %v6592_v58 = vpack.c.bf16 %v2743_v49, %v2735_v48  ;;  %v6346_v1 = vpack.c.bf16 %v2740_v52, %v2732_v56  ;;  %v6360_v49 = vpack.c.bf16 %v2805_v42, %v2797_v41  ;;  %v2855_v28 = vld [vmem:[%s14342_s4 + $0x7d8] sm:$0xff] }
 0x227   : > { %6577 = vmatprep.subr.bf16.mxu1 %v6576_v63  ;;  %v2751_v63 = vld [vmem:[%s14342_s4 + $0x498] sm:$0xff]  ;;  %v6594_v2 = vpack.c.bf16 %v2742_v59, %v2734_v57  ;;  %v2806_v52 = vld [vmem:[%s14342_s4 + $0x650] sm:$0xff]  ;;  %v2813_v57 = vld [vmem:[%s14342_s4 + $0x688] sm:$0xff] }
 0x228   : > { %v2815_v59 = vld [vmem:[%s14342_s4 + $0x698] sm:$0xff] }
 0x229   : > { %6331 = vmatpush1.bf16.msra.mxu0 %v6330_v9  ;;  %v2756_v9 = vld [vmem:[%s14342_s4 + $0x4c0] sm:$0xff]  ;;  %v2863_v41 = vld [vmem:[%s14342_s4 + $0x818] sm:$0xff] }
 0x22a   : > { %6579 = vmatpush1.bf16.msra.mxu1 %v6578_v10  ;;  %6333 = vmatprep.subr.bf16.mxu0 %v6332_v11  ;;  %v2750_v10 = vld [vmem:[%s14342_s4 + $0x490] sm:$0xff]  ;;  %v6596_v11 = vpack.c.bf16 %v2759_v0, %v2751_v63  ;;  %v6350_v17 = vpack.c.bf16 %v2756_v9, %v2748_v8  ;;  %v1330_v63 = vsub.s32 3, %v10703_v6  ;;  %v2820_v8 = vld [vmem:[%s14342_s4 + $0x6c0] sm:$0xff]  ;;  %v2871_v42 = vld [vmem:[%s14342_s4 + $0x858] sm:$0xff] }
 0x22b   : > { %6581 = vmatprep.subr.bf16.mxu1 %v6580_v15  ;;  %v2767_v15 = vld [vmem:[%s14342_s4 + $0x518] sm:$0xff]  ;;  %v6598_v18 = vpack.c.bf16 %v2758_v12, %v2750_v10  ;;  %v2814_v9 = vld [vmem:[%s14342_s4 + $0x690] sm:$0xff]  ;;  %v6612_v10 = vpack.c.bf16 %v2823_v60, %v2815_v59  ;;  %v2829_v12 = vld [vmem:[%s14342_s4 + $0x708] sm:$0xff] }
 0x22d   : > { %6335 = vmatpush1.bf16.msra.mxu0 %v6334_v22  ;;  %v2772_v22 = vld [vmem:[%s14342_s4 + $0x540] sm:$0xff] }
 0x22e   : > { %6583 = vmatpush1.bf16.msra.mxu1 %v6582_v23  ;;  %6337 = vmatprep.subr.bf16.mxu0 %v6336_v24  ;;  %v2766_v23 = vld [vmem:[%s14342_s4 + $0x510] sm:$0xff]  ;;  %v6600_v24 = vpack.c.bf16 %v2775_v16, %v2767_v15  ;;  %v6354_v31 = vpack.c.bf16 %v2772_v22, %v2764_v21  ;;  %v2839_v15 = vld [vmem:[%s14342_s4 + $0x758] sm:$0xff]  ;;  %v7304_v16 = vadd.f32 %v10543_v46, %v1319_v61  ;;  %v2836_v46 = vld [vmem:[%s14342_s4 + $0x740] sm:$0xff] }
 0x22f   : > { %6585 = vmatprep.subr.bf16.mxu1 %v6584_v29  ;;  %v2783_v29 = vld [vmem:[%s14342_s4 + $0x598] sm:$0xff]  ;;  %v6602_v32 = vpack.c.bf16 %v2774_v26, %v2766_v23  ;;  %v6368_v22 = vpack.c.bf16 %v2837_v13, %v2829_v12  ;;  %v2828_v23 = vld [vmem:[%s14342_s4 + $0x700] sm:$0xff]  ;;  %v2853_v26 = vld [vmem:[%s14342_s4 + $0x7c8] sm:$0xff] }
 0x230   : > { %7452 = vtanh.f32 %v7304_v16  ;;  %v2901_v12 = vld [vmem:[%s14342_s4 + $0x948] sm:$0xff]  ;;  %v2895_v13 = vld [vmem:[%s14342_s4 + $0x918] sm:$0xff] }
 0x231   : > { %6339 = vmatpush1.bf16.msra.mxu0 %v6338_v36  ;;  %v2788_v36 = vld [vmem:[%s14342_s4 + $0x5c0] sm:$0xff] }
 0x232   : > { %6587 = vmatpush1.bf16.msra.mxu1 %v6586_v37  ;;  %6341 = vmatprep.subr.bf16.mxu0 %v6340_v38  ;;  %v2782_v37 = vld [vmem:[%s14342_s4 + $0x590] sm:$0xff]  ;;  %v6604_v38 = vpack.c.bf16 %v2791_v30, %v2783_v29  ;;  %v6358_v47 = vpack.c.bf16 %v2788_v36, %v2780_v35  ;;  %v7306_v29 = vadd.f32 %v10575_v62, %v1319_v61  ;;  %v2844_v35 = vld [vmem:[%s14342_s4 + $0x780] sm:$0xff] }
 0x233   : > { %6589 = vmatprep.subr.bf16.mxu1 %v6588_v43  ;;  %v2799_v43 = vld [vmem:[%s14342_s4 + $0x618] sm:$0xff]  ;;  %v6606_v48 = vpack.c.bf16 %v2790_v39, %v2782_v37  ;;  %v6370_v30 = vpack.c.bf16 %v2836_v46, %v2828_v23  ;;  %v2852_v36 = vld [vmem:[%s14342_s4 + $0x7c0] sm:$0xff]  ;;  %v2846_v62 = vld [vmem:[%s14342_s4 + $0x790] sm:$0xff]  ;;  %v6620_v37 = vpack.c.bf16 %v2855_v28, %v2847_v27 }
 0x234   : > { %v6608_v56 = vpack.c.bf16 %v2807_v44, %v2799_v43  ;;  %v2869_v39 = vld [vmem:[%s14342_s4 + $0x848] sm:$0xff]  ;;  %v6374_v43 = vpack.c.bf16 %v2852_v36, %v2844_v35  ;;  %v2894_v23 = vld [vmem:[%s14342_s4 + $0x910] sm:$0xff]  ;;  %v2919_v27 = vld [vmem:[%s14342_s4 + $0x9d8] sm:$0xff] }
 0x235   : > { %6343 = vmatpush1.bf16.msra.mxu0 %v6342_v50  ;;  %v2796_v50 = vld [vmem:[%s14342_s4 + $0x600] sm:$0xff]  ;;  %v2918_v36 = vld [vmem:[%s14342_s4 + $0x9d0] sm:$0xff] }
 0x236   : > { %6591 = vmatpush1.bf16.msra.mxu1 %v6590_v53  ;;  %6345 = vmatprep.subr.bf16.mxu0 %v6344_v54  ;;  %v2804_v53 = vld [vmem:[%s14342_s4 + $0x640] sm:$0xff]  ;;  %v2798_v54 = vld [vmem:[%s14342_s4 + $0x610] sm:$0xff] }
 0x237   : > { %6593 = vmatprep.subr.bf16.mxu1 %v6592_v58  ;;  %v2821_v58 = vld [vmem:[%s14342_s4 + $0x6c8] sm:$0xff]  ;;  %v6362_v0 = vpack.c.bf16 %v2804_v53, %v2796_v50  ;;  %v2868_v50 = vld [vmem:[%s14342_s4 + $0x840] sm:$0xff]  ;;  %v2862_v53 = vld [vmem:[%s14342_s4 + $0x810] sm:$0xff] }
 0x239   : > { %6347 = vmatpush1.bf16.msra.mxu0 %v6346_v1  ;;  %v6610_v1 = vpack.c.bf16 %v2806_v52, %v2798_v54  ;;  %v2870_v54 = vld [vmem:[%s14342_s4 + $0x850] sm:$0xff]  ;;  %v2885_v52 = vld [vmem:[%s14342_s4 + $0x8c8] sm:$0xff] }
 0x23a   : > { %6595 = vmatpush1.bf16.msra.mxu1 %v6594_v2  ;;  %6349 = vmatprep.subr.bf16.mxu0 %v6348_v5  ;;  %v6364_v2 = vpack.c.bf16 %v2821_v58, %v2813_v57  ;;  %v2812_v5 = vld [vmem:[%s14342_s4 + $0x680] sm:$0xff]  ;;  %v2879_v57 = vld [vmem:[%s14342_s4 + $0x898] sm:$0xff]  ;;  %v11236_v60 = vpop.eup %7452  ;;  %v6626_v61 = vpack.c.bf16 %v2870_v54, %v2862_v53  ;;  %v2949_v53 = vld [vmem:[%s14342_s4 + $0xac8] sm:$0xff] }
 0x23b   : > { %6597 = vmatprep.subr.bf16.mxu1 %v6596_v11  ;;  %v2822_v11 = vld [vmem:[%s14342_s4 + $0x6d0] sm:$0xff]  ;;  %v2887_v58 = vld [vmem:[%s14342_s4 + $0x8d8] sm:$0xff] }
 0x23c   : > { %v6614_v21 = vpack.c.bf16 %v2822_v11, %v2814_v9  ;;  %v6628_v9 = vpack.c.bf16 %v2887_v58, %v2879_v57  ;;  %v2893_v11 = vld [vmem:[%s14342_s4 + $0x908] sm:$0xff]  ;;  %v2943_v54 = vld [vmem:[%s14342_s4 + $0xa98] sm:$0xff] }
 0x23d   : > { %6351 = vmatpush1.bf16.msra.mxu0 %v6350_v17  ;;  %v11157_v17 = vrot.slane %v10742_v25, %v1330_v63  ;;  %v2830_v25 = vld [vmem:[%s14342_s4 + $0x710] sm:$0xff] }
 0x23e   : > { %6599 = vmatpush1.bf16.msra.mxu1 %v6598_v18  ;;  %6353 = vmatprep.subr.bf16.mxu0 %v6352_v19  ;;  %v6366_v18 = vpack.c.bf16 %v2820_v8, %v2812_v5  ;;  %v7307_v19 = vadd.f32 %v10588_v4, %v10762_v34  ;;  %v2838_v4 = vld [vmem:[%s14342_s4 + $0x750] sm:$0xff]  ;;  %v2845_v34 = vld [vmem:[%s14342_s4 + $0x788] sm:$0xff] }
 0x23f   : > { %6601 = vmatprep.subr.bf16.mxu1 %v6600_v24  ;;  %v6616_v24 = vpack.c.bf16 %v2839_v15, %v2831_v14  ;;  %v2878_v5 = vld [vmem:[%s14342_s4 + $0x890] sm:$0xff]  ;;  %v2903_v14 = vld [vmem:[%s14342_s4 + $0x958] sm:$0xff] }
 0x240   : > { %7454 = vtanh.f32 %v7307_v19  ;;  %v6384_v19 = vpack.c.bf16 %v2901_v12, %v2893_v11  ;;  %v2967_v11 = vld [vmem:[%s14342_s4 + $0xb58] sm:$0xff] }
 0x241   : > { %6355 = vmatpush1.bf16.msra.mxu0 %v6354_v31  ;;  %v7309_v31 = vadd.f32 %v10564_v55, %v11157_v17  ;;  %v2854_v55 = vld [vmem:[%s14342_s4 + $0x7d0] sm:$0xff]  ;;  %7456 = vtanh.f32 %v7306_v29 }
 0x242   : > { %6603 = vmatpush1.bf16.msra.mxu1 %v6602_v32  ;;  %6357 = vmatprep.subr.bf16.mxu0 %v6356_v33  ;;  %v6618_v32 = vpack.c.bf16 %v2838_v4, %v2830_v25  ;;  %v6372_v33 = vpack.c.bf16 %v2853_v26, %v2845_v34  ;;  %v6622_v44 = vpack.c.bf16 %v2854_v55, %v2846_v62  ;;  %v2909_v4 = vld [vmem:[%s14342_s4 + $0x988] sm:$0xff]  ;;  %v2911_v26 = vld [vmem:[%s14342_s4 + $0x998] sm:$0xff] }
 0x243   : > { %6605 = vmatprep.subr.bf16.mxu1 %v6604_v38  ;;  %v2861_v38 = vld [vmem:[%s14342_s4 + $0x808] sm:$0xff]  ;;  %7458 = vtanh.f32 %v7309_v31  ;;  %v6632_v25 = vpack.c.bf16 %v2903_v14, %v2895_v13  ;;  %v2908_v31 = vld [vmem:[%s14342_s4 + $0x980] sm:$0xff]  ;;  %v6636_v35 = vpack.c.bf16 %v2919_v27, %v2911_v26  ;;  %v2927_v55 = vld [vmem:[%s14342_s4 + $0xa18] sm:$0xff] }
 0x244   : > { %v2917_v34 = vld [vmem:[%s14342_s4 + $0x9c8] sm:$0xff] }
 0x245   : > { %6359 = vmatpush1.bf16.msra.mxu0 %v6358_v47  ;;  %v6376_v47 = vpack.c.bf16 %v2869_v39, %v2861_v38  ;;  %v2925_v62 = vld [vmem:[%s14342_s4 + $0xa08] sm:$0xff]  ;;  %v2935_v38 = vld [vmem:[%s14342_s4 + $0xa58] sm:$0xff] }
 0x246   : > { %6607 = vmatpush1.bf16.msra.mxu1 %v6606_v48  ;;  %6361 = vmatprep.subr.bf16.mxu0 %v6360_v49  ;;  %v6624_v48 = vpack.c.bf16 %v2871_v42, %v2863_v41  ;;  %v2860_v49 = vld [vmem:[%s14342_s4 + $0x800] sm:$0xff] }
 0x247   : > { %6609 = vmatprep.subr.bf16.mxu1 %v6608_v56  ;;  %v2877_v56 = vld [vmem:[%s14342_s4 + $0x888] sm:$0xff]  ;;  %v6378_v59 = vpack.c.bf16 %v2868_v50, %v2860_v49  ;;  %v2934_v49 = vld [vmem:[%s14342_s4 + $0xa50] sm:$0xff] }
 0x248   : > { %v2941_v50 = vld [vmem:[%s14342_s4 + $0xa88] sm:$0xff] }
 0x249   : > { %6363 = vmatpush1.bf16.msra.mxu0 %v6362_v0  ;;  %v6380_v0 = vpack.c.bf16 %v2885_v52, %v2877_v56  ;;  %v2951_v56 = vld [vmem:[%s14342_s4 + $0xad8] sm:$0xff]  ;;  %v6396_v58 = vpack.c.bf16 %v2949_v53, %v2941_v50 }
 0x24a   : > { %6611 = vmatpush1.bf16.msra.mxu1 %v6610_v1  ;;  %6365 = vmatprep.subr.bf16.mxu0 %v6364_v2  ;;  %v2876_v1 = vld [vmem:[%s14342_s4 + $0x880] sm:$0xff]  ;;  %v11247_v8 = vpop.eup %7454  ;;  %v3015_v50 = vld [vmem:[%s14342_s4 + $0xcd8] sm:$0xff] }
 0x24b   : > { %6613 = vmatprep.subr.bf16.mxu1 %v6612_v10  ;;  %v2884_v2 = vld [vmem:[%s14342_s4 + $0x8c0] sm:$0xff]  ;;  %v2886_v10 = vld [vmem:[%s14342_s4 + $0x8d0] sm:$0xff]  ;;  %v11268_v16 = vpop.eup %7456 }
 0x24c   : > { %v6382_v15 = vpack.c.bf16 %v2884_v2, %v2876_v1  ;;  %v6644_v1 = vpack.c.bf16 %v2951_v56, %v2943_v54  ;;  %v2950_v2 = vld [vmem:[%s14342_s4 + $0xad0] sm:$0xff] }
 0x24d   : > { %6367 = vmatpush1.bf16.msra.mxu0 %v6366_v18  ;;  %v6630_v18 = vpack.c.bf16 %v2886_v10, %v2878_v5  ;;  %v11279_v46 = vpop.eup %7458  ;;  %v2957_v5 = vld [vmem:[%s14342_s4 + $0xb08] sm:$0xff]  ;;  %v2959_v10 = vld [vmem:[%s14342_s4 + $0xb18] sm:$0xff] }
 0x24e   : > { %6615 = vmatpush1.bf16.msra.mxu1 %v6614_v21  ;;  %6369 = vmatprep.subr.bf16.mxu0 %v6368_v22  ;;  %v2892_v21 = vld [vmem:[%s14342_s4 + $0x900] sm:$0xff] }
 0x24f   : > { %6617 = vmatprep.subr.bf16.mxu1 %v6616_v24  ;;  %v2900_v22 = vld [vmem:[%s14342_s4 + $0x940] sm:$0xff]  ;;  %v2902_v24 = vld [vmem:[%s14342_s4 + $0x950] sm:$0xff] }
 0x250   : > { %v6386_v28 = vpack.c.bf16 %v2900_v22, %v2892_v21  ;;  %v6634_v29 = vpack.c.bf16 %v2902_v24, %v2894_v23  ;;  %v6648_v21 = vpack.c.bf16 %v2967_v11, %v2959_v10  ;;  %v2966_v22 = vld [vmem:[%s14342_s4 + $0xb50] sm:$0xff]  ;;  %v2973_v23 = vld [vmem:[%s14342_s4 + $0xb88] sm:$0xff]  ;;  %v2975_v24 = vld [vmem:[%s14342_s4 + $0xb98] sm:$0xff] }
 0x251   : > { %6371 = vmatpush1.bf16.msra.mxu0 %v6370_v30  ;;  %v6388_v30 = vpack.c.bf16 %v2917_v34, %v2909_v4  ;;  %v2983_v4 = vld [vmem:[%s14342_s4 + $0xbd8] sm:$0xff] }
 0x252   : > { %6619 = vmatpush1.bf16.msra.mxu1 %v6618_v32  ;;  %6373 = vmatprep.subr.bf16.mxu0 %v6372_v33  ;;  %v2916_v32 = vld [vmem:[%s14342_s4 + $0x9c0] sm:$0xff]  ;;  %v2910_v33 = vld [vmem:[%s14342_s4 + $0x990] sm:$0xff] }
 0x253   : > { %6621 = vmatprep.subr.bf16.mxu1 %v6620_v37  ;;  %v2933_v37 = vld [vmem:[%s14342_s4 + $0xa48] sm:$0xff]  ;;  %v6390_v39 = vpack.c.bf16 %v2916_v32, %v2908_v31  ;;  %v6638_v41 = vpack.c.bf16 %v2918_v36, %v2910_v33  ;;  %v6652_v31 = vpack.c.bf16 %v2983_v4, %v2975_v24  ;;  %v2982_v32 = vld [vmem:[%s14342_s4 + $0xbd0] sm:$0xff]  ;;  %v2991_v36 = vld [vmem:[%s14342_s4 + $0xc18] sm:$0xff] }
 0x254   : > { %v6392_v42 = vpack.c.bf16 %v2933_v37, %v2925_v62  ;;  %v2989_v33 = vld [vmem:[%s14342_s4 + $0xc08] sm:$0xff]  ;;  %v2999_v62 = vld [vmem:[%s14342_s4 + $0xc58] sm:$0xff] }
 0x255   : > { %6375 = vmatpush1.bf16.msra.mxu0 %v6374_v43  ;;  %v2924_v43 = vld [vmem:[%s14342_s4 + $0xa00] sm:$0xff] }
 0x256   : > { %6623 = vmatpush1.bf16.msra.mxu1 %v6622_v44  ;;  %6377 = vmatprep.subr.bf16.mxu0 %v6376_v47  ;;  %v2932_v44 = vld [vmem:[%s14342_s4 + $0xa40] sm:$0xff]  ;;  %v2926_v47 = vld [vmem:[%s14342_s4 + $0xa10] sm:$0xff] }
 0x257   : > { %6625 = vmatprep.subr.bf16.mxu1 %v6624_v48  ;;  %v6640_v48 = vpack.c.bf16 %v2935_v38, %v2927_v55  ;;  %v6394_v52 = vpack.c.bf16 %v2932_v44, %v2924_v43  ;;  %v6642_v57 = vpack.c.bf16 %v2934_v49, %v2926_v47  ;;  %v6656_v43 = vpack.c.bf16 %v2999_v62, %v2991_v36  ;;  %v2998_v44 = vld [vmem:[%s14342_s4 + $0xc50] sm:$0xff]  ;;  %v3005_v47 = vld [vmem:[%s14342_s4 + $0xc88] sm:$0xff]  ;;  %v3007_v49 = vld [vmem:[%s14342_s4 + $0xc98] sm:$0xff] }
 0x258   : > { %3718 = vmatmul.mubr.f32.vlgmr.msra.gmra.mrb[8].mxu0 %v11236_v60 }
 0x259   : > { %4026 = vmatmul.mubr.f32.vlgmr.msra.gmra.mrb[8].mxu1 %v11236_v60  ;;  %3723 = vmatprep.mubr.f32.mxu0 %v11247_v8 }
 0x25a   : > { %6379 = vmatpush1.bf16.msra.mxu0 %v6378_v59  ;;  %4031 = vmatprep.mubr.f32.mxu1 %v11247_v8  ;;  %v2940_v59 = vld [vmem:[%s14342_s4 + $0xa80] sm:$0xff] }
 0x25b   : > { %6627 = vmatpush1.bf16.msra.mxu1 %v6626_v61  ;;  %6381 = vmatprep.subr.bf16.mxu0 %v6380_v0  ;;  %v2948_v61 = vld [vmem:[%s14342_s4 + $0xac0] sm:$0xff]  ;;  %v2942_v0 = vld [vmem:[%s14342_s4 + $0xa90] sm:$0xff] }
 0x25c   : > { %3724 = vmatmul.mubr.f32.gmra.mrb[10].mxu0 %v11268_v16  ;;  %6629 = vmatprep.subr.bf16.mxu1 %v6628_v9  ;;  %v2965_v9 = vld [vmem:[%s14342_s4 + $0xb48] sm:$0xff]  ;;  %v6398_v12 = vpack.c.bf16 %v2948_v61, %v2940_v59  ;;  %v6646_v13 = vpack.c.bf16 %v2950_v2, %v2942_v0  ;;  %v6660_v59 = vpack.c.bf16 %v3015_v50, %v3007_v49  ;;  %v3014_v61 = vld [vmem:[%s14342_s4 + $0xcd0] sm:$0xff]  ;;  %v3023_v2 = vld [vmem:[%s14342_s4 + $0xd18] sm:$0xff] }
 0x25d   : > { %4032 = vmatmul.mubr.f32.gmra.mrb[10].mxu1 %v11268_v16  ;;  %3794 = vmatprep.mubr.f32.mxu0 %v11279_v46  ;;  %v6400_v14 = vpack.c.bf16 %v2965_v9, %v2957_v5  ;;  %v3021_v0 = vld [vmem:[%s14342_s4 + $0xd08] sm:$0xff]  ;;  %v3031_v5 = vld [vmem:[%s14342_s4 + $0xd58] sm:$0xff]  ;;  %v11544_v49 = vld [vmem:[%s14341_s3] sm:$0xff] }
 0x25e   : > { %6383 = vmatpush1.bf16.msra.mxu0 %v6382_v15  ;;  %4102 = vmatprep.mubr.f32.mxu1 %v11279_v46  ;;  %v2956_v15 = vld [vmem:[%s14342_s4 + $0xb00] sm:$0xff] }
 0x25f   : > { %6631 = vmatpush1.bf16.msra.mxu1 %v6630_v18  ;;  %6385 = vmatprep.subr.bf16.mxu0 %v6384_v19  ;;  %v2964_v18 = vld [vmem:[%s14342_s4 + $0xb40] sm:$0xff]  ;;  %v2958_v19 = vld [vmem:[%s14342_s4 + $0xb10] sm:$0xff] }
 0x260   : > { %6633 = vmatprep.subr.bf16.mxu1 %v6632_v25  ;;  %v2981_v25 = vld [vmem:[%s14342_s4 + $0xbc8] sm:$0xff]  ;;  %v6402_v34 = vpack.c.bf16 %v2964_v18, %v2956_v15  ;;  %v6650_v26 = vpack.c.bf16 %v2966_v22, %v2958_v19  ;;  %v6664_v15 = vpack.c.bf16 %v3031_v5, %v3023_v2  ;;  %v3030_v18 = vld [vmem:[%s14342_s4 + $0xd50] sm:$0xff]  ;;  %v3039_v22 = vld [vmem:[%s14342_s4 + $0xd98] sm:$0xff] }
 0x261   : > { %v6404_v27 = vpack.c.bf16 %v2981_v25, %v2973_v23  ;;  %v3037_v19 = vld [vmem:[%s14342_s4 + $0xd88] sm:$0xff]  ;;  %v3047_v23 = vld [vmem:[%s14342_s4 + $0xdd8] sm:$0xff] }
 0x262   : > { %6387 = vmatpush1.bf16.msra.mxu0 %v6386_v28  ;;  %v2972_v28 = vld [vmem:[%s14342_s4 + $0xb80] sm:$0xff]  ;;  %v3087_v2 = vld [vmem:[%s14342_s4 + $0xf18] sm:$0xff] }
 0x263   : > { %6635 = vmatpush1.bf16.msra.mxu1 %v6634_v29  ;;  %6389 = vmatprep.subr.bf16.mxu0 %v6388_v30  ;;  %v2980_v29 = vld [vmem:[%s14342_s4 + $0xbc0] sm:$0xff]  ;;  %v2974_v30 = vld [vmem:[%s14342_s4 + $0xb90] sm:$0xff]  ;;  %v3095_v5 = vld [vmem:[%s14342_s4 + $0xf58] sm:$0xff] }
 0x264   : > { %6637 = vmatprep.subr.bf16.mxu1 %v6636_v35  ;;  %v2997_v35 = vld [vmem:[%s14342_s4 + $0xc48] sm:$0xff]  ;;  %v6406_v37 = vpack.c.bf16 %v2980_v29, %v2972_v28  ;;  %v6654_v55 = vpack.c.bf16 %v2982_v32, %v2974_v30  ;;  %v6668_v28 = vpack.c.bf16 %v3047_v23, %v3039_v22  ;;  %v3046_v29 = vld [vmem:[%s14342_s4 + $0xdd0] sm:$0xff]  ;;  %v3055_v32 = vld [vmem:[%s14342_s4 + $0xe18] sm:$0xff] }
 0x265   : > { %v6408_v38 = vpack.c.bf16 %v2997_v35, %v2989_v33  ;;  %v3053_v30 = vld [vmem:[%s14342_s4 + $0xe08] sm:$0xff]  ;;  %v3063_v33 = vld [vmem:[%s14342_s4 + $0xe58] sm:$0xff]  ;;  %v1326_v35 = vsub.s32 2, %v10703_v6 }
 0x266   : > { %6391 = vmatpush1.bf16.msra.mxu0 %v6390_v39  ;;  %v2988_v39 = vld [vmem:[%s14342_s4 + $0xc00] sm:$0xff]  ;;  %v3111_v22 = vld [vmem:[%s14342_s4 + $0xfd8] sm:$0xff] }
 0x267   : > { %6639 = vmatpush1.bf16.msra.mxu1 %v6638_v41  ;;  %6393 = vmatprep.subr.bf16.mxu0 %v6392_v42  ;;  %v2996_v41 = vld [vmem:[%s14342_s4 + $0xc40] sm:$0xff]  ;;  %v2990_v42 = vld [vmem:[%s14342_s4 + $0xc10] sm:$0xff]  ;;  %v1327_v50 = vrot.slane %v11544_v49, %v1326_v35 }
 0x268   : > { %6641 = vmatprep.subr.bf16.mxu1 %v6640_v48  ;;  %v3013_v48 = vld [vmem:[%s14342_s4 + $0xcc8] sm:$0xff]  ;;  %v6410_v53 = vpack.c.bf16 %v2996_v41, %v2988_v39  ;;  %v6658_v54 = vpack.c.bf16 %v2998_v44, %v2990_v42  ;;  %v3054_v39 = vld [vmem:[%s14342_s4 + $0xe10] sm:$0xff]  ;;  %v6672_v41 = vpack.c.bf16 %v3063_v33, %v3055_v32  ;;  %v3127_v32 = vld [vmem:[%s14342_s4 + $0x1058] sm:$0xff] }
 0x269   : > { %v6412_v56 = vpack.c.bf16 %v3013_v48, %v3005_v47  ;;  %v3062_v42 = vld [vmem:[%s14342_s4 + $0xe50] sm:$0xff]  ;;  %v3077_v44 = vld [vmem:[%s14342_s4 + $0xec8] sm:$0xff]  ;;  %v3071_v47 = vld [vmem:[%s14342_s4 + $0xe98] sm:$0xff]  ;;  %v7310_v23 = vadd.f32 %v10586_v3, %v1327_v50 }
 0x26a   : > { %6395 = vmatpush1.bf16.msra.mxu0 %v6394_v52  ;;  %v3004_v52 = vld [vmem:[%s14342_s4 + $0xc80] sm:$0xff]  ;;  %v3079_v48 = vld [vmem:[%s14342_s4 + $0xed8] sm:$0xff] }
 0x26b   : > { %6643 = vmatpush1.bf16.msra.mxu1 %v6642_v57  ;;  %6397 = vmatprep.subr.bf16.mxu0 %v6396_v58  ;;  %v3012_v57 = vld [vmem:[%s14342_s4 + $0xcc0] sm:$0xff]  ;;  %v3006_v58 = vld [vmem:[%s14342_s4 + $0xc90] sm:$0xff] }
 0x26c   : > { %6645 = vmatprep.subr.bf16.mxu1 %v6644_v1  ;;  %v3029_v1 = vld [vmem:[%s14342_s4 + $0xd48] sm:$0xff]  ;;  %v6414_v9 = vpack.c.bf16 %v3012_v57, %v3004_v52  ;;  %v6662_v10 = vpack.c.bf16 %v3014_v61, %v3006_v58  ;;  %v3068_v52 = vld [vmem:[%s14342_s4 + $0xe80] sm:$0xff]  ;;  %v3070_v58 = vld [vmem:[%s14342_s4 + $0xe90] sm:$0xff] }
 0x26d   : > { %v6416_v11 = vpack.c.bf16 %v3029_v1, %v3021_v0  ;;  %v3076_v57 = vld [vmem:[%s14342_s4 + $0xec0] sm:$0xff]  ;;  %v3078_v61 = vld [vmem:[%s14342_s4 + $0xed0] sm:$0xff]  ;;  %v3085_v0 = vld [vmem:[%s14342_s4 + $0xf08] sm:$0xff] }
 0x26e   : > { %6399 = vmatpush1.bf16.msra.mxu0 %v6398_v12  ;;  %v3020_v12 = vld [vmem:[%s14342_s4 + $0xd00] sm:$0xff]  ;;  %v3093_v1 = vld [vmem:[%s14342_s4 + $0xf48] sm:$0xff] }
 0x26f   : > { %6647 = vmatpush1.bf16.msra.mxu1 %v6646_v13  ;;  %6401 = vmatprep.subr.bf16.mxu0 %v6400_v14  ;;  %v3028_v13 = vld [vmem:[%s14342_s4 + $0xd40] sm:$0xff]  ;;  %v3022_v14 = vld [vmem:[%s14342_s4 + $0xd10] sm:$0xff] }
 0x270   : > { %6649 = vmatprep.subr.bf16.mxu1 %v6648_v21  ;;  %v3045_v21 = vld [vmem:[%s14342_s4 + $0xdc8] sm:$0xff]  ;;  %v6418_v25 = vpack.c.bf16 %v3028_v13, %v3020_v12  ;;  %v6666_v24 = vpack.c.bf16 %v3030_v18, %v3022_v14  ;;  %v6678_v12 = vpack.c.bf16 %v3078_v61, %v3070_v58  ;;  %v6432_v13 = vpack.c.bf16 %v3093_v1, %v3085_v0  ;;  %v3084_v14 = vld [vmem:[%s14342_s4 + $0xf00] sm:$0xff]  ;;  %v3142_v61 = vld [vmem:[%s14342_s4 + $0x10d0] sm:$0xff] }
 0x271   : > { %v6420_v4 = vpack.c.bf16 %v3045_v21, %v3037_v19  ;;  %v6680_v18 = vpack.c.bf16 %v3095_v5, %v3087_v2  ;;  %v3109_v19 = vld [vmem:[%s14342_s4 + $0xfc8] sm:$0xff]  ;;  %v3103_v21 = vld [vmem:[%s14342_s4 + $0xf98] sm:$0xff] }
 0x272   : > { %6403 = vmatpush1.bf16.msra.mxu0 %v6402_v34  ;;  %v3036_v34 = vld [vmem:[%s14342_s4 + $0xd80] sm:$0xff]  ;;  %v6684_v3 = vpack.c.bf16 %v3111_v22, %v3103_v21  ;;  %v3149_v0 = vld [vmem:[%s14342_s4 + $0x1108] sm:$0xff]  ;;  %v3151_v2 = vld [vmem:[%s14342_s4 + $0x1118] sm:$0xff] }
 0x273   : > { %6651 = vmatpush1.bf16.msra.mxu1 %v6650_v26  ;;  %6405 = vmatprep.subr.bf16.mxu0 %v6404_v27  ;;  %v3044_v26 = vld [vmem:[%s14342_s4 + $0xdc0] sm:$0xff]  ;;  %v3038_v27 = vld [vmem:[%s14342_s4 + $0xd90] sm:$0xff]  ;;  %v3157_v1 = vld [vmem:[%s14342_s4 + $0x1148] sm:$0xff] }
 0x274   : > { %6653 = vmatprep.subr.bf16.mxu1 %v6652_v31  ;;  %v3061_v31 = vld [vmem:[%s14342_s4 + $0xe48] sm:$0xff]  ;;  %v6422_v36 = vpack.c.bf16 %v3044_v26, %v3036_v34  ;;  %v6670_v62 = vpack.c.bf16 %v3046_v29, %v3038_v27  ;;  %v3100_v34 = vld [vmem:[%s14342_s4 + $0xf80] sm:$0xff]  ;;  %v3102_v27 = vld [vmem:[%s14342_s4 + $0xf90] sm:$0xff] }
 0x275   : > { %v3108_v26 = vld [vmem:[%s14342_s4 + $0xfc0] sm:$0xff]  ;;  %v3117_v29 = vld [vmem:[%s14342_s4 + $0x1008] sm:$0xff]  ;;  %v3159_v5 = vld [vmem:[%s14342_s4 + $0x1158] sm:$0xff] }
 0x276   : > { %6407 = vmatpush1.bf16.msra.mxu0 %v6406_v37  ;;  %v6424_v37 = vpack.c.bf16 %v3061_v31, %v3053_v30  ;;  %v3125_v30 = vld [vmem:[%s14342_s4 + $0x1048] sm:$0xff]  ;;  %v3119_v31 = vld [vmem:[%s14342_s4 + $0x1018] sm:$0xff]  ;;  %v6438_v33 = vpack.c.bf16 %v3108_v26, %v3100_v34  ;;  %v3166_v34 = vld [vmem:[%s14342_s4 + $0x1190] sm:$0xff] }
 0x277   : > { %6655 = vmatpush1.bf16.msra.mxu1 %v6654_v55  ;;  %6409 = vmatprep.subr.bf16.mxu0 %v6408_v38  ;;  %v3052_v55 = vld [vmem:[%s14342_s4 + $0xe00] sm:$0xff]  ;;  %v3175_v21 = vld [vmem:[%s14342_s4 + $0x11d8] sm:$0xff] }
 0x278   : > { %6657 = vmatprep.subr.bf16.mxu1 %v6656_v43  ;;  %v3060_v38 = vld [vmem:[%s14342_s4 + $0xe40] sm:$0xff]  ;;  %v3069_v43 = vld [vmem:[%s14342_s4 + $0xe88] sm:$0xff] }
 0x27a   : > { %6411 = vmatpush1.bf16.msra.mxu0 %v6410_v53  ;;  %v6426_v53 = vpack.c.bf16 %v3060_v38, %v3052_v55  ;;  %v3116_v55 = vld [vmem:[%s14342_s4 + $0x1000] sm:$0xff] }
 0x27b   : > { %6659 = vmatpush1.bf16.msra.mxu1 %v6658_v54  ;;  %6413 = vmatprep.subr.bf16.mxu0 %v6412_v56  ;;  %v6674_v54 = vpack.c.bf16 %v3062_v42, %v3054_v39  ;;  %v6428_v56 = vpack.c.bf16 %v3077_v44, %v3069_v43  ;;  %v3124_v38 = vld [vmem:[%s14342_s4 + $0x1040] sm:$0xff]  ;;  %v3118_v39 = vld [vmem:[%s14342_s4 + $0x1010] sm:$0xff]  ;;  %v3133_v42 = vld [vmem:[%s14342_s4 + $0x1088] sm:$0xff] }
 0x27c   : > { %6661 = vmatprep.subr.bf16.mxu1 %v6660_v59  ;;  %v6676_v59 = vpack.c.bf16 %v3079_v48, %v3071_v47  ;;  %v3141_v43 = vld [vmem:[%s14342_s4 + $0x10c8] sm:$0xff]  ;;  %v3135_v44 = vld [vmem:[%s14342_s4 + $0x1098] sm:$0xff]  ;;  %v6442_v48 = vpack.c.bf16 %v3124_v38, %v3116_v55  ;;  %v3190_v38 = vld [vmem:[%s14342_s4 + $0x1250] sm:$0xff] }
 0x27d   : > { %v3143_v47 = vld [vmem:[%s14342_s4 + $0x10d8] sm:$0xff] }
 0x27e   : > { %6415 = vmatpush1.bf16.msra.mxu0 %v6414_v9  ;;  %v7308_v9 = vadd.f32 %v10554_v51, %v1327_v50  ;;  %v3086_v51 = vld [vmem:[%s14342_s4 + $0xf10] sm:$0xff] }
 0x27f   : > { %6663 = vmatpush1.bf16.msra.mxu1 %v6662_v10  ;;  %6417 = vmatprep.subr.bf16.mxu0 %v6416_v11  ;;  %v6430_v10 = vpack.c.bf16 %v3076_v57, %v3068_v52  ;;  %v7311_v11 = vadd.f32 %v10596_v7, %v11157_v17  ;;  %v3094_v7 = vld [vmem:[%s14342_s4 + $0xf50] sm:$0xff]  ;;  %v3101_v17 = vld [vmem:[%s14342_s4 + $0xf88] sm:$0xff]  ;;  %v3140_v52 = vld [vmem:[%s14342_s4 + $0x10c0] sm:$0xff] }
 0x280   : > { %6665 = vmatprep.subr.bf16.mxu1 %v6664_v15  ;;  %v3092_v15 = vld [vmem:[%s14342_s4 + $0xf40] sm:$0xff]  ;;  %7460 = vtanh.f32 %v7308_v9  ;;  %v3134_v57 = vld [vmem:[%s14342_s4 + $0x1090] sm:$0xff] }
 0x281   : > { %7462 = vtanh.f32 %v7311_v11  ;;  %v6694_v11 = vpack.c.bf16 %v3142_v61, %v3134_v57  ;;  %v3206_v57 = vld [vmem:[%s14342_s4 + $0x12d0] sm:$0xff]  ;;  %v3221_v61 = vld [vmem:[%s14342_s4 + $0x1348] sm:$0xff] }
 0x282   : > { %6419 = vmatpush1.bf16.msra.mxu0 %v6418_v25  ;;  %v6434_v25 = vpack.c.bf16 %v3092_v15, %v3084_v14  ;;  %7464 = vtanh.f32 %v7310_v23  ;;  %v3156_v14 = vld [vmem:[%s14342_s4 + $0x1140] sm:$0xff]  ;;  %v3150_v15 = vld [vmem:[%s14342_s4 + $0x1110] sm:$0xff] }
 0x283   : > { %6667 = vmatpush1.bf16.msra.mxu1 %v6666_v24  ;;  %6421 = vmatprep.subr.bf16.mxu0 %v6420_v4  ;;  %v6682_v24 = vpack.c.bf16 %v3094_v7, %v3086_v51  ;;  %v6436_v4 = vpack.c.bf16 %v3109_v19, %v3101_v17  ;;  %v6696_v51 = vpack.c.bf16 %v3159_v5, %v3151_v2  ;;  %v3165_v7 = vld [vmem:[%s14342_s4 + $0x1188] sm:$0xff]  ;;  %v3167_v19 = vld [vmem:[%s14342_s4 + $0x1198] sm:$0xff] }
 0x284   : > { %6669 = vmatprep.subr.bf16.mxu1 %v6668_v28  ;;  %v3110_v28 = vld [vmem:[%s14342_s4 + $0xfd0] sm:$0xff]  ;;  %v3173_v17 = vld [vmem:[%s14342_s4 + $0x11c8] sm:$0xff]  ;;  %v6700_v26 = vpack.c.bf16 %v3175_v21, %v3167_v19 }
 0x286   : > { %6423 = vmatpush1.bf16.msra.mxu0 %v6422_v36  ;;  %v6686_v36 = vpack.c.bf16 %v3110_v28, %v3102_v27  ;;  %v3174_v27 = vld [vmem:[%s14342_s4 + $0x11d0] sm:$0xff]  ;;  %v3189_v28 = vld [vmem:[%s14342_s4 + $0x1248] sm:$0xff] }
 0x287   : > { %6671 = vmatpush1.bf16.msra.mxu1 %v6670_v62  ;;  %6425 = vmatprep.subr.bf16.mxu0 %v6424_v37  ;;  %v6440_v62 = vpack.c.bf16 %v3125_v30, %v3117_v29  ;;  %v6688_v37 = vpack.c.bf16 %v3127_v32, %v3119_v31  ;;  %v3183_v29 = vld [vmem:[%s14342_s4 + $0x1218] sm:$0xff]  ;;  %v6702_v32 = vpack.c.bf16 %v3174_v27, %v3166_v34  ;;  %v3238_v34 = vld [vmem:[%s14342_s4 + $0x13d0] sm:$0xff]  ;;  %v3253_v27 = vld [vmem:[%s14342_s4 + $0x1448] sm:$0xff] }
 0x288   : > { %6673 = vmatprep.subr.bf16.mxu1 %v6672_v41  ;;  %v3126_v41 = vld [vmem:[%s14342_s4 + $0x1050] sm:$0xff]  ;;  %v3191_v30 = vld [vmem:[%s14342_s4 + $0x1258] sm:$0xff] }
 0x289   : > { %v6704_v55 = vpack.c.bf16 %v3191_v30, %v3183_v29 }
 0x28a   : > { %6427 = vmatpush1.bf16.msra.mxu0 %v6426_v53  ;;  %v11649_v50 = vpop.eup %7460  ;;  %v6690_v53 = vpack.c.bf16 %v3126_v41, %v3118_v39  ;;  %v3197_v39 = vld [vmem:[%s14342_s4 + $0x1288] sm:$0xff] }
 0x28b   : > { %6675 = vmatpush1.bf16.msra.mxu1 %v6674_v54  ;;  %6429 = vmatprep.subr.bf16.mxu0 %v6428_v56  ;;  %v6444_v54 = vpack.c.bf16 %v3141_v43, %v3133_v42  ;;  %v3132_v56 = vld [vmem:[%s14342_s4 + $0x1080] sm:$0xff]  ;;  %v11660_v58 = vpop.eup %7462  ;;  %v3205_v41 = vld [vmem:[%s14342_s4 + $0x12c8] sm:$0xff]  ;;  %v3199_v42 = vld [vmem:[%s14342_s4 + $0x1298] sm:$0xff] }
 0x28c   : > { %6677 = vmatprep.subr.bf16.mxu1 %v6676_v59  ;;  %v6692_v59 = vpack.c.bf16 %v3143_v47, %v3135_v44  ;;  %v6446_v9 = vpack.c.bf16 %v3140_v52, %v3132_v56  ;;  %v3207_v43 = vld [vmem:[%s14342_s4 + $0x12d8] sm:$0xff]  ;;  %v3198_v56 = vld [vmem:[%s14342_s4 + $0x1290] sm:$0xff] }
 0x28d   : > { %v6708_v52 = vpack.c.bf16 %v3207_v43, %v3199_v42  ;;  %v6710_v5 = vpack.c.bf16 %v3206_v57, %v3198_v56  ;;  %v3270_v56 = vld [vmem:[%s14342_s4 + $0x14d0] sm:$0xff]  ;;  %v3285_v57 = vld [vmem:[%s14342_s4 + $0x1548] sm:$0xff] }
 0x28e   : > { %6431 = vmatpush1.bf16.msra.mxu0 %v6430_v10  ;;  %v11681_v10 = vpop.eup %7464 }
 0x28f   : > { %6679 = vmatpush1.bf16.msra.mxu1 %v6678_v12  ;;  %6433 = vmatprep.subr.bf16.mxu0 %v6432_v13  ;;  %v6448_v12 = vpack.c.bf16 %v3157_v1, %v3149_v0  ;;  %v3148_v13 = vld [vmem:[%s14342_s4 + $0x1100] sm:$0xff]  ;;  %v3215_v0 = vld [vmem:[%s14342_s4 + $0x1318] sm:$0xff] }
 0x290   : > { %6681 = vmatprep.subr.bf16.mxu1 %v6680_v18  ;;  %v3158_v18 = vld [vmem:[%s14342_s4 + $0x1150] sm:$0xff]  ;;  %v6450_v22 = vpack.c.bf16 %v3156_v14, %v3148_v13  ;;  %v3223_v1 = vld [vmem:[%s14342_s4 + $0x1358] sm:$0xff] }
 0x291   : > { %v6698_v23 = vpack.c.bf16 %v3158_v18, %v3150_v15  ;;  %v3214_v13 = vld [vmem:[%s14342_s4 + $0x1310] sm:$0xff]  ;;  %v6712_v14 = vpack.c.bf16 %v3223_v1, %v3215_v0  ;;  %v3237_v18 = vld [vmem:[%s14342_s4 + $0x13c8] sm:$0xff] }
 0x292   : > { %6435 = vmatpush1.bf16.msra.mxu0 %v6434_v25  ;;  %v6452_v25 = vpack.c.bf16 %v3173_v17, %v3165_v7  ;;  %v3222_v15 = vld [vmem:[%s14342_s4 + $0x1350] sm:$0xff]  ;;  %v3231_v7 = vld [vmem:[%s14342_s4 + $0x1398] sm:$0xff] }
 0x293   : > { %6683 = vmatpush1.bf16.msra.mxu1 %v6682_v24  ;;  %6437 = vmatprep.subr.bf16.mxu0 %v6436_v4  ;;  %v3164_v24 = vld [vmem:[%s14342_s4 + $0x1180] sm:$0xff]  ;;  %v3239_v17 = vld [vmem:[%s14342_s4 + $0x13d8] sm:$0xff]  ;;  %v6714_v21 = vpack.c.bf16 %v3222_v15, %v3214_v13  ;;  %v3286_v13 = vld [vmem:[%s14342_s4 + $0x1550] sm:$0xff] }
 0x294   : > { %6685 = vmatprep.subr.bf16.mxu1 %v6684_v3  ;;  %v3172_v4 = vld [vmem:[%s14342_s4 + $0x11c0] sm:$0xff]  ;;  %v3181_v3 = vld [vmem:[%s14342_s4 + $0x1208] sm:$0xff] }
 0x295   : > { %v6454_v31 = vpack.c.bf16 %v3172_v4, %v3164_v24  ;;  %v3230_v24 = vld [vmem:[%s14342_s4 + $0x1390] sm:$0xff]  ;;  %v6716_v4 = vpack.c.bf16 %v3239_v17, %v3231_v7  ;;  %v3301_v15 = vld [vmem:[%s14342_s4 + $0x15c8] sm:$0xff] }
 0x296   : > { %6439 = vmatpush1.bf16.msra.mxu0 %v6438_v33  ;;  %v6456_v33 = vpack.c.bf16 %v3189_v28, %v3181_v3  ;;  %v3247_v3 = vld [vmem:[%s14342_s4 + $0x1418] sm:$0xff]  ;;  %v6718_v30 = vpack.c.bf16 %v3238_v34, %v3230_v24  ;;  %v3302_v24 = vld [vmem:[%s14342_s4 + $0x15d0] sm:$0xff]  ;;  %v3317_v34 = vld [vmem:[%s14342_s4 + $0x1648] sm:$0xff] }
 0x297   : > { %6687 = vmatpush1.bf16.msra.mxu1 %v6686_v36  ;;  %6441 = vmatprep.subr.bf16.mxu0 %v6440_v62  ;;  %v3180_v36 = vld [vmem:[%s14342_s4 + $0x1200] sm:$0xff]  ;;  %v3255_v28 = vld [vmem:[%s14342_s4 + $0x1458] sm:$0xff] }
 0x298   : > { %6689 = vmatprep.subr.bf16.mxu1 %v6688_v37  ;;  %v3188_v62 = vld [vmem:[%s14342_s4 + $0x1240] sm:$0xff]  ;;  %v3182_v37 = vld [vmem:[%s14342_s4 + $0x1210] sm:$0xff] }
 0x299   : > { %3795 = vmatmul.mubr.f32.vlgmr.msra.gmra.mrb[8].mxu0 %v11649_v50  ;;  %v6458_v44 = vpack.c.bf16 %v3188_v62, %v3180_v36  ;;  %v6706_v47 = vpack.c.bf16 %v3190_v38, %v3182_v37  ;;  %v3246_v36 = vld [vmem:[%s14342_s4 + $0x1410] sm:$0xff]  ;;  %v6720_v62 = vpack.c.bf16 %v3255_v28, %v3247_v3  ;;  %v3269_v38 = vld [vmem:[%s14342_s4 + $0x14c8] sm:$0xff] }
 0x29a   : > { %4103 = vmatmul.mubr.f32.vlgmr.msra.gmra.mrb[8].mxu1 %v11649_v50  ;;  %3800 = vmatprep.mubr.f32.mxu0 %v11660_v58  ;;  %v3254_v37 = vld [vmem:[%s14342_s4 + $0x1450] sm:$0xff] }
 0x29b   : > { %4108 = vmatprep.mubr.f32.mxu1 %v11660_v58  ;;  %6443 = vmatpush1.bf16.msra.mxu0 %v6442_v48  ;;  %v6460_v48 = vpack.c.bf16 %v3205_v41, %v3197_v39  ;;  %v3263_v39 = vld [vmem:[%s14342_s4 + $0x1498] sm:$0xff]  ;;  %v6722_v43 = vpack.c.bf16 %v3254_v37, %v3246_v36  ;;  %v3318_v36 = vld [vmem:[%s14342_s4 + $0x1650] sm:$0xff]  ;;  %v3333_v37 = vld [vmem:[%s14342_s4 + $0x16c8] sm:$0xff] }
 0x29c   : > { %6691 = vmatpush1.bf16.msra.mxu1 %v6690_v53  ;;  %6445 = vmatprep.subr.bf16.mxu0 %v6444_v54  ;;  %v3196_v53 = vld [vmem:[%s14342_s4 + $0x1280] sm:$0xff]  ;;  %v3271_v41 = vld [vmem:[%s14342_s4 + $0x14d8] sm:$0xff] }
 0x29d   : > { %3801 = vmatmul.mubr.f32.gmra.mrb[10].mxu0 %v11681_v10  ;;  %6693 = vmatprep.subr.bf16.mxu1 %v6692_v59  ;;  %v3204_v54 = vld [vmem:[%s14342_s4 + $0x12c0] sm:$0xff]  ;;  %v3213_v59 = vld [vmem:[%s14342_s4 + $0x1308] sm:$0xff] }
 0x29e   : > { %4109 = vmatmul.mubr.f32.gmra.mrb[10].mxu1 %v11681_v10  ;;  %v6462_v2 = vpack.c.bf16 %v3204_v54, %v3196_v53  ;;  %v3262_v53 = vld [vmem:[%s14342_s4 + $0x1490] sm:$0xff]  ;;  %v6724_v54 = vpack.c.bf16 %v3271_v41, %v3263_v39 }
 0x29f   : > { %6447 = vmatpush1.bf16.msra.mxu0 %v6446_v9  ;;  %v6464_v9 = vpack.c.bf16 %v3221_v61, %v3213_v59  ;;  %v3279_v59 = vld [vmem:[%s14342_s4 + $0x1518] sm:$0xff]  ;;  %v6726_v1 = vpack.c.bf16 %v3270_v56, %v3262_v53  ;;  %v3334_v53 = vld [vmem:[%s14342_s4 + $0x16d0] sm:$0xff]  ;;  %v3349_v56 = vld [vmem:[%s14342_s4 + $0x1748] sm:$0xff] }
 0x2a0   : > { %6695 = vmatpush1.bf16.msra.mxu1 %v6694_v11  ;;  %6449 = vmatprep.subr.bf16.mxu0 %v6448_v12  ;;  %v3212_v11 = vld [vmem:[%s14342_s4 + $0x1300] sm:$0xff]  ;;  %v3287_v61 = vld [vmem:[%s14342_s4 + $0x1558] sm:$0xff] }
 0x2a1   : > { %6697 = vmatprep.subr.bf16.mxu1 %v6696_v51  ;;  %v3220_v12 = vld [vmem:[%s14342_s4 + $0x1340] sm:$0xff]  ;;  %v3229_v51 = vld [vmem:[%s14342_s4 + $0x1388] sm:$0xff] }
 0x2a2   : > { %v6466_v19 = vpack.c.bf16 %v3220_v12, %v3212_v11  ;;  %v3278_v11 = vld [vmem:[%s14342_s4 + $0x1510] sm:$0xff]  ;;  %v6728_v12 = vpack.c.bf16 %v3287_v61, %v3279_v59 }
 0x2a3   : > { %6451 = vmatpush1.bf16.msra.mxu0 %v6450_v22  ;;  %v6468_v22 = vpack.c.bf16 %v3237_v18, %v3229_v51  ;;  %v3295_v51 = vld [vmem:[%s14342_s4 + $0x1598] sm:$0xff]  ;;  %v6730_v17 = vpack.c.bf16 %v3286_v13, %v3278_v11  ;;  %v3350_v11 = vld [vmem:[%s14342_s4 + $0x1750] sm:$0xff]  ;;  %v3365_v13 = vld [vmem:[%s14342_s4 + $0x17c8] sm:$0xff] }
 0x2a4   : > { %6699 = vmatpush1.bf16.msra.mxu1 %v6698_v23  ;;  %6453 = vmatprep.subr.bf16.mxu0 %v6452_v25  ;;  %v3228_v23 = vld [vmem:[%s14342_s4 + $0x1380] sm:$0xff]  ;;  %v3303_v18 = vld [vmem:[%s14342_s4 + $0x15d8] sm:$0xff] }
 0x2a5   : > { %6701 = vmatprep.subr.bf16.mxu1 %v6700_v26  ;;  %v3236_v25 = vld [vmem:[%s14342_s4 + $0x13c0] sm:$0xff]  ;;  %v3245_v26 = vld [vmem:[%s14342_s4 + $0x1408] sm:$0xff] }
 0x2a6   : > { %v6470_v29 = vpack.c.bf16 %v3236_v25, %v3228_v23  ;;  %v3294_v23 = vld [vmem:[%s14342_s4 + $0x1590] sm:$0xff]  ;;  %v6732_v25 = vpack.c.bf16 %v3303_v18, %v3295_v51 }
 0x2a7   : > { %6455 = vmatpush1.bf16.msra.mxu0 %v6454_v31  ;;  %v6472_v31 = vpack.c.bf16 %v3253_v27, %v3245_v26  ;;  %v3311_v26 = vld [vmem:[%s14342_s4 + $0x1618] sm:$0xff]  ;;  %v6734_v28 = vpack.c.bf16 %v3302_v24, %v3294_v23  ;;  %v3366_v23 = vld [vmem:[%s14342_s4 + $0x17d0] sm:$0xff]  ;;  %v3381_v24 = vld [vmem:[%s14342_s4 + $0x1848] sm:$0xff] }
 0x2a8   : > { %6703 = vmatpush1.bf16.msra.mxu1 %v6702_v32  ;;  %6457 = vmatprep.subr.bf16.mxu0 %v6456_v33  ;;  %v3244_v32 = vld [vmem:[%s14342_s4 + $0x1400] sm:$0xff]  ;;  %v3319_v27 = vld [vmem:[%s14342_s4 + $0x1658] sm:$0xff] }
 0x2a9   : > { %6705 = vmatprep.subr.bf16.mxu1 %v6704_v55  ;;  %v3252_v33 = vld [vmem:[%s14342_s4 + $0x1440] sm:$0xff]  ;;  %v3261_v55 = vld [vmem:[%s14342_s4 + $0x1488] sm:$0xff] }
 0x2aa   : > { %v6474_v42 = vpack.c.bf16 %v3252_v33, %v3244_v32  ;;  %v3310_v32 = vld [vmem:[%s14342_s4 + $0x1610] sm:$0xff]  ;;  %v6736_v33 = vpack.c.bf16 %v3319_v27, %v3311_v26 }
 0x2ab   : > { %6459 = vmatpush1.bf16.msra.mxu0 %v6458_v44  ;;  %v6476_v44 = vpack.c.bf16 %v3269_v38, %v3261_v55  ;;  %v3327_v55 = vld [vmem:[%s14342_s4 + $0x1698] sm:$0xff]  ;;  %v6738_v41 = vpack.c.bf16 %v3318_v36, %v3310_v32  ;;  %v1346_v36 = vsub.s32 7, %v10703_v6 }
 0x2ac   : > { %6707 = vmatpush1.bf16.msra.mxu1 %v6706_v47  ;;  %6461 = vmatprep.subr.bf16.mxu0 %v6460_v48  ;;  %v3260_v47 = vld [vmem:[%s14342_s4 + $0x1480] sm:$0xff]  ;;  %v3335_v38 = vld [vmem:[%s14342_s4 + $0x16d8] sm:$0xff] }
 0x2ad   : > { %6709 = vmatprep.subr.bf16.mxu1 %v6708_v52  ;;  %v3268_v48 = vld [vmem:[%s14342_s4 + $0x14c0] sm:$0xff]  ;;  %v3277_v52 = vld [vmem:[%s14342_s4 + $0x1508] sm:$0xff] }
 0x2ae   : > { %v6478_v0 = vpack.c.bf16 %v3268_v48, %v3260_v47  ;;  %v3326_v47 = vld [vmem:[%s14342_s4 + $0x1690] sm:$0xff]  ;;  %v6740_v48 = vpack.c.bf16 %v3335_v38, %v3327_v55 }
 0x2af   : > { %6463 = vmatpush1.bf16.msra.mxu0 %v6462_v2  ;;  %v6480_v2 = vpack.c.bf16 %v3285_v57, %v3277_v52  ;;  %v3343_v52 = vld [vmem:[%s14342_s4 + $0x1718] sm:$0xff]  ;;  %v6742_v61 = vpack.c.bf16 %v3334_v53, %v3326_v47 }
 0x2b0   : > { %6711 = vmatpush1.bf16.msra.mxu1 %v6710_v5  ;;  %6465 = vmatprep.subr.bf16.mxu0 %v6464_v9  ;;  %v3276_v5 = vld [vmem:[%s14342_s4 + $0x1500] sm:$0xff]  ;;  %v3351_v57 = vld [vmem:[%s14342_s4 + $0x1758] sm:$0xff] }
 0x2b1   : > { %6713 = vmatprep.subr.bf16.mxu1 %v6712_v14  ;;  %v3284_v9 = vld [vmem:[%s14342_s4 + $0x1540] sm:$0xff]  ;;  %v3293_v14 = vld [vmem:[%s14342_s4 + $0x1588] sm:$0xff] }
 0x2b2   : > { %v6482_v7 = vpack.c.bf16 %v3284_v9, %v3276_v5  ;;  %v3342_v5 = vld [vmem:[%s14342_s4 + $0x1710] sm:$0xff]  ;;  %v6744_v9 = vpack.c.bf16 %v3351_v57, %v3343_v52 }
 0x2b3   : > { %6467 = vmatpush1.bf16.msra.mxu0 %v6466_v19  ;;  %v6484_v19 = vpack.c.bf16 %v3301_v15, %v3293_v14  ;;  %v3359_v14 = vld [vmem:[%s14342_s4 + $0x1798] sm:$0xff]  ;;  %v6746_v18 = vpack.c.bf16 %v3350_v11, %v3342_v5  ;;  %v3374_v52 = vld [vmem:[%s14342_s4 + $0x1810] sm:$0xff] }
 0x2b4   : > { %6715 = vmatpush1.bf16.msra.mxu1 %v6714_v21  ;;  %6469 = vmatprep.subr.bf16.mxu0 %v6468_v22  ;;  %v3292_v21 = vld [vmem:[%s14342_s4 + $0x1580] sm:$0xff]  ;;  %v3367_v15 = vld [vmem:[%s14342_s4 + $0x17d8] sm:$0xff]  ;;  %v3382_v57 = vld [vmem:[%s14342_s4 + $0x1850] sm:$0xff] }
 0x2b5   : > { %6717 = vmatprep.subr.bf16.mxu1 %v6716_v4  ;;  %v3300_v22 = vld [vmem:[%s14342_s4 + $0x15c0] sm:$0xff]  ;;  %v3309_v4 = vld [vmem:[%s14342_s4 + $0x1608] sm:$0xff]  ;;  %v6754_v5 = vpack.c.bf16 %v3382_v57, %v3374_v52  ;;  %v3439_v57 = vld [vmem:[%s14342_s4 + $0x1a18] sm:$0xff] }
 0x2b6   : > { %v6486_v3 = vpack.c.bf16 %v3300_v22, %v3292_v21  ;;  %v3358_v21 = vld [vmem:[%s14342_s4 + $0x1790] sm:$0xff]  ;;  %v6748_v22 = vpack.c.bf16 %v3367_v15, %v3359_v14  ;;  %v3396_v14 = vld [vmem:[%s14342_s4 + $0x18c0] sm:$0xff]  ;;  %v3445_v52 = vld [vmem:[%s14342_s4 + $0x1a48] sm:$0xff] }
 0x2b7   : > { %6471 = vmatpush1.bf16.msra.mxu0 %v6470_v29  ;;  %v6488_v29 = vpack.c.bf16 %v3317_v34, %v3309_v4  ;;  %v3375_v4 = vld [vmem:[%s14342_s4 + $0x1818] sm:$0xff]  ;;  %v6750_v27 = vpack.c.bf16 %v3366_v23, %v3358_v21  ;;  %v3390_v15 = vld [vmem:[%s14342_s4 + $0x1890] sm:$0xff] }
 0x2b8   : > { %6719 = vmatpush1.bf16.msra.mxu1 %v6718_v30  ;;  %6473 = vmatprep.subr.bf16.mxu0 %v6472_v31  ;;  %v3308_v30 = vld [vmem:[%s14342_s4 + $0x1600] sm:$0xff]  ;;  %v3383_v34 = vld [vmem:[%s14342_s4 + $0x1858] sm:$0xff] }
 0x2b9   : > { %6721 = vmatprep.subr.bf16.mxu1 %v6720_v62  ;;  %v3316_v31 = vld [vmem:[%s14342_s4 + $0x1640] sm:$0xff]  ;;  %v3325_v62 = vld [vmem:[%s14342_s4 + $0x1688] sm:$0xff]  ;;  %v3415_v21 = vld [vmem:[%s14342_s4 + $0x1958] sm:$0xff] }
 0x2ba   : > { %v6490_v39 = vpack.c.bf16 %v3316_v31, %v3308_v30  ;;  %v1338_v30 = vsub.s32 5, %v10703_v6 }
 0x2bb   : > { %6475 = vmatpush1.bf16.msra.mxu0 %v6474_v42  ;;  %v6492_v42 = vpack.c.bf16 %v3333_v37, %v3325_v62 }
 0x2bc   : > { %6723 = vmatpush1.bf16.msra.mxu1 %v6722_v43  ;;  %6477 = vmatprep.subr.bf16.mxu0 %v6476_v44  ;;  %v3324_v43 = vld [vmem:[%s14342_s4 + $0x1680] sm:$0xff]  ;;  %v1339_v32 = vrot.slane %v11544_v49, %v1338_v30 }
 0x2bd   : > { %6725 = vmatprep.subr.bf16.mxu1 %v6724_v54  ;;  %v3332_v44 = vld [vmem:[%s14342_s4 + $0x16c0] sm:$0xff]  ;;  %v3341_v54 = vld [vmem:[%s14342_s4 + $0x1708] sm:$0xff] }
 0x2be   : > { %v6494_v59 = vpack.c.bf16 %v3332_v44, %v3324_v43 }
 0x2bf   : > { %6479 = vmatpush1.bf16.msra.mxu0 %v6478_v0  ;;  %v6496_v0 = vpack.c.bf16 %v3349_v56, %v3341_v54  ;;  %v3372_v56 = vld [vmem:[%s14342_s4 + $0x1800] sm:$0xff] }
 0x2c0   : > { %6727 = vmatpush1.bf16.msra.mxu1 %v6726_v1  ;;  %6481 = vmatprep.subr.bf16.mxu0 %v6480_v2  ;;  %v3340_v1 = vld [vmem:[%s14342_s4 + $0x1700] sm:$0xff] }
 0x2c1   : > { %6729 = vmatprep.subr.bf16.mxu1 %v6728_v12  ;;  %v3348_v2 = vld [vmem:[%s14342_s4 + $0x1740] sm:$0xff]  ;;  %v3357_v12 = vld [vmem:[%s14342_s4 + $0x1788] sm:$0xff] }
 0x2c2   : > { %v6498_v51 = vpack.c.bf16 %v3348_v2, %v3340_v1  ;;  %v3399_v1 = vld [vmem:[%s14342_s4 + $0x18d8] sm:$0xff] }
 0x2c3   : > { %6483 = vmatpush1.bf16.msra.mxu0 %v6482_v7  ;;  %v6500_v7 = vpack.c.bf16 %v3365_v13, %v3357_v12 }
 0x2c4   : > { %6731 = vmatpush1.bf16.msra.mxu1 %v6730_v17  ;;  %6485 = vmatprep.subr.bf16.mxu0 %v6484_v19  ;;  %v3356_v17 = vld [vmem:[%s14342_s4 + $0x1780] sm:$0xff] }
 0x2c5   : > { %6733 = vmatprep.subr.bf16.mxu1 %v6732_v25  ;;  %v3364_v19 = vld [vmem:[%s14342_s4 + $0x17c0] sm:$0xff]  ;;  %v3373_v25 = vld [vmem:[%s14342_s4 + $0x1808] sm:$0xff] }
 0x2c6   : > { %v6502_v26 = vpack.c.bf16 %v3364_v19, %v3356_v17  ;;  %v3413_v17 = vld [vmem:[%s14342_s4 + $0x1948] sm:$0xff]  ;;  %v3407_v19 = vld [vmem:[%s14342_s4 + $0x1918] sm:$0xff] }
 0x2c7   : > { %6487 = vmatpush1.bf16.msra.mxu0 %v6486_v3  ;;  %v6504_v3 = vpack.c.bf16 %v3381_v24, %v3373_v25  ;;  %v3404_v25 = vld [vmem:[%s14342_s4 + $0x1900] sm:$0xff] }
 0x2c8   : > { %6735 = vmatpush1.bf16.msra.mxu1 %v6734_v28  ;;  %6489 = vmatprep.subr.bf16.mxu0 %v6488_v29  ;;  %v6752_v28 = vpack.c.bf16 %v3383_v34, %v3375_v4  ;;  %v1334_v29 = vsub.s32 4, %v10703_v6  ;;  %v3412_v24 = vld [vmem:[%s14342_s4 + $0x1940] sm:$0xff]  ;;  %v3406_v34 = vld [vmem:[%s14342_s4 + $0x1910] sm:$0xff] }
 0x2c9   : > { %6737 = vmatprep.subr.bf16.mxu1 %v6736_v33 }
 0x2ca   : > { %v1335_v31 = vrot.slane %v11544_v49, %v1334_v29 }
 0x2cb   : > { %6491 = vmatpush1.bf16.msra.mxu0 %v6490_v39 }
 0x2cc   : > { %6739 = vmatpush1.bf16.msra.mxu1 %v6738_v41  ;;  %6493 = vmatprep.subr.bf16.mxu0 %v6492_v42  ;;  %v12035_v41 = vrot.slane %v11544_v49, %v1346_v36  ;;  %v3380_v49 = vld [vmem:[%s14342_s4 + $0x1840] sm:$0xff] }
 0x2cd   : > { %6741 = vmatprep.subr.bf16.mxu1 %v6740_v48  ;;  %v6506_v2 = vpack.c.bf16 %v3380_v49, %v3372_v56  ;;  %v3430_v56 = vld [vmem:[%s14342_s4 + $0x19d0] sm:$0xff]  ;;  %v3437_v49 = vld [vmem:[%s14342_s4 + $0x1a08] sm:$0xff] }
 0x2cf   : > { %6495 = vmatpush1.bf16.msra.mxu0 %v6494_v59  ;;  %v3389_v59 = vld [vmem:[%s14342_s4 + $0x1888] sm:$0xff] }
 0x2d0   : > { %6743 = vmatpush1.bf16.msra.mxu1 %v6742_v61  ;;  %6497 = vmatprep.subr.bf16.mxu0 %v6496_v0  ;;  %v3397_v61 = vld [vmem:[%s14342_s4 + $0x18c8] sm:$0xff]  ;;  %v3391_v0 = vld [vmem:[%s14342_s4 + $0x1898] sm:$0xff] }
 0x2d1   : > { %6745 = vmatprep.subr.bf16.mxu1 %v6744_v9  ;;  %v3388_v9 = vld [vmem:[%s14342_s4 + $0x1880] sm:$0xff]  ;;  %v6508_v12 = vpack.c.bf16 %v3397_v61, %v3389_v59  ;;  %v6756_v13 = vpack.c.bf16 %v3399_v1, %v3391_v0  ;;  %v3447_v59 = vld [vmem:[%s14342_s4 + $0x1a58] sm:$0xff] }
 0x2d2   : > { %v3436_v1 = vld [vmem:[%s14342_s4 + $0x1a00] sm:$0xff] }
 0x2d3   : > { %6499 = vmatpush1.bf16.msra.mxu0 %v6498_v51  ;;  %v3398_v51 = vld [vmem:[%s14342_s4 + $0x18d0] sm:$0xff] }
 0x2d4   : > { %6747 = vmatpush1.bf16.msra.mxu1 %v6746_v18  ;;  %6501 = vmatprep.subr.bf16.mxu0 %v6500_v7  ;;  %v3405_v7 = vld [vmem:[%s14342_s4 + $0x1908] sm:$0xff]  ;;  %v6758_v23 = vpack.c.bf16 %v3398_v51, %v3390_v15  ;;  %v3455_v51 = vld [vmem:[%s14342_s4 + $0x1a98] sm:$0xff] }
 0x2d5   : > { %6749 = vmatprep.subr.bf16.mxu1 %v6748_v22  ;;  %v6510_v22 = vpack.c.bf16 %v3396_v14, %v3388_v9  ;;  %v6768_v9 = vpack.c.bf16 %v3447_v59, %v3439_v57  ;;  %v3453_v14 = vld [vmem:[%s14342_s4 + $0x1a88] sm:$0xff]  ;;  %v3484_v59 = vld [vmem:[%s14342_s4 + $0x1b80] sm:$0xff] }
 0x2d6   : > { %v3461_v15 = vld [vmem:[%s14342_s4 + $0x1ac8] sm:$0xff] }
 0x2d7   : > { %6503 = vmatpush1.bf16.msra.mxu0 %v6502_v26  ;;  %v3414_v26 = vld [vmem:[%s14342_s4 + $0x1950] sm:$0xff] }
 0x2d8   : > { %6751 = vmatpush1.bf16.msra.mxu1 %v6750_v27  ;;  %6505 = vmatprep.subr.bf16.mxu0 %v6504_v3  ;;  %v3421_v27 = vld [vmem:[%s14342_s4 + $0x1988] sm:$0xff] }
 0x2d9   : > { %6753 = vmatprep.subr.bf16.mxu1 %v6752_v28  ;;  %v6512_v28 = vpack.c.bf16 %v3413_v17, %v3405_v7  ;;  %v3463_v7 = vld [vmem:[%s14342_s4 + $0x1ad8] sm:$0xff] }
 0x2eb   : > { %v2269_v33 = vpop.f32.mrb[4].mxu0 }
 0x2ec   : > { %v12030_v62 = vpop.f32.mrb[4].mxu1  ;;  %v2271_v37 = vpop.f32.mrb[5].mxu0  ;;  %v7312_v55 = vadd.f32 %v2269_v33, %v1335_v31  ;;  %v3423_v33 = vld [vmem:[%s14342_s4 + $0x1998] sm:$0xff] }
 0x2ed   : > { %v7313_v38 = vadd.f32 %v2271_v37, %v1339_v32  ;;  %v2579_v39 = vpop.f32.mrb[5].mxu1  ;;  %v3431_v37 = vld [vmem:[%s14342_s4 + $0x19d8] sm:$0xff] }
 0x2ee   : > { %v7317_v54 = vadd.f32 %v2579_v39, %v12035_v41  ;;  %v6762_v39 = vpack.c.bf16 %v3414_v26, %v3406_v34  ;;  %v3462_v34 = vld [vmem:[%s14342_s4 + $0x1ad0] sm:$0xff]  ;;  %v3469_v26 = vld [vmem:[%s14342_s4 + $0x1b08] sm:$0xff] }
 0x2ef   : > { %v2275_v42 = vpop.f32.mrb[6].mxu0  ;;  %7466 = vtanh.f32 %v7313_v38  ;;  %v6514_v38 = vpack.c.bf16 %v3412_v24, %v3404_v25  ;;  %v6772_v25 = vpack.c.bf16 %v3463_v7, %v3455_v51  ;;  %v3454_v24 = vld [vmem:[%s14342_s4 + $0x1a90] sm:$0xff]  ;;  %v3500_v7 = vld [vmem:[%s14342_s4 + $0x1c00] sm:$0xff] }
 0x2f0   : > { %v12037_v43 = vpop.f32.mrb[6].mxu1  ;;  %v2277_v44 = vpop.f32.mrb[7].mxu0  ;;  %7468 = vtanh.f32 %v7312_v55  ;;  %v7314_v47 = vadd.f32 %v2275_v42, %v1335_v31  ;;  %v6760_v31 = vpack.c.bf16 %v3415_v21, %v3407_v19  ;;  %v3420_v42 = vld [vmem:[%s14342_s4 + $0x1980] sm:$0xff] }
 0x2f1   : > { %v7315_v48 = vadd.f32 %v2277_v44, %v1339_v32  ;;  %v12039_v53 = vpop.f32.mrb[7].mxu1  ;;  %v3429_v32 = vld [vmem:[%s14342_s4 + $0x19c8] sm:$0xff]  ;;  %v3428_v44 = vld [vmem:[%s14342_s4 + $0x19c0] sm:$0xff] }
 0x2f2   : > { %v6518_v61 = vpack.c.bf16 %v3428_v44, %v3420_v42  ;;  %v3452_v21 = vld [vmem:[%s14342_s4 + $0x1a80] sm:$0xff]  ;;  %v3470_v44 = vld [vmem:[%s14342_s4 + $0x1b10] sm:$0xff] }
 0x2f3   : > { %7470 = vtanh.f32 %v7315_v48  ;;  %v6764_v48 = vpack.c.bf16 %v3431_v37, %v3423_v33  ;;  %v6774_v33 = vpack.c.bf16 %v3462_v34, %v3454_v24  ;;  %v3468_v37 = vld [vmem:[%s14342_s4 + $0x1b00] sm:$0xff]  ;;  %v3525_v24 = vld [vmem:[%s14342_s4 + $0x1cc8] sm:$0xff]  ;;  %v3519_v34 = vld [vmem:[%s14342_s4 + $0x1c98] sm:$0xff] }
 0x2f4   : > { %7472 = vtanh.f32 %v7314_v47  ;;  %v6516_v47 = vpack.c.bf16 %v3429_v32, %v3421_v27  ;;  %v3477_v27 = vld [vmem:[%s14342_s4 + $0x1b48] sm:$0xff] }
 0x2f5   : > { %7474 = vtanh.f32 %v7317_v54  ;;  %v3422_v54 = vld [vmem:[%s14342_s4 + $0x1990] sm:$0xff] }
 0x2f6   : > { %v6766_v0 = vpack.c.bf16 %v3430_v56, %v3422_v54  ;;  %v3493_v54 = vld [vmem:[%s14342_s4 + $0x1bc8] sm:$0xff]  ;;  %v3487_v56 = vld [vmem:[%s14342_s4 + $0x1b98] sm:$0xff] }
 0x2f9   : > { %v12069_v11 = vpop.eup %7466 }
 0x2fa   : > { %v12080_v18 = vpop.eup %7468  ;;  %3871 = vmatprep.mubr.f32.mxu0 %v12069_v11  ;;  %4179 = vmatprep.mubr.f32.mxu1 %v12069_v11 }
 0x2fb   : > { %3872 = vmatmul.mubr.f32.vlgmr.msra.gmra.mrb[8].mxu0 %v12080_v18  ;;  %4180 = vmatmul.mubr.f32.vlgmr.msra.gmra.mrb[8].mxu1 %v12080_v18 }
 0x2fc   : > { %6507 = vmatpush1.bf16.msra.mxu0 %v6506_v2  ;;  %6755 = vmatpush1.bf16.msra.mxu1 %v6754_v5  ;;  %v3444_v2 = vld [vmem:[%s14342_s4 + $0x1a40] sm:$0xff]  ;;  %v6520_v5 = vpack.c.bf16 %v3445_v52, %v3437_v49  ;;  %v3495_v49 = vld [vmem:[%s14342_s4 + $0x1bd8] sm:$0xff] }
 0x2fd   : > { %v12104_v4 = vpop.eup %7470  ;;  %6509 = vmatprep.subr.bf16.mxu0 %v6508_v12  ;;  %6757 = vmatprep.subr.bf16.mxu1 %v6756_v13  ;;  %v3438_v12 = vld [vmem:[%s14342_s4 + $0x1a10] sm:$0xff]  ;;  %v6522_v17 = vpack.c.bf16 %v3444_v2, %v3436_v1  ;;  %v6780_v1 = vpack.c.bf16 %v3495_v49, %v3487_v56  ;;  %v3532_v49 = vld [vmem:[%s14342_s4 + $0x1d00] sm:$0xff] }
 0x2fe   : > { %v12115_v3 = vpop.eup %7472  ;;  %3877 = vmatprep.mubr.f32.mxu0 %v12104_v4  ;;  %4185 = vmatprep.mubr.f32.mxu1 %v12104_v4  ;;  %v3446_v13 = vld [vmem:[%s14342_s4 + $0x1a50] sm:$0xff] }
 0x2ff   : > { %3878 = vmatmul.mubr.f32.gmra.mrb[10].mxu0 %v12115_v3  ;;  %4186 = vmatmul.mubr.f32.gmra.mrb[10].mxu1 %v12115_v3  ;;  %v12130_v55 = vpop.eup %7474  ;;  %v6770_v19 = vpack.c.bf16 %v3446_v13, %v3438_v12  ;;  %v3486_v2 = vld [vmem:[%s14342_s4 + $0x1b90] sm:$0xff]  ;;  %v3509_v12 = vld [vmem:[%s14342_s4 + $0x1c48] sm:$0xff]  ;;  %v3503_v13 = vld [vmem:[%s14342_s4 + $0x1c18] sm:$0xff] }
 0x300   : > { %6511 = vmatpush1.bf16.msra.mxu0 %v6510_v22  ;;  %6759 = vmatpush1.bf16.msra.mxu1 %v6758_v23  ;;  %v3460_v22 = vld [vmem:[%s14342_s4 + $0x1ac0] sm:$0xff]  ;;  %v6524_v23 = vpack.c.bf16 %v3461_v15, %v3453_v14  ;;  %v3511_v14 = vld [vmem:[%s14342_s4 + $0x1c58] sm:$0xff] }
 0x301   : > { %5274 = vmatprep.mubr.msk.f32.mxu0 %vm3646_vm1, %v12130_v55  ;;  %5276 = vmatprep.mubr.msk.f32.mxu1 %vm3646_vm1, %v12130_v55  ;;  %v6526_v32 = vpack.c.bf16 %v3460_v22, %v3452_v21  ;;  %v6784_v21 = vpack.c.bf16 %v3511_v14, %v3503_v13  ;;  %v3502_v22 = vld [vmem:[%s14342_s4 + $0x1c10] sm:$0xff] }
 0x302   : > { %6513 = vmatprep.subr.bf16.mxu0 %v6512_v28  ;;  %6761 = vmatprep.subr.bf16.mxu1 %v6760_v31  ;;  %v3471_v28 = vld [vmem:[%s14342_s4 + $0x1b18] sm:$0xff] }
 0x303   : > { %v3479_v31 = vld [vmem:[%s14342_s4 + $0x1b58] sm:$0xff] }
 0x304   : > { %6515 = vmatpush1.bf16.msra.mxu0 %v6514_v38  ;;  %6763 = vmatpush1.bf16.msra.mxu1 %v6762_v39  ;;  %v3476_v38 = vld [vmem:[%s14342_s4 + $0x1b40] sm:$0xff]  ;;  %v6528_v39 = vpack.c.bf16 %v3477_v27, %v3469_v26  ;;  %v6776_v42 = vpack.c.bf16 %v3479_v31, %v3471_v28  ;;  %v3527_v26 = vld [vmem:[%s14342_s4 + $0x1cd8] sm:$0xff] }
 0x305   : > { %6517 = vmatprep.subr.bf16.mxu0 %v6516_v47  ;;  %6765 = vmatprep.subr.bf16.mxu1 %v6764_v48  ;;  %v3478_v47 = vld [vmem:[%s14342_s4 + $0x1b50] sm:$0xff]  ;;  %v3485_v48 = vld [vmem:[%s14342_s4 + $0x1b88] sm:$0xff]  ;;  %v6530_v52 = vpack.c.bf16 %v3476_v38, %v3468_v37  ;;  %v3516_v31 = vld [vmem:[%s14342_s4 + $0x1c80] sm:$0xff]  ;;  %v6788_v37 = vpack.c.bf16 %v3527_v26, %v3519_v34 }
 0x306   : > { %v6778_v57 = vpack.c.bf16 %v3478_v47, %v3470_v44  ;;  %v3518_v38 = vld [vmem:[%s14342_s4 + $0x1c90] sm:$0xff]  ;;  %v3541_v44 = vld [vmem:[%s14342_s4 + $0x1d48] sm:$0xff]  ;;  %v3535_v47 = vld [vmem:[%s14342_s4 + $0x1d18] sm:$0xff] }
 0x307   : > { %v3567_v34 = vld [vmem:[%s14342_s4 + $0x1e18] sm:$0xff] }
 0x308   : > { %6519 = vmatpush1.bf16.msra.mxu0 %v6518_v61  ;;  %6767 = vmatpush1.bf16.msra.mxu1 %v6766_v0  ;;  %v3492_v61 = vld [vmem:[%s14342_s4 + $0x1bc0] sm:$0xff]  ;;  %v6532_v0 = vpack.c.bf16 %v3493_v54, %v3485_v48  ;;  %v3543_v48 = vld [vmem:[%s14342_s4 + $0x1d58] sm:$0xff] }
 0x309   : > { %6521 = vmatprep.subr.bf16.mxu0 %v6520_v5  ;;  %6769 = vmatprep.subr.bf16.mxu1 %v6768_v9  ;;  %v3494_v5 = vld [vmem:[%s14342_s4 + $0x1bd0] sm:$0xff]  ;;  %v3501_v9 = vld [vmem:[%s14342_s4 + $0x1c08] sm:$0xff]  ;;  %v6534_v15 = vpack.c.bf16 %v3492_v61, %v3484_v59  ;;  %v6792_v59 = vpack.c.bf16 %v3543_v48, %v3535_v47  ;;  %v3575_v26 = vld [vmem:[%s14342_s4 + $0x1e58] sm:$0xff] }
 0x30a   : > { %v6782_v51 = vpack.c.bf16 %v3494_v5, %v3486_v2  ;;  %v3534_v61 = vld [vmem:[%s14342_s4 + $0x1d10] sm:$0xff]  ;;  %v1342_v2 = vsub.s32 6, %v10703_v6  ;;  %v3557_v5 = vld [vmem:[%s14342_s4 + $0x1dc8] sm:$0xff]  ;;  %v3583_v48 = vld [vmem:[%s14342_s4 + $0x1e98] sm:$0xff] }
 0x30b   : > { %v3589_v47 = vld [vmem:[%s14342_s4 + $0x1ec8] sm:$0xff] }
 0x30c   : > { %6523 = vmatpush1.bf16.msra.mxu0 %v6522_v17  ;;  %6771 = vmatpush1.bf16.msra.mxu1 %v6770_v19  ;;  %v3508_v17 = vld [vmem:[%s14342_s4 + $0x1c40] sm:$0xff]  ;;  %v6536_v19 = vpack.c.bf16 %v3509_v12, %v3501_v9  ;;  %v3551_v9 = vld [vmem:[%s14342_s4 + $0x1d98] sm:$0xff] }
 0x30d   : > { %6525 = vmatprep.subr.bf16.mxu0 %v6524_v23  ;;  %6773 = vmatprep.subr.bf16.mxu1 %v6772_v25  ;;  %v3510_v23 = vld [vmem:[%s14342_s4 + $0x1c50] sm:$0xff]  ;;  %v3517_v25 = vld [vmem:[%s14342_s4 + $0x1c88] sm:$0xff]  ;;  %v6538_v27 = vpack.c.bf16 %v3508_v17, %v3500_v7  ;;  %v3559_v12 = vld [vmem:[%s14342_s4 + $0x1dd8] sm:$0xff] }
 0x30e   : > { %v6786_v28 = vpack.c.bf16 %v3510_v23, %v3502_v22  ;;  %v6796_v17 = vpack.c.bf16 %v3559_v12, %v3551_v9  ;;  %v3565_v22 = vld [vmem:[%s14342_s4 + $0x1e08] sm:$0xff]  ;;  %v7563_v23 = vld [vmem:[%s14341_s3] sm:$0xff]  ;;  %v3599_v12 = vld [vmem:[%s14342_s4 + $0x1f18] sm:$0xff] }
 0x30f   : > { %v3597_v9 = vld [vmem:[%s14342_s4 + $0x1f08] sm:$0xff] }
 0x310   : > { %6527 = vmatpush1.bf16.msra.mxu0 %v6526_v32  ;;  %6775 = vmatpush1.bf16.msra.mxu1 %v6774_v33  ;;  %v3524_v32 = vld [vmem:[%s14342_s4 + $0x1cc0] sm:$0xff]  ;;  %v6540_v33 = vpack.c.bf16 %v3525_v24, %v3517_v25  ;;  %v1343_v25 = vrot.slane %v7563_v23, %v1342_v2  ;;  %v3573_v24 = vld [vmem:[%s14342_s4 + $0x1e48] sm:$0xff] }
 0x311   : > { %6529 = vmatprep.subr.bf16.mxu0 %v6528_v39  ;;  %6777 = vmatprep.subr.bf16.mxu1 %v6776_v42  ;;  %v3526_v39 = vld [vmem:[%s14342_s4 + $0x1cd0] sm:$0xff]  ;;  %v3533_v42 = vld [vmem:[%s14342_s4 + $0x1d08] sm:$0xff]  ;;  %v6542_v54 = vpack.c.bf16 %v3524_v32, %v3516_v31  ;;  %v3564_v31 = vld [vmem:[%s14342_s4 + $0x1e00] sm:$0xff] }
 0x312   : > { %v6790_v56 = vpack.c.bf16 %v3526_v39, %v3518_v38  ;;  %v3572_v32 = vld [vmem:[%s14342_s4 + $0x1e40] sm:$0xff]  ;;  %v3566_v38 = vld [vmem:[%s14342_s4 + $0x1e10] sm:$0xff] }
 0x313   : > { %v3574_v39 = vld [vmem:[%s14342_s4 + $0x1e50] sm:$0xff] }
 0x314   : > { %6531 = vmatpush1.bf16.msra.mxu0 %v6530_v52  ;;  %6779 = vmatpush1.bf16.msra.mxu1 %v6778_v57  ;;  %v3540_v52 = vld [vmem:[%s14342_s4 + $0x1d40] sm:$0xff]  ;;  %v6544_v57 = vpack.c.bf16 %v3541_v44, %v3533_v42  ;;  %v3581_v42 = vld [vmem:[%s14342_s4 + $0x1e88] sm:$0xff]  ;;  %v7316_v44 = vadd.f32 %v12030_v62, %v1343_v25 }
 0x315   : > { %6533 = vmatprep.subr.bf16.mxu0 %v6532_v0  ;;  %6781 = vmatprep.subr.bf16.mxu1 %v6780_v1  ;;  %v3542_v0 = vld [vmem:[%s14342_s4 + $0x1d50] sm:$0xff]  ;;  %v3549_v1 = vld [vmem:[%s14342_s4 + $0x1d88] sm:$0xff]  ;;  %v6546_v13 = vpack.c.bf16 %v3540_v52, %v3532_v49  ;;  %v6554_v49 = vpack.c.bf16 %v3572_v32, %v3564_v31  ;;  %v6802_v52 = vpack.c.bf16 %v3574_v39, %v3566_v38  ;;  %v3580_v62 = vld [vmem:[%s14342_s4 + $0x1e80] sm:$0xff] }
 0x316   : > { %v6794_v14 = vpack.c.bf16 %v3542_v0, %v3534_v61  ;;  %v6548_v7 = vpack.c.bf16 %v3557_v5, %v3549_v1  ;;  %v3588_v61 = vld [vmem:[%s14342_s4 + $0x1ec0] sm:$0xff]  ;;  %7476 = vtanh.f32 %v7316_v44  ;;  %v7318_v0 = vadd.f32 %v12037_v43, %v1343_v25  ;;  %v2609_v43 = vld [vmem:[%s14342_s4 + $0x28] sm:$0xff]  ;;  %v2626_v38 = vld [vmem:[%s14342_s4 + $0xb0] sm:$0xff] }
 0x317   : > { %v6558_v1 = vpack.c.bf16 %v3588_v61, %v3580_v62  ;;  %v2634_v39 = vld [vmem:[%s14342_s4 + $0xf0] sm:$0xff]  ;;  %v2648_v61 = vld [vmem:[%s14342_s4 + $0x160] sm:$0xff] }
 0x318   : > { %6535 = vmatpush1.bf16.msra.mxu0 %v6534_v15  ;;  %6783 = vmatpush1.bf16.msra.mxu1 %v6782_v51  ;;  %v3548_v15 = vld [vmem:[%s14342_s4 + $0x1d80] sm:$0xff] }
 0x319   : > { %6537 = vmatprep.subr.bf16.mxu0 %v6536_v19  ;;  %6785 = vmatprep.subr.bf16.mxu1 %v6784_v21  ;;  %v3556_v51 = vld [vmem:[%s14342_s4 + $0x1dc0] sm:$0xff]  ;;  %v3550_v19 = vld [vmem:[%s14342_s4 + $0x1d90] sm:$0xff] }
 0x31a   : > { %v3558_v21 = vld [vmem:[%s14342_s4 + $0x1dd0] sm:$0xff] }
 0x31c   : > { %6539 = vmatpush1.bf16.msra.mxu0 %v6538_v27  ;;  %6787 = vmatpush1.bf16.msra.mxu1 %v6786_v28  ;;  %v6550_v27 = vpack.c.bf16 %v3556_v51, %v3548_v15  ;;  %v6798_v28 = vpack.c.bf16 %v3558_v21, %v3550_v19  ;;  %v2619_v15 = vld [vmem:[%s14342_s4 + $0x78] sm:$0xff]  ;;  %v3596_v51 = vld [vmem:[%s14342_s4 + $0x1f00] sm:$0xff]  ;;  %v2610_v21 = vld [vmem:[%s14342_s4 + $0x30] sm:$0xff] }
 0x31d   : > { %6541 = vmatprep.subr.bf16.mxu0 %v6540_v33  ;;  %6789 = vmatprep.subr.bf16.mxu1 %v6788_v37  ;;  %v6552_v33 = vpack.c.bf16 %v3573_v24, %v3565_v22  ;;  %v6800_v37 = vpack.c.bf16 %v3575_v26, %v3567_v34  ;;  %v2616_v19 = vld [vmem:[%s14342_s4 + $0x60] sm:$0xff]  ;;  %v2618_v22 = vld [vmem:[%s14342_s4 + $0x70] sm:$0xff]  ;;  %v2625_v24 = vld [vmem:[%s14342_s4 + $0xa8] sm:$0xff] }
 0x31e   : > { %v2633_v34 = vld [vmem:[%s14342_s4 + $0xe8] sm:$0xff]  ;;  %v2627_v26 = vld [vmem:[%s14342_s4 + $0xb8] sm:$0xff]  ;;  %v7058_v32 = vpack.c.bf16 %v2618_v22, %v2610_v21 }
 0x31f   : > { %v2673_v21 = vld [vmem:[%s14342_s4 + $0x228] sm:$0xff] }
 0x320   : > { %6543 = vmatpush1.bf16.msra.mxu0 %v6542_v54  ;;  %6791 = vmatpush1.bf16.msra.mxu1 %v6790_v56  ;;  %v3591_v54 = vld [vmem:[%s14342_s4 + $0x1ed8] sm:$0xff]  ;;  %v7319_v56 = vadd.f32 %v12039_v53, %v12035_v41  ;;  %v3582_v41 = vld [vmem:[%s14342_s4 + $0x1e90] sm:$0xff]  ;;  %v2681_v22 = vld [vmem:[%s14342_s4 + $0x268] sm:$0xff] }
 0x321   : > { %6545 = vmatprep.subr.bf16.mxu0 %v6544_v57  ;;  %6793 = vmatprep.subr.bf16.mxu1 %v6792_v59  ;;  %v6556_v57 = vpack.c.bf16 %v3589_v47, %v3581_v42  ;;  %v6804_v59 = vpack.c.bf16 %v3591_v54, %v3583_v48  ;;  %v3590_v53 = vld [vmem:[%s14342_s4 + $0x1ed0] sm:$0xff]  ;;  %v2641_v42 = vld [vmem:[%s14342_s4 + $0x128] sm:$0xff]  ;;  %v6812_v47 = vpack.c.bf16 %v2633_v34, %v2625_v24 }
 0x322   : > { %7478 = vtanh.f32 %v7319_v56  ;;  %v6806_v5 = vpack.c.bf16 %v3590_v53, %v3582_v41  ;;  %v2649_v54 = vld [vmem:[%s14342_s4 + $0x168] sm:$0xff]  ;;  %v2643_v56 = vld [vmem:[%s14342_s4 + $0x138] sm:$0xff] }
 0x323   : > { %7480 = vtanh.f32 %v7318_v0  ;;  %v6816_v41 = vpack.c.bf16 %v2649_v54, %v2641_v42  ;;  %v2642_v0 = vld [vmem:[%s14342_s4 + $0x130] sm:$0xff]  ;;  %v2691_v42 = vld [vmem:[%s14342_s4 + $0x2b8] sm:$0xff] }
 0x324   : > { %6547 = vmatpush1.bf16.msra.mxu0 %v6546_v13  ;;  %6795 = vmatpush1.bf16.msra.mxu1 %v6794_v14  ;;  %v2617_v13 = vld [vmem:[%s14342_s4 + $0x68] sm:$0xff]  ;;  %v2611_v14 = vld [vmem:[%s14342_s4 + $0x38] sm:$0xff] }
 0x325   : > { %6549 = vmatprep.subr.bf16.mxu0 %v6548_v7  ;;  %6797 = vmatprep.subr.bf16.mxu1 %v6796_v17  ;;  %v3598_v7 = vld [vmem:[%s14342_s4 + $0x1f10] sm:$0xff]  ;;  %v2608_v17 = vld [vmem:[%s14342_s4 + $0x20] sm:$0xff]  ;;  %v6808_v23 = vpack.c.bf16 %v2617_v13, %v2609_v43  ;;  %v7056_v25 = vpack.c.bf16 %v2619_v15, %v2611_v14  ;;  %v2667_v43 = vld [vmem:[%s14342_s4 + $0x1f8] sm:$0xff] }
 0x326   : > { %v6810_v31 = vpack.c.bf16 %v2616_v19, %v2608_v17  ;;  %v2656_v15 = vld [vmem:[%s14342_s4 + $0x1a0] sm:$0xff]  ;;  %v2666_v19 = vld [vmem:[%s14342_s4 + $0x1f0] sm:$0xff] }
 0x328   : > { %6551 = vmatpush1.bf16.msra.mxu0 %v6550_v27  ;;  %6799 = vmatpush1.bf16.msra.mxu1 %v6798_v28  ;;  %v2635_v27 = vld [vmem:[%s14342_s4 + $0xf8] sm:$0xff]  ;;  %v12446_v28 = vpop.eup %7476 }
 0x329   : > { %6553 = vmatprep.subr.bf16.mxu0 %v6552_v33  ;;  %6801 = vmatprep.subr.bf16.mxu1 %v6800_v37  ;;  %v2624_v33 = vld [vmem:[%s14342_s4 + $0xa0] sm:$0xff]  ;;  %v7060_v48 = vpack.c.bf16 %v2635_v27, %v2627_v26 }
 0x32a   : > { %v2632_v37 = vld [vmem:[%s14342_s4 + $0xe0] sm:$0xff] }
 0x32b   : > { %v6814_v62 = vpack.c.bf16 %v2632_v37, %v2624_v33  ;;  %v2672_v26 = vld [vmem:[%s14342_s4 + $0x220] sm:$0xff]  ;;  %v2674_v33 = vld [vmem:[%s14342_s4 + $0x230] sm:$0xff] }
 0x32c   : > { %6555 = vmatpush1.bf16.msra.mxu0 %v6554_v49  ;;  %6803 = vmatpush1.bf16.msra.mxu1 %v6802_v52  ;;  %v12465_v44 = vpop.eup %7478  ;;  %v2651_v49 = vld [vmem:[%s14342_s4 + $0x178] sm:$0xff]  ;;  %v2680_v27 = vld [vmem:[%s14342_s4 + $0x260] sm:$0xff]  ;;  %v2682_v37 = vld [vmem:[%s14342_s4 + $0x270] sm:$0xff] }
 0x32d   : > { %6557 = vmatprep.subr.bf16.mxu0 %v6556_v57  ;;  %6805 = vmatprep.subr.bf16.mxu1 %v6804_v59  ;;  %v12480_v52 = vpop.eup %7480  ;;  %v7062_v57 = vpack.c.bf16 %v2634_v39, %v2626_v38  ;;  %v2640_v59 = vld [vmem:[%s14342_s4 + $0x120] sm:$0xff]  ;;  %v7064_v53 = vpack.c.bf16 %v2651_v49, %v2643_v56  ;;  %v2689_v38 = vld [vmem:[%s14342_s4 + $0x2a8] sm:$0xff]  ;;  %v7074_v54 = vpack.c.bf16 %v2682_v37, %v2674_v33  ;;  %v2739_v33 = vld [vmem:[%s14342_s4 + $0x438] sm:$0xff] }
 0x32e   : > { %v6818_v13 = vpack.c.bf16 %v2648_v61, %v2640_v59  ;;  %v2697_v39 = vld [vmem:[%s14342_s4 + $0x2e8] sm:$0xff]  ;;  %v2688_v56 = vld [vmem:[%s14342_s4 + $0x2a0] sm:$0xff]  ;;  %v2690_v59 = vld [vmem:[%s14342_s4 + $0x2b0] sm:$0xff] }
 0x32f   : > { %v2696_v49 = vld [vmem:[%s14342_s4 + $0x2e0] sm:$0xff]  ;;  %v2698_v61 = vld [vmem:[%s14342_s4 + $0x2f0] sm:$0xff]  ;;  %v2747_v37 = vld [vmem:[%s14342_s4 + $0x478] sm:$0xff] }
 0x330   : > { %6559 = vmatpush1.bf16.msra.mxu0 %v6558_v1  ;;  %6807 = vmatpush1.bf16.msra.mxu1 %v6806_v5  ;;  %v2650_v1 = vld [vmem:[%s14342_s4 + $0x170] sm:$0xff]  ;;  %v2657_v5 = vld [vmem:[%s14342_s4 + $0x1a8] sm:$0xff] }
 0x331   : > { %3940 = vmatprep.subr.mxu0 %v3597_v9  ;;  %4248 = vmatprep.subr.mxu1 %v3599_v12  ;;  %v2665_v9 = vld [vmem:[%s14342_s4 + $0x1e8] sm:$0xff]  ;;  %v2659_v12 = vld [vmem:[%s14342_s4 + $0x1b8] sm:$0xff]  ;;  %v7066_v14 = vpack.c.bf16 %v2650_v1, %v2642_v0 }
 0x332   : > { %v7068_v17 = vpack.c.bf16 %v2667_v43, %v2659_v12  ;;  %v2707_v0 = vld [vmem:[%s14342_s4 + $0x338] sm:$0xff]  ;;  %v2704_v12 = vld [vmem:[%s14342_s4 + $0x320] sm:$0xff] }
 0x333   : > { %v2715_v1 = vld [vmem:[%s14342_s4 + $0x378] sm:$0xff]  ;;  %v2712_v43 = vld [vmem:[%s14342_s4 + $0x360] sm:$0xff] }
 0x334   : > { %3941 = vmatpush1.msra.mxu0 %v3596_v51  ;;  %4249 = vmatpush1.msra.mxu1 %v3598_v7  ;;  %v2664_v51 = vld [vmem:[%s14342_s4 + $0x1e0] sm:$0xff]  ;;  %v6820_v7 = vpack.c.bf16 %v2665_v9, %v2657_v5  ;;  %v6830_v5 = vpack.c.bf16 %v2696_v49, %v2688_v56  ;;  %v7078_v9 = vpack.c.bf16 %v2698_v61, %v2690_v59  ;;  %v2738_v56 = vld [vmem:[%s14342_s4 + $0x430] sm:$0xff]  ;;  %v2755_v59 = vld [vmem:[%s14342_s4 + $0x4b8] sm:$0xff] }
 0x335   : > { %3949 = vmatmul.mubr.f32.vlgmr.msra.gmra.mrb[8].mxu0 %v12446_v28  ;;  %4257 = vmatmul.mubr.f32.vlgmr.msra.gmra.mrb[8].mxu1 %v12446_v28  ;;  %v6822_v24 = vpack.c.bf16 %v2664_v51, %v2656_v15  ;;  %v2706_v15 = vld [vmem:[%s14342_s4 + $0x330] sm:$0xff]  ;;  %v2763_v61 = vld [vmem:[%s14342_s4 + $0x4f8] sm:$0xff] }
 0x336   : > { %6809 = vmatprep.subr.bf16.mxu0 %v6808_v23  ;;  %7057 = vmatprep.subr.bf16.mxu1 %v7056_v25  ;;  %v2675_v23 = vld [vmem:[%s14342_s4 + $0x238] sm:$0xff]  ;;  %v2714_v51 = vld [vmem:[%s14342_s4 + $0x370] sm:$0xff] }
 0x337   : > { %5275 = vmatprep.mubr.msk.f32.mxu0 %vm3646_vm1, %v12465_v44  ;;  %5277 = vmatprep.mubr.msk.f32.mxu1 %vm3646_vm1, %v12465_v44  ;;  %v2683_v25 = vld [vmem:[%s14342_s4 + $0x278] sm:$0xff]  ;;  %v2746_v49 = vld [vmem:[%s14342_s4 + $0x470] sm:$0xff] }
 0x338   : > { %6811 = vmatpush1.bf16.msra.mxu0 %v6810_v31  ;;  %7059 = vmatpush1.bf16.msra.mxu1 %v7058_v32  ;;  %v6824_v31 = vpack.c.bf16 %v2681_v22, %v2673_v21  ;;  %v7072_v32 = vpack.c.bf16 %v2683_v25, %v2675_v23  ;;  %v6834_v21 = vpack.c.bf16 %v2712_v43, %v2704_v12  ;;  %v2720_v23 = vld [vmem:[%s14342_s4 + $0x3a0] sm:$0xff]  ;;  %v2754_v12 = vld [vmem:[%s14342_s4 + $0x4b0] sm:$0xff] }
 0x339   : > { %3955 = vmatmul.mubr.f32.gmra.mrb[10].mxu0 %v12480_v52  ;;  %4263 = vmatmul.mubr.f32.gmra.mrb[10].mxu1 %v12480_v52  ;;  %v7082_v22 = vpack.c.bf16 %v2714_v51, %v2706_v15  ;;  %v2728_v25 = vld [vmem:[%s14342_s4 + $0x3e0] sm:$0xff]  ;;  %v2762_v43 = vld [vmem:[%s14342_s4 + $0x4f0] sm:$0xff]  ;;  %v2771_v15 = vld [vmem:[%s14342_s4 + $0x538] sm:$0xff] }
 0x33a   : > { %6813 = vmatprep.subr.bf16.mxu0 %v6812_v47  ;;  %7061 = vmatprep.subr.bf16.mxu1 %v7060_v48  ;;  %v2699_v47 = vld [vmem:[%s14342_s4 + $0x2f8] sm:$0xff]  ;;  %v6826_v48 = vpack.c.bf16 %v2680_v27, %v2672_v26  ;;  %v2722_v26 = vld [vmem:[%s14342_s4 + $0x3b0] sm:$0xff] }
 0x33b   : > { %4333 = vmatprep.mubr.f32.mxu0 %v10880_v40  ;;  %4641 = vmatprep.mubr.f32.mxu1 %v10880_v40  ;;  %v2658_v40 = vld [vmem:[%s14342_s4 + $0x1b0] sm:$0xff]  ;;  %v2779_v51 = vld [vmem:[%s14342_s4 + $0x578] sm:$0xff] }
 0x33c   : > { %6815 = vmatpush1.bf16.msra.mxu0 %v6814_v62  ;;  %7063 = vmatpush1.bf16.msra.mxu1 %v7062_v57  ;;  %v7070_v34 = vpack.c.bf16 %v2666_v19, %v2658_v40  ;;  %v6828_v62 = vpack.c.bf16 %v2697_v39, %v2689_v38  ;;  %v7076_v57 = vpack.c.bf16 %v2699_v47, %v2691_v42  ;;  %v2723_v40 = vld [vmem:[%s14342_s4 + $0x3b8] sm:$0xff]  ;;  %v2730_v27 = vld [vmem:[%s14342_s4 + $0x3f0] sm:$0xff]  ;;  %v2736_v42 = vld [vmem:[%s14342_s4 + $0x420] sm:$0xff] }
 0x33d   : > { %6817 = vmatprep.subr.bf16.mxu0 %v6816_v41  ;;  %7065 = vmatprep.subr.bf16.mxu1 %v7064_v53  ;;  %v2705_v41 = vld [vmem:[%s14342_s4 + $0x328] sm:$0xff]  ;;  %v2731_v19 = vld [vmem:[%s14342_s4 + $0x3f8] sm:$0xff]  ;;  %v6838_v38 = vpack.c.bf16 %v2728_v25, %v2720_v23  ;;  %v7086_v39 = vpack.c.bf16 %v2730_v27, %v2722_v26  ;;  %v2744_v47 = vld [vmem:[%s14342_s4 + $0x460] sm:$0xff] }
 0x33e   : > { %v2713_v53 = vld [vmem:[%s14342_s4 + $0x368] sm:$0xff]  ;;  %v2770_v23 = vld [vmem:[%s14342_s4 + $0x530] sm:$0xff]  ;;  %v2787_v26 = vld [vmem:[%s14342_s4 + $0x5b8] sm:$0xff] }
 0x33f   : > { %v2778_v25 = vld [vmem:[%s14342_s4 + $0x570] sm:$0xff]  ;;  %v2795_v27 = vld [vmem:[%s14342_s4 + $0x5f8] sm:$0xff] }
 0x340   : > { %6819 = vmatpush1.bf16.msra.mxu0 %v6818_v13  ;;  %7067 = vmatpush1.bf16.msra.mxu1 %v7066_v14  ;;  %v6832_v13 = vpack.c.bf16 %v2713_v53, %v2705_v41  ;;  %v7080_v14 = vpack.c.bf16 %v2715_v1, %v2707_v0  ;;  %v6842_v41 = vpack.c.bf16 %v2744_v47, %v2736_v42  ;;  %v2752_v0 = vld [vmem:[%s14342_s4 + $0x4a0] sm:$0xff]  ;;  %v2786_v42 = vld [vmem:[%s14342_s4 + $0x5b0] sm:$0xff] }
 0x341   : > { %6821 = vmatprep.subr.bf16.mxu0 %v6820_v7  ;;  %7069 = vmatprep.subr.bf16.mxu1 %v7068_v17  ;;  %v2721_v7 = vld [vmem:[%s14342_s4 + $0x3a8] sm:$0xff]  ;;  %v7090_v53 = vpack.c.bf16 %v2746_v49, %v2738_v56  ;;  %v2760_v1 = vld [vmem:[%s14342_s4 + $0x4e0] sm:$0xff]  ;;  %v2794_v47 = vld [vmem:[%s14342_s4 + $0x5f0] sm:$0xff] }
 0x342   : > { %v2729_v17 = vld [vmem:[%s14342_s4 + $0x3e8] sm:$0xff]  ;;  %v2803_v56 = vld [vmem:[%s14342_s4 + $0x638] sm:$0xff] }
 0x343   : > { %v2811_v49 = vld [vmem:[%s14342_s4 + $0x678] sm:$0xff] }
 0x344   : > { %6823 = vmatpush1.bf16.msra.mxu0 %v6822_v24  ;;  %7071 = vmatpush1.bf16.msra.mxu1 %v7070_v34  ;;  %v6836_v24 = vpack.c.bf16 %v2729_v17, %v2721_v7  ;;  %v7084_v34 = vpack.c.bf16 %v2731_v19, %v2723_v40  ;;  %v6846_v7 = vpack.c.bf16 %v2760_v1, %v2752_v0  ;;  %v2768_v40 = vld [vmem:[%s14342_s4 + $0x520] sm:$0xff]  ;;  %v2802_v0 = vld [vmem:[%s14342_s4 + $0x630] sm:$0xff] }
 0x345   : > { %6825 = vmatprep.subr.bf16.mxu0 %v6824_v31  ;;  %7073 = vmatprep.subr.bf16.mxu1 %v7072_v32  ;;  %v2737_v31 = vld [vmem:[%s14342_s4 + $0x428] sm:$0xff]  ;;  %v7094_v17 = vpack.c.bf16 %v2762_v43, %v2754_v12  ;;  %v2776_v19 = vld [vmem:[%s14342_s4 + $0x560] sm:$0xff]  ;;  %v2810_v1 = vld [vmem:[%s14342_s4 + $0x670] sm:$0xff] }
 0x346   : > { %v2745_v32 = vld [vmem:[%s14342_s4 + $0x468] sm:$0xff]  ;;  %v2819_v12 = vld [vmem:[%s14342_s4 + $0x6b8] sm:$0xff] }
 0x347   : > { %v2827_v43 = vld [vmem:[%s14342_s4 + $0x6f8] sm:$0xff] }
 0x348   : > { %6827 = vmatpush1.bf16.msra.mxu0 %v6826_v48  ;;  %7075 = vmatpush1.bf16.msra.mxu1 %v7074_v54  ;;  %v6840_v48 = vpack.c.bf16 %v2745_v32, %v2737_v31  ;;  %v7088_v54 = vpack.c.bf16 %v2747_v37, %v2739_v33  ;;  %v6850_v31 = vpack.c.bf16 %v2776_v19, %v2768_v40  ;;  %v2784_v33 = vld [vmem:[%s14342_s4 + $0x5a0] sm:$0xff]  ;;  %v2818_v40 = vld [vmem:[%s14342_s4 + $0x6b0] sm:$0xff] }
 0x349   : > { %6829 = vmatprep.subr.bf16.mxu0 %v6828_v62  ;;  %7077 = vmatprep.subr.bf16.mxu1 %v7076_v57  ;;  %v2753_v62 = vld [vmem:[%s14342_s4 + $0x4a8] sm:$0xff]  ;;  %v7098_v32 = vpack.c.bf16 %v2778_v25, %v2770_v23  ;;  %v2792_v37 = vld [vmem:[%s14342_s4 + $0x5e0] sm:$0xff]  ;;  %v2826_v19 = vld [vmem:[%s14342_s4 + $0x6f0] sm:$0xff] }
 0x34a   : > { %v2761_v57 = vld [vmem:[%s14342_s4 + $0x4e8] sm:$0xff]  ;;  %v2835_v23 = vld [vmem:[%s14342_s4 + $0x738] sm:$0xff] }
 0x34b   : > { %v2843_v25 = vld [vmem:[%s14342_s4 + $0x778] sm:$0xff] }
 0x34c   : > { %6831 = vmatpush1.bf16.msra.mxu0 %v6830_v5  ;;  %7079 = vmatpush1.bf16.msra.mxu1 %v7078_v9  ;;  %v6844_v5 = vpack.c.bf16 %v2761_v57, %v2753_v62  ;;  %v7092_v9 = vpack.c.bf16 %v2763_v61, %v2755_v59  ;;  %v6854_v62 = vpack.c.bf16 %v2792_v37, %v2784_v33  ;;  %v2800_v59 = vld [vmem:[%s14342_s4 + $0x620] sm:$0xff]  ;;  %v2834_v33 = vld [vmem:[%s14342_s4 + $0x730] sm:$0xff] }
 0x34d   : > { %6833 = vmatprep.subr.bf16.mxu0 %v6832_v13  ;;  %7081 = vmatprep.subr.bf16.mxu1 %v7080_v14  ;;  %v2769_v13 = vld [vmem:[%s14342_s4 + $0x528] sm:$0xff]  ;;  %v7102_v57 = vpack.c.bf16 %v2794_v47, %v2786_v42  ;;  %v2808_v61 = vld [vmem:[%s14342_s4 + $0x660] sm:$0xff]  ;;  %v2842_v37 = vld [vmem:[%s14342_s4 + $0x770] sm:$0xff] }
 0x34e   : > { %v2777_v14 = vld [vmem:[%s14342_s4 + $0x568] sm:$0xff]  ;;  %v2851_v42 = vld [vmem:[%s14342_s4 + $0x7b8] sm:$0xff] }
 0x34f   : > { %v2859_v47 = vld [vmem:[%s14342_s4 + $0x7f8] sm:$0xff] }
 0x350   : > { %6835 = vmatpush1.bf16.msra.mxu0 %v6834_v21  ;;  %7083 = vmatpush1.bf16.msra.mxu1 %v7082_v22  ;;  %v6848_v21 = vpack.c.bf16 %v2777_v14, %v2769_v13  ;;  %v7096_v22 = vpack.c.bf16 %v2779_v51, %v2771_v15  ;;  %v6858_v13 = vpack.c.bf16 %v2808_v61, %v2800_v59  ;;  %v2816_v15 = vld [vmem:[%s14342_s4 + $0x6a0] sm:$0xff]  ;;  %v2850_v59 = vld [vmem:[%s14342_s4 + $0x7b0] sm:$0xff] }
 0x351   : > { %6837 = vmatprep.subr.bf16.mxu0 %v6836_v24  ;;  %7085 = vmatprep.subr.bf16.mxu1 %v7084_v34  ;;  %v2785_v24 = vld [vmem:[%s14342_s4 + $0x5a8] sm:$0xff]  ;;  %v7106_v14 = vpack.c.bf16 %v2810_v1, %v2802_v0  ;;  %v2824_v51 = vld [vmem:[%s14342_s4 + $0x6e0] sm:$0xff]  ;;  %v2858_v61 = vld [vmem:[%s14342_s4 + $0x7f0] sm:$0xff] }
 0x352   : > { %v2793_v34 = vld [vmem:[%s14342_s4 + $0x5e8] sm:$0xff]  ;;  %v2867_v0 = vld [vmem:[%s14342_s4 + $0x838] sm:$0xff] }
 0x353   : > { %v2875_v1 = vld [vmem:[%s14342_s4 + $0x878] sm:$0xff] }
 0x354   : > { %6839 = vmatpush1.bf16.msra.mxu0 %v6838_v38  ;;  %7087 = vmatpush1.bf16.msra.mxu1 %v7086_v39  ;;  %v6852_v38 = vpack.c.bf16 %v2793_v34, %v2785_v24  ;;  %v7100_v39 = vpack.c.bf16 %v2795_v27, %v2787_v26  ;;  %v6862_v24 = vpack.c.bf16 %v2824_v51, %v2816_v15  ;;  %v2832_v26 = vld [vmem:[%s14342_s4 + $0x720] sm:$0xff]  ;;  %v2866_v15 = vld [vmem:[%s14342_s4 + $0x830] sm:$0xff] }
 0x355   : > { %6841 = vmatprep.subr.bf16.mxu0 %v6840_v48  ;;  %7089 = vmatprep.subr.bf16.mxu1 %v7088_v54  ;;  %v2801_v48 = vld [vmem:[%s14342_s4 + $0x628] sm:$0xff]  ;;  %v7110_v34 = vpack.c.bf16 %v2826_v19, %v2818_v40  ;;  %v2840_v27 = vld [vmem:[%s14342_s4 + $0x760] sm:$0xff]  ;;  %v2874_v51 = vld [vmem:[%s14342_s4 + $0x870] sm:$0xff] }
 0x356   : > { %v2809_v54 = vld [vmem:[%s14342_s4 + $0x668] sm:$0xff]  ;;  %v2883_v40 = vld [vmem:[%s14342_s4 + $0x8b8] sm:$0xff] }
 0x357   : > { %v2891_v19 = vld [vmem:[%s14342_s4 + $0x8f8] sm:$0xff] }
 0x358   : > { %6843 = vmatpush1.bf16.msra.mxu0 %v6842_v41  ;;  %7091 = vmatpush1.bf16.msra.mxu1 %v7090_v53  ;;  %v6856_v41 = vpack.c.bf16 %v2809_v54, %v2801_v48  ;;  %v7104_v53 = vpack.c.bf16 %v2811_v49, %v2803_v56  ;;  %v6866_v48 = vpack.c.bf16 %v2840_v27, %v2832_v26  ;;  %v2848_v56 = vld [vmem:[%s14342_s4 + $0x7a0] sm:$0xff]  ;;  %v2882_v26 = vld [vmem:[%s14342_s4 + $0x8b0] sm:$0xff] }
 0x359   : > { %6845 = vmatprep.subr.bf16.mxu0 %v6844_v5  ;;  %7093 = vmatprep.subr.bf16.mxu1 %v7092_v9  ;;  %v2817_v5 = vld [vmem:[%s14342_s4 + $0x6a8] sm:$0xff]  ;;  %v7114_v54 = vpack.c.bf16 %v2842_v37, %v2834_v33  ;;  %v2856_v49 = vld [vmem:[%s14342_s4 + $0x7e0] sm:$0xff]  ;;  %v2890_v27 = vld [vmem:[%s14342_s4 + $0x8f0] sm:$0xff] }
 0x35a   : > { %v2825_v9 = vld [vmem:[%s14342_s4 + $0x6e8] sm:$0xff]  ;;  %v2899_v33 = vld [vmem:[%s14342_s4 + $0x938] sm:$0xff] }
 0x35b   : > { %v2907_v37 = vld [vmem:[%s14342_s4 + $0x978] sm:$0xff] }
 0x35c   : > { %6847 = vmatpush1.bf16.msra.mxu0 %v6846_v7  ;;  %7095 = vmatpush1.bf16.msra.mxu1 %v7094_v17  ;;  %v6860_v7 = vpack.c.bf16 %v2825_v9, %v2817_v5  ;;  %v7108_v17 = vpack.c.bf16 %v2827_v43, %v2819_v12  ;;  %v6870_v5 = vpack.c.bf16 %v2856_v49, %v2848_v56  ;;  %v2913_v56 = vld [vmem:[%s14342_s4 + $0x9a8] sm:$0xff] }
 0x35d   : > { %6849 = vmatprep.subr.bf16.mxu0 %v6848_v21  ;;  %7097 = vmatprep.subr.bf16.mxu1 %v7096_v22  ;;  %v2833_v21 = vld [vmem:[%s14342_s4 + $0x728] sm:$0xff]  ;;  %v7118_v9 = vpack.c.bf16 %v2858_v61, %v2850_v59  ;;  %v7120_v43 = vpack.c.bf16 %v2875_v1, %v2867_v0  ;;  %v2914_v0 = vld [vmem:[%s14342_s4 + $0x9b0] sm:$0xff] }
 0x35e   : > { %v2841_v22 = vld [vmem:[%s14342_s4 + $0x768] sm:$0xff] }
 0x35f   : > { %v2921_v49 = vld [vmem:[%s14342_s4 + $0x9e8] sm:$0xff] }
 0x360   : > { %6851 = vmatpush1.bf16.msra.mxu0 %v6850_v31  ;;  %7099 = vmatpush1.bf16.msra.mxu1 %v7098_v32  ;;  %v6864_v31 = vpack.c.bf16 %v2841_v22, %v2833_v21  ;;  %v7112_v32 = vpack.c.bf16 %v2843_v25, %v2835_v23  ;;  %v7122_v22 = vpack.c.bf16 %v2874_v51, %v2866_v15  ;;  %v2880_v23 = vld [vmem:[%s14342_s4 + $0x8a0] sm:$0xff] }
 0x361   : > { %6853 = vmatprep.subr.bf16.mxu0 %v6852_v38  ;;  %7101 = vmatprep.subr.bf16.mxu1 %v7100_v39  ;;  %v2849_v38 = vld [vmem:[%s14342_s4 + $0x7a8] sm:$0xff]  ;;  %v2888_v25 = vld [vmem:[%s14342_s4 + $0x8e0] sm:$0xff] }
 0x362   : > { %v2857_v39 = vld [vmem:[%s14342_s4 + $0x7e8] sm:$0xff]  ;;  %v2928_v51 = vld [vmem:[%s14342_s4 + $0xa20] sm:$0xff] }
 0x364   : > { %6855 = vmatpush1.bf16.msra.mxu0 %v6854_v62  ;;  %7103 = vmatpush1.bf16.msra.mxu1 %v7102_v57  ;;  %v6868_v62 = vpack.c.bf16 %v2857_v39, %v2849_v38  ;;  %v7116_v57 = vpack.c.bf16 %v2859_v47, %v2851_v42  ;;  %v6878_v38 = vpack.c.bf16 %v2888_v25, %v2880_v23  ;;  %v2896_v39 = vld [vmem:[%s14342_s4 + $0x920] sm:$0xff]  ;;  %v2898_v47 = vld [vmem:[%s14342_s4 + $0x930] sm:$0xff]  ;;  %v2947_v23 = vld [vmem:[%s14342_s4 + $0xab8] sm:$0xff] }
 0x365   : > { %6857 = vmatprep.subr.bf16.mxu0 %v6856_v41  ;;  %7105 = vmatprep.subr.bf16.mxu1 %v7104_v53  ;;  %v2865_v41 = vld [vmem:[%s14342_s4 + $0x828] sm:$0xff]  ;;  %v2904_v42 = vld [vmem:[%s14342_s4 + $0x960] sm:$0xff]  ;;  %v2955_v25 = vld [vmem:[%s14342_s4 + $0xaf8] sm:$0xff] }
 0x366   : > { %v2873_v53 = vld [vmem:[%s14342_s4 + $0x868] sm:$0xff]  ;;  %v6882_v59 = vpack.c.bf16 %v2904_v42, %v2896_v39  ;;  %v2963_v39 = vld [vmem:[%s14342_s4 + $0xb38] sm:$0xff] }
 0x367   : > { %v6872_v12 = vpack.c.bf16 %v2873_v53, %v2865_v41  ;;  %v6884_v41 = vpack.c.bf16 %v2921_v49, %v2913_v56  ;;  %v2920_v53 = vld [vmem:[%s14342_s4 + $0x9e0] sm:$0xff]  ;;  %v2971_v42 = vld [vmem:[%s14342_s4 + $0xb78] sm:$0xff]  ;;  %v2962_v49 = vld [vmem:[%s14342_s4 + $0xb30] sm:$0xff] }
 0x368   : > { %6859 = vmatpush1.bf16.msra.mxu0 %v6858_v13  ;;  %7107 = vmatpush1.bf16.msra.mxu1 %v7106_v14  ;;  %v2864_v13 = vld [vmem:[%s14342_s4 + $0x820] sm:$0xff] }
 0x369   : > { %6861 = vmatprep.subr.bf16.mxu0 %v6860_v7  ;;  %7109 = vmatprep.subr.bf16.mxu1 %v7108_v17  ;;  %v2872_v14 = vld [vmem:[%s14342_s4 + $0x860] sm:$0xff]  ;;  %v2881_v7 = vld [vmem:[%s14342_s4 + $0x8a8] sm:$0xff] }
 0x36a   : > { %v2889_v17 = vld [vmem:[%s14342_s4 + $0x8e8] sm:$0xff]  ;;  %v6874_v21 = vpack.c.bf16 %v2872_v14, %v2864_v13  ;;  %v2968_v56 = vld [vmem:[%s14342_s4 + $0xb60] sm:$0xff] }
 0x36c   : > { %6863 = vmatpush1.bf16.msra.mxu0 %v6862_v24  ;;  %7111 = vmatpush1.bf16.msra.mxu1 %v7110_v34  ;;  %v6876_v24 = vpack.c.bf16 %v2889_v17, %v2881_v7  ;;  %v7124_v34 = vpack.c.bf16 %v2891_v19, %v2883_v40  ;;  %v2936_v7 = vld [vmem:[%s14342_s4 + $0xa60] sm:$0xff]  ;;  %v2930_v17 = vld [vmem:[%s14342_s4 + $0xa30] sm:$0xff] }
 0x36d   : > { %6865 = vmatprep.subr.bf16.mxu0 %v6864_v31  ;;  %7113 = vmatprep.subr.bf16.mxu1 %v7112_v32  ;;  %v2897_v31 = vld [vmem:[%s14342_s4 + $0x928] sm:$0xff]  ;;  %v2938_v19 = vld [vmem:[%s14342_s4 + $0xa70] sm:$0xff] }
 0x36e   : > { %v2905_v32 = vld [vmem:[%s14342_s4 + $0x968] sm:$0xff] }
 0x370   : > { %6867 = vmatpush1.bf16.msra.mxu0 %v6866_v48  ;;  %7115 = vmatpush1.bf16.msra.mxu1 %v7114_v54  ;;  %v6880_v48 = vpack.c.bf16 %v2905_v32, %v2897_v31  ;;  %v7128_v54 = vpack.c.bf16 %v2907_v37, %v2899_v33  ;;  %v2952_v31 = vld [vmem:[%s14342_s4 + $0xae0] sm:$0xff]  ;;  %v2946_v32 = vld [vmem:[%s14342_s4 + $0xab0] sm:$0xff]  ;;  %v7140_v33 = vpack.c.bf16 %v2955_v25, %v2947_v23 }
 0x371   : > { %6869 = vmatprep.subr.bf16.mxu0 %v6868_v62  ;;  %7117 = vmatprep.subr.bf16.mxu1 %v7116_v57  ;;  %v2915_v62 = vld [vmem:[%s14342_s4 + $0x9b8] sm:$0xff]  ;;  %v2954_v37 = vld [vmem:[%s14342_s4 + $0xaf0] sm:$0xff] }
 0x372   : > { %v2923_v57 = vld [vmem:[%s14342_s4 + $0x9f8] sm:$0xff]  ;;  %v3002_v25 = vld [vmem:[%s14342_s4 + $0xc70] sm:$0xff] }
 0x373   : > { %v7132_v1 = vpack.c.bf16 %v2923_v57, %v2915_v62  ;;  %v7144_v62 = vpack.c.bf16 %v2971_v42, %v2963_v39  ;;  %v2970_v57 = vld [vmem:[%s14342_s4 + $0xb70] sm:$0xff] }
 0x374   : > { %6871 = vmatpush1.bf16.msra.mxu0 %v6870_v5  ;;  %7119 = vmatpush1.bf16.msra.mxu1 %v7118_v9  ;;  %v2929_v5 = vld [vmem:[%s14342_s4 + $0xa28] sm:$0xff]  ;;  %v3018_v42 = vld [vmem:[%s14342_s4 + $0xcf0] sm:$0xff] }
 0x375   : > { %6873 = vmatprep.subr.bf16.mxu0 %v6872_v12  ;;  %7121 = vmatprep.subr.bf16.mxu1 %v7120_v43  ;;  %v2937_v9 = vld [vmem:[%s14342_s4 + $0xa68] sm:$0xff]  ;;  %v2931_v12 = vld [vmem:[%s14342_s4 + $0xa38] sm:$0xff] }
 0x376   : > { %v2939_v43 = vld [vmem:[%s14342_s4 + $0xa78] sm:$0xff]  ;;  %v6888_v15 = vpack.c.bf16 %v2937_v9, %v2929_v5  ;;  %v2984_v5 = vld [vmem:[%s14342_s4 + $0xbe0] sm:$0xff]  ;;  %v2978_v9 = vld [vmem:[%s14342_s4 + $0xbb0] sm:$0xff] }
 0x377   : > { %4334 = vmatmul.mubr.f32.vlgmr.msra.gmra.mrb[12].mxu0 %v11236_v60  ;;  %4642 = vmatmul.mubr.f32.vlgmr.msra.gmra.mrb[12].mxu1 %v11236_v60  ;;  %v7126_v60 = vpack.c.bf16 %v2890_v27, %v2882_v26  ;;  %v7136_v40 = vpack.c.bf16 %v2939_v43, %v2931_v12  ;;  %v2944_v27 = vld [vmem:[%s14342_s4 + $0xaa0] sm:$0xff]  ;;  %v2986_v43 = vld [vmem:[%s14342_s4 + $0xbf0] sm:$0xff] }
 0x378   : > { %4339 = vmatprep.mubr.f32.mxu0 %v11247_v8  ;;  %6875 = vmatpush1.bf16.msra.mxu0 %v6874_v21  ;;  %v2945_v21 = vld [vmem:[%s14342_s4 + $0xaa8] sm:$0xff] }
 0x379   : > { %4647 = vmatprep.mubr.f32.mxu1 %v11247_v8  ;;  %7123 = vmatpush1.bf16.msra.mxu1 %v7122_v22  ;;  %v2906_v8 = vld [vmem:[%s14342_s4 + $0x970] sm:$0xff]  ;;  %v2953_v22 = vld [vmem:[%s14342_s4 + $0xae8] sm:$0xff] }
 0x37a   : > { %6877 = vmatprep.subr.bf16.mxu0 %v6876_v24  ;;  %7125 = vmatprep.subr.bf16.mxu1 %v7124_v34  ;;  %v7130_v61 = vpack.c.bf16 %v2906_v8, %v2898_v47  ;;  %v6890_v24 = vpack.c.bf16 %v2936_v7, %v2928_v51  ;;  %v7138_v34 = vpack.c.bf16 %v2938_v19, %v2930_v17  ;;  %v2960_v8 = vld [vmem:[%s14342_s4 + $0xb20] sm:$0xff]  ;;  %v3003_v51 = vld [vmem:[%s14342_s4 + $0xc78] sm:$0xff] }
 0x37b   : > { %4340 = vmatmul.mubr.f32.gmra.mrb[14].mxu0 %v11268_v16  ;;  %4648 = vmatmul.mubr.f32.gmra.mrb[14].mxu1 %v11268_v16  ;;  %v2912_v16 = vld [vmem:[%s14342_s4 + $0x9a0] sm:$0xff]  ;;  %v6892_v26 = vpack.c.bf16 %v2953_v22, %v2945_v21  ;;  %v6894_v47 = vpack.c.bf16 %v2952_v31, %v2944_v27  ;;  %v7150_v17 = vpack.c.bf16 %v2986_v43, %v2978_v9  ;;  %v2994_v22 = vld [vmem:[%s14342_s4 + $0xc30] sm:$0xff]  ;;  %v3019_v27 = vld [vmem:[%s14342_s4 + $0xcf8] sm:$0xff] }
 0x37c   : > { %6879 = vmatpush1.bf16.msra.mxu0 %v6878_v38  ;;  %4410 = vmatprep.mubr.f32.mxu0 %v11279_v46  ;;  %v6886_v13 = vpack.c.bf16 %v2920_v53, %v2912_v16  ;;  %v2961_v38 = vld [vmem:[%s14342_s4 + $0xb28] sm:$0xff]  ;;  %v2987_v16 = vld [vmem:[%s14342_s4 + $0xbf8] sm:$0xff]  ;;  %v6898_v53 = vpack.c.bf16 %v2968_v56, %v2960_v8  ;;  %v2992_v19 = vld [vmem:[%s14342_s4 + $0xc20] sm:$0xff] }
 0x37d   : > { %7127 = vmatpush1.bf16.msra.mxu1 %v7126_v60  ;;  %4718 = vmatprep.mubr.f32.mxu1 %v11279_v46  ;;  %v2922_v46 = vld [vmem:[%s14342_s4 + $0x9f0] sm:$0xff]  ;;  %v2969_v60 = vld [vmem:[%s14342_s4 + $0xb68] sm:$0xff]  ;;  %v3000_v21 = vld [vmem:[%s14342_s4 + $0xc60] sm:$0xff] }
 0x37e   : > { %6881 = vmatprep.subr.bf16.mxu0 %v6880_v48  ;;  %7129 = vmatprep.subr.bf16.mxu1 %v7128_v54  ;;  %v7134_v14 = vpack.c.bf16 %v2922_v46, %v2914_v0  ;;  %v7142_v48 = vpack.c.bf16 %v2954_v37, %v2946_v32  ;;  %v6896_v54 = vpack.c.bf16 %v2969_v60, %v2961_v38  ;;  %v2976_v46 = vld [vmem:[%s14342_s4 + $0xba0] sm:$0xff]  ;;  %v3010_v60 = vld [vmem:[%s14342_s4 + $0xcb0] sm:$0xff]  ;;  %v3035_v8 = vld [vmem:[%s14342_s4 + $0xd78] sm:$0xff] }
 0x37f   : > { %v7146_v0 = vpack.c.bf16 %v2970_v57, %v2962_v49  ;;  %v6902_v7 = vpack.c.bf16 %v2984_v5, %v2976_v46  ;;  %v6906_v31 = vpack.c.bf16 %v3000_v21, %v2992_v19  ;;  %v7154_v32 = vpack.c.bf16 %v3002_v25, %v2994_v22  ;;  %v3008_v37 = vld [vmem:[%s14342_s4 + $0xca0] sm:$0xff]  ;;  %v3051_v46 = vld [vmem:[%s14342_s4 + $0xdf8] sm:$0xff] }
 0x380   : > { %6883 = vmatpush1.bf16.msra.mxu0 %v6882_v59  ;;  %v2977_v59 = vld [vmem:[%s14342_s4 + $0xba8] sm:$0xff]  ;;  %v3016_v38 = vld [vmem:[%s14342_s4 + $0xce0] sm:$0xff]  ;;  %v7158_v49 = vpack.c.bf16 %v3018_v42, %v3010_v60  ;;  %v3067_v19 = vld [vmem:[%s14342_s4 + $0xe78] sm:$0xff] }
 0x381   : > { %7131 = vmatpush1.bf16.msra.mxu1 %v7130_v61  ;;  %6885 = vmatprep.subr.bf16.mxu0 %v6884_v41  ;;  %v2985_v61 = vld [vmem:[%s14342_s4 + $0xbe8] sm:$0xff]  ;;  %v2979_v41 = vld [vmem:[%s14342_s4 + $0xbb8] sm:$0xff]  ;;  %v6910_v56 = vpack.c.bf16 %v3016_v38, %v3008_v37  ;;  %v3024_v57 = vld [vmem:[%s14342_s4 + $0xd20] sm:$0xff] }
 0x382   : > { %7133 = vmatprep.subr.bf16.mxu1 %v7132_v1  ;;  %v6900_v1 = vpack.c.bf16 %v2985_v61, %v2977_v59  ;;  %v7148_v12 = vpack.c.bf16 %v2987_v16, %v2979_v41  ;;  %v3032_v59 = vld [vmem:[%s14342_s4 + $0xd60] sm:$0xff]  ;;  %v3026_v61 = vld [vmem:[%s14342_s4 + $0xd30] sm:$0xff]  ;;  %v3083_v37 = vld [vmem:[%s14342_s4 + $0xef8] sm:$0xff] }
 0x383   : > { %v3034_v16 = vld [vmem:[%s14342_s4 + $0xd70] sm:$0xff]  ;;  %v6914_v5 = vpack.c.bf16 %v3032_v59, %v3024_v57  ;;  %v3040_v43 = vld [vmem:[%s14342_s4 + $0xda0] sm:$0xff]  ;;  %v3099_v57 = vld [vmem:[%s14342_s4 + $0xf78] sm:$0xff] }
 0x384   : > { %6887 = vmatpush1.bf16.msra.mxu0 %v6886_v13  ;;  %v2993_v13 = vld [vmem:[%s14342_s4 + $0xc28] sm:$0xff]  ;;  %v7162_v9 = vpack.c.bf16 %v3034_v16, %v3026_v61  ;;  %v3056_v25 = vld [vmem:[%s14342_s4 + $0xe20] sm:$0xff] }
 0x385   : > { %7135 = vmatpush1.bf16.msra.mxu1 %v7134_v14  ;;  %6889 = vmatprep.subr.bf16.mxu0 %v6888_v15  ;;  %v3001_v14 = vld [vmem:[%s14342_s4 + $0xc68] sm:$0xff]  ;;  %v2995_v15 = vld [vmem:[%s14342_s4 + $0xc38] sm:$0xff]  ;;  %v3072_v42 = vld [vmem:[%s14342_s4 + $0xea0] sm:$0xff] }
 0x386   : > { %7137 = vmatprep.subr.bf16.mxu1 %v7136_v40  ;;  %v6904_v40 = vpack.c.bf16 %v3001_v14, %v2993_v13  ;;  %v7152_v23 = vpack.c.bf16 %v3003_v51, %v2995_v15  ;;  %v3048_v13 = vld [vmem:[%s14342_s4 + $0xde0] sm:$0xff]  ;;  %v3042_v14 = vld [vmem:[%s14342_s4 + $0xdb0] sm:$0xff] }
 0x387   : > { %v3050_v51 = vld [vmem:[%s14342_s4 + $0xdf0] sm:$0xff]  ;;  %v6918_v21 = vpack.c.bf16 %v3048_v13, %v3040_v43  ;;  %v3088_v16 = vld [vmem:[%s14342_s4 + $0xf20] sm:$0xff]  ;;  %v3115_v43 = vld [vmem:[%s14342_s4 + $0xff8] sm:$0xff] }
 0x388   : > { %6891 = vmatpush1.bf16.msra.mxu0 %v6890_v24  ;;  %v3009_v24 = vld [vmem:[%s14342_s4 + $0xca8] sm:$0xff]  ;;  %v7166_v22 = vpack.c.bf16 %v3050_v51, %v3042_v14  ;;  %v3104_v51 = vld [vmem:[%s14342_s4 + $0xfa0] sm:$0xff] }
 0x389   : > { %7139 = vmatpush1.bf16.msra.mxu1 %v7138_v34  ;;  %6893 = vmatprep.subr.bf16.mxu0 %v6892_v26  ;;  %v3017_v34 = vld [vmem:[%s14342_s4 + $0xce8] sm:$0xff]  ;;  %v3011_v26 = vld [vmem:[%s14342_s4 + $0xcb8] sm:$0xff] }
 0x38a   : > { %7141 = vmatprep.subr.bf16.mxu1 %v7140_v33  ;;  %v6908_v33 = vpack.c.bf16 %v3017_v34, %v3009_v24  ;;  %v7156_v39 = vpack.c.bf16 %v3019_v27, %v3011_v26  ;;  %v3064_v24 = vld [vmem:[%s14342_s4 + $0xe60] sm:$0xff]  ;;  %v3058_v34 = vld [vmem:[%s14342_s4 + $0xe30] sm:$0xff] }
 0x38b   : > { %v3066_v27 = vld [vmem:[%s14342_s4 + $0xe70] sm:$0xff]  ;;  %v6922_v38 = vpack.c.bf16 %v3064_v24, %v3056_v25  ;;  %v3131_v25 = vld [vmem:[%s14342_s4 + $0x1078] sm:$0xff] }
 0x38c   : > { %6895 = vmatpush1.bf16.msra.mxu0 %v6894_v47  ;;  %v3025_v47 = vld [vmem:[%s14342_s4 + $0xd28] sm:$0xff]  ;;  %v7170_v60 = vpack.c.bf16 %v3066_v27, %v3058_v34 }
 0x38d   : > { %7143 = vmatpush1.bf16.msra.mxu1 %v7142_v48  ;;  %6897 = vmatprep.subr.bf16.mxu0 %v6896_v54  ;;  %v3033_v48 = vld [vmem:[%s14342_s4 + $0xd68] sm:$0xff]  ;;  %v3027_v54 = vld [vmem:[%s14342_s4 + $0xd38] sm:$0xff] }
 0x38e   : > { %7145 = vmatprep.subr.bf16.mxu1 %v7144_v62  ;;  %v6912_v62 = vpack.c.bf16 %v3033_v48, %v3025_v47  ;;  %v7160_v41 = vpack.c.bf16 %v3035_v8, %v3027_v54  ;;  %v3080_v47 = vld [vmem:[%s14342_s4 + $0xee0] sm:$0xff]  ;;  %v3074_v48 = vld [vmem:[%s14342_s4 + $0xeb0] sm:$0xff] }
 0x38f   : > { %v3082_v8 = vld [vmem:[%s14342_s4 + $0xef0] sm:$0xff]  ;;  %v6926_v59 = vpack.c.bf16 %v3080_v47, %v3072_v42  ;;  %v3147_v42 = vld [vmem:[%s14342_s4 + $0x10f8] sm:$0xff] }
 0x390   : > { %6899 = vmatpush1.bf16.msra.mxu0 %v6898_v53  ;;  %v3041_v53 = vld [vmem:[%s14342_s4 + $0xda8] sm:$0xff]  ;;  %v7174_v61 = vpack.c.bf16 %v3082_v8, %v3074_v48  ;;  %v3136_v8 = vld [vmem:[%s14342_s4 + $0x10a0] sm:$0xff] }
 0x391   : > { %7147 = vmatpush1.bf16.msra.mxu1 %v7146_v0  ;;  %6901 = vmatprep.subr.bf16.mxu0 %v6900_v1  ;;  %v3049_v0 = vld [vmem:[%s14342_s4 + $0xde8] sm:$0xff]  ;;  %v3043_v1 = vld [vmem:[%s14342_s4 + $0xdb8] sm:$0xff] }
 0x392   : > { %7149 = vmatprep.subr.bf16.mxu1 %v7148_v12  ;;  %v6916_v12 = vpack.c.bf16 %v3049_v0, %v3041_v53  ;;  %v7164_v15 = vpack.c.bf16 %v3051_v46, %v3043_v1  ;;  %v3096_v53 = vld [vmem:[%s14342_s4 + $0xf60] sm:$0xff]  ;;  %v3090_v0 = vld [vmem:[%s14342_s4 + $0xf30] sm:$0xff] }
 0x393   : > { %v3098_v46 = vld [vmem:[%s14342_s4 + $0xf70] sm:$0xff]  ;;  %v6930_v13 = vpack.c.bf16 %v3096_v53, %v3088_v16  ;;  %v3163_v16 = vld [vmem:[%s14342_s4 + $0x1178] sm:$0xff] }
 0x394   : > { %6903 = vmatpush1.bf16.msra.mxu0 %v6902_v7  ;;  %v3057_v7 = vld [vmem:[%s14342_s4 + $0xe28] sm:$0xff]  ;;  %v7178_v14 = vpack.c.bf16 %v3098_v46, %v3090_v0  ;;  %v3160_v46 = vld [vmem:[%s14342_s4 + $0x1160] sm:$0xff] }
 0x395   : > { %7151 = vmatpush1.bf16.msra.mxu1 %v7150_v17  ;;  %6905 = vmatprep.subr.bf16.mxu0 %v6904_v40  ;;  %v3065_v17 = vld [vmem:[%s14342_s4 + $0xe68] sm:$0xff]  ;;  %v3059_v40 = vld [vmem:[%s14342_s4 + $0xe38] sm:$0xff] }
 0x396   : > { %7153 = vmatprep.subr.bf16.mxu1 %v7152_v23  ;;  %v6920_v23 = vpack.c.bf16 %v3065_v17, %v3057_v7  ;;  %v7168_v26 = vpack.c.bf16 %v3067_v19, %v3059_v40  ;;  %v3112_v7 = vld [vmem:[%s14342_s4 + $0xfe0] sm:$0xff]  ;;  %v3106_v17 = vld [vmem:[%s14342_s4 + $0xfb0] sm:$0xff] }
 0x397   : > { %v3114_v19 = vld [vmem:[%s14342_s4 + $0xff0] sm:$0xff]  ;;  %v6934_v24 = vpack.c.bf16 %v3112_v7, %v3104_v51 }
 0x398   : > { %6907 = vmatpush1.bf16.msra.mxu0 %v6906_v31  ;;  %v3073_v31 = vld [vmem:[%s14342_s4 + $0xea8] sm:$0xff]  ;;  %v7182_v34 = vpack.c.bf16 %v3114_v19, %v3106_v17  ;;  %v3176_v17 = vld [vmem:[%s14342_s4 + $0x11e0] sm:$0xff] }
 0x399   : > { %7155 = vmatpush1.bf16.msra.mxu1 %v7154_v32  ;;  %6909 = vmatprep.subr.bf16.mxu0 %v6908_v33  ;;  %v3081_v32 = vld [vmem:[%s14342_s4 + $0xee8] sm:$0xff]  ;;  %v3075_v33 = vld [vmem:[%s14342_s4 + $0xeb8] sm:$0xff] }
 0x39a   : > { %7157 = vmatprep.subr.bf16.mxu1 %v7156_v39  ;;  %v6924_v39 = vpack.c.bf16 %v3081_v32, %v3073_v31  ;;  %v7172_v54 = vpack.c.bf16 %v3083_v37, %v3075_v33  ;;  %v3120_v31 = vld [vmem:[%s14342_s4 + $0x1020] sm:$0xff]  ;;  %v3122_v33 = vld [vmem:[%s14342_s4 + $0x1030] sm:$0xff] }
 0x39b   : > { %v3128_v32 = vld [vmem:[%s14342_s4 + $0x1060] sm:$0xff]  ;;  %v3130_v37 = vld [vmem:[%s14342_s4 + $0x1070] sm:$0xff] }
 0x39c   : > { %6911 = vmatpush1.bf16.msra.mxu0 %v6910_v56  ;;  %v3089_v56 = vld [vmem:[%s14342_s4 + $0xf28] sm:$0xff]  ;;  %v6938_v47 = vpack.c.bf16 %v3128_v32, %v3120_v31  ;;  %v7186_v48 = vpack.c.bf16 %v3130_v37, %v3122_v33  ;;  %v3192_v31 = vld [vmem:[%s14342_s4 + $0x1260] sm:$0xff]  ;;  %v3186_v32 = vld [vmem:[%s14342_s4 + $0x1230] sm:$0xff] }
 0x39d   : > { %7159 = vmatpush1.bf16.msra.mxu1 %v7158_v49  ;;  %6913 = vmatprep.subr.bf16.mxu0 %v6912_v62  ;;  %v3097_v49 = vld [vmem:[%s14342_s4 + $0xf68] sm:$0xff]  ;;  %v3091_v62 = vld [vmem:[%s14342_s4 + $0xf38] sm:$0xff]  ;;  %v3194_v37 = vld [vmem:[%s14342_s4 + $0x1270] sm:$0xff] }
 0x39e   : > { %7161 = vmatprep.subr.bf16.mxu1 %v7160_v41  ;;  %v6928_v41 = vpack.c.bf16 %v3097_v49, %v3089_v56  ;;  %v7176_v1 = vpack.c.bf16 %v3099_v57, %v3091_v62  ;;  %v3144_v56 = vld [vmem:[%s14342_s4 + $0x10e0] sm:$0xff]  ;;  %v3138_v49 = vld [vmem:[%s14342_s4 + $0x10b0] sm:$0xff] }
 0x39f   : > { %v3146_v57 = vld [vmem:[%s14342_s4 + $0x10f0] sm:$0xff]  ;;  %v6942_v53 = vpack.c.bf16 %v3144_v56, %v3136_v8  ;;  %v3200_v8 = vld [vmem:[%s14342_s4 + $0x12a0] sm:$0xff] }
 0x3a0   : > { %6915 = vmatpush1.bf16.msra.mxu0 %v6914_v5  ;;  %v3105_v5 = vld [vmem:[%s14342_s4 + $0xfa8] sm:$0xff]  ;;  %v7190_v0 = vpack.c.bf16 %v3146_v57, %v3138_v49  ;;  %v3208_v56 = vld [vmem:[%s14342_s4 + $0x12e0] sm:$0xff]  ;;  %v3202_v49 = vld [vmem:[%s14342_s4 + $0x12b0] sm:$0xff] }
 0x3a1   : > { %7163 = vmatpush1.bf16.msra.mxu1 %v7162_v9  ;;  %6917 = vmatprep.subr.bf16.mxu0 %v6916_v12  ;;  %v3113_v9 = vld [vmem:[%s14342_s4 + $0xfe8] sm:$0xff]  ;;  %v3107_v12 = vld [vmem:[%s14342_s4 + $0xfb8] sm:$0xff]  ;;  %v3210_v57 = vld [vmem:[%s14342_s4 + $0x12f0] sm:$0xff] }
 0x3a2   : > { %7165 = vmatprep.subr.bf16.mxu1 %v7164_v15  ;;  %v6932_v15 = vpack.c.bf16 %v3113_v9, %v3105_v5  ;;  %v7180_v40 = vpack.c.bf16 %v3115_v43, %v3107_v12  ;;  %v3154_v5 = vld [vmem:[%s14342_s4 + $0x1130] sm:$0xff]  ;;  %v3169_v12 = vld [vmem:[%s14342_s4 + $0x11a8] sm:$0xff] }
 0x3a3   : > { %v3162_v9 = vld [vmem:[%s14342_s4 + $0x1170] sm:$0xff]  ;;  %v3177_v43 = vld [vmem:[%s14342_s4 + $0x11e8] sm:$0xff] }
 0x3a4   : > { %6919 = vmatpush1.bf16.msra.mxu0 %v6918_v21  ;;  %v3121_v21 = vld [vmem:[%s14342_s4 + $0x1028] sm:$0xff]  ;;  %v7194_v51 = vpack.c.bf16 %v3162_v9, %v3154_v5  ;;  %v6948_v7 = vpack.c.bf16 %v3177_v43, %v3169_v12  ;;  %v3218_v5 = vld [vmem:[%s14342_s4 + $0x1330] sm:$0xff] }
 0x3a5   : > { %7167 = vmatpush1.bf16.msra.mxu1 %v7166_v22  ;;  %6921 = vmatprep.subr.bf16.mxu0 %v6920_v23  ;;  %v3129_v22 = vld [vmem:[%s14342_s4 + $0x1068] sm:$0xff]  ;;  %v3123_v23 = vld [vmem:[%s14342_s4 + $0x1038] sm:$0xff]  ;;  %v3226_v9 = vld [vmem:[%s14342_s4 + $0x1370] sm:$0xff] }
 0x3a6   : > { %7169 = vmatprep.subr.bf16.mxu1 %v7168_v26  ;;  %v6936_v26 = vpack.c.bf16 %v3129_v22, %v3121_v21  ;;  %v7184_v27 = vpack.c.bf16 %v3131_v25, %v3123_v23  ;;  %v3185_v21 = vld [vmem:[%s14342_s4 + $0x1228] sm:$0xff]  ;;  %v3187_v23 = vld [vmem:[%s14342_s4 + $0x1238] sm:$0xff] }
 0x3a7   : > { %v3193_v22 = vld [vmem:[%s14342_s4 + $0x1268] sm:$0xff]  ;;  %v3195_v25 = vld [vmem:[%s14342_s4 + $0x1278] sm:$0xff] }
 0x3a8   : > { %6923 = vmatpush1.bf16.msra.mxu0 %v6922_v38  ;;  %v3137_v38 = vld [vmem:[%s14342_s4 + $0x10a8] sm:$0xff]  ;;  %v7200_v33 = vpack.c.bf16 %v3195_v25, %v3187_v23  ;;  %v3251_v23 = vld [vmem:[%s14342_s4 + $0x1438] sm:$0xff] }
 0x3a9   : > { %7171 = vmatpush1.bf16.msra.mxu1 %v7170_v60  ;;  %6925 = vmatprep.subr.bf16.mxu0 %v6924_v39  ;;  %v3145_v60 = vld [vmem:[%s14342_s4 + $0x10e8] sm:$0xff]  ;;  %v3139_v39 = vld [vmem:[%s14342_s4 + $0x10b8] sm:$0xff] }
 0x3aa   : > { %7173 = vmatprep.subr.bf16.mxu1 %v7172_v54  ;;  %v6940_v54 = vpack.c.bf16 %v3145_v60, %v3137_v38  ;;  %v7188_v62 = vpack.c.bf16 %v3147_v42, %v3139_v39  ;;  %v3201_v38 = vld [vmem:[%s14342_s4 + $0x12a8] sm:$0xff]  ;;  %v3203_v39 = vld [vmem:[%s14342_s4 + $0x12b8] sm:$0xff] }
 0x3ab   : > { %v3209_v60 = vld [vmem:[%s14342_s4 + $0x12e8] sm:$0xff]  ;;  %v3211_v42 = vld [vmem:[%s14342_s4 + $0x12f8] sm:$0xff] }
 0x3ac   : > { %6927 = vmatpush1.bf16.msra.mxu0 %v6926_v59  ;;  %v3153_v59 = vld [vmem:[%s14342_s4 + $0x1128] sm:$0xff]  ;;  %v3259_v25 = vld [vmem:[%s14342_s4 + $0x1478] sm:$0xff] }
 0x3ad   : > { %7175 = vmatpush1.bf16.msra.mxu1 %v7174_v61  ;;  %6929 = vmatprep.subr.bf16.mxu0 %v6928_v41  ;;  %v3161_v61 = vld [vmem:[%s14342_s4 + $0x1168] sm:$0xff]  ;;  %v3155_v41 = vld [vmem:[%s14342_s4 + $0x1138] sm:$0xff] }
 0x3ae   : > { %7177 = vmatprep.subr.bf16.mxu1 %v7176_v1  ;;  %v6944_v1 = vpack.c.bf16 %v3161_v61, %v3153_v59  ;;  %v3217_v59 = vld [vmem:[%s14342_s4 + $0x1328] sm:$0xff] }
 0x3af   : > { %v3225_v61 = vld [vmem:[%s14342_s4 + $0x1368] sm:$0xff] }
 0x3b0   : > { %6931 = vmatpush1.bf16.msra.mxu0 %v6930_v13  ;;  %v3171_v13 = vld [vmem:[%s14342_s4 + $0x11b8] sm:$0xff]  ;;  %v3233_v12 = vld [vmem:[%s14342_s4 + $0x13a8] sm:$0xff] }
 0x3b1   : > { %7179 = vmatpush1.bf16.msra.mxu1 %v7178_v14  ;;  %6933 = vmatprep.subr.bf16.mxu0 %v6932_v15  ;;  %v3179_v14 = vld [vmem:[%s14342_s4 + $0x11f8] sm:$0xff]  ;;  %v3241_v43 = vld [vmem:[%s14342_s4 + $0x13e8] sm:$0xff] }
 0x3b2   : > { %7181 = vmatprep.subr.bf16.mxu1 %v7180_v40  ;;  %v3170_v40 = vld [vmem:[%s14342_s4 + $0x11b0] sm:$0xff]  ;;  %v7196_v19 = vpack.c.bf16 %v3179_v14, %v3171_v13  ;;  %v3235_v13 = vld [vmem:[%s14342_s4 + $0x13b8] sm:$0xff] }
 0x3b3   : > { %v3243_v14 = vld [vmem:[%s14342_s4 + $0x13f8] sm:$0xff] }
 0x3b4   : > { %6935 = vmatpush1.bf16.msra.mxu0 %v6934_v24 }
 0x3b5   : > { %7183 = vmatpush1.bf16.msra.mxu1 %v7182_v34  ;;  %6937 = vmatprep.subr.bf16.mxu0 %v6936_v26  ;;  %v6952_v26 = vpack.c.bf16 %v3193_v22, %v3185_v21  ;;  %v3249_v21 = vld [vmem:[%s14342_s4 + $0x1428] sm:$0xff] }
 0x3b6   : > { %7185 = vmatprep.subr.bf16.mxu1 %v7184_v27  ;;  %v3184_v27 = vld [vmem:[%s14342_s4 + $0x1220] sm:$0xff]  ;;  %v3257_v22 = vld [vmem:[%s14342_s4 + $0x1468] sm:$0xff] }
 0x3b7   : > { %4411 = vmatmul.mubr.f32.vlgmr.msra.gmra.mrb[12].mxu0 %v11649_v50 }
 0x3b8   : > { %4719 = vmatmul.mubr.f32.vlgmr.msra.gmra.mrb[12].mxu1 %v11649_v50  ;;  %4416 = vmatprep.mubr.f32.mxu0 %v11660_v58  ;;  %v3152_v50 = vld [vmem:[%s14342_s4 + $0x1120] sm:$0xff] }
 0x3b9   : > { %6939 = vmatpush1.bf16.msra.mxu0 %v6938_v47  ;;  %4724 = vmatprep.mubr.f32.mxu1 %v11660_v58  ;;  %v7192_v58 = vpack.c.bf16 %v3163_v16, %v3155_v41  ;;  %v6946_v15 = vpack.c.bf16 %v3160_v46, %v3152_v50  ;;  %v6954_v47 = vpack.c.bf16 %v3192_v31, %v3184_v27  ;;  %v3219_v41 = vld [vmem:[%s14342_s4 + $0x1338] sm:$0xff]  ;;  %v3216_v50 = vld [vmem:[%s14342_s4 + $0x1320] sm:$0xff] }
 0x3ba   : > { %7187 = vmatpush1.bf16.msra.mxu1 %v7186_v48  ;;  %6941 = vmatprep.subr.bf16.mxu0 %v6940_v54  ;;  %v7202_v48 = vpack.c.bf16 %v3194_v37, %v3186_v32  ;;  %v6956_v54 = vpack.c.bf16 %v3209_v60, %v3201_v38  ;;  %v3227_v16 = vld [vmem:[%s14342_s4 + $0x1378] sm:$0xff]  ;;  %v3224_v46 = vld [vmem:[%s14342_s4 + $0x1360] sm:$0xff]  ;;  %v3250_v32 = vld [vmem:[%s14342_s4 + $0x1430] sm:$0xff] }
 0x3bb   : > { %4417 = vmatmul.mubr.f32.gmra.mrb[14].mxu0 %v11681_v10  ;;  %7189 = vmatprep.subr.bf16.mxu1 %v7188_v62  ;;  %v7204_v62 = vpack.c.bf16 %v3211_v42, %v3203_v39  ;;  %v3248_v27 = vld [vmem:[%s14342_s4 + $0x1420] sm:$0xff]  ;;  %v3258_v37 = vld [vmem:[%s14342_s4 + $0x1470] sm:$0xff]  ;;  %v3265_v38 = vld [vmem:[%s14342_s4 + $0x14a8] sm:$0xff] }
 0x3bc   : > { %4725 = vmatmul.mubr.f32.gmra.mrb[14].mxu1 %v11681_v10  ;;  %4487 = vmatprep.mubr.f32.mxu0 %v12069_v11  ;;  %v3168_v10 = vld [vmem:[%s14342_s4 + $0x11a0] sm:$0xff]  ;;  %v3273_v60 = vld [vmem:[%s14342_s4 + $0x14e8] sm:$0xff]  ;;  %v3267_v39 = vld [vmem:[%s14342_s4 + $0x14b8] sm:$0xff] }
 0x3bd   : > { %6943 = vmatpush1.bf16.msra.mxu0 %v6942_v53  ;;  %4795 = vmatprep.mubr.f32.mxu1 %v12069_v11  ;;  %v3178_v11 = vld [vmem:[%s14342_s4 + $0x11f0] sm:$0xff]  ;;  %v6950_v24 = vpack.c.bf16 %v3176_v17, %v3168_v10  ;;  %v6958_v53 = vpack.c.bf16 %v3208_v56, %v3200_v8  ;;  %v3232_v10 = vld [vmem:[%s14342_s4 + $0x13a0] sm:$0xff]  ;;  %v3275_v42 = vld [vmem:[%s14342_s4 + $0x14f8] sm:$0xff] }
 0x3be   : > { %7191 = vmatpush1.bf16.msra.mxu1 %v7190_v0  ;;  %6945 = vmatprep.subr.bf16.mxu0 %v6944_v1  ;;  %v7198_v34 = vpack.c.bf16 %v3178_v11, %v3170_v40  ;;  %v7206_v0 = vpack.c.bf16 %v3210_v57, %v3202_v49  ;;  %v6960_v1 = vpack.c.bf16 %v3225_v61, %v3217_v59  ;;  %v3240_v17 = vld [vmem:[%s14342_s4 + $0x13e0] sm:$0xff]  ;;  %v3234_v40 = vld [vmem:[%s14342_s4 + $0x13b0] sm:$0xff]  ;;  %v3281_v59 = vld [vmem:[%s14342_s4 + $0x1528] sm:$0xff] }
 0x3bf   : > { %7193 = vmatprep.subr.bf16.mxu1 %v7192_v58  ;;  %v7208_v58 = vpack.c.bf16 %v3227_v16, %v3219_v41  ;;  %v3242_v11 = vld [vmem:[%s14342_s4 + $0x13f0] sm:$0xff]  ;;  %v3256_v31 = vld [vmem:[%s14342_s4 + $0x1460] sm:$0xff]  ;;  %v3289_v61 = vld [vmem:[%s14342_s4 + $0x1568] sm:$0xff] }
 0x3c0   : > { %v3264_v8 = vld [vmem:[%s14342_s4 + $0x14a0] sm:$0xff]  ;;  %v3266_v49 = vld [vmem:[%s14342_s4 + $0x14b0] sm:$0xff]  ;;  %v3283_v41 = vld [vmem:[%s14342_s4 + $0x1538] sm:$0xff] }
 0x3c1   : > { %6947 = vmatpush1.bf16.msra.mxu0 %v6946_v15  ;;  %v6962_v15 = vpack.c.bf16 %v3224_v46, %v3216_v50  ;;  %v3272_v56 = vld [vmem:[%s14342_s4 + $0x14e0] sm:$0xff]  ;;  %v3274_v57 = vld [vmem:[%s14342_s4 + $0x14f0] sm:$0xff]  ;;  %v3291_v16 = vld [vmem:[%s14342_s4 + $0x1578] sm:$0xff] }
 0x3c2   : > { %7195 = vmatpush1.bf16.msra.mxu1 %v7194_v51  ;;  %6949 = vmatprep.subr.bf16.mxu0 %v6948_v7  ;;  %v7210_v51 = vpack.c.bf16 %v3226_v9, %v3218_v5  ;;  %v6964_v7 = vpack.c.bf16 %v3241_v43, %v3233_v12  ;;  %v3280_v50 = vld [vmem:[%s14342_s4 + $0x1520] sm:$0xff]  ;;  %v3282_v5 = vld [vmem:[%s14342_s4 + $0x1530] sm:$0xff]  ;;  %v3297_v12 = vld [vmem:[%s14342_s4 + $0x15a8] sm:$0xff] }
 0x3c3   : > { %7197 = vmatprep.subr.bf16.mxu1 %v7196_v19  ;;  %v7212_v19 = vpack.c.bf16 %v3243_v14, %v3235_v13  ;;  %v3288_v46 = vld [vmem:[%s14342_s4 + $0x1560] sm:$0xff]  ;;  %v3290_v9 = vld [vmem:[%s14342_s4 + $0x1570] sm:$0xff]  ;;  %v3305_v43 = vld [vmem:[%s14342_s4 + $0x15e8] sm:$0xff] }
 0x3c4   : > { %v3299_v13 = vld [vmem:[%s14342_s4 + $0x15b8] sm:$0xff] }
 0x3c5   : > { %6951 = vmatpush1.bf16.msra.mxu0 %v6950_v24  ;;  %v6966_v24 = vpack.c.bf16 %v3240_v17, %v3232_v10  ;;  %v3307_v14 = vld [vmem:[%s14342_s4 + $0x15f8] sm:$0xff]  ;;  %v3296_v10 = vld [vmem:[%s14342_s4 + $0x15a0] sm:$0xff] }
 0x3c6   : > { %7199 = vmatpush1.bf16.msra.mxu1 %v7198_v34  ;;  %6953 = vmatprep.subr.bf16.mxu0 %v6952_v26  ;;  %v7214_v34 = vpack.c.bf16 %v3242_v11, %v3234_v40  ;;  %v6968_v26 = vpack.c.bf16 %v3257_v22, %v3249_v21  ;;  %v3304_v17 = vld [vmem:[%s14342_s4 + $0x15e0] sm:$0xff]  ;;  %v3298_v40 = vld [vmem:[%s14342_s4 + $0x15b0] sm:$0xff]  ;;  %v3313_v21 = vld [vmem:[%s14342_s4 + $0x1628] sm:$0xff] }
 0x3c7   : > { %7201 = vmatprep.subr.bf16.mxu1 %v7200_v33  ;;  %v7216_v33 = vpack.c.bf16 %v3259_v25, %v3251_v23  ;;  %v3306_v11 = vld [vmem:[%s14342_s4 + $0x15f0] sm:$0xff]  ;;  %v3321_v22 = vld [vmem:[%s14342_s4 + $0x1668] sm:$0xff]  ;;  %v3315_v23 = vld [vmem:[%s14342_s4 + $0x1638] sm:$0xff] }
 0x3c8   : > { %v3323_v25 = vld [vmem:[%s14342_s4 + $0x1678] sm:$0xff] }
 0x3c9   : > { %6955 = vmatpush1.bf16.msra.mxu0 %v6954_v47  ;;  %v6970_v47 = vpack.c.bf16 %v3256_v31, %v3248_v27  ;;  %v3312_v27 = vld [vmem:[%s14342_s4 + $0x1620] sm:$0xff] }
 0x3ca   : > { %7203 = vmatpush1.bf16.msra.mxu1 %v7202_v48  ;;  %6957 = vmatprep.subr.bf16.mxu0 %v6956_v54  ;;  %v7218_v48 = vpack.c.bf16 %v3258_v37, %v3250_v32  ;;  %v6972_v54 = vpack.c.bf16 %v3273_v60, %v3265_v38  ;;  %v3320_v31 = vld [vmem:[%s14342_s4 + $0x1660] sm:$0xff]  ;;  %v3314_v32 = vld [vmem:[%s14342_s4 + $0x1630] sm:$0xff]  ;;  %v3329_v38 = vld [vmem:[%s14342_s4 + $0x16a8] sm:$0xff] }
 0x3cb   : > { %7205 = vmatprep.subr.bf16.mxu1 %v7204_v62  ;;  %v7220_v62 = vpack.c.bf16 %v3275_v42, %v3267_v39  ;;  %v3322_v37 = vld [vmem:[%s14342_s4 + $0x1670] sm:$0xff]  ;;  %v3337_v60 = vld [vmem:[%s14342_s4 + $0x16e8] sm:$0xff]  ;;  %v3331_v39 = vld [vmem:[%s14342_s4 + $0x16b8] sm:$0xff] }
 0x3cc   : > { %v3339_v42 = vld [vmem:[%s14342_s4 + $0x16f8] sm:$0xff] }
 0x3cd   : > { %6959 = vmatpush1.bf16.msra.mxu0 %v6958_v53  ;;  %v6974_v53 = vpack.c.bf16 %v3272_v56, %v3264_v8  ;;  %v3328_v8 = vld [vmem:[%s14342_s4 + $0x16a0] sm:$0xff] }
 0x3ce   : > { %7207 = vmatpush1.bf16.msra.mxu1 %v7206_v0  ;;  %6961 = vmatprep.subr.bf16.mxu0 %v6960_v1  ;;  %v7222_v0 = vpack.c.bf16 %v3274_v57, %v3266_v49  ;;  %v6976_v1 = vpack.c.bf16 %v3289_v61, %v3281_v59  ;;  %v3336_v56 = vld [vmem:[%s14342_s4 + $0x16e0] sm:$0xff]  ;;  %v3330_v49 = vld [vmem:[%s14342_s4 + $0x16b0] sm:$0xff]  ;;  %v3345_v59 = vld [vmem:[%s14342_s4 + $0x1728] sm:$0xff] }
 0x3cf   : > { %7209 = vmatprep.subr.bf16.mxu1 %v7208_v58  ;;  %v7224_v58 = vpack.c.bf16 %v3291_v16, %v3283_v41  ;;  %v3338_v57 = vld [vmem:[%s14342_s4 + $0x16f0] sm:$0xff]  ;;  %v3353_v61 = vld [vmem:[%s14342_s4 + $0x1768] sm:$0xff]  ;;  %v3347_v41 = vld [vmem:[%s14342_s4 + $0x1738] sm:$0xff] }
 0x3d0   : > { %v3355_v16 = vld [vmem:[%s14342_s4 + $0x1778] sm:$0xff] }
 0x3d1   : > { %6963 = vmatpush1.bf16.msra.mxu0 %v6962_v15  ;;  %v6978_v15 = vpack.c.bf16 %v3288_v46, %v3280_v50  ;;  %v3344_v50 = vld [vmem:[%s14342_s4 + $0x1720] sm:$0xff] }
 0x3d2   : > { %7211 = vmatpush1.bf16.msra.mxu1 %v7210_v51  ;;  %6965 = vmatprep.subr.bf16.mxu0 %v6964_v7  ;;  %v7226_v51 = vpack.c.bf16 %v3290_v9, %v3282_v5  ;;  %v6980_v7 = vpack.c.bf16 %v3305_v43, %v3297_v12  ;;  %v3352_v46 = vld [vmem:[%s14342_s4 + $0x1760] sm:$0xff]  ;;  %v3346_v5 = vld [vmem:[%s14342_s4 + $0x1730] sm:$0xff]  ;;  %v3361_v12 = vld [vmem:[%s14342_s4 + $0x17a8] sm:$0xff] }
 0x3d3   : > { %7213 = vmatprep.subr.bf16.mxu1 %v7212_v19  ;;  %v7228_v19 = vpack.c.bf16 %v3307_v14, %v3299_v13  ;;  %v3354_v9 = vld [vmem:[%s14342_s4 + $0x1770] sm:$0xff]  ;;  %v3369_v43 = vld [vmem:[%s14342_s4 + $0x17e8] sm:$0xff]  ;;  %v3363_v13 = vld [vmem:[%s14342_s4 + $0x17b8] sm:$0xff] }
 0x3d4   : > { %v3371_v14 = vld [vmem:[%s14342_s4 + $0x17f8] sm:$0xff] }
 0x3d5   : > { %6967 = vmatpush1.bf16.msra.mxu0 %v6966_v24  ;;  %v6982_v24 = vpack.c.bf16 %v3304_v17, %v3296_v10  ;;  %v3360_v10 = vld [vmem:[%s14342_s4 + $0x17a0] sm:$0xff] }
 0x3d6   : > { %7215 = vmatpush1.bf16.msra.mxu1 %v7214_v34  ;;  %6969 = vmatprep.subr.bf16.mxu0 %v6968_v26  ;;  %v7230_v34 = vpack.c.bf16 %v3306_v11, %v3298_v40  ;;  %v6984_v26 = vpack.c.bf16 %v3321_v22, %v3313_v21  ;;  %v3368_v17 = vld [vmem:[%s14342_s4 + $0x17e0] sm:$0xff]  ;;  %v3362_v40 = vld [vmem:[%s14342_s4 + $0x17b0] sm:$0xff]  ;;  %v3377_v21 = vld [vmem:[%s14342_s4 + $0x1828] sm:$0xff] }
 0x3d7   : > { %7217 = vmatprep.subr.bf16.mxu1 %v7216_v33  ;;  %v7232_v33 = vpack.c.bf16 %v3323_v25, %v3315_v23  ;;  %v3370_v11 = vld [vmem:[%s14342_s4 + $0x17f0] sm:$0xff]  ;;  %v3385_v22 = vld [vmem:[%s14342_s4 + $0x1868] sm:$0xff]  ;;  %v3379_v23 = vld [vmem:[%s14342_s4 + $0x1838] sm:$0xff] }
 0x3d8   : > { %v3387_v25 = vld [vmem:[%s14342_s4 + $0x1878] sm:$0xff] }
 0x3d9   : > { %6971 = vmatpush1.bf16.msra.mxu0 %v6970_v47  ;;  %v6986_v47 = vpack.c.bf16 %v3320_v31, %v3312_v27  ;;  %v7248_v27 = vpack.c.bf16 %v3387_v25, %v3379_v23  ;;  %v3376_v31 = vld [vmem:[%s14342_s4 + $0x1820] sm:$0xff] }
 0x3da   : > { %7219 = vmatpush1.bf16.msra.mxu1 %v7218_v48  ;;  %6973 = vmatprep.subr.bf16.mxu0 %v6972_v54  ;;  %v7234_v48 = vpack.c.bf16 %v3322_v37, %v3314_v32  ;;  %v6988_v54 = vpack.c.bf16 %v3337_v60, %v3329_v38  ;;  %v3384_v32 = vld [vmem:[%s14342_s4 + $0x1860] sm:$0xff]  ;;  %v3386_v37 = vld [vmem:[%s14342_s4 + $0x1870] sm:$0xff]  ;;  %v3393_v38 = vld [vmem:[%s14342_s4 + $0x18a8] sm:$0xff] }
 0x3db   : > { %7221 = vmatprep.subr.bf16.mxu1 %v7220_v62  ;;  %v7236_v62 = vpack.c.bf16 %v3339_v42, %v3331_v39  ;;  %v3401_v60 = vld [vmem:[%s14342_s4 + $0x18e8] sm:$0xff]  ;;  %v3395_v39 = vld [vmem:[%s14342_s4 + $0x18b8] sm:$0xff] }
 0x3dc   : > { %v3403_v42 = vld [vmem:[%s14342_s4 + $0x18f8] sm:$0xff] }
 0x3dd   : > { %6975 = vmatpush1.bf16.msra.mxu0 %v6974_v53  ;;  %v6990_v53 = vpack.c.bf16 %v3336_v56, %v3328_v8  ;;  %v3392_v8 = vld [vmem:[%s14342_s4 + $0x18a0] sm:$0xff] }
 0x3de   : > { %7223 = vmatpush1.bf16.msra.mxu1 %v7222_v0  ;;  %6977 = vmatprep.subr.bf16.mxu0 %v6976_v1  ;;  %v7238_v0 = vpack.c.bf16 %v3338_v57, %v3330_v49  ;;  %v6992_v1 = vpack.c.bf16 %v3353_v61, %v3345_v59  ;;  %v3400_v56 = vld [vmem:[%s14342_s4 + $0x18e0] sm:$0xff]  ;;  %v3394_v49 = vld [vmem:[%s14342_s4 + $0x18b0] sm:$0xff]  ;;  %v3409_v59 = vld [vmem:[%s14342_s4 + $0x1928] sm:$0xff] }
 0x3df   : > { %7225 = vmatprep.subr.bf16.mxu1 %v7224_v58  ;;  %v7240_v58 = vpack.c.bf16 %v3355_v16, %v3347_v41  ;;  %v3402_v57 = vld [vmem:[%s14342_s4 + $0x18f0] sm:$0xff]  ;;  %v3417_v61 = vld [vmem:[%s14342_s4 + $0x1968] sm:$0xff]  ;;  %v3411_v41 = vld [vmem:[%s14342_s4 + $0x1938] sm:$0xff] }
 0x3e0   : > { %v3419_v16 = vld [vmem:[%s14342_s4 + $0x1978] sm:$0xff] }
 0x3e1   : > { %6979 = vmatpush1.bf16.msra.mxu0 %v6978_v15  ;;  %v6994_v15 = vpack.c.bf16 %v3352_v46, %v3344_v50  ;;  %v3416_v50 = vld [vmem:[%s14342_s4 + $0x1960] sm:$0xff]  ;;  %v3410_v46 = vld [vmem:[%s14342_s4 + $0x1930] sm:$0xff] }
 0x3e2   : > { %7227 = vmatpush1.bf16.msra.mxu1 %v7226_v51  ;;  %6981 = vmatprep.subr.bf16.mxu0 %v6980_v7  ;;  %v7242_v51 = vpack.c.bf16 %v3354_v9, %v3346_v5  ;;  %v6996_v7 = vpack.c.bf16 %v3369_v43, %v3361_v12  ;;  %v3418_v5 = vld [vmem:[%s14342_s4 + $0x1970] sm:$0xff]  ;;  %v3433_v9 = vld [vmem:[%s14342_s4 + $0x19e8] sm:$0xff]  ;;  %v3427_v12 = vld [vmem:[%s14342_s4 + $0x19b8] sm:$0xff] }
 0x3e3   : > { %7229 = vmatprep.subr.bf16.mxu1 %v7228_v19  ;;  %v7244_v19 = vpack.c.bf16 %v3371_v14, %v3363_v13  ;;  %v3435_v43 = vld [vmem:[%s14342_s4 + $0x19f8] sm:$0xff]  ;;  %v7258_v14 = vpack.c.bf16 %v3418_v5, %v3410_v46  ;;  %v3472_v46 = vld [vmem:[%s14342_s4 + $0x1b20] sm:$0xff] }
 0x3e5   : > { %6983 = vmatpush1.bf16.msra.mxu0 %v6982_v24  ;;  %v6998_v24 = vpack.c.bf16 %v3368_v17, %v3360_v10  ;;  %v7260_v10 = vpack.c.bf16 %v3435_v43, %v3427_v12  ;;  %v3441_v17 = vld [vmem:[%s14342_s4 + $0x1a28] sm:$0xff]  ;;  %v3474_v43 = vld [vmem:[%s14342_s4 + $0x1b30] sm:$0xff] }
 0x3e6   : > { %7231 = vmatpush1.bf16.msra.mxu1 %v7230_v34  ;;  %6985 = vmatprep.subr.bf16.mxu0 %v6984_v26  ;;  %v7246_v34 = vpack.c.bf16 %v3370_v11, %v3362_v40  ;;  %v7000_v26 = vpack.c.bf16 %v3385_v22, %v3377_v21  ;;  %v3449_v40 = vld [vmem:[%s14342_s4 + $0x1a68] sm:$0xff]  ;;  %v3451_v11 = vld [vmem:[%s14342_s4 + $0x1a78] sm:$0xff]  ;;  %v13715_v22 = vld [vmem:[%s14343_s5] sm:$0xff] }
 0x3e7   : > { %7233 = vmatprep.subr.bf16.mxu1 %v7232_v33  ;;  %v3378_v33 = vld [vmem:[%s14342_s4 + $0x1830] sm:$0xff]  ;;  %v7016_v25 = vpack.c.bf16 %v3449_v40, %v3441_v17 }
 0x3e9   : > { %6987 = vmatpush1.bf16.msra.mxu0 %v6986_v47  ;;  %v7002_v47 = vpack.c.bf16 %v3384_v32, %v3376_v31  ;;  %v3450_v31 = vld [vmem:[%s14342_s4 + $0x1a70] sm:$0xff]  ;;  %v3457_v32 = vld [vmem:[%s14342_s4 + $0x1aa8] sm:$0xff] }
 0x3ea   : > { %7235 = vmatpush1.bf16.msra.mxu1 %v7234_v48  ;;  %6989 = vmatprep.subr.bf16.mxu0 %v6988_v54  ;;  %v7250_v48 = vpack.c.bf16 %v3386_v37, %v3378_v33  ;;  %v7004_v54 = vpack.c.bf16 %v3401_v60, %v3393_v38  ;;  %v3465_v33 = vld [vmem:[%s14342_s4 + $0x1ae8] sm:$0xff]  ;;  %v13738_v37 = vrot.slane %v13715_v22, %v1318_v45  ;;  %v3459_v60 = vld [vmem:[%s14342_s4 + $0x1ab8] sm:$0xff] }
 0x3eb   : > { %7237 = vmatprep.subr.bf16.mxu1 %v7236_v62  ;;  %v7252_v62 = vpack.c.bf16 %v3403_v42, %v3395_v39  ;;  %v13743_v38 = vrot.slane %v13715_v22, %v1326_v35  ;;  %v3467_v39 = vld [vmem:[%s14342_s4 + $0x1af8] sm:$0xff]  ;;  %v13754_v45 = vrot.slane %v13715_v22, %v1322_v20  ;;  %v13759_v35 = vrot.slane %v13715_v22, %v1330_v63  ;;  %v3458_v20 = vld [vmem:[%s14342_s4 + $0x1ab0] sm:$0xff] }
 0x3ec   : > { %v3466_v63 = vld [vmem:[%s14342_s4 + $0x1af0] sm:$0xff] }
 0x3ed   : > { %6991 = vmatpush1.bf16.msra.mxu0 %v6990_v53  ;;  %v7006_v53 = vpack.c.bf16 %v3400_v56, %v3392_v8  ;;  %v3464_v8 = vld [vmem:[%s14342_s4 + $0x1ae0] sm:$0xff] }
 0x3ee   : > { %7239 = vmatpush1.bf16.msra.mxu1 %v7238_v0  ;;  %6993 = vmatprep.subr.bf16.mxu0 %v6992_v1  ;;  %v7254_v0 = vpack.c.bf16 %v3402_v57, %v3394_v49  ;;  %v7008_v1 = vpack.c.bf16 %v3417_v61, %v3409_v59  ;;  %v3473_v57 = vld [vmem:[%s14342_s4 + $0x1b28] sm:$0xff] }
 0x3ef   : > { %7241 = vmatprep.subr.bf16.mxu1 %v7240_v58  ;;  %v3425_v58 = vld [vmem:[%s14342_s4 + $0x19a8] sm:$0xff] }
 0x3f0   : > { %v3481_v59 = vld [vmem:[%s14342_s4 + $0x1b68] sm:$0xff] }
 0x3f1   : > { %6995 = vmatpush1.bf16.msra.mxu0 %v6994_v15  ;;  %v3424_v15 = vld [vmem:[%s14342_s4 + $0x19a0] sm:$0xff]  ;;  %v7024_v12 = vpack.c.bf16 %v3481_v59, %v3473_v57 }
 0x3f2   : > { %7243 = vmatpush1.bf16.msra.mxu1 %v7242_v51  ;;  %6997 = vmatprep.subr.bf16.mxu0 %v6996_v7  ;;  %v3432_v51 = vld [vmem:[%s14342_s4 + $0x19e0] sm:$0xff]  ;;  %v3426_v7 = vld [vmem:[%s14342_s4 + $0x19b0] sm:$0xff] }
 0x3f3   : > { %7245 = vmatprep.subr.bf16.mxu1 %v7244_v19  ;;  %v3443_v19 = vld [vmem:[%s14342_s4 + $0x1a38] sm:$0xff]  ;;  %v7014_v21 = vpack.c.bf16 %v3432_v51, %v3424_v15 }
 0x3f5   : > { %6999 = vmatpush1.bf16.msra.mxu0 %v6998_v24  ;;  %v3440_v24 = vld [vmem:[%s14342_s4 + $0x1a20] sm:$0xff] }
 0x3f6   : > { %7247 = vmatpush1.bf16.msra.mxu1 %v7246_v34  ;;  %7001 = vmatprep.subr.bf16.mxu0 %v7000_v26  ;;  %v3448_v34 = vld [vmem:[%s14342_s4 + $0x1a60] sm:$0xff]  ;;  %v3442_v26 = vld [vmem:[%s14342_s4 + $0x1a30] sm:$0xff] }
 0x3f7   : > { %7249 = vmatprep.subr.bf16.mxu1 %v7248_v27  ;;  %v7264_v27 = vpack.c.bf16 %v3451_v11, %v3443_v19  ;;  %v7018_v42 = vpack.c.bf16 %v3448_v34, %v3440_v24  ;;  %v3488_v34 = vld [vmem:[%s14342_s4 + $0x1ba0] sm:$0xff] }
 0x3f8   : > { %4488 = vmatmul.mubr.f32.vlgmr.msra.gmra.mrb[12].mxu0 %v12080_v18 }
 0x3f9   : > { %4796 = vmatmul.mubr.f32.vlgmr.msra.gmra.mrb[12].mxu1 %v12080_v18  ;;  %4493 = vmatprep.mubr.f32.mxu0 %v12104_v4  ;;  %v3408_v18 = vld [vmem:[%s14342_s4 + $0x1920] sm:$0xff] }
 0x3fa   : > { %7003 = vmatpush1.bf16.msra.mxu0 %v7002_v47  ;;  %4801 = vmatprep.mubr.f32.mxu1 %v12104_v4  ;;  %v7256_v4 = vpack.c.bf16 %v3419_v16, %v3411_v41  ;;  %v7010_v13 = vpack.c.bf16 %v3416_v50, %v3408_v18  ;;  %v7266_v47 = vpack.c.bf16 %v3450_v31, %v3442_v26  ;;  %v3496_v26 = vld [vmem:[%s14342_s4 + $0x1be0] sm:$0xff] }
 0x3fb   : > { %7251 = vmatpush1.bf16.msra.mxu1 %v7250_v48  ;;  %7005 = vmatprep.subr.bf16.mxu0 %v7004_v54  ;;  %v7020_v48 = vpack.c.bf16 %v3465_v33, %v3457_v32  ;;  %v3456_v54 = vld [vmem:[%s14342_s4 + $0x1aa0] sm:$0xff] }
 0x3fc   : > { %4494 = vmatmul.mubr.f32.gmra.mrb[14].mxu0 %v12115_v3  ;;  %7253 = vmatprep.subr.bf16.mxu1 %v7252_v62  ;;  %v7268_v62 = vpack.c.bf16 %v3467_v39, %v3459_v60  ;;  %v7022_v50 = vpack.c.bf16 %v3464_v8, %v3456_v54  ;;  %v3490_v60 = vld [vmem:[%s14342_s4 + $0x1bb0] sm:$0xff]  ;;  %v3513_v54 = vld [vmem:[%s14342_s4 + $0x1c68] sm:$0xff] }
 0x3fd   : > { %4802 = vmatmul.mubr.f32.gmra.mrb[14].mxu1 %v12115_v3  ;;  %5278 = vmatprep.mubr.msk.f32.mxu0 %vm3646_vm1, %v12130_v55  ;;  %v7012_v3 = vpack.c.bf16 %v3433_v9, %v3425_v58  ;;  %v7270_v9 = vpack.c.bf16 %v3466_v63, %v3458_v20 }
 0x3fe   : > { %7007 = vmatpush1.bf16.msra.mxu0 %v7006_v53  ;;  %5280 = vmatprep.mubr.msk.f32.mxu1 %vm3646_vm1, %v12130_v55  ;;  %v3434_v55 = vld [vmem:[%s14342_s4 + $0x19f0] sm:$0xff] }
 0x3ff   : > { %7255 = vmatpush1.bf16.msra.mxu1 %v7254_v0  ;;  %7009 = vmatprep.subr.bf16.mxu0 %v7008_v1  ;;  %v7262_v23 = vpack.c.bf16 %v3434_v55, %v3426_v7  ;;  %v3475_v0 = vld [vmem:[%s14342_s4 + $0x1b38] sm:$0xff] }
 0x400   : > { %7257 = vmatprep.subr.bf16.mxu1 %v7256_v4  ;;  %v3483_v1 = vld [vmem:[%s14342_s4 + $0x1b78] sm:$0xff]  ;;  %v3480_v4 = vld [vmem:[%s14342_s4 + $0x1b60] sm:$0xff] }
 0x401   : > { %v7272_v7 = vpack.c.bf16 %v3483_v1, %v3475_v0  ;;  %v3491_v55 = vld [vmem:[%s14342_s4 + $0x1bb8] sm:$0xff]  ;;  %v3506_v0 = vld [vmem:[%s14342_s4 + $0x1c30] sm:$0xff] }
 0x402   : > { %7011 = vmatpush1.bf16.msra.mxu0 %v7010_v13  ;;  %v3482_v13 = vld [vmem:[%s14342_s4 + $0x1b70] sm:$0xff] }
 0x403   : > { %7259 = vmatpush1.bf16.msra.mxu1 %v7258_v14  ;;  %7013 = vmatprep.subr.bf16.mxu0 %v7012_v3  ;;  %v3489_v14 = vld [vmem:[%s14342_s4 + $0x1ba8] sm:$0xff]  ;;  %v7274_v24 = vpack.c.bf16 %v3482_v13, %v3474_v43 }
 0x404   : > { %7261 = vmatprep.subr.bf16.mxu1 %v7260_v10  ;;  %v3497_v10 = vld [vmem:[%s14342_s4 + $0x1be8] sm:$0xff] }
 0x405   : > { %v7028_v33 = vpack.c.bf16 %v3497_v10, %v3489_v14  ;;  %v3520_v14 = vld [vmem:[%s14342_s4 + $0x1ca0] sm:$0xff] }
 0x406   : > { %7015 = vmatpush1.bf16.msra.mxu0 %v7014_v21  ;;  %v3499_v21 = vld [vmem:[%s14342_s4 + $0x1bf8] sm:$0xff] }
 0x407   : > { %7263 = vmatpush1.bf16.msra.mxu1 %v7262_v23  ;;  %7017 = vmatprep.subr.bf16.mxu0 %v7016_v25  ;;  %v7026_v25 = vpack.c.bf16 %v3480_v4, %v3472_v46  ;;  %v3521_v46 = vld [vmem:[%s14342_s4 + $0x1ca8] sm:$0xff] }
 0x408   : > { %7265 = vmatprep.subr.bf16.mxu1 %v7264_v27  ;;  %v3950_v56 = vpop.f32.mrb[8].mxu0  ;;  %v4258_v49 = vpop.f32.mrb[8].mxu1  ;;  %v3529_v4 = vld [vmem:[%s14342_s4 + $0x1ce8] sm:$0xff] }
 0x409   : > { %v13780_v61 = vadd.f32 %v3950_v56, %v13738_v37  ;;  %v13783_v41 = vadd.f32 %v4258_v49, %v13743_v38  ;;  %v3952_v16 = vpop.f32.mrb[9].mxu0  ;;  %v4260_v53 = vpop.f32.mrb[9].mxu1  ;;  %v3507_v56 = vld [vmem:[%s14342_s4 + $0x1c38] sm:$0xff]  ;;  %v7036_v13 = vpack.c.bf16 %v3529_v4, %v3521_v46  ;;  %v3569_v46 = vld [vmem:[%s14342_s4 + $0x1e28] sm:$0xff] }
 0x40a   : > { %7019 = vmatpush1.bf16.msra.mxu0 %v7018_v42  ;;  %v13792_v18 = vadd.f32 %v3952_v16, %v13754_v45  ;;  %v13802_v58 = vadd.f32 %v4260_v53, %v13759_v35  ;;  %v7276_v42 = vpack.c.bf16 %v3499_v21, %v3491_v55  ;;  %v3515_v49 = vld [vmem:[%s14342_s4 + $0x1c78] sm:$0xff]  ;;  %v3504_v16 = vld [vmem:[%s14342_s4 + $0x1c20] sm:$0xff]  ;;  %v3530_v55 = vld [vmem:[%s14342_s4 + $0x1cf0] sm:$0xff] }
 0x40b   : > { %7267 = vmatpush1.bf16.msra.mxu1 %v7266_v47  ;;  %v4949_v5 = vand.u32 2147483647, %v13780_v61  ;;  %7021 = vmatprep.subr.bf16.mxu0 %v7020_v48  ;;  %v4951_v3 = vand.u32 2147483647, %v13783_v41  ;;  %v3498_v47 = vld [vmem:[%s14342_s4 + $0x1bf0] sm:$0xff]  ;;  %v3505_v48 = vld [vmem:[%s14342_s4 + $0x1c28] sm:$0xff]  ;;  %v7280_v1 = vpack.c.bf16 %v3515_v49, %v3507_v56 }
 0x40c   : > { %7269 = vmatprep.subr.bf16.mxu1 %v7268_v62  ;;  %v13814_v15 = vpop.f32.mrb[10].mxu0  ;;  %v13816_v51 = vpop.f32.mrb[10].mxu1  ;;  %v4950_v40 = vand.u32 2147483647, %v13792_v18  ;;  %v4952_v32 = vand.u32 2147483647, %v13802_v58  ;;  %v7030_v62 = vpack.c.bf16 %v3496_v26, %v3488_v34  ;;  %v7278_v57 = vpack.c.bf16 %v3498_v47, %v3490_v60 }
 0x40d   : > { %v4965_v17 = vsub.f32 0.0, %v4949_v5  ;;  %v13825_v19 = vpop.f32.mrb[11].mxu0  ;;  %v13827_v11 = vpop.f32.mrb[11].mxu1  ;;  %v4967_v23 = vsub.f32 0.0, %v4951_v3  ;;  %v7032_v59 = vpack.c.bf16 %v3513_v54, %v3505_v48  ;;  %v3512_v53 = vld [vmem:[%s14342_s4 + $0x1c60] sm:$0xff]  ;;  %v3523_v5 = vld [vmem:[%s14342_s4 + $0x1cb8] sm:$0xff] }
 0x40e   : > { %7023 = vmatpush1.bf16.msra.mxu0 %v7022_v50  ;;  %v4966_v31 = vsub.f32 0.0, %v4950_v40  ;;  %v4968_v20 = vsub.f32 0.0, %v4952_v32  ;;  %v3514_v50 = vld [vmem:[%s14342_s4 + $0x1c70] sm:$0xff]  ;;  %v3528_v3 = vld [vmem:[%s14342_s4 + $0x1ce0] sm:$0xff]  ;;  %v3545_v40 = vld [vmem:[%s14342_s4 + $0x1d68] sm:$0xff] }
 0x40f   : > { %v4981_v27 = vmul.f32 1.442695, %v4965_v17  ;;  %7271 = vmatpush1.bf16.msra.mxu1 %v7270_v9  ;;  %7025 = vmatprep.subr.bf16.mxu0 %v7024_v12  ;;  %v4985_v39 = vmul.f32 1.442695, %v4967_v23  ;;  %v3531_v9 = vld [vmem:[%s14342_s4 + $0x1cf8] sm:$0xff]  ;;  %v7034_v12 = vpack.c.bf16 %v3512_v53, %v3504_v16  ;;  %v7282_v43 = vpack.c.bf16 %v3514_v50, %v3506_v0  ;;  %v3537_v17 = vld [vmem:[%s14342_s4 + $0x1d28] sm:$0xff] }
 0x410   : > { %7273 = vmatprep.subr.bf16.mxu1 %v7272_v7  ;;  %v4983_v8 = vmul.f32 1.442695, %v4966_v31  ;;  %v4987_v63 = vmul.f32 1.442695, %v4968_v20  ;;  %v3522_v7 = vld [vmem:[%s14342_s4 + $0x1cb0] sm:$0xff]  ;;  %v7284_v10 = vpack.c.bf16 %v3531_v9, %v3523_v5  ;;  %v3539_v21 = vld [vmem:[%s14342_s4 + $0x1d38] sm:$0xff]  ;;  %v7040_v26 = vpack.c.bf16 %v3545_v40, %v3537_v17 }
 0x411   : > { %7482 = vpow2.f32 %v4981_v27  ;;  %v3547_v23 = vld [vmem:[%s14342_s4 + $0x1d78] sm:$0xff]  ;;  %v7286_v34 = vpack.c.bf16 %v3530_v55, %v3522_v7  ;;  %v3536_v27 = vld [vmem:[%s14342_s4 + $0x1d20] sm:$0xff]  ;;  %v3538_v32 = vld [vmem:[%s14342_s4 + $0x1d30] sm:$0xff] }
 0x412   : > { %7484 = vpow2.f32 %v4985_v39  ;;  %7027 = vmatpush1.bf16.msra.mxu0 %v7026_v25  ;;  %v7038_v25 = vpack.c.bf16 %v3528_v3, %v3520_v14  ;;  %v3544_v31 = vld [vmem:[%s14342_s4 + $0x1d60] sm:$0xff]  ;;  %v7288_v39 = vpack.c.bf16 %v3547_v23, %v3539_v21  ;;  %v3553_v47 = vld [vmem:[%s14342_s4 + $0x1da8] sm:$0xff]  ;;  %v3555_v20 = vld [vmem:[%s14342_s4 + $0x1db8] sm:$0xff] }
 0x413   : > { %7486 = vpow2.f32 %v4983_v8  ;;  %7275 = vmatpush1.bf16.msra.mxu1 %v7274_v24  ;;  %7029 = vmatprep.subr.bf16.mxu0 %v7028_v33  ;;  %v3561_v48 = vld [vmem:[%s14342_s4 + $0x1de8] sm:$0xff]  ;;  %v3563_v56 = vld [vmem:[%s14342_s4 + $0x1df8] sm:$0xff]  ;;  %v3552_v49 = vld [vmem:[%s14342_s4 + $0x1da0] sm:$0xff] }
 0x414   : > { %7277 = vmatprep.subr.bf16.mxu1 %v7276_v42  ;;  %7488 = vpow2.f32 %v4987_v63  ;;  %v3546_v42 = vld [vmem:[%s14342_s4 + $0x1d70] sm:$0xff]  ;;  %v7042_v63 = vpack.c.bf16 %v3544_v31, %v3536_v27  ;;  %v4885_v0 = vld [vmem:[%s7658_s30] sm:$0xff]  ;;  %v7044_v50 = vpack.c.bf16 %v3561_v48, %v3553_v47  ;;  %v3577_v4 = vld [vmem:[%s14342_s4 + $0x1e68] sm:$0xff] }
 0x415   : > { %v3562_v16 = vld [vmem:[%s14342_s4 + $0x1df0] sm:$0xff]  ;;  %v3571_v5 = vld [vmem:[%s14342_s4 + $0x1e38] sm:$0xff]  ;;  %v3576_v14 = vld [vmem:[%s14342_s4 + $0x1e60] sm:$0xff]  ;;  %v7048_v31 = vpack.c.bf16 %v3577_v4, %v3569_v46  ;;  %v4917_v47 = vmul.f32 %v13780_v61, %v4885_v0 }
 0x416   : > { %7031 = vmatpush1.bf16.msra.mxu0 %v7030_v62  ;;  %v13976_v7 = vld [vmem:[%s14342_s4 + $0x1e30] sm:$0xff]  ;;  %v13986_v55 = vld [vmem:[%s14342_s4 + $0x1ea8] sm:$0xff]  ;;  %v13994_v23 = vld [vmem:[%s14342_s4 + $0x1eb8] sm:$0xff] }
 0x417   : > { %7279 = vmatpush1.bf16.msra.mxu1 %v7278_v57  ;;  %7033 = vmatprep.subr.bf16.mxu0 %v7032_v59  ;;  %v3560_v57 = vld [vmem:[%s14342_s4 + $0x1de0] sm:$0xff]  ;;  %v3554_v59 = vld [vmem:[%s14342_s4 + $0x1db0] sm:$0xff]  ;;  %v3593_v21 = vld [vmem:[%s14342_s4 + $0x1ee8] sm:$0xff] }
 0x418   : > { %7281 = vmatprep.subr.bf16.mxu1 %v7280_v1  ;;  %v7290_v1 = vpack.c.bf16 %v3546_v42, %v3538_v32  ;;  %v7046_v17 = vpack.c.bf16 %v3560_v57, %v3552_v49  ;;  %v7294_v40 = vpack.c.bf16 %v3562_v16, %v3554_v59  ;;  %v4901_v42 = vmax.f32 %v13780_v61, 0.0 }
 0x419   : > { %v7052_v57 = vpack.c.bf16 %v3593_v21, %v13986_v55  ;;  %v4902_v16 = vmax.f32 %v13792_v18, 0.0  ;;  %v4904_v55 = vmax.f32 %v13802_v58, 0.0 }
 0x41a   : > { %7035 = vmatpush1.bf16.msra.mxu0 %v7034_v12  ;;  %v7292_v12 = vpack.c.bf16 %v3563_v56, %v3555_v20  ;;  %v3586_v20 = vld [vmem:[%s14342_s4 + $0x1eb0] sm:$0xff] }
 0x41b   : > { %v13905_v24 = vpop.eup %7482  ;;  %7283 = vmatpush1.bf16.msra.mxu1 %v7282_v43  ;;  %7037 = vmatprep.subr.bf16.mxu0 %v7036_v13  ;;  %v3579_v43 = vld [vmem:[%s14342_s4 + $0x1e78] sm:$0xff]  ;;  %v3568_v13 = vld [vmem:[%s14342_s4 + $0x1e20] sm:$0xff]  ;;  %v3594_v56 = vld [vmem:[%s14342_s4 + $0x1ef0] sm:$0xff] }
 0x41c   : > { %v13916_v33 = vpop.eup %7484  ;;  %v5013_v60 = vadd.f32 1.0, %v13905_v24  ;;  %7285 = vmatprep.subr.bf16.mxu1 %v7284_v10  ;;  %v5016_v3 = vmul.f32 -0.5, %v13905_v24  ;;  %v13981_v10 = vld [vmem:[%s14342_s4 + $0x1e70] sm:$0xff]  ;;  %v7296_v32 = vpack.c.bf16 %v3579_v43, %v3571_v5  ;;  %v7050_v48 = vpack.c.bf16 %v3576_v14, %v3568_v13 }
 0x41d   : > { %v13928_v54 = vpop.eup %7486  ;;  %v5031_v8 = vadd.f32 1.0, %v13916_v33  ;;  %v5019_v59 = vand.u32 2147483647, %v13905_v24  ;;  %v7302_v5 = vpack.c.bf16 %v3594_v56, %v3586_v20  ;;  %v5037_v13 = vand.u32 2147483647, %v13916_v33  ;;  %v3600_v56 = vld [vmem:[%s14342_s4 + $0x1f20] sm:$0xff] }
 0x41e   : > { %7490 = vlog2.f32 %v5013_v60  ;;  %v5022_v62 = vadd.f32 1.0, %v13928_v54  ;;  %7039 = vmatpush1.bf16.msra.mxu0 %v7038_v25  ;;  %v13950_v53 = vpop.eup %7488  ;;  %v3595_v25 = vld [vmem:[%s14342_s4 + $0x1ef8] sm:$0xff]  ;;  %v5025_v27 = vmul.f32 -0.5, %v13928_v54  ;;  %v14005_v60 = vld [vmem:[%s14342_s4 + $0x1ea0] sm:$0xff]  ;;  %v5017_v49 = vadd.f32 1.0, %v5016_v3 }
 0x41f   : > { %7492 = vlog2.f32 %v5031_v8  ;;  %7287 = vmatpush1.bf16.msra.mxu1 %v7286_v34  ;;  %7041 = vmatprep.subr.bf16.mxu0 %v7040_v26  ;;  %v5040_v9 = vadd.f32 1.0, %v13950_v53  ;;  %v5034_v34 = vmul.f32 -0.5, %v13916_v33  ;;  %v4886_v26 = vld [vmem:[%s7658_s30 + $0x8] sm:$0xff]  ;;  %v7298_v8 = vpack.c.bf16 %v13981_v10, %v13976_v7  ;;  %v4888_v10 = vld [vmem:[%s7658_s30 + $0x18] sm:$0xff] }
 0x420   : > { %7494 = vlog2.f32 %v5022_v62  ;;  %7289 = vmatprep.subr.bf16.mxu1 %v7288_v39  ;;  %v14010_v39 = vld [vmem:[%s14342_s4 + $0x1ee0] sm:$0xff]  ;;  %v4887_v62 = vld [vmem:[%s7658_s30 + $0x10] sm:$0xff]  ;;  %v7300_v61 = vpack.c.bf16 %v3595_v25, %v13994_v23  ;;  %v4918_v0 = vmul.f32 %v13792_v18, %v4886_v26  ;;  %v5026_v4 = vadd.f32 1.0, %v5025_v27 }
 0x421   : > { %7496 = vlog2.f32 %v5040_v9  ;;  %v5035_v46 = vadd.f32 1.0, %v5034_v34  ;;  %v4919_v43 = vmul.f32 %v13783_v41, %v4887_v62  ;;  %v5028_v18 = vand.u32 2147483647, %v13928_v54 }
 0x422   : > { %7043 = vmatpush1.bf16.msra.mxu0 %v7042_v63  ;;  %v5043_v63 = vmul.f32 -0.5, %v13950_v53  ;;  %v5018_v7 = vmul.f32 %v13905_v24, %v5017_v49  ;;  %vm5020_vm2 = vcmp.lt.f32.partialorder %v5019_v59, 0.0004427343  ;;  %v4934_v23 = vsub.f32 %v4902_v16, %v4918_v0 }
 0x423   : > { %7291 = vmatpush1.bf16.msra.mxu1 %v7290_v1  ;;  %7045 = vmatprep.subr.bf16.mxu0 %v7044_v50  ;;  %v7054_v1 = vpack.c.bf16 %v14010_v39, %v14005_v60  ;;  %v4903_v50 = vmax.f32 %v13783_v41, 0.0  ;;  %v5046_v25 = vand.u32 2147483647, %v13950_v53  ;;  %v5036_v34 = vmul.f32 %v13916_v33, %v5035_v46  ;;  %v3601_v39 = vld [vmem:[%s14342_s4 + $0x1f28] sm:$0xff] }
 0x424   : > { %7293 = vmatprep.subr.bf16.mxu1 %v7292_v12  ;;  %v4933_v12 = vsub.f32 %v4901_v42, %v4917_v47  ;;  %v5027_v27 = vmul.f32 %v13928_v54, %v5026_v4  ;;  %vm14041_vm3 = vcmp.lt.f32.partialorder %v5037_v13, 0.0004427343  ;;  %vm5029_vm4 = vcmp.lt.f32.partialorder %v5028_v18, 0.0004427343 }
 0x425   : > { %v4920_v60 = vmul.f32 %v13802_v58, %v4888_v10  ;;  %vm5047_vm5 = vcmp.lt.f32.partialorder %v5046_v25, 0.0004427343  ;;  %v14073_v16 = vadd.f32 %v13814_v15, %v13738_v37  ;;  %v14077_v0 = vadd.f32 %v13816_v51, %v13743_v38 }
 0x426   : > { %7047 = vmatpush1.bf16.msra.mxu0 %v7046_v17  ;;  %v5044_v17 = vadd.f32 1.0, %v5043_v63 }
 0x427   : > { %7295 = vmatpush1.bf16.msra.mxu1 %v7294_v40  ;;  %7049 = vmatprep.subr.bf16.mxu0 %v7048_v31  ;;  %v4936_v63 = vsub.f32 %v4904_v55, %v4920_v60 }
 0x428   : > { %v7491_v9 = vpop.eup %7490  ;;  %7297 = vmatprep.subr.bf16.mxu1 %v7296_v32  ;;  %v5045_v47 = vmul.f32 %v13950_v53, %v5044_v17  ;;  %v3602_v53 = vld [vmem:[%s14342_s4 + $0x1f30] sm:$0xff] }
 0x429   : > { %v7493_v14 = vpop.eup %7492  ;;  %v5015_v3 = vmul.f32 0.6931472, %v7491_v9 }
 0x42a   : > { %v7495_v40 = vpop.eup %7494  ;;  %v5033_v21 = vmul.f32 0.6931472, %v7493_v14  ;;  %7051 = vmatpush1.bf16.msra.mxu0 %v7050_v48  ;;  %v3603_v48 = vld [vmem:[%s14342_s4 + $0x1f38] sm:$0xff] }
 0x42b   : > { %v5021_v41 = vsel %vm5020_vm2, %v5018_v7, %v5015_v3  ;;  %v5024_v26 = vmul.f32 0.6931472, %v7495_v40  ;;  %7299 = vmatpush1.bf16.msra.mxu1 %v7298_v8  ;;  %7053 = vmatprep.subr.bf16.mxu0 %v7052_v57  ;;  %v7497_v24 = vpop.eup %7496  ;;  %v4935_v8 = vsub.f32 %v4903_v50, %v4919_v43 }
 0x42c   : > { %v5157_v31 = vadd.f32 %v5021_v41, %v4933_v12  ;;  %7301 = vmatprep.subr.bf16.mxu1 %v7300_v61  ;;  %v5039_v33 = vsel %vm14041_vm3, %v5036_v34, %v5033_v21  ;;  %v5042_v42 = vmul.f32 0.6931472, %v7497_v24  ;;  %v4909_v34 = vmax.f32 %v14073_v16, 0.0 }
 0x42d   : > { %v5030_v54 = vsel %vm5029_vm4, %v5027_v27, %v5024_v26  ;;  %v5159_v49 = vadd.f32 %v5039_v33, %v4935_v8  ;;  %vm5203_vm3 = vcmask 0  }
 0x42e   : > { %v5158_v20 = vadd.f32 %v5030_v54, %v4934_v23  ;;  %7055 = vmatpush1.bf16.msra.mxu0 %v7054_v1  ;;  %v5048_v58 = vsel %vm5047_vm5, %v5045_v47, %v5042_v42  ;;  %v4959_v1 = vand.u32 2147483647, %v14077_v0 }
 0x42f   : > { %7303 = vmatpush1.bf16.msra.mxu1 %v7302_v5  ;;  %4556 = vmatprep.subr.mxu0 %v3601_v39  ;;  %v5160_v57 = vadd.f32 %v5048_v58, %v4936_v63 }
 0x430   : > { %v5174_v62 = vadd.f32 %v5158_v20, %v5157_v31  ;;  %4864 = vmatprep.subr.mxu1 %v3603_v48  ;;  %v4975_v46 = vsub.f32 0.0, %v4959_v1  ;;  %v4895_v31 = vld [vmem:[%s7658_s30 + $0x50] sm:$0xff]  ;;  %v4894_v48 = vld [vmem:[%s7658_s30 + $0x48] sm:$0xff] }
 0x432   : > { %v5175_v61 = vadd.f32 %v5174_v62, %v5159_v49  ;;  %4557 = vmatpush1.msra.mxu0 %v3600_v56  ;;  %v5001_v4 = vmul.f32 1.442695, %v4975_v46  ;;  %v4911_v49 = vmax.f32 %v14077_v0, 0.0  ;;  %v4927_v62 = vmul.f32 %v14077_v0, %v4895_v31 }
 0x433   : > { %4865 = vmatpush1.msra.mxu1 %v3602_v53  ;;  %4565 = vmatmul.mubr.f32.vlgmr.msra.gmra.mrb[12].mxu0 %v12446_v28 }
 0x434   : > { %v14062_v59 = vadd.f32 %v5175_v61, %v5160_v57  ;;  %4873 = vmatmul.mubr.f32.vlgmr.msra.gmra.mrb[12].mxu1 %v12446_v28  ;;  %5279 = vmatprep.mubr.msk.f32.mxu0 %vm3646_vm1, %v12465_v44  ;;  %v4957_v28 = vand.u32 2147483647, %v14073_v16 }
 0x435   : > { %5281 = vmatprep.mubr.msk.f32.mxu1 %vm3646_vm1, %v12465_v44  ;;  %v14083_v44 = vadd.f32 %v13825_v19, %v13754_v45  ;;  %v3625_v45 = vrot.slane %v13715_v22, %v1334_v29  ;;  %v3629_v19 = vrot.slane %v13715_v22, %v1338_v30  ;;  %v4893_v30 = vld [vmem:[%s7658_s30 + $0x40] sm:$0xff] }
 0x436   : > { %v4973_v50 = vsub.f32 0.0, %v4957_v28  ;;  %v4925_v26 = vmul.f32 %v14073_v16, %v4893_v30 }
 0x437   : > { %4571 = vmatmul.mubr.f32.gmra.mrb[14].mxu0 %v12480_v52  ;;  %v4958_v15 = vand.u32 2147483647, %v14083_v44  ;;  %v4910_v16 = vmax.f32 %v14083_v44, 0.0  ;;  %v4926_v28 = vmul.f32 %v14083_v44, %v4894_v48 }
 0x438   : > { %4879 = vmatmul.mubr.f32.gmra.mrb[14].mxu1 %v12480_v52  ;;  %v14087_v52 = vadd.f32 %v13827_v11, %v13759_v35  ;;  %v4997_v37 = vmul.f32 1.442695, %v4973_v50  ;;  %v3633_v35 = vrot.slane %v13715_v22, %v1342_v2  ;;  %v3637_v11 = vrot.slane %v13715_v22, %v1346_v36 }
 0x439   : > { %v4974_v51 = vsub.f32 0.0, %v4958_v15  ;;  %v14139_v53 = vsub.f32 %v4909_v34, %v4925_v26 }
 0x43a   : > { %v4960_v38 = vand.u32 2147483647, %v14087_v52  ;;  %7498 = vpow2.f32 %v4997_v37 }
 0x43b   : > { %7500 = vpow2.f32 %v5001_v4  ;;  %v4999_v9 = vmul.f32 1.442695, %v4974_v51 }
 0x43c   : > { %v4976_v5 = vsub.f32 0.0, %v4960_v38  ;;  %v4896_v38 = vld [vmem:[%s7658_s30 + $0x58] sm:$0xff] }
 0x43d   : > { %7502 = vpow2.f32 %v4999_v9  ;;  %v4912_v9 = vmax.f32 %v14087_v52, 0.0 }
 0x43e   : > { %v5003_v12 = vmul.f32 1.442695, %v4976_v5 }
 0x440   : > { %7504 = vpow2.f32 %v5003_v12 }
 0x444   : > { %v14103_v43 = vpop.eup %7498 }
 0x445   : > { %v14105_v18 = vpop.eup %7500  ;;  %v5085_v6 = vadd.f32 1.0, %v14103_v43  ;;  %v5088_v15 = vmul.f32 -0.5, %v14103_v43 }
 0x446   : > { %v5103_v55 = vadd.f32 1.0, %v14105_v18  ;;  %v5106_v4 = vmul.f32 -0.5, %v14105_v18 }
 0x447   : > { %7506 = vlog2.f32 %v5085_v6  ;;  %v14125_v33 = vpop.eup %7502  ;;  %v5089_v30 = vadd.f32 1.0, %v5088_v15  ;;  %v14158_v6 = vsub.f32 %v4911_v49, %v4927_v62  ;;  %v4891_v62 = vld [vmem:[%s7658_s30 + $0x30] sm:$0xff] }
 0x448   : > { %7508 = vlog2.f32 %v5103_v55  ;;  %v5094_v57 = vadd.f32 1.0, %v14125_v33  ;;  %v5097_v44 = vmul.f32 -0.5, %v14125_v33 }
 0x44a   : > { %v14134_v56 = vpop.eup %7504 }
 0x44b   : > { %v5112_v46 = vadd.f32 1.0, %v14134_v56 }
 0x506   : > { %v4566_v13 = vpop.f32.mrb[12].mxu0 }
 0x507   : > { %v14107_v29 = vadd.f32 %v4566_v13, %v3625_v45  ;;  %v4874_v14 = vpop.f32.mrb[12].mxu1  ;;  %v4568_v3 = vpop.f32.mrb[13].mxu0  ;;  %v5109_v13 = vand.u32 2147483647, %v14105_v18 }
 0x508   : > { %v14109_v7 = vadd.f32 %v4874_v14, %v3633_v35  ;;  %v14111_v2 = vadd.f32 %v4568_v3, %v3629_v19  ;;  %v4876_v10 = vpop.f32.mrb[13].mxu1  ;;  %v4928_v14 = vmul.f32 %v14087_v52, %v4896_v38  ;;  %v4892_v38 = vld [vmem:[%s7658_s30 + $0x38] sm:$0xff] }
 0x509   : > { %v4953_v36 = vand.u32 2147483647, %v14107_v29  ;;  %v14116_v22 = vadd.f32 %v4876_v10, %v3637_v11  ;;  %vm14176_vm7 = vcmp.lt.f32.partialorder %v5109_v13, 0.0004427343 }
 0x50a   : > { %v4955_v17 = vand.u32 2147483647, %v14109_v7  ;;  %v4572_v40 = vpop.f32.mrb[14].mxu0  ;;  %v4954_v23 = vand.u32 2147483647, %v14111_v2  ;;  %v14181_v31 = vsub.f32 %v4912_v9, %v4928_v14  ;;  %v4923_v15 = vmul.f32 %v14109_v7, %v4891_v62 }
 0x50b   : > { %v4969_v21 = vsub.f32 0.0, %v4953_v36  ;;  %v4880_v25 = vpop.f32.mrb[14].mxu1  ;;  %v4574_v41 = vpop.f32.mrb[15].mxu0  ;;  %v4956_v39 = vand.u32 2147483647, %v14116_v22  ;;  %v14127_v42 = vadd.f32 %v4572_v40, %v3625_v45  ;;  %v5107_v36 = vadd.f32 1.0, %v5106_v4 }
 0x50c   : > { %v4971_v27 = vsub.f32 0.0, %v4955_v17  ;;  %v4882_v24 = vpop.f32.mrb[15].mxu1  ;;  %v4970_v60 = vsub.f32 0.0, %v4954_v23  ;;  %v14129_v47 = vadd.f32 %v4880_v25, %v3633_v35  ;;  %v14132_v58 = vadd.f32 %v4574_v41, %v3629_v19 }
 0x50d   : > { %v4989_v32 = vmul.f32 1.442695, %v4969_v21  ;;  %v4972_v20 = vsub.f32 0.0, %v4956_v39  ;;  %v4961_v63 = vand.u32 2147483647, %v14127_v42  ;;  %v14147_v37 = vadd.f32 %v4882_v24, %v3637_v11  ;;  %v7507_v11 = vpop.eup %7506 }
 0x50e   : > { %v4993_v54 = vmul.f32 1.442695, %v4971_v27  ;;  %v4991_v8 = vmul.f32 1.442695, %v4970_v60  ;;  %v4963_v50 = vand.u32 2147483647, %v14129_v47  ;;  %v7509_v10 = vpop.eup %7508  ;;  %v14162_v17 = vsub.f32 %v4910_v16, %v4926_v28 }
 0x50f   : > { %7510 = vpow2.f32 %v4989_v32  ;;  %v4995_v61 = vmul.f32 1.442695, %v4972_v20  ;;  %v4977_v1 = vsub.f32 0.0, %v4961_v63  ;;  %v4962_v0 = vand.u32 2147483647, %v14132_v58 }
 0x510   : > { %7512 = vpow2.f32 %v4993_v54  ;;  %v4979_v5 = vsub.f32 0.0, %v4963_v50  ;;  %v5091_v45 = vand.u32 2147483647, %v14103_v43  ;;  %v4964_v19 = vand.u32 2147483647, %v14147_v37  ;;  %v4889_v54 = vld [vmem:[%s7658_s30 + $0x20] sm:$0xff] }
 0x511   : > { %7514 = vpow2.f32 %v4991_v8  ;;  %v5005_v51 = vmul.f32 1.442695, %v4977_v1  ;;  %v4978_v12 = vsub.f32 0.0, %v4962_v0  ;;  %v5098_v40 = vadd.f32 1.0, %v5097_v44 }
 0x512   : > { %7516 = vpow2.f32 %v4995_v61  ;;  %v5009_v35 = vmul.f32 1.442695, %v4979_v5  ;;  %v4980_v21 = vsub.f32 0.0, %v4964_v19  ;;  %v14166_v25 = vmul.f32 0.6931472, %v7507_v11 }
 0x513   : > { %7518 = vlog2.f32 %v5094_v57  ;;  %v5007_v3 = vmul.f32 1.442695, %v4978_v12  ;;  %vm14168_vm6 = vcmp.lt.f32.partialorder %v5091_v45, 0.0004427343  ;;  %v5115_v41 = vmul.f32 -0.5, %v14134_v56  ;;  %v4890_v57 = vld [vmem:[%s7658_s30 + $0x28] sm:$0xff] }
 0x514   : > { %7520 = vpow2.f32 %v5005_v51  ;;  %v5100_v24 = vand.u32 2147483647, %v14125_v33  ;;  %v14185_v60 = vmul.f32 %v14103_v43, %v5089_v30  ;;  %v14188_v39 = vmul.f32 %v14105_v18, %v5107_v36 }
 0x515   : > { %7522 = vlog2.f32 %v5112_v46  ;;  %v14194_v20 = vmul.f32 0.6931472, %v7509_v10  ;;  %v14197_v49 = vmul.f32 %v14125_v33, %v5098_v40  ;;  %v5011_v63 = vmul.f32 1.442695, %v4980_v21 }
 0x516   : > { %7524 = vpow2.f32 %v5009_v35  ;;  %v5093_v43 = vsel %vm14168_vm6, %v14185_v60, %v14166_v25  ;;  %v5116_v18 = vadd.f32 1.0, %v5115_v41  ;;  %v5118_v28 = vand.u32 2147483647, %v14134_v56 }
 0x517   : > { %7526 = vpow2.f32 %v5007_v3  ;;  %v4905_v33 = vmax.f32 %v14107_v29, 0.0  ;;  %v4921_v1 = vmul.f32 %v14107_v29, %v4889_v54  ;;  %v4907_v0 = vmax.f32 %v14109_v7, 0.0 }
 0x518   : > { %v4906_v4 = vmax.f32 %v14111_v2, 0.0  ;;  %v4922_v44 = vmul.f32 %v14111_v2, %v4890_v57  ;;  %v5111_v12 = vsel %vm14176_vm7, %v14188_v39, %v14194_v20  ;;  %v14228_v45 = vmul.f32 %v14134_v56, %v5116_v18 }
 0x519   : > { %v14160_v55 = vpop.eup %7510  ;;  %v4908_v11 = vmax.f32 %v14116_v22, 0.0  ;;  %v4924_v13 = vmul.f32 %v14116_v22, %v4892_v38  ;;  %vm14236_vm8 = vcmp.lt.f32.partialorder %v5100_v24, 0.0004427343  ;;  %vm14240_vm9 = vcmp.lt.f32.partialorder %v5118_v28, 0.0004427343 }
 0x51a   : > { %v14164_v23 = vpop.eup %7512  ;;  %v5049_v34 = vadd.f32 1.0, %v14160_v55  ;;  %v5052_v50 = vmul.f32 -0.5, %v14160_v55  ;;  %v4937_v56 = vsub.f32 %v4905_v33, %v4921_v1  ;;  %v5055_v36 = vand.u32 2147483647, %v14160_v55 }
 0x51b   : > { %v14174_v26 = vpop.eup %7514  ;;  %v5067_v32 = vadd.f32 1.0, %v14164_v23  ;;  %v5070_v5 = vmul.f32 -0.5, %v14164_v23  ;;  %v4939_v21 = vsub.f32 %v4907_v0, %v4923_v15  ;;  %v5073_v24 = vand.u32 2147483647, %v14164_v23 }
 0x51c   : > { %7528 = vlog2.f32 %v5049_v34  ;;  %v5058_v48 = vadd.f32 1.0, %v14174_v26  ;;  %v14192_v8 = vpop.eup %7516  ;;  %v5061_v9 = vmul.f32 -0.5, %v14174_v26  ;;  %v5053_v2 = vadd.f32 1.0, %v5052_v50 }
 0x51d   : > { %7530 = vlog2.f32 %v5067_v32  ;;  %v5076_v61 = vadd.f32 1.0, %v14192_v8  ;;  %v7519_v16 = vpop.eup %7518  ;;  %v5079_v14 = vmul.f32 -0.5, %v14192_v8  ;;  %v5071_v41 = vadd.f32 1.0, %v5070_v5 }
 0x51e   : > { %7532 = vlog2.f32 %v5058_v48  ;;  %v14210_v46 = vpop.eup %7520  ;;  %v14225_v7 = vmul.f32 0.6931472, %v7519_v16  ;;  %v4938_v34 = vsub.f32 %v4906_v4, %v4922_v44  ;;  %v5062_v22 = vadd.f32 1.0, %v5061_v9 }
 0x51f   : > { %7534 = vlog2.f32 %v5076_v61  ;;  %v7523_v51 = vpop.eup %7522  ;;  %v5121_v35 = vadd.f32 1.0, %v14210_v46  ;;  %v5064_v32 = vand.u32 2147483647, %v14174_v26  ;;  %v5054_v20 = vmul.f32 %v14160_v55, %v5053_v2 }
 0x520   : > { %7536 = vpow2.f32 %v5011_v63  ;;  %v14219_v29 = vpop.eup %7524  ;;  %v5114_v10 = vmul.f32 0.6931472, %v7523_v51  ;;  %v4940_v62 = vsub.f32 %v4908_v11, %v4924_v13  ;;  %v5080_v63 = vadd.f32 1.0, %v5079_v14  ;;  %v4897_v14 = vld [vmem:[%s7658_s30 + $0x60] sm:$0xff] }
 0x521   : > { %v14231_v19 = vpop.eup %7526  ;;  %7538 = vlog2.f32 %v5121_v35  ;;  %v5139_v39 = vadd.f32 1.0, %v14219_v29  ;;  %vm5056_vm10 = vcmp.lt.f32.partialorder %v5055_v36, 0.0004427343  ;;  %v5082_v61 = vand.u32 2147483647, %v14192_v8 }
 0x522   : > { %v5130_v40 = vadd.f32 1.0, %v14231_v19  ;;  %v5072_v28 = vmul.f32 %v14164_v23, %v5071_v41  ;;  %v5063_v1 = vmul.f32 %v14174_v26, %v5062_v22  ;;  %vm14253_vm11 = vcmp.lt.f32.partialorder %v5073_v24, 0.0004427343 }
 0x523   : > { %vm5065_vm12 = vcmp.lt.f32.partialorder %v5064_v32, 0.0004427343  ;;  %v5081_v23 = vmul.f32 %v14192_v8, %v5080_v63  ;;  %vm5083_vm13 = vcmp.lt.f32.partialorder %v5082_v61, 0.0004427343  ;;  %v5102_v9 = vsel %vm14236_vm8, %v14197_v49, %v14225_v7 }
 0x524   : > { %7540 = vlog2.f32 %v5130_v40  ;;  %v5120_v35 = vsel %vm14240_vm9, %v14228_v45, %v5114_v10  ;;  %v5124_v11 = vmul.f32 -0.5, %v14210_v46  ;;  %v5165_v49 = vadd.f32 %v5093_v43, %v14139_v53  ;;  %v4899_v40 = vld [vmem:[%s7658_s30 + $0x70] sm:$0xff] }
 0x525   : > { %7542 = vlog2.f32 %v5139_v39  ;;  %v5167_v7 = vadd.f32 %v5111_v12, %v14158_v6  ;;  %v5133_v45 = vmul.f32 -0.5, %v14231_v19  ;;  %v5166_v10 = vadd.f32 %v5102_v9, %v14162_v17  ;;  %v4900_v39 = vld [vmem:[%s7658_s30 + $0x78] sm:$0xff] }
 0x526   : > { %v7529_v27 = vpop.eup %7528  ;;  %v5168_v30 = vadd.f32 %v5120_v35, %v14181_v31  ;;  %v4913_v36 = vmax.f32 %v14127_v42, 0.0  ;;  %v5125_v25 = vadd.f32 1.0, %v5124_v11  ;;  %v5142_v53 = vmul.f32 -0.5, %v14219_v29 }
 0x527   : > { %v7531_v54 = vpop.eup %7530  ;;  %v5051_v48 = vmul.f32 0.6931472, %v7529_v27  ;;  %v4929_v12 = vmul.f32 %v14127_v42, %v4897_v14  ;;  %v4915_v17 = vmax.f32 %v14129_v47, 0.0  ;;  %v5127_v31 = vand.u32 2147483647, %v14210_v46 }
 0x528   : > { %v7533_v18 = vpop.eup %7532  ;;  %v5069_v57 = vmul.f32 0.6931472, %v7531_v54  ;;  %v4931_v41 = vmul.f32 %v14129_v47, %v4899_v40  ;;  %v5134_v27 = vadd.f32 1.0, %v5133_v45  ;;  %v4916_v54 = vmax.f32 %v14147_v37, 0.0 }
 0x529   : > { %v5057_v16 = vsel %vm5056_vm10, %v5054_v20, %v5051_v48  ;;  %v5060_v33 = vmul.f32 0.6931472, %v7533_v18  ;;  %v7535_v50 = vpop.eup %7534  ;;  %v5136_v48 = vand.u32 2147483647, %v14231_v19  ;;  %v5126_v42 = vmul.f32 %v14210_v46, %v5125_v25 }
 0x52a   : > { %v5161_v0 = vadd.f32 %v5057_v16, %v4937_v56  ;;  %v14257_v55 = vpop.eup %7536  ;;  %v5075_v4 = vsel %vm14253_vm11, %v5072_v28, %v5069_v57  ;;  %v5078_v51 = vmul.f32 0.6931472, %v7535_v50  ;;  %v5143_v63 = vadd.f32 1.0, %v5142_v53 }
 0x52b   : > { %v5066_v38 = vsel %vm5065_vm12, %v5063_v1, %v5060_v33  ;;  %v5148_v44 = vadd.f32 1.0, %v14257_v55  ;;  %v5163_v8 = vadd.f32 %v5075_v4, %v4939_v21  ;;  %v7539_v3 = vpop.eup %7538  ;;  %v4898_v21 = vld [vmem:[%s7658_s30 + $0x68] sm:$0xff]  ;;  %v5151_v6 = vmul.f32 -0.5, %v14257_v55 }
 0x52c   : > { %v5177_v26 = vadd.f32 %v14062_v59, %v5161_v0  ;;  %v5162_v5 = vadd.f32 %v5066_v38, %v4938_v34  ;;  %v5084_v2 = vsel %vm5083_vm13, %v5081_v23, %v5078_v51  ;;  %v4914_v34 = vmax.f32 %v14132_v58, 0.0 }
 0x52d   : > { %v5164_v13 = vadd.f32 %v5084_v2, %v4940_v62  ;;  %7544 = vlog2.f32 %v5148_v44  ;;  %v5123_v22 = vmul.f32 0.6931472, %v7539_v3  ;;  %v4930_v32 = vmul.f32 %v14132_v58, %v4898_v21 }
 0x52e   : > { %v5178_v59 = vadd.f32 %v5177_v26, %v5162_v5  ;;  %v7541_v60 = vpop.eup %7540  ;;  %v5152_v18 = vadd.f32 1.0, %v5151_v6  ;;  %vm14299_vm14 = vcmp.lt.f32.partialorder %v5127_v31, 0.0004427343  ;;  %v5145_v57 = vand.u32 2147483647, %v14219_v29 }
 0x52f   : > { %v5180_v52 = vsel %vm3646_vm1, %v5164_v13, 0.0  ;;  %v7543_v24 = vpop.eup %7542  ;;  %v5132_v62 = vmul.f32 0.6931472, %v7541_v60  ;;  %v5154_v61 = vand.u32 2147483647, %v14257_v55  ;;  %v4932_v16 = vmul.f32 %v14147_v37, %v4900_v39 }
 0x530   : > { %v5179_v56 = vadd.f32 %v5178_v59, %v5163_v8  ;;  %v5129_v28 = vsel %vm14299_vm14, %v5126_v42, %v5123_v22  ;;  %v5135_v33 = vmul.f32 %v14231_v19, %v5134_v27  ;;  %v5141_v46 = vmul.f32 0.6931472, %v7543_v24 }
 0x531   : > { %v4945_v50 = vsub.f32 %v4913_v36, %v4929_v12  ;;  %v4946_v0 = vsub.f32 %v4914_v34, %v4930_v32  ;;  %vm5137_vm15 = vcmp.lt.f32.partialorder %v5136_v48, 0.0004427343  ;;  %v5144_v38 = vmul.f32 %v14219_v29, %v5143_v63 }
 0x532   : > { %v5181_v43 = vadd.f32 %v5180_v52, %v5179_v56  ;;  %v5138_v4 = vsel %vm5137_vm15, %v5135_v33, %v5132_v62  ;;  %v5153_v23 = vmul.f32 %v14257_v55, %v5152_v18  ;;  %vm5146_vm0 = vcmp.lt.f32.partialorder %v5145_v57, 0.0004427343  ;;  %v5173_v56 = vld [vmem:[#allocation2] sm:$0x1] }
 0x533   : > { %vm5155_vm2 = vcmp.lt.f32.partialorder %v5154_v61, 0.0004427343  ;;  %v5169_v37 = vadd.f32 %v5129_v28, %v4945_v50  ;;  %v4948_v5 = vsub.f32 %v4916_v54, %v4932_v16  ;;  %v5147_v44 = vsel %vm5146_vm0, %v5144_v38, %v5141_v46 }
 0x534   : > { %v5182_v20 = vadd.f32 %v5181_v43, %v5165_v49  ;;  %v4947_v19 = vsub.f32 %v4915_v17, %v4931_v41  ;;  %v5170_v35 = vadd.f32 %v5138_v4, %v4946_v0 }
 0x536   : > { %v5183_v58 = vadd.f32 %v5182_v20, %v5166_v10  ;;  %v5171_v8 = vadd.f32 %v5147_v44, %v4947_v19 }
 0x537   : > { %v7545_v1 = vpop.eup %7544 }
 0x538   : > { %v5184_v15 = vadd.f32 %v5183_v58, %v5167_v7  ;;  %v5150_v51 = vmul.f32 0.6931472, %v7545_v1 }
 0x53a   : > { %v5185_v26 = vadd.f32 %v5184_v15, %v5168_v30  ;;  %v5156_v9 = vsel %vm5155_vm2, %v5153_v23, %v5150_v51 }
 0x53b   : > { %v5172_v11 = vadd.f32 %v5156_v9, %v4948_v5 }
 0x53c   : > { %v5186_v2 = vadd.f32 %v5185_v26, %v5169_v37 }
 0x53d   : > { %v5189_v49 = vsel %vm3646_vm1, %v5172_v11, 0.0 }
 0x53e   : > { %v5187_v59 = vadd.f32 %v5186_v2, %v5170_v35 }
 0x540   : > { %v5188_v13 = vadd.f32 %v5187_v59, %v5171_v8 }
 0x542   : > { %v5190_v29 = vadd.f32 %v5189_v49, %v5188_v13 }
 0x544   : > { %5191 = vadd.xlane.f32.xlu0 %v5190_v29 }
 0x5d1   : > { %v5192_v55 = vpop.xlane.xlu0 %5191 }
 0x5d2   : > { %v5193_v7 = vrot.slane %v5192_v55, 4 }
 0x5d4   : > { %v5194_v14 = vadd.f32 %v5193_v7, %v5192_v55 }
 0x5d6   : > { %v5195_v45 = vrot.slane %v5194_v14, 2 }
 0x5d8   : > { %v5196_v3 = vadd.f32 %v5195_v45, %v5194_v14 }
 0x5da   : > { %v5197_v10 = vrot.slane %v5196_v3, 1 }
 0x5dc   : > { %v5198_v30 = vadd.f32 %v5197_v10, %v5196_v3 }
 0x5de   : > { %7432 = vpush %v5198_v30 }
 0x60f   : > { %s7433_s30 = spop %7432 }
 0x610   : > { %v5200_v36 = vstv %s7433_s30 }
 0x611   : > { %v5201_v40 = vmul.f32 3.125e-05, %v5200_v36 }
 0x613   : > { %v5202_v52 = vadd.f32 %v5201_v40, %v5173_v56 }
 0x615   : > { %5204 = vst.msk [vmem:[#allocation2] sm:$0x1] %vm5203_vm3, %v5202_v52 }
 0x616   : > { %7577 = shalt.err (!%p7574_p12)
}
 0x617   : > { %s7578_s15 = scalar_lea.hbm %s14344_s6, 16 }
 0x618   : > { %p7579_p13 = scmp.ne.s32.totalorder %s14344_s6, %s7578_s15  ;;  %p7584_p2 = scmp.lt.u32.totalorder %s7578_s15, %s14344_s6 }
 0x61a   : > { %p7580_p0 = pnand %p7579_p13, %p7438_p5 }
 0x61c   : > { %p7581_p1 = pneg %p7580_p0 }
 0x61e   : > { %p7586_p3 = pnand %p7584_p2, %p7581_p1 }
 0x620   : > { %7589 = shalt.err (!%p7586_p3)
}
 0x621   : > { %7435 = dma.vmem_to_hbm [thread:$0]  (%p7438_p5), %s5213_s11, 16, %s14344_s6, [#allocation3]  }
 0x622   : > { %7595 = dma.done.wait (%p7438_p5), [#allocation3], 16  }
 0x623   : > { %7597 = vsyncadd (%p7438_p5), [#allocation3], 4294967280 }
 0x624 PF: > { %s17_s21 = sadd.s32 1, %s7600_s21  }
 0x625   : > { %p14_p4 = scmp.ge.s32.totalorder %s17_s21, 4  }
 0x627   :  { %16 = sbr.rel (!%p14_p4) target bundleno = 1 (0x1), region = 78 }
 0x62e   :  { %5225 = vsyncpa [#allocation3], 1 }
 0x62f   :  { %5227 = vsyncpa [#allocation3 + $0x1], 1 }

</bundles_post_ra>
